<compile_context>
chip_gen: v6e
topology: v6e:2x2x1
jax: 0.10.0
libtpu: 0.0.40
codegen_flags: <defaults>
</compile_context>

<pallas_src>
import functools

import jax
import jax.numpy as jnp
from jax import lax
from jax.experimental import pallas as pl
from jax.experimental.pallas import tpu as pltpu
import numpy as np

EPS = 1e-5
LANE = 128
VMEM_LIMIT_BYTES = 40 * 1024 * 1024  # conservative under v7x's 64 MiB physical VMEM


def _round_up(x, m):
    return ((x + m - 1) // m) * m


def _pick_tile_h(h, w, cout_p, target_bytes=512 * 1024):
    """Largest divisor of h whose f32 accumulator (tile_h*w, cout_p) stays under
    ~target_bytes (MXU saturates around M=256-512 anyway).  Falls back to 1
    (tile_rows = w) for very wide rows."""
    target_rows = max(8, target_bytes // (cout_p * 4))
    best = 1
    for cand in range(1, h + 1):
        if h % cand == 0 and cand * w <= target_rows:
            best = cand
    return best


# ---------------------------------------------------------------------------
# Kernel 1: 3x3 conv as 3 MXU matmuls (dy folded into K) + resident BN partials.
# ---------------------------------------------------------------------------
def _conv_stats_kernel(xp_ref, w_ref, y_ref, stats_ref):
    # xp_ref:    (1, HP, WP, Cin_p)      bf16  zero-padded image, resident per n
    # w_ref:     (3, 3*Cin_p, Cout_p)    bf16  w[dx, dy*Cin_p + ci, co]
    # y_ref:     (1, tile_h, W, Cout_p)  bf16  conv output tile
    # stats_ref: (1, 2, Cout_p)          f32   per-n [sum, sum_sq], resident across j
    tile_h = y_ref.shape[1]
    w_out = y_ref.shape[2]
    cout_p = y_ref.shape[3]
    wp = xp_ref.shape[2]
    cin_p = xp_ref.shape[3]

    j = pl.program_id(1)
    h0 = pl.multiple_of(j * tile_h, tile_h)

    # dy-folded LHS over the full 8-aligned padded width: three contiguous
    # row-shifted slabs concatenated along lanes -> K = 3*Cin_p.  No strided
    # per-tap patch copies; the reshape is layout-free because wp % 8 == 0.
    lhs = jnp.concatenate(
        [xp_ref[0, pl.ds(h0 + dy, tile_h), :, :] for dy in range(3)], axis=-1)
    lhs = lhs.reshape(tile_h * wp, 3 * cin_p)

    acc = None
    for dx in range(3):  # 3 MXU matmuls, K = 3*Cin_p
        q = jnp.dot(lhs, w_ref[dx], preferred_element_type=jnp.float32)
        q = q.reshape(tile_h, wp, cout_p)
        part = q[:, dx:dx + w_out, :]  # dx alignment on the f32 result
        acc = part if acc is None else acc + part

    y_ref[...] = acc.reshape(1, tile_h, w_out, cout_p).astype(y_ref.dtype)

    # BatchNorm partials, accumulated in the resident per-n stats block.
    # NOTE: sum / sum-of-squares merging is numerically fine at these activation
    # scales; use a Welford-style merge for very large activations.
    acc2 = acc.reshape(tile_h * w_out, cout_p)
    s = jnp.sum(acc2, axis=0, keepdims=True)
    ss = jnp.sum(acc2 * acc2, axis=0, keepdims=True)

    @pl.when(j == 0)
    def _():
        stats_ref[...] = jnp.zeros_like(stats_ref)

    stats_ref[...] += jnp.concatenate([s, ss], axis=0).reshape(1, 2, cout_p)


# ---------------------------------------------------------------------------
# Kernel 2a: BatchNorm apply + ReLU, fused with the next conv's zero-pad.
# ---------------------------------------------------------------------------
def _bn_relu_pad_kernel(yprev_ref, ycurr_ref, scale_ref, shift_ref, o_ref, *,
                        h_valid):
    # Writes BN+ReLU activations directly into the next conv's zero-haloed
    # (1, tile_h, WP, Cout_p) padded block.  Padded row r = j*tile_h + t needs
    # conv row r-1: t == 0 comes from the single-row "previous" window, t >= 1
    # from the current block's rows t-1.  Rows with r == 0 or r > h_valid are
    # halo / over-allocation -> zero.
    tile_h = o_ref.shape[1]
    w = ycurr_ref.shape[2]
    r0 = pl.program_id(1) * tile_h

    scale = scale_ref[...]
    shift = shift_ref[...]

    # Zero the whole block first: covers halo columns, halo rows, extra width
    # alignment columns and any over-allocated rows.
    o_ref[...] = jnp.zeros(o_ref.shape, o_ref.dtype)

    @pl.when(jnp.logical_and(r0 >= 1, r0 <= h_valid))
    def _():
        z0 = jnp.maximum(
            yprev_ref[0, 0].astype(jnp.float32) * scale + shift, 0.0)
        o_ref[0, 0, pl.ds(1, w), :] = z0.astype(o_ref.dtype)

    if tile_h > 1:
        yb = ycurr_ref[0, pl.ds(0, tile_h - 1), :, :].astype(jnp.float32)
        z = jnp.maximum(yb * scale + shift, 0.0)
        t = lax.broadcasted_iota(jnp.int32, (tile_h - 1, 1, 1), 0) + 1
        z = jnp.where(r0 + t <= h_valid, z, 0.0)
        o_ref[0, pl.ds(1, tile_h - 1), pl.ds(1, w), :] = z.astype(o_ref.dtype)


# ---------------------------------------------------------------------------
# Kernel 2b: plain BatchNorm apply + ReLU (final layer, unpadded output).
# ---------------------------------------------------------------------------
def _bn_relu_kernel(y_ref, scale_ref, shift_ref, o_ref):
    z = y_ref[...].astype(jnp.float32) * scale_ref[...] + shift_ref[...]
    o_ref[...] = jnp.maximum(z, 0.0).astype(o_ref.dtype)


# ---------------------------------------------------------------------------
# Wrapper for one Conv3x3(pad=1, no bias) + BatchNorm2d(training stats) + ReLU.
# ---------------------------------------------------------------------------
def conv_bn_relu_block(xp, h, w, w_oihw, gamma, beta, *, pad_output):
    """xp: (N, HP, WP, Cin_p) bf16, zero-padded image (interior at [1:h+1, 1:w+1]),
    channels lane-padded with zeros, WP % 8 == 0, HP >= h+2.
    Returns a zero-haloed bf16 activation ready for the next conv
    (pad_output=True) or the plain (N, h, w, Cout_p) f32 activation."""
    n, hp_in, wp, cin_p = xp.shape
    cout, cin = int(w_oihw.shape[0]), int(w_oihw.shape[1])
    cout_p = _round_up(cout, LANE)
    assert hp_in >= h + 2 and wp >= w + 2 and wp % 8 == 0 and cin <= cin_p

    # OIHW -> w_fold[dx, dy*Cin_p + ci, co], zero-padded, bf16.
    wt = jnp.transpose(w_oihw, (3, 2, 1, 0))  # (dx, dy, cin, cout)
    wt = jnp.pad(wt, ((0, 0), (0, 0), (0, cin_p - cin), (0, cout_p - cout)))
    w_fold = wt.astype(jnp.bfloat16).reshape(3, 3 * cin_p, cout_p)

    tile_h = _pick_tile_h(h, w, cout_p)
    n_hj = h // tile_h  # conv grid blocks along H
    n_hb = (h + 2 + tile_h - 1) // tile_h if pad_output else n_hj
    h_alloc = n_hb * tile_h if pad_output else h  # rows allocated for y (>= h)

    # ----- Pass 1: conv (3 K-folded MXU matmuls per tile) + BN partials -----
    y, stats = pl.pallas_call(
        _conv_stats_kernel,
        out_shape=(
            jax.ShapeDtypeStruct((n, h_alloc, w, cout_p), jnp.bfloat16),
            jax.ShapeDtypeStruct((n, 2, cout_p), jnp.float32),
        ),
        grid=(n, n_hj),
        in_specs=[
            # Whole padded image per batch element (block index depends only on
            # n, so it is DMA'd once per n and reused across H tiles).
            pl.BlockSpec((1, hp_in, wp, cin_p), lambda i, j: (i, 0, 0, 0)),
            pl.BlockSpec((3, 3 * cin_p, cout_p), lambda i, j: (0, 0, 0)),
        ],
        out_specs=(
            pl.BlockSpec((1, tile_h, w, cout_p), lambda i, j: (i, j, 0, 0)),
            # Resident accumulator across the H-tile axis.
            pl.BlockSpec((1, 2, cout_p), lambda i, j: (i, 0, 0)),
        ),
        compiler_params=pltpu.CompilerParams(
            dimension_semantics=("parallel", "arbitrary"),
            vmem_limit_bytes=VMEM_LIMIT_BYTES,
        ),
    )(xp, w_fold)

    # ----- Global BatchNorm statistics (tiny reduction in plain JAX) -----
    count = float(n * h * w)
    tot = jnp.sum(stats, axis=0)  # (2, cout_p)
    mean = tot[0] / count
    var = jnp.maximum(tot[1] / count - mean * mean, 0.0)  # biased (training)
    inv_std = lax.rsqrt(var + EPS)
    gamma_p = jnp.pad(gamma.astype(jnp.float32), (0, cout_p - cout))
    beta_p = jnp.pad(beta.astype(jnp.float32), (0, cout_p - cout))
    scale = (gamma_p * inv_std).reshape(1, cout_p)
    shift = (beta_p - mean * gamma_p * inv_std).reshape(1, cout_p)

    # ----- Pass 2: normalize + affine + ReLU -----
    if pad_output:
        # Fused with the next layer's zero-pad: write directly into the padded
        # (N, HP_out, WP, Cout_p) bf16 buffer consumed by the next conv.
        hp_out = n_hb * tile_h
        kernel = functools.partial(_bn_relu_pad_kernel, h_valid=h)
        return pl.pallas_call(
            kernel,
            out_shape=jax.ShapeDtypeStruct((n, hp_out, wp, cout_p),
                                           jnp.bfloat16),
            grid=(n, n_hb),
            in_specs=[
                # Single previous row (y row j*tile_h - 1, clamped; unused at j==0).
                pl.BlockSpec(
                    (1, 1, w, cout_p),
                    lambda i, j: (i, jnp.maximum(j * tile_h - 1, 0), 0, 0)),
                pl.BlockSpec((1, tile_h, w, cout_p),
                             lambda i, j: (i, j, 0, 0)),
                pl.BlockSpec((1, cout_p), lambda i, j: (0, 0)),
                pl.BlockSpec((1, cout_p), lambda i, j: (0, 0)),
            ],
            out_specs=pl.BlockSpec((1, tile_h, wp, cout_p),
                                   lambda i, j: (i, j, 0, 0)),
            compiler_params=pltpu.CompilerParams(
                dimension_semantics=("parallel", "parallel"),
                vmem_limit_bytes=VMEM_LIMIT_BYTES,
            ),
        )(y, y, scale, shift)

    return pl.pallas_call(
        _bn_relu_kernel,
        out_shape=jax.ShapeDtypeStruct((n, h, w, cout_p), jnp.float32),
        grid=(n, n_hj),
        in_specs=[
            pl.BlockSpec((1, tile_h, w, cout_p), lambda i, j: (i, j, 0, 0)),
            pl.BlockSpec((1, cout_p), lambda i, j: (0, 0)),
            pl.BlockSpec((1, cout_p), lambda i, j: (0, 0)),
        ],
        out_specs=pl.BlockSpec((1, tile_h, w, cout_p), lambda i, j: (i, j, 0, 0)),
        compiler_params=pltpu.CompilerParams(
            dimension_semantics=("parallel", "parallel"),
            vmem_limit_bytes=VMEM_LIMIT_BYTES,
        ),
    )(y, scale, shift)


def double_conv(x_nchw, params):
    """Forward pass of DoubleConv. Input/output are NCHW (PyTorch convention)."""
    # TODO(synk): BatchNorm2d running_mean/running_var buffer updates (a
    # training-time side effect of the PyTorch module) are not replicated; the
    # returned activations match the module's forward output.
    n, cin, h, w = x_nchw.shape
    cin_p = _round_up(cin, LANE)
    wp = _round_up(w + 2, 8)  # 8-aligned padded width (free in-kernel reshape)

    x = jnp.transpose(x_nchw, (0, 2, 3, 1)).astype(jnp.bfloat16)  # NCHW -> NHWC
    xp = jnp.pad(x, ((0, 0), (1, 1), (1, wp - w - 1), (0, cin_p - cin)))

    a1p = conv_bn_relu_block(xp, h, w, params["w1"], params["gamma1"],
                             params["beta1"], pad_output=True)   # padded bf16
    a2 = conv_bn_relu_block(a1p, h, w, params["w2"], params["gamma2"],
                            params["beta2"], pad_output=False)   # (n,h,w,Cp) f32
    cout = params["w2"].shape[0]
    return jnp.transpose(a2[..., :cout], (0, 3, 1, 2))  # strip pad, NHWC->NCHW


# ----- pure-JAX f32 reference for verification -----------------------------
def _ref_block(x_nhwc, w_oihw, gamma, beta):
    w_hwio = jnp.transpose(w_oihw, (2, 3, 1, 0))
    y = lax.conv_general_dilated(
        x_nhwc, w_hwio, window_strides=(1, 1), padding="SAME",
        dimension_numbers=("NHWC", "HWIO", "NHWC"),
    )
    mean = jnp.mean(y, axis=(0, 1, 2), keepdims=True)
    var = jnp.mean(jnp.square(y - mean), axis=(0, 1, 2), keepdims=True)
    y = (y - mean) * lax.rsqrt(var + EPS) * gamma + beta
    return jnp.maximum(y, 0.0)


def double_conv_ref(x_nchw, params):
    x = jnp.transpose(x_nchw, (0, 2, 3, 1))
    h1 = _ref_block(x, params["w1"], params["gamma1"], params["beta1"])
    h2 = _ref_block(h1, params["w2"], params["gamma2"], params["beta2"])
    return jnp.transpose(h2, (0, 3, 1, 2))


if __name__ == "__main__":
    # Small shapes consistent with the module: DoubleConv(in=4, out=8) (mid=out=8)
    N, C_IN, C_MID, C_OUT, H, W = 2, 4, 8, 8, 16, 16

    key = jax.random.PRNGKey(0)
    k_x, k_w1, k_w2, k_g1, k_b1, k_g2, k_b2 = jax.random.split(key, 7)

    x = jax.random.normal(k_x, (N, C_IN, H, W), dtype=jnp.float32)

    params = {
        # Conv weights in PyTorch OIHW layout, kaiming-like scale, no bias.
        "w1": jax.random.normal(k_w1, (C_MID, C_IN, 3, 3), jnp.float32)
              * (2.0 / (C_IN * 9)) ** 0.5,
        "w2": jax.random.normal(k_w2, (C_OUT, C_MID, 3, 3), jnp.float32)
              * (2.0 / (C_MID * 9)) ** 0.5,
        # BatchNorm affine params (PyTorch default is ones/zeros; perturbed to
        # exercise the affine path deterministically).
        "gamma1": 1.0 + 0.1 * jax.random.normal(k_g1, (C_MID,), jnp.float32),
        "beta1": 0.1 * jax.random.normal(k_b1, (C_MID,), jnp.float32),
        "gamma2": 1.0 + 0.1 * jax.random.normal(k_g2, (C_OUT,), jnp.float32),
        "beta2": 0.1 * jax.random.normal(k_b2, (C_OUT,), jnp.float32),
    }

    out = jax.jit(double_conv)(x, params)
    out = jax.block_until_ready(out)
    assert out.shape == (N, C_OUT, H, W), out.shape

    ref = jax.block_until_ready(double_conv_ref(x, params))
    # Tolerance sized for bf16 MXU operands and a bf16 conv intermediate through
    # two conv+BN layers; accumulation and all BN math stay in f32.
    np.testing.assert_allclose(np.asarray(out), np.asarray(ref),
                               rtol=3e-2, atol=3e-2)

    print("KERNEL_OK")
</pallas_src>

<mosaic_0001>
module attributes {stable_mosaic.version = 11 : i64} {
  func.func @_conv_stats_kernel(%arg0: i32, %arg1: i32, %arg2: memref<1x18x24x128xbf16, #tpu.memory_space<vmem>>, %arg3: memref<3x384x128xbf16, #tpu.memory_space<vmem>>, %arg4: memref<1x16x16x128xbf16, #tpu.memory_space<vmem>>, %arg5: memref<1x2x128xf32, #tpu.memory_space<vmem>>) attributes {dimension_semantics = [#tpu.dimension_semantics<parallel>, #tpu.dimension_semantics<arbitrary>], iteration_bounds = array<i64: 2, 1>, scalar_prefetch = 0 : i64, scratch_operands = 0 : i64, tpu.core_type = #tpu.core_type<tc>, window_params = [{transform_indices = @transform_0, window_bounds = array<i64: 1, 18, 24, 128>}, {pipeline_mode = #tpu.pipeline_mode<synchronous>, transform_indices = @transform_1, window_bounds = array<i64: 3, 384, 128>}, {transform_indices = @transform_2, window_bounds = array<i64: 1, 16, 16, 128>}, {transform_indices = @transform_3, window_bounds = array<i64: 1, 2, 128>}]} {
    %c16_i32 = arith.constant 16 : i32
    %0 = arith.muli %arg1, %c16_i32 : i32
    %1 = tpu.assume_multiple %0, 16 : i32
    %c0_i32 = arith.constant 0 : i32
    %2 = arith.addi %1, %c0_i32 : i32
    %c0 = arith.constant 0 : index
    %3 = arith.index_cast %2 : i32 to index
    %c0_0 = arith.constant 0 : index
    %c0_1 = arith.constant 0 : index
    %4 = vector.load %arg2[%c0, %3, %c0_0, %c0_1] : memref<1x18x24x128xbf16, #tpu.memory_space<vmem>>, vector<1x16x24x128xbf16>
    %5 = vector.shape_cast %4 : vector<1x16x24x128xbf16> to vector<16x24x128xbf16>
    %c1_i32 = arith.constant 1 : i32
    %6 = arith.addi %1, %c1_i32 : i32
    %c0_2 = arith.constant 0 : index
    %7 = arith.index_cast %6 : i32 to index
    %c0_3 = arith.constant 0 : index
    %c0_4 = arith.constant 0 : index
    %8 = vector.load %arg2[%c0_2, %7, %c0_3, %c0_4] : memref<1x18x24x128xbf16, #tpu.memory_space<vmem>>, vector<1x16x24x128xbf16>
    %9 = vector.shape_cast %8 : vector<1x16x24x128xbf16> to vector<16x24x128xbf16>
    %c2_i32 = arith.constant 2 : i32
    %10 = arith.addi %1, %c2_i32 : i32
    %c0_5 = arith.constant 0 : index
    %11 = arith.index_cast %10 : i32 to index
    %c0_6 = arith.constant 0 : index
    %c0_7 = arith.constant 0 : index
    %12 = vector.load %arg2[%c0_5, %11, %c0_6, %c0_7] : memref<1x18x24x128xbf16, #tpu.memory_space<vmem>>, vector<1x16x24x128xbf16>
    %13 = vector.shape_cast %12 : vector<1x16x24x128xbf16> to vector<16x24x128xbf16>
    %14 = tpu.concatenate %5, %9, %13 in 2 : vector<16x24x128xbf16>, vector<16x24x128xbf16>, vector<16x24x128xbf16> -> vector<16x24x384xbf16>
    %15 = vector.shape_cast %14 : vector<16x24x384xbf16> to vector<384x384xbf16>
    %c0_8 = arith.constant 0 : index
    %c0_9 = arith.constant 0 : index
    %c0_10 = arith.constant 0 : index
    %16 = vector.load %arg3[%c0_8, %c0_9, %c0_10] : memref<3x384x128xbf16, #tpu.memory_space<vmem>>, vector<1x384x128xbf16>
    %17 = vector.shape_cast %16 : vector<1x384x128xbf16> to vector<384x128xbf16>
    %cst = arith.constant dense<0.000000e+00> : vector<384x128xf32>
    %18 = tpu.matmul %15, %17, %cst {dimension_numbers = #tpu.dot_dimension_numbers<[1], [0], [0], [1], [0, 0, 1, 1], [], []>} : vector<384x384xbf16>, vector<384x128xbf16>, vector<384x128xf32> -> vector<384x128xf32>
    %19 = vector.shape_cast %18 : vector<384x128xf32> to vector<16x24x128xf32>
    %20 = vector.extract_strided_slice %19 {offsets = [0, 0, 0], sizes = [16, 16, 128], strides = [1, 1, 1]} : vector<16x24x128xf32> to vector<16x16x128xf32>
    %c1 = arith.constant 1 : index
    %c0_11 = arith.constant 0 : index
    %c0_12 = arith.constant 0 : index
    %21 = vector.load %arg3[%c1, %c0_11, %c0_12] : memref<3x384x128xbf16, #tpu.memory_space<vmem>>, vector<1x384x128xbf16>
    %22 = vector.shape_cast %21 : vector<1x384x128xbf16> to vector<384x128xbf16>
    %cst_13 = arith.constant dense<0.000000e+00> : vector<384x128xf32>
    %23 = tpu.matmul %15, %22, %cst_13 {dimension_numbers = #tpu.dot_dimension_numbers<[1], [0], [0], [1], [0, 0, 1, 1], [], []>} : vector<384x384xbf16>, vector<384x128xbf16>, vector<384x128xf32> -> vector<384x128xf32>
    %24 = vector.shape_cast %23 : vector<384x128xf32> to vector<16x24x128xf32>
    %25 = vector.extract_strided_slice %24 {offsets = [0, 1, 0], sizes = [16, 16, 128], strides = [1, 1, 1]} : vector<16x24x128xf32> to vector<16x16x128xf32>
    %26 = arith.addf %20, %25 : vector<16x16x128xf32>
    %c2 = arith.constant 2 : index
    %c0_14 = arith.constant 0 : index
    %c0_15 = arith.constant 0 : index
    %27 = vector.load %arg3[%c2, %c0_14, %c0_15] : memref<3x384x128xbf16, #tpu.memory_space<vmem>>, vector<1x384x128xbf16>
    %28 = vector.shape_cast %27 : vector<1x384x128xbf16> to vector<384x128xbf16>
    %cst_16 = arith.constant dense<0.000000e+00> : vector<384x128xf32>
    %29 = tpu.matmul %15, %28, %cst_16 {dimension_numbers = #tpu.dot_dimension_numbers<[1], [0], [0], [1], [0, 0, 1, 1], [], []>} : vector<384x384xbf16>, vector<384x128xbf16>, vector<384x128xf32> -> vector<384x128xf32>
    %30 = vector.shape_cast %29 : vector<384x128xf32> to vector<16x24x128xf32>
    %31 = vector.extract_strided_slice %30 {offsets = [0, 2, 0], sizes = [16, 16, 128], strides = [1, 1, 1]} : vector<16x24x128xf32> to vector<16x16x128xf32>
    %32 = arith.addf %26, %31 : vector<16x16x128xf32>
    %33 = vector.shape_cast %32 : vector<16x16x128xf32> to vector<1x16x16x128xf32>
    %34 = arith.truncf %33 : vector<1x16x16x128xf32> to vector<1x16x16x128xbf16>
    %c0_17 = arith.constant 0 : index
    %c0_18 = arith.constant 0 : index
    %c0_19 = arith.constant 0 : index
    %c0_20 = arith.constant 0 : index
    %35 = vector.load %arg4[%c0_17, %c0_18, %c0_19, %c0_20] : memref<1x16x16x128xbf16, #tpu.memory_space<vmem>>, vector<1x16x16x128xbf16>
    tpu.vector_store %arg4[%c0_17, %c0_18, %c0_19, %c0_20], %34 {strides = array<i32>} : memref<1x16x16x128xbf16, #tpu.memory_space<vmem>>, vector<1x16x16x128xbf16>,
    %36 = vector.shape_cast %32 : vector<16x16x128xf32> to vector<256x128xf32>
    %cst_21 = arith.constant dense<0.000000e+00> : vector<128xf32>
    %37 = vector.multi_reduction <add>, %36, %cst_21 [0] : vector<256x128xf32> to vector<128xf32>
    %38 = vector.shape_cast %37 : vector<128xf32> to vector<1x128xf32>
    %39 = arith.mulf %36, %36 : vector<256x128xf32>
    %cst_22 = arith.constant dense<0.000000e+00> : vector<128xf32>
    %40 = vector.multi_reduction <add>, %39, %cst_22 [0] : vector<256x128xf32> to vector<128xf32>
    %41 = vector.shape_cast %40 : vector<128xf32> to vector<1x128xf32>
    %c0_i32_23 = arith.constant 0 : i32
    %42 = arith.cmpi eq, %arg1, %c0_i32_23 : i32
    %43 = arith.extui %42 : i1 to i32
    %c0_i32_24 = arith.constant 0 : i32
    %44 = arith.cmpi ne, %43, %c0_i32_24 : i32
    scf.if %44 {
      %cst_31 = arith.constant 0.000000e+00 : f32
      %50 = vector.broadcast %cst_31 : f32 to vector<1x2x128xf32>
      %c0_32 = arith.constant 0 : index
      %c0_33 = arith.constant 0 : index
      %c0_34 = arith.constant 0 : index
      %51 = vector.load %arg5[%c0_32, %c0_33, %c0_34] : memref<1x2x128xf32, #tpu.memory_space<vmem>>, vector<1x2x128xf32>
      tpu.vector_store %arg5[%c0_32, %c0_33, %c0_34], %50 {strides = array<i32>} : memref<1x2x128xf32, #tpu.memory_space<vmem>>, vector<1x2x128xf32>,
    } else {
    }
    %c0_25 = arith.constant 0 : index
    %c0_26 = arith.constant 0 : index
    %c0_27 = arith.constant 0 : index
    %45 = vector.load %arg5[%c0_25, %c0_26, %c0_27] : memref<1x2x128xf32, #tpu.memory_space<vmem>>, vector<1x2x128xf32>
    %46 = tpu.concatenate %38, %41 in 0 : vector<1x128xf32>, vector<1x128xf32> -> vector<2x128xf32>
    %47 = vector.shape_cast %46 : vector<2x128xf32> to vector<1x2x128xf32>
    %48 = arith.addf %45, %47 : vector<1x2x128xf32>
    %c0_28 = arith.constant 0 : index
    %c0_29 = arith.constant 0 : index
    %c0_30 = arith.constant 0 : index
    %49 = vector.load %arg5[%c0_28, %c0_29, %c0_30] : memref<1x2x128xf32, #tpu.memory_space<vmem>>, vector<1x2x128xf32>
    tpu.vector_store %arg5[%c0_28, %c0_29, %c0_30], %48 {strides = array<i32>} : memref<1x2x128xf32, #tpu.memory_space<vmem>>, vector<1x2x128xf32>,
    return
  }
  func.func @transform_0(%arg0: i32, %arg1: i32) -> (i32, i32, i32, i32) {
    %c0_i32 = arith.constant 0 : i32
    %c0_i32_0 = arith.constant 0 : i32
    %c0_i32_1 = arith.constant 0 : i32
    %c0_i32_2 = arith.constant 0 : i32
    return %arg0, %c0_i32, %c0_i32_0, %c0_i32_1 : i32, i32, i32, i32
  }
  func.func @transform_1(%arg0: i32, %arg1: i32) -> (i32, i32, i32) {
    %c0_i32 = arith.constant 0 : i32
    %c0_i32_0 = arith.constant 0 : i32
    %c0_i32_1 = arith.constant 0 : i32
    %c0_i32_2 = arith.constant 0 : i32
    return %c0_i32, %c0_i32_0, %c0_i32_1 : i32, i32, i32
  }
  func.func @transform_2(%arg0: i32, %arg1: i32) -> (i32, i32, i32, i32) {
    %c0_i32 = arith.constant 0 : i32
    %c0_i32_0 = arith.constant 0 : i32
    %c0_i32_1 = arith.constant 0 : i32
    return %arg0, %arg1, %c0_i32, %c0_i32_0 : i32, i32, i32, i32
  }
  func.func @transform_3(%arg0: i32, %arg1: i32) -> (i32, i32, i32) {
    %c0_i32 = arith.constant 0 : i32
    %c0_i32_0 = arith.constant 0 : i32
    %c0_i32_1 = arith.constant 0 : i32
    return %arg0, %c0_i32, %c0_i32_0 : i32, i32, i32
  }
}

module attributes {stable_mosaic.version = 11 : i64} {
  func.func @_bn_relu_pad_kernel(%arg0: i32, %arg1: i32, %arg2: memref<1x1x16x128xbf16, #tpu.memory_space<vmem>>, %arg3: memref<1x16x16x128xbf16, #tpu.memory_space<vmem>>, %arg4: memref<1x128xf32, #tpu.memory_space<vmem>>, %arg5: memref<1x128xf32, #tpu.memory_space<vmem>>, %arg6: memref<1x16x24x128xbf16, #tpu.memory_space<vmem>>) attributes {dimension_semantics = [#tpu.dimension_semantics<parallel>, #tpu.dimension_semantics<parallel>], iteration_bounds = array<i64: 2, 2>, scalar_prefetch = 0 : i64, scratch_operands = 0 : i64, tpu.core_type = #tpu.core_type<tc>, window_params = [{transform_indices = @transform_0, window_bounds = array<i64: 1, 1, 16, 128>}, {transform_indices = @transform_1, window_bounds = array<i64: 1, 16, 16, 128>}, {pipeline_mode = #tpu.pipeline_mode<synchronous>, transform_indices = @transform_2, window_bounds = array<i64: 1, 128>}, {pipeline_mode = #tpu.pipeline_mode<synchronous>, transform_indices = @transform_3, window_bounds = array<i64: 1, 128>}, {transform_indices = @transform_4, window_bounds = array<i64: 1, 16, 24, 128>}]} {
    %c16_i32 = arith.constant 16 : i32
    %0 = arith.muli %arg1, %c16_i32 : i32
    %c0 = arith.constant 0 : index
    %c0_0 = arith.constant 0 : index
    %1 = vector.load %arg4[%c0, %c0_0] : memref<1x128xf32, #tpu.memory_space<vmem>>, vector<1x128xf32>
    %c0_1 = arith.constant 0 : index
    %c0_2 = arith.constant 0 : index
    %2 = vector.load %arg5[%c0_1, %c0_2] : memref<1x128xf32, #tpu.memory_space<vmem>>, vector<1x128xf32>
    %cst = arith.constant 0.000000e+00 : bf16
    %3 = vector.broadcast %cst : bf16 to vector<1x16x24x128xbf16>
    %c0_3 = arith.constant 0 : index
    %c0_4 = arith.constant 0 : index
    %c0_5 = arith.constant 0 : index
    %c0_6 = arith.constant 0 : index
    %4 = vector.load %arg6[%c0_3, %c0_4, %c0_5, %c0_6] : memref<1x16x24x128xbf16, #tpu.memory_space<vmem>>, vector<1x16x24x128xbf16>
    tpu.vector_store %arg6[%c0_3, %c0_4, %c0_5, %c0_6], %3 {strides = array<i32>} : memref<1x16x24x128xbf16, #tpu.memory_space<vmem>>, vector<1x16x24x128xbf16>,
    %c1_i32 = arith.constant 1 : i32
    %5 = arith.cmpi sge, %0, %c1_i32 : i32
    %c16_i32_7 = arith.constant 16 : i32
    %6 = arith.cmpi sle, %0, %c16_i32_7 : i32
    %7 = arith.andi %5, %6 : i1
    %8 = arith.extui %7 : i1 to i32
    %c0_i32 = arith.constant 0 : i32
    %9 = arith.cmpi ne, %8, %c0_i32 : i32
    scf.if %9 {
      %c0_19 = arith.constant 0 : index
      %c0_20 = arith.constant 0 : index
      %c0_21 = arith.constant 0 : index
      %c0_22 = arith.constant 0 : index
      %36 = vector.load %arg2[%c0_19, %c0_20, %c0_21, %c0_22] : memref<1x1x16x128xbf16, #tpu.memory_space<vmem>>, vector<1x1x16x128xbf16>
      %37 = vector.shape_cast %36 : vector<1x1x16x128xbf16> to vector<16x128xbf16>
      %38 = arith.extf %37 : vector<16x128xbf16> to vector<16x128xf32>
      %39 = vector.broadcast %1 : vector<1x128xf32> to vector<16x128xf32>
      %40 = arith.mulf %38, %39 : vector<16x128xf32>
      %41 = vector.broadcast %2 : vector<1x128xf32> to vector<16x128xf32>
      %42 = arith.addf %40, %41 : vector<16x128xf32>
      %cst_23 = arith.constant 0.000000e+00 : f32
      %43 = vector.broadcast %cst_23 : f32 to vector<16x128xf32>
      %44 = arith.maximumf %42, %43 : vector<16x128xf32>
      %45 = arith.truncf %44 : vector<16x128xf32> to vector<16x128xbf16>
      %c0_24 = arith.constant 0 : index
      %c0_25 = arith.constant 0 : index
      %c1_26 = arith.constant 1 : index
      %c0_27 = arith.constant 0 : index
      %46 = vector.load %arg6[%c0_24, %c0_25, %c1_26, %c0_27] : memref<1x16x24x128xbf16, #tpu.memory_space<vmem>>, vector<1x1x16x128xbf16>
      %47 = vector.shape_cast %46 : vector<1x1x16x128xbf16> to vector<16x128xbf16>
      %48 = vector.shape_cast %45 : vector<16x128xbf16> to vector<1x1x16x128xbf16>
      tpu.vector_store %arg6[%c0_24, %c0_25, %c1_26, %c0_27], %48 {strides = array<i32>} : memref<1x16x24x128xbf16, #tpu.memory_space<vmem>>, vector<1x1x16x128xbf16>,
    } else {
    }
    %c0_8 = arith.constant 0 : index
    %c0_9 = arith.constant 0 : index
    %c0_10 = arith.constant 0 : index
    %c0_11 = arith.constant 0 : index
    %10 = vector.load %arg3[%c0_8, %c0_9, %c0_10, %c0_11] : memref<1x16x16x128xbf16, #tpu.memory_space<vmem>>, vector<1x15x16x128xbf16>
    %11 = vector.shape_cast %10 : vector<1x15x16x128xbf16> to vector<15x16x128xbf16>
    %12 = arith.extf %11 : vector<15x16x128xbf16> to vector<15x16x128xf32>
    %13 = vector.shape_cast %1 : vector<1x128xf32> to vector<1x1x128xf32>
    %14 = vector.broadcast %13 : vector<1x1x128xf32> to vector<15x16x128xf32>
    %15 = arith.mulf %12, %14 : vector<15x16x128xf32>
    %16 = vector.shape_cast %2 : vector<1x128xf32> to vector<1x1x128xf32>
    %17 = vector.broadcast %16 : vector<1x1x128xf32> to vector<15x16x128xf32>
    %18 = arith.addf %15, %17 : vector<15x16x128xf32>
    %cst_12 = arith.constant 0.000000e+00 : f32
    %19 = vector.broadcast %cst_12 : f32 to vector<15x16x128xf32>
    %20 = arith.maximumf %18, %19 : vector<15x16x128xf32>
    %21 = tpu.iota {dimensions = array<i32: 0>} : vector<15x1x1xi32>
    %c1_i32_13 = arith.constant 1 : i32
    %22 = vector.broadcast %c1_i32_13 : i32 to vector<15x1x1xi32>
    %23 = arith.addi %21, %22 : vector<15x1x1xi32>
    %24 = vector.broadcast %0 : i32 to vector<15x1x1xi32>
    %25 = arith.addi %24, %23 : vector<15x1x1xi32>
    %c16_i32_14 = arith.constant 16 : i32
    %26 = vector.broadcast %c16_i32_14 : i32 to vector<15x1x1xi32>
    %27 = arith.cmpi sle, %25, %26 : vector<15x1x1xi32>
    %cst_15 = arith.constant 0.000000e+00 : f32
    %28 = vector.shape_cast %27 : vector<15x1x1xi1> to vector<15x1x1xi1>
    %29 = vector.broadcast %28 : vector<15x1x1xi1> to vector<15x16x128xi1>
    %30 = vector.broadcast %cst_15 : f32 to vector<15x16x128xf32>
    %31 = arith.select %29, %20, %30 : vector<15x16x128xi1>, vector<15x16x128xf32>
    %32 = arith.truncf %31 : vector<15x16x128xf32> to vector<15x16x128xbf16>
    %c0_16 = arith.constant 0 : index
    %c1 = arith.constant 1 : index
    %c1_17 = arith.constant 1 : index
    %c0_18 = arith.constant 0 : index
    %33 = vector.load %arg6[%c0_16, %c1, %c1_17, %c0_18] : memref<1x16x24x128xbf16, #tpu.memory_space<vmem>>, vector<1x15x16x128xbf16>
    %34 = vector.shape_cast %33 : vector<1x15x16x128xbf16> to vector<15x16x128xbf16>
    %35 = vector.shape_cast %32 : vector<15x16x128xbf16> to vector<1x15x16x128xbf16>
    tpu.vector_store %arg6[%c0_16, %c1, %c1_17, %c0_18], %35 {strides = array<i32>} : memref<1x16x24x128xbf16, #tpu.memory_space<vmem>>, vector<1x15x16x128xbf16>,
    return
  }
  func.func @transform_0(%arg0: i32, %arg1: i32) -> (i32, i32, i32, i32) {
    %c16_i32 = arith.constant 16 : i32
    %0 = arith.muli %arg1, %c16_i32 : i32
    %c1_i32 = arith.constant 1 : i32
    %1 = arith.subi %0, %c1_i32 : i32
    %c0_i32 = arith.constant 0 : i32
    %2 = arith.maxsi %1, %c0_i32 : i32
    %c0_i32_0 = arith.constant 0 : i32
    %c0_i32_1 = arith.constant 0 : i32
    %c0_i32_2 = arith.constant 0 : i32
    return %arg0, %2, %c0_i32_0, %c0_i32_1 : i32, i32, i32, i32
  }
  func.func @transform_1(%arg0: i32, %arg1: i32) -> (i32, i32, i32, i32) {
    %c0_i32 = arith.constant 0 : i32
    %c0_i32_0 = arith.constant 0 : i32
    %c0_i32_1 = arith.constant 0 : i32
    return %arg0, %arg1, %c0_i32, %c0_i32_0 : i32, i32, i32, i32
  }
  func.func @transform_2(%arg0: i32, %arg1: i32) -> (i32, i32) {
    %c0_i32 = arith.constant 0 : i32
    %c0_i32_0 = arith.constant 0 : i32
    %c0_i32_1 = arith.constant 0 : i32
    return %c0_i32, %c0_i32_0 : i32, i32
  }
  func.func @transform_3(%arg0: i32, %arg1: i32) -> (i32, i32) {
    %c0_i32 = arith.constant 0 : i32
    %c0_i32_0 = arith.constant 0 : i32
    %c0_i32_1 = arith.constant 0 : i32
    return %c0_i32, %c0_i32_0 : i32, i32
  }
  func.func @transform_4(%arg0: i32, %arg1: i32) -> (i32, i32, i32, i32) {
    %c0_i32 = arith.constant 0 : i32
    %c0_i32_0 = arith.constant 0 : i32
    %c0_i32_1 = arith.constant 0 : i32
    return %arg0, %arg1, %c0_i32, %c0_i32_0 : i32, i32, i32, i32
  }
}

module attributes {stable_mosaic.version = 11 : i64} {
  func.func @_conv_stats_kernel(%arg0: i32, %arg1: i32, %arg2: memref<1x32x24x128xbf16, #tpu.memory_space<vmem>>, %arg3: memref<3x384x128xbf16, #tpu.memory_space<vmem>>, %arg4: memref<1x16x16x128xbf16, #tpu.memory_space<vmem>>, %arg5: memref<1x2x128xf32, #tpu.memory_space<vmem>>) attributes {dimension_semantics = [#tpu.dimension_semantics<parallel>, #tpu.dimension_semantics<arbitrary>], iteration_bounds = array<i64: 2, 1>, scalar_prefetch = 0 : i64, scratch_operands = 0 : i64, tpu.core_type = #tpu.core_type<tc>, window_params = [{transform_indices = @transform_0, window_bounds = array<i64: 1, 32, 24, 128>}, {pipeline_mode = #tpu.pipeline_mode<synchronous>, transform_indices = @transform_1, window_bounds = array<i64: 3, 384, 128>}, {transform_indices = @transform_2, window_bounds = array<i64: 1, 16, 16, 128>}, {transform_indices = @transform_3, window_bounds = array<i64: 1, 2, 128>}]} {
    %c16_i32 = arith.constant 16 : i32
    %0 = arith.muli %arg1, %c16_i32 : i32
    %1 = tpu.assume_multiple %0, 16 : i32
    %c0_i32 = arith.constant 0 : i32
    %2 = arith.addi %1, %c0_i32 : i32
    %c0 = arith.constant 0 : index
    %3 = arith.index_cast %2 : i32 to index
    %c0_0 = arith.constant 0 : index
    %c0_1 = arith.constant 0 : index
    %4 = vector.load %arg2[%c0, %3, %c0_0, %c0_1] : memref<1x32x24x128xbf16, #tpu.memory_space<vmem>>, vector<1x16x24x128xbf16>
    %5 = vector.shape_cast %4 : vector<1x16x24x128xbf16> to vector<16x24x128xbf16>
    %c1_i32 = arith.constant 1 : i32
    %6 = arith.addi %1, %c1_i32 : i32
    %c0_2 = arith.constant 0 : index
    %7 = arith.index_cast %6 : i32 to index
    %c0_3 = arith.constant 0 : index
    %c0_4 = arith.constant 0 : index
    %8 = vector.load %arg2[%c0_2, %7, %c0_3, %c0_4] : memref<1x32x24x128xbf16, #tpu.memory_space<vmem>>, vector<1x16x24x128xbf16>
    %9 = vector.shape_cast %8 : vector<1x16x24x128xbf16> to vector<16x24x128xbf16>
    %c2_i32 = arith.constant 2 : i32
    %10 = arith.addi %1, %c2_i32 : i32
    %c0_5 = arith.constant 0 : index
    %11 = arith.index_cast %10 : i32 to index
    %c0_6 = arith.constant 0 : index
    %c0_7 = arith.constant 0 : index
    %12 = vector.load %arg2[%c0_5, %11, %c0_6, %c0_7] : memref<1x32x24x128xbf16, #tpu.memory_space<vmem>>, vector<1x16x24x128xbf16>
    %13 = vector.shape_cast %12 : vector<1x16x24x128xbf16> to vector<16x24x128xbf16>
    %14 = tpu.concatenate %5, %9, %13 in 2 : vector<16x24x128xbf16>, vector<16x24x128xbf16>, vector<16x24x128xbf16> -> vector<16x24x384xbf16>
    %15 = vector.shape_cast %14 : vector<16x24x384xbf16> to vector<384x384xbf16>
    %c0_8 = arith.constant 0 : index
    %c0_9 = arith.constant 0 : index
    %c0_10 = arith.constant 0 : index
    %16 = vector.load %arg3[%c0_8, %c0_9, %c0_10] : memref<3x384x128xbf16, #tpu.memory_space<vmem>>, vector<1x384x128xbf16>
    %17 = vector.shape_cast %16 : vector<1x384x128xbf16> to vector<384x128xbf16>
    %cst = arith.constant dense<0.000000e+00> : vector<384x128xf32>
    %18 = tpu.matmul %15, %17, %cst {dimension_numbers = #tpu.dot_dimension_numbers<[1], [0], [0], [1], [0, 0, 1, 1], [], []>} : vector<384x384xbf16>, vector<384x128xbf16>, vector<384x128xf32> -> vector<384x128xf32>
    %19 = vector.shape_cast %18 : vector<384x128xf32> to vector<16x24x128xf32>
    %20 = vector.extract_strided_slice %19 {offsets = [0, 0, 0], sizes = [16, 16, 128], strides = [1, 1, 1]} : vector<16x24x128xf32> to vector<16x16x128xf32>
    %c1 = arith.constant 1 : index
    %c0_11 = arith.constant 0 : index
    %c0_12 = arith.constant 0 : index
    %21 = vector.load %arg3[%c1, %c0_11, %c0_12] : memref<3x384x128xbf16, #tpu.memory_space<vmem>>, vector<1x384x128xbf16>
    %22 = vector.shape_cast %21 : vector<1x384x128xbf16> to vector<384x128xbf16>
    %cst_13 = arith.constant dense<0.000000e+00> : vector<384x128xf32>
    %23 = tpu.matmul %15, %22, %cst_13 {dimension_numbers = #tpu.dot_dimension_numbers<[1], [0], [0], [1], [0, 0, 1, 1], [], []>} : vector<384x384xbf16>, vector<384x128xbf16>, vector<384x128xf32> -> vector<384x128xf32>
    %24 = vector.shape_cast %23 : vector<384x128xf32> to vector<16x24x128xf32>
    %25 = vector.extract_strided_slice %24 {offsets = [0, 1, 0], sizes = [16, 16, 128], strides = [1, 1, 1]} : vector<16x24x128xf32> to vector<16x16x128xf32>
    %26 = arith.addf %20, %25 : vector<16x16x128xf32>
    %c2 = arith.constant 2 : index
    %c0_14 = arith.constant 0 : index
    %c0_15 = arith.constant 0 : index
    %27 = vector.load %arg3[%c2, %c0_14, %c0_15] : memref<3x384x128xbf16, #tpu.memory_space<vmem>>, vector<1x384x128xbf16>
    %28 = vector.shape_cast %27 : vector<1x384x128xbf16> to vector<384x128xbf16>
    %cst_16 = arith.constant dense<0.000000e+00> : vector<384x128xf32>
    %29 = tpu.matmul %15, %28, %cst_16 {dimension_numbers = #tpu.dot_dimension_numbers<[1], [0], [0], [1], [0, 0, 1, 1], [], []>} : vector<384x384xbf16>, vector<384x128xbf16>, vector<384x128xf32> -> vector<384x128xf32>
    %30 = vector.shape_cast %29 : vector<384x128xf32> to vector<16x24x128xf32>
    %31 = vector.extract_strided_slice %30 {offsets = [0, 2, 0], sizes = [16, 16, 128], strides = [1, 1, 1]} : vector<16x24x128xf32> to vector<16x16x128xf32>
    %32 = arith.addf %26, %31 : vector<16x16x128xf32>
    %33 = vector.shape_cast %32 : vector<16x16x128xf32> to vector<1x16x16x128xf32>
    %34 = arith.truncf %33 : vector<1x16x16x128xf32> to vector<1x16x16x128xbf16>
    %c0_17 = arith.constant 0 : index
    %c0_18 = arith.constant 0 : index
    %c0_19 = arith.constant 0 : index
    %c0_20 = arith.constant 0 : index
    %35 = vector.load %arg4[%c0_17, %c0_18, %c0_19, %c0_20] : memref<1x16x16x128xbf16, #tpu.memory_space<vmem>>, vector<1x16x16x128xbf16>
    tpu.vector_store %arg4[%c0_17, %c0_18, %c0_19, %c0_20], %34 {strides = array<i32>} : memref<1x16x16x128xbf16, #tpu.memory_space<vmem>>, vector<1x16x16x128xbf16>,
    %36 = vector.shape_cast %32 : vector<16x16x128xf32> to vector<256x128xf32>
    %cst_21 = arith.constant dense<0.000000e+00> : vector<128xf32>
    %37 = vector.multi_reduction <add>, %36, %cst_21 [0] : vector<256x128xf32> to vector<128xf32>
    %38 = vector.shape_cast %37 : vector<128xf32> to vector<1x128xf32>
    %39 = arith.mulf %36, %36 : vector<256x128xf32>
    %cst_22 = arith.constant dense<0.000000e+00> : vector<128xf32>
    %40 = vector.multi_reduction <add>, %39, %cst_22 [0] : vector<256x128xf32> to vector<128xf32>
    %41 = vector.shape_cast %40 : vector<128xf32> to vector<1x128xf32>
    %c0_i32_23 = arith.constant 0 : i32
    %42 = arith.cmpi eq, %arg1, %c0_i32_23 : i32
    %43 = arith.extui %42 : i1 to i32
    %c0_i32_24 = arith.constant 0 : i32
    %44 = arith.cmpi ne, %43, %c0_i32_24 : i32
    scf.if %44 {
      %cst_31 = arith.constant 0.000000e+00 : f32
      %50 = vector.broadcast %cst_31 : f32 to vector<1x2x128xf32>
      %c0_32 = arith.constant 0 : index
      %c0_33 = arith.constant 0 : index
      %c0_34 = arith.constant 0 : index
      %51 = vector.load %arg5[%c0_32, %c0_33, %c0_34] : memref<1x2x128xf32, #tpu.memory_space<vmem>>, vector<1x2x128xf32>
      tpu.vector_store %arg5[%c0_32, %c0_33, %c0_34], %50 {strides = array<i32>} : memref<1x2x128xf32, #tpu.memory_space<vmem>>, vector<1x2x128xf32>,
    } else {
    }
    %c0_25 = arith.constant 0 : index
    %c0_26 = arith.constant 0 : index
    %c0_27 = arith.constant 0 : index
    %45 = vector.load %arg5[%c0_25, %c0_26, %c0_27] : memref<1x2x128xf32, #tpu.memory_space<vmem>>, vector<1x2x128xf32>
    %46 = tpu.concatenate %38, %41 in 0 : vector<1x128xf32>, vector<1x128xf32> -> vector<2x128xf32>
    %47 = vector.shape_cast %46 : vector<2x128xf32> to vector<1x2x128xf32>
    %48 = arith.addf %45, %47 : vector<1x2x128xf32>
    %c0_28 = arith.constant 0 : index
    %c0_29 = arith.constant 0 : index
    %c0_30 = arith.constant 0 : index
    %49 = vector.load %arg5[%c0_28, %c0_29, %c0_30] : memref<1x2x128xf32, #tpu.memory_space<vmem>>, vector<1x2x128xf32>
    tpu.vector_store %arg5[%c0_28, %c0_29, %c0_30], %48 {strides = array<i32>} : memref<1x2x128xf32, #tpu.memory_space<vmem>>, vector<1x2x128xf32>,
    return
  }
  func.func @transform_0(%arg0: i32, %arg1: i32) -> (i32, i32, i32, i32) {
    %c0_i32 = arith.constant 0 : i32
    %c0_i32_0 = arith.constant 0 : i32
    %c0_i32_1 = arith.constant 0 : i32
    %c0_i32_2 = arith.constant 0 : i32
    return %arg0, %c0_i32, %c0_i32_0, %c0_i32_1 : i32, i32, i32, i32
  }
  func.func @transform_1(%arg0: i32, %arg1: i32) -> (i32, i32, i32) {
    %c0_i32 = arith.constant 0 : i32
    %c0_i32_0 = arith.constant 0 : i32
    %c0_i32_1 = arith.constant 0 : i32
    %c0_i32_2 = arith.constant 0 : i32
    return %c0_i32, %c0_i32_0, %c0_i32_1 : i32, i32, i32
  }
  func.func @transform_2(%arg0: i32, %arg1: i32) -> (i32, i32, i32, i32) {
    %c0_i32 = arith.constant 0 : i32
    %c0_i32_0 = arith.constant 0 : i32
    %c0_i32_1 = arith.constant 0 : i32
    return %arg0, %arg1, %c0_i32, %c0_i32_0 : i32, i32, i32, i32
  }
  func.func @transform_3(%arg0: i32, %arg1: i32) -> (i32, i32, i32) {
    %c0_i32 = arith.constant 0 : i32
    %c0_i32_0 = arith.constant 0 : i32
    %c0_i32_1 = arith.constant 0 : i32
    return %arg0, %c0_i32, %c0_i32_0 : i32, i32, i32
  }
}

module attributes {stable_mosaic.version = 11 : i64} {
  func.func @_bn_relu_kernel(%arg0: i32, %arg1: i32, %arg2: memref<1x16x16x128xbf16, #tpu.memory_space<vmem>>, %arg3: memref<1x128xf32, #tpu.memory_space<vmem>>, %arg4: memref<1x128xf32, #tpu.memory_space<vmem>>, %arg5: memref<1x16x16x128xf32, #tpu.memory_space<vmem>>) attributes {dimension_semantics = [#tpu.dimension_semantics<parallel>, #tpu.dimension_semantics<parallel>], iteration_bounds = array<i64: 2, 1>, scalar_prefetch = 0 : i64, scratch_operands = 0 : i64, tpu.core_type = #tpu.core_type<tc>, window_params = [{transform_indices = @transform_0, window_bounds = array<i64: 1, 16, 16, 128>}, {pipeline_mode = #tpu.pipeline_mode<synchronous>, transform_indices = @transform_1, window_bounds = array<i64: 1, 128>}, {pipeline_mode = #tpu.pipeline_mode<synchronous>, transform_indices = @transform_2, window_bounds = array<i64: 1, 128>}, {transform_indices = @transform_3, window_bounds = array<i64: 1, 16, 16, 128>}]} {
    %c0 = arith.constant 0 : index
    %c0_0 = arith.constant 0 : index
    %c0_1 = arith.constant 0 : index
    %c0_2 = arith.constant 0 : index
    %0 = vector.load %arg2[%c0, %c0_0, %c0_1, %c0_2] : memref<1x16x16x128xbf16, #tpu.memory_space<vmem>>, vector<1x16x16x128xbf16>
    %1 = arith.extf %0 : vector<1x16x16x128xbf16> to vector<1x16x16x128xf32>
    %c0_3 = arith.constant 0 : index
    %c0_4 = arith.constant 0 : index
    %2 = vector.load %arg3[%c0_3, %c0_4] : memref<1x128xf32, #tpu.memory_space<vmem>>, vector<1x128xf32>
    %3 = vector.shape_cast %2 : vector<1x128xf32> to vector<1x1x1x128xf32>
    %4 = vector.broadcast %3 : vector<1x1x1x128xf32> to vector<1x16x16x128xf32>
    %5 = arith.mulf %1, %4 : vector<1x16x16x128xf32>
    %c0_5 = arith.constant 0 : index
    %c0_6 = arith.constant 0 : index
    %6 = vector.load %arg4[%c0_5, %c0_6] : memref<1x128xf32, #tpu.memory_space<vmem>>, vector<1x128xf32>
    %7 = vector.shape_cast %6 : vector<1x128xf32> to vector<1x1x1x128xf32>
    %8 = vector.broadcast %7 : vector<1x1x1x128xf32> to vector<1x16x16x128xf32>
    %9 = arith.addf %5, %8 : vector<1x16x16x128xf32>
    %cst = arith.constant 0.000000e+00 : f32
    %10 = vector.broadcast %cst : f32 to vector<1x16x16x128xf32>
    %11 = arith.maximumf %9, %10 : vector<1x16x16x128xf32>
    %c0_7 = arith.constant 0 : index
    %c0_8 = arith.constant 0 : index
    %c0_9 = arith.constant 0 : index
    %c0_10 = arith.constant 0 : index
    %12 = vector.load %arg5[%c0_7, %c0_8, %c0_9, %c0_10] : memref<1x16x16x128xf32, #tpu.memory_space<vmem>>, vector<1x16x16x128xf32>
    tpu.vector_store %arg5[%c0_7, %c0_8, %c0_9, %c0_10], %11 {strides = array<i32>} : memref<1x16x16x128xf32, #tpu.memory_space<vmem>>, vector<1x16x16x128xf32>,
    return
  }
  func.func @transform_0(%arg0: i32, %arg1: i32) -> (i32, i32, i32, i32) {
    %c0_i32 = arith.constant 0 : i32
    %c0_i32_0 = arith.constant 0 : i32
    %c0_i32_1 = arith.constant 0 : i32
    return %arg0, %arg1, %c0_i32, %c0_i32_0 : i32, i32, i32, i32
  }
  func.func @transform_1(%arg0: i32, %arg1: i32) -> (i32, i32) {
    %c0_i32 = arith.constant 0 : i32
    %c0_i32_0 = arith.constant 0 : i32
    %c0_i32_1 = arith.constant 0 : i32
    return %c0_i32, %c0_i32_0 : i32, i32
  }
  func.func @transform_2(%arg0: i32, %arg1: i32) -> (i32, i32) {
    %c0_i32 = arith.constant 0 : i32
    %c0_i32_0 = arith.constant 0 : i32
    %c0_i32_1 = arith.constant 0 : i32
    return %c0_i32, %c0_i32_0 : i32, i32
  }
  func.func @transform_3(%arg0: i32, %arg1: i32) -> (i32, i32, i32, i32) {
    %c0_i32 = arith.constant 0 : i32
    %c0_i32_0 = arith.constant 0 : i32
    %c0_i32_1 = arith.constant 0 : i32
    return %arg0, %arg1, %c0_i32, %c0_i32_0 : i32, i32, i32, i32
  }
}

</mosaic_0001>

<bundles_post_ra>
// kernel: double_conv.7
= control target key start
LH: loop header
LB: loop body
LE: loop exit
PB: predicated region body
PF: predicated region fallthrough
CT: control target
= control target key end

     0   :  { %s679_s12 = smov 0   ;;  %s681_s13 = smov 0   ;;  %s842_s0 = inlined_call_operand.vmem [shape: bf16[2,16,16,128], index: 0, kind: input, shape index: {}]   ;;  %s843_s1 = inlined_call_operand.vmem [shape: f32[1,128], index: 1, kind: input, shape index: {}]   ;;  %s844_s2 = inlined_call_operand.vmem [shape: f32[1,128], index: 2, kind: input, shape index: {}]   ;;  %s845_s3 = inlined_call_operand.vmem [shape: f32[2,16,16,128], index: 3, kind: output, shape index: {}]  }
   0x1   :  { %s683_s14 = smov 0  }
   0x2 LB: > { %s25_s15 = sadd.s32 1, %s653_s13  ;;  %p521_p0 = scmp.ge.s32.totalorder %s657_s14, 1  ;;  %s657_s14 = sphi %s683_s14, %s13_s14   ;;  %s653_s13 = sphi %s681_s13, %s847_s13   ;;  %s649_s12 = sphi %s679_s12, %s846_s12  }
   0x3   : > { %p27_p1 = scmp.ge.s32.totalorder %s25_s15, 2  ;;  %p159_p2 = scmp.lt.s32.totalorder %s657_s14, 3 }
   0x5   : > { %s849_s15 = smov (%p27_p1, %s25_s15), 0  ;;  %p160_p3 = pnand %p521_p0, %p159_p2 }
   0x6   : > { %p194_p4 = scmp.lt.s32.totalorder (!%p160_p3), %s649_s12, 1 }
   0x7   : > { %163 = sbr.rel (%p160_p3) target bundleno = 52 (0x34), region = 32 }
   0xc   : > { %s851_s12 = smov (!%p194_p4, %s649_s12), 1  ;;  %v708_v0 = vld [vmem:[%s843_s1] ss:$0 sm:$0xff] }
   0xd   : > { %s530_s16 = sshll.u32 %s851_s12, 7  ;;  %v717_v9 = vld [vmem:[%s844_s2] ss:$0 sm:$0xff]  ;;  %s531_s24 = sshll.u32 %s851_s12, 8 }
   0xe   : > { %s703_s19 = scalar_lea.vmem %s842_s0, %s530_s16  ;;  %s735_s27 = scalar_lea.vmem %s845_s3, %s531_s24 }
   0xf   : > { %v533_v1 = vld [vmem:[%s703_s19] sm:$0xff]   ;;  %v596_v2 = vld [vmem:[%s703_s19 + $0x8] sm:$0xff]   ;;  %v597_v3 = vld [vmem:[%s703_s19 + $0x10] sm:$0xff]  }
  0x10   : > { %v534_v4 = vunpack.c.l.bf16 %v533_v1  ;;  %v535_v5 = vunpack.c.h.bf16 %v533_v1  ;;  %v538_v6 = vunpack.c.l.bf16 %v596_v2  ;;  %v539_v7 = vunpack.c.h.bf16 %v596_v2  ;;  %v598_v8 = vld [vmem:[%s703_s19 + $0x18] sm:$0xff]   ;;  %v599_v30 = vld [vmem:[%s703_s19 + $0x20] sm:$0xff]   ;;  %v600_v31 = vld [vmem:[%s703_s19 + $0x28] sm:$0xff]  }
  0x11   : > { %v542_v10 = vunpack.c.l.bf16 %v597_v3  ;;  %v543_v11 = vunpack.c.h.bf16 %v597_v3  ;;  %v546_v12 = vunpack.c.l.bf16 %v598_v8  ;;  %v547_v13 = vunpack.c.h.bf16 %v598_v8  ;;  %v601_v36 = vld [vmem:[%s703_s19 + $0x30] sm:$0xff]   ;;  %v602_v37 = vld [vmem:[%s703_s19 + $0x38] sm:$0xff]   ;;  %v603_v3 = vld [vmem:[%s703_s19 + $0x40] sm:$0xff]  }
  0x12   : > { %v286_v14 = vmul.f32 %v534_v4, %v708_v0  ;;  %v287_v15 = vmul.f32 %v535_v5, %v708_v0  ;;  %v288_v16 = vmul.f32 %v538_v6, %v708_v0  ;;  %v289_v17 = vmul.f32 %v539_v7, %v708_v0  ;;  %v604_v4 = vld [vmem:[%s703_s19 + $0x48] sm:$0xff]  }
  0x13   : > { %v290_v18 = vmul.f32 %v542_v10, %v708_v0  ;;  %v291_v19 = vmul.f32 %v543_v11, %v708_v0  ;;  %v292_v20 = vmul.f32 %v546_v12, %v708_v0  ;;  %v293_v21 = vmul.f32 %v547_v13, %v708_v0  ;;  %v605_v10 = vld [vmem:[%s703_s19 + $0x50] sm:$0xff]   ;;  %v606_v11 = vld [vmem:[%s703_s19 + $0x58] sm:$0xff]  }
  0x14   : > { %v325_v22 = vadd.f32 %v717_v9, %v286_v14  ;;  %v326_v23 = vadd.f32 %v717_v9, %v287_v15  ;;  %v327_v24 = vadd.f32 %v717_v9, %v288_v16  ;;  %v328_v25 = vadd.f32 %v717_v9, %v289_v17 }
  0x15   : > { %v329_v26 = vadd.f32 %v717_v9, %v290_v18  ;;  %v330_v27 = vadd.f32 %v717_v9, %v291_v19  ;;  %v331_v28 = vadd.f32 %v717_v9, %v292_v20  ;;  %v332_v29 = vadd.f32 %v717_v9, %v293_v21 }
  0x16   : > { %v357_v32 = vmax.f32 %v325_v22, 0.0  ;;  %v358_v33 = vmax.f32 %v326_v23, 0.0  ;;  %v359_v34 = vmax.f32 %v327_v24, 0.0  ;;  %v360_v35 = vmax.f32 %v328_v25, 0.0 }
  0x17   : > { %v361_v38 = vmax.f32 %v329_v26, 0.0  ;;  %v362_v39 = vmax.f32 %v330_v27, 0.0  ;;  %v363_v40 = vmax.f32 %v331_v28, 0.0  ;;  %v364_v41 = vmax.f32 %v332_v29, 0.0 }
  0x18   : > { %389 = vst [vmem:[%s735_s27] sm:$0xff] %v357_v32  ;;  %390 = vst [vmem:[%s735_s27 + $0x8] sm:$0xff] %v358_v33  ;;  %v550_v42 = vunpack.c.l.bf16 %v599_v30  ;;  %v551_v43 = vunpack.c.h.bf16 %v599_v30  ;;  %v554_v44 = vunpack.c.l.bf16 %v600_v31  ;;  %v555_v45 = vunpack.c.h.bf16 %v600_v31 }
  0x19   : > { %391 = vst [vmem:[%s735_s27 + $0x10] sm:$0xff] %v359_v34  ;;  %392 = vst [vmem:[%s735_s27 + $0x18] sm:$0xff] %v360_v35  ;;  %v558_v46 = vunpack.c.l.bf16 %v601_v36  ;;  %v559_v47 = vunpack.c.h.bf16 %v601_v36  ;;  %v562_v48 = vunpack.c.l.bf16 %v602_v37  ;;  %v563_v49 = vunpack.c.h.bf16 %v602_v37 }
  0x1a   : > { %393 = vst [vmem:[%s735_s27 + $0x20] sm:$0xff] %v361_v38  ;;  %394 = vst [vmem:[%s735_s27 + $0x28] sm:$0xff] %v362_v39  ;;  %v294_v50 = vmul.f32 %v550_v42, %v708_v0  ;;  %v295_v51 = vmul.f32 %v551_v43, %v708_v0  ;;  %v296_v52 = vmul.f32 %v554_v44, %v708_v0  ;;  %v566_v16 = vunpack.c.l.bf16 %v603_v3 }
  0x1b   : > { %395 = vst [vmem:[%s735_s27 + $0x30] sm:$0xff] %v363_v40  ;;  %396 = vst [vmem:[%s735_s27 + $0x38] sm:$0xff] %v364_v41  ;;  %v297_v53 = vmul.f32 %v555_v45, %v708_v0  ;;  %v298_v54 = vmul.f32 %v558_v46, %v708_v0  ;;  %v299_v55 = vmul.f32 %v559_v47, %v708_v0  ;;  %v567_v17 = vunpack.c.h.bf16 %v603_v3  ;;  %v607_v40 = vld [vmem:[%s703_s19 + $0x60] sm:$0xff]   ;;  %v608_v41 = vld [vmem:[%s703_s19 + $0x68] sm:$0xff]  }
  0x1c   : > { %v300_v56 = vmul.f32 %v562_v48, %v708_v0  ;;  %v301_v57 = vmul.f32 %v563_v49, %v708_v0  ;;  %v333_v58 = vadd.f32 %v717_v9, %v294_v50  ;;  %v334_v59 = vadd.f32 %v717_v9, %v295_v51  ;;  %v609_v46 = vld [vmem:[%s703_s19 + $0x70] sm:$0xff]   ;;  %v610_v47 = vld [vmem:[%s703_s19 + $0x78] sm:$0xff]  }
  0x1d   : > { %v335_v60 = vadd.f32 %v717_v9, %v296_v52  ;;  %v336_v61 = vadd.f32 %v717_v9, %v297_v53  ;;  %v337_v62 = vadd.f32 %v717_v9, %v298_v54  ;;  %v338_v63 = vadd.f32 %v717_v9, %v299_v55 }
  0x1e   : > { %v339_v1 = vadd.f32 %v717_v9, %v300_v56  ;;  %v340_v2 = vadd.f32 %v717_v9, %v301_v57  ;;  %v365_v5 = vmax.f32 %v333_v58, 0.0  ;;  %v366_v6 = vmax.f32 %v334_v59, 0.0 }
  0x1f   : > { %v367_v7 = vmax.f32 %v335_v60, 0.0  ;;  %v368_v8 = vmax.f32 %v336_v61, 0.0  ;;  %v369_v12 = vmax.f32 %v337_v62, 0.0  ;;  %v370_v13 = vmax.f32 %v338_v63, 0.0 }
  0x20   : > { %v371_v14 = vmax.f32 %v339_v1, 0.0  ;;  %v372_v15 = vmax.f32 %v340_v2, 0.0  ;;  %397 = vst [vmem:[%s735_s27 + $0x40] sm:$0xff] %v365_v5  ;;  %398 = vst [vmem:[%s735_s27 + $0x48] sm:$0xff] %v366_v6  ;;  %v570_v18 = vunpack.c.l.bf16 %v604_v4  ;;  %v571_v19 = vunpack.c.h.bf16 %v604_v4 }
  0x21   : > { %399 = vst [vmem:[%s735_s27 + $0x50] sm:$0xff] %v367_v7  ;;  %400 = vst [vmem:[%s735_s27 + $0x58] sm:$0xff] %v368_v8  ;;  %v574_v20 = vunpack.c.l.bf16 %v605_v10  ;;  %v575_v21 = vunpack.c.h.bf16 %v605_v10  ;;  %v578_v22 = vunpack.c.l.bf16 %v606_v11  ;;  %v579_v23 = vunpack.c.h.bf16 %v606_v11 }
  0x22   : > { %401 = vst [vmem:[%s735_s27 + $0x60] sm:$0xff] %v369_v12  ;;  %402 = vst [vmem:[%s735_s27 + $0x68] sm:$0xff] %v370_v13  ;;  %v302_v24 = vmul.f32 %v566_v16, %v708_v0  ;;  %v303_v25 = vmul.f32 %v567_v17, %v708_v0  ;;  %v304_v26 = vmul.f32 %v570_v18, %v708_v0  ;;  %v582_v52 = vunpack.c.l.bf16 %v607_v40 }
  0x23   : > { %403 = vst [vmem:[%s735_s27 + $0x70] sm:$0xff] %v371_v14  ;;  %404 = vst [vmem:[%s735_s27 + $0x78] sm:$0xff] %v372_v15  ;;  %v305_v27 = vmul.f32 %v571_v19, %v708_v0  ;;  %v306_v28 = vmul.f32 %v574_v20, %v708_v0  ;;  %v307_v29 = vmul.f32 %v575_v21, %v708_v0  ;;  %v583_v53 = vunpack.c.h.bf16 %v607_v40 }
  0x24   : > { %v308_v30 = vmul.f32 %v578_v22, %v708_v0  ;;  %v309_v31 = vmul.f32 %v579_v23, %v708_v0  ;;  %v341_v32 = vadd.f32 %v717_v9, %v302_v24  ;;  %v342_v33 = vadd.f32 %v717_v9, %v303_v25 }
  0x25   : > { %v343_v34 = vadd.f32 %v717_v9, %v304_v26  ;;  %v344_v35 = vadd.f32 %v717_v9, %v305_v27  ;;  %v345_v36 = vadd.f32 %v717_v9, %v306_v28  ;;  %v346_v37 = vadd.f32 %v717_v9, %v307_v29 }
  0x26   : > { %v347_v38 = vadd.f32 %v717_v9, %v308_v30  ;;  %v348_v39 = vadd.f32 %v717_v9, %v309_v31  ;;  %v373_v42 = vmax.f32 %v341_v32, 0.0  ;;  %v374_v43 = vmax.f32 %v342_v33, 0.0 }
  0x27   : > { %v375_v44 = vmax.f32 %v343_v34, 0.0  ;;  %v376_v45 = vmax.f32 %v344_v35, 0.0  ;;  %v377_v48 = vmax.f32 %v345_v36, 0.0  ;;  %v378_v49 = vmax.f32 %v346_v37, 0.0 }
  0x28   : > { %v379_v50 = vmax.f32 %v347_v38, 0.0  ;;  %v380_v51 = vmax.f32 %v348_v39, 0.0  ;;  %405 = vst [vmem:[%s735_s27 + $0x80] sm:$0xff] %v373_v42  ;;  %406 = vst [vmem:[%s735_s27 + $0x88] sm:$0xff] %v374_v43  ;;  %v586_v54 = vunpack.c.l.bf16 %v608_v41  ;;  %v587_v55 = vunpack.c.h.bf16 %v608_v41 }
  0x29   : > { %407 = vst [vmem:[%s735_s27 + $0x90] sm:$0xff] %v375_v44  ;;  %408 = vst [vmem:[%s735_s27 + $0x98] sm:$0xff] %v376_v45  ;;  %v590_v56 = vunpack.c.l.bf16 %v609_v46  ;;  %v591_v57 = vunpack.c.h.bf16 %v609_v46  ;;  %v594_v58 = vunpack.c.l.bf16 %v610_v47  ;;  %v595_v59 = vunpack.c.h.bf16 %v610_v47 }
  0x2a   : > { %409 = vst [vmem:[%s735_s27 + $0xa0] sm:$0xff] %v377_v48  ;;  %410 = vst [vmem:[%s735_s27 + $0xa8] sm:$0xff] %v378_v49  ;;  %v310_v60 = vmul.f32 %v582_v52, %v708_v0  ;;  %v311_v61 = vmul.f32 %v583_v53, %v708_v0  ;;  %v312_v62 = vmul.f32 %v586_v54, %v708_v0 }
  0x2b   : > { %411 = vst [vmem:[%s735_s27 + $0xb0] sm:$0xff] %v379_v50  ;;  %412 = vst [vmem:[%s735_s27 + $0xb8] sm:$0xff] %v380_v51  ;;  %v313_v63 = vmul.f32 %v587_v55, %v708_v0  ;;  %v314_v1 = vmul.f32 %v590_v56, %v708_v0  ;;  %v315_v2 = vmul.f32 %v591_v57, %v708_v0 }
  0x2c   : > { %v316_v3 = vmul.f32 %v594_v58, %v708_v0  ;;  %v317_v4 = vmul.f32 %v595_v59, %v708_v0  ;;  %v349_v5 = vadd.f32 %v717_v9, %v310_v60  ;;  %v350_v6 = vadd.f32 %v717_v9, %v311_v61 }
  0x2d   : > { %v351_v7 = vadd.f32 %v717_v9, %v312_v62  ;;  %v352_v8 = vadd.f32 %v717_v9, %v313_v63  ;;  %v353_v10 = vadd.f32 %v717_v9, %v314_v1  ;;  %v354_v11 = vadd.f32 %v717_v9, %v315_v2 }
  0x2e   : > { %v355_v0 = vadd.f32 %v717_v9, %v316_v3  ;;  %v356_v12 = vadd.f32 %v717_v9, %v317_v4  ;;  %v381_v13 = vmax.f32 %v349_v5, 0.0  ;;  %v382_v14 = vmax.f32 %v350_v6, 0.0 }
  0x2f   : > { %v383_v15 = vmax.f32 %v351_v7, 0.0  ;;  %v384_v16 = vmax.f32 %v352_v8, 0.0  ;;  %v385_v17 = vmax.f32 %v353_v10, 0.0  ;;  %v386_v18 = vmax.f32 %v354_v11, 0.0 }
  0x30   : > { %v387_v19 = vmax.f32 %v355_v0, 0.0  ;;  %v388_v20 = vmax.f32 %v356_v12, 0.0  ;;  %413 = vst [vmem:[%s735_s27 + $0xc0] sm:$0xff] %v381_v13  ;;  %414 = vst [vmem:[%s735_s27 + $0xc8] sm:$0xff] %v382_v14 }
  0x31   : > { %415 = vst [vmem:[%s735_s27 + $0xd0] sm:$0xff] %v383_v15  ;;  %416 = vst [vmem:[%s735_s27 + $0xd8] sm:$0xff] %v384_v16 }
  0x32   : > { %417 = vst [vmem:[%s735_s27 + $0xe0] sm:$0xff] %v385_v17  ;;  %418 = vst [vmem:[%s735_s27 + $0xe8] sm:$0xff] %v386_v18 }
  0x33   : > { %419 = vst [vmem:[%s735_s27 + $0xf0] sm:$0xff] %v387_v19  ;;  %420 = vst [vmem:[%s735_s27 + $0xf8] sm:$0xff] %v388_v20 }
  0x34 PF: > { %s13_s14 = sadd.s32 1, %s657_s14   ;;  %s846_s12 = smov %s653_s13 }
  0x35   : > { %p10_p5 = scmp.ge.s32.totalorder %s13_s14, 4   ;;  %s847_s13 = smov %s849_s15 }
  0x37   :  { %12 = sbr.rel (!%p10_p5) target bundleno = 2 (0x2), region = 62 }

// kernel: double_conv.5
= control target key start
LH: loop header
LB: loop body
LE: loop exit
PB: predicated region body
PF: predicated region fallthrough
CT: control target
= control target key end

     0   :  { %s1658_s15 = smov 0   ;;  %s1660_s16 = smov 0   ;;  %s2144_s0 = inlined_call_operand.vmem [shape: bf16[2,32,16,128], index: 0, kind: input, shape index: {}, may-alias: {0,1}]   ;;  %s2145_s1 = inlined_call_operand.vmem [shape: bf16[2,32,16,128], index: 1, kind: input, shape index: {}, may-alias: {0,1}]   ;;  %s2146_s2 = inlined_call_operand.vmem [shape: f32[1,128], index: 2, kind: input, shape index: {}]   ;;  %s2147_s3 = inlined_call_operand.vmem [shape: f32[1,128], index: 3, kind: input, shape index: {}]   ;;  %s2148_s4 = inlined_call_operand.vmem [shape: bf16[2,32,24,128], index: 4, kind: output, shape index: {}]  }
   0x1   :  { %s1662_s17 = smov 0   ;;  %s1664_s18 = smov 0  }
   0x2   :  { %s1666_s19 = smov 0  }
   0x3 LB: > { %s23_s20 = sadd.s32 1, %s1622_s17  ;;  %s26_s21 = sadd.s32 1, %s1626_s18  ;;  %s1630_s19 = sphi %s1666_s19, %s14_s19   ;;  %s1626_s18 = sphi %s1664_s18, %s2159_s18   ;;  %s1622_s17 = sphi %s1662_s17, %s2158_s17   ;;  %s1618_s16 = sphi %s1660_s16, %s2157_s16   ;;  %s1614_s15 = sphi %s1658_s15, %s2156_s15  }
   0x4   : > { %p24_p0 = scmp.ge.s32.totalorder %s23_s20, 2  ;;  %p1310_p1 = scmp.ge.s32.totalorder %s1630_s19, 1 }
   0x5   : > { %p216_p2 = scmp.lt.s32.totalorder %s1630_s19, 5 }
   0x6   : > { %s2161_s20 = smov (%p24_p0, %s23_s20), 0  ;;  %s2163_s21 = smov (!%p24_p0, %s26_s21), %s1626_s18 }
   0x7   : > { %p217_p3 = pnand %p1310_p1, %p216_p2  ;;  %p28_p4 = scmp.ge.s32.totalorder %s2163_s21, 2 }
   0x8   : > { %s1688_s22 = sshll.u32 (!%p217_p3), %s1614_s15, 4  ;;  %p269_p5 = scmp.lt.s32.totalorder (!%p217_p3), %s1618_s16, 1 }
   0x9   : > { %s2165_s21 = smov (%p28_p4, %s2163_s21), 0  ;;  %220 = sbr.rel (%p217_p3) target bundleno = 190 (0xbe), region = 36 }
   0xa   : > { %s1312_s27 = sadd.s32 (!%p217_p3), 4294967295, %s1688_s22  ;;  %p285_p6 = scmp.lt.s32.totalorder (!%p217_p3), %s1688_s22, 31 }
   0xb   : > { %p267_p7 = scmp.gt.s32.totalorder (!%p217_p3), %s1312_s27, 0  ;;  %p1313_p8 = scmp.lt.s32.totalorder (!%p217_p3), %s1312_s27, 31 }
   0xc   : > { %p356_p9 = scmp.ge.s32.totalorder (!%p217_p3), %s1688_s22, 1  ;;  %p357_p10 = scmp.le.s32.totalorder (!%p217_p3), %s1688_s22, 16 }
   0xe   : > { %v1693_v0 = vld [vmem:[%s2146_s2] sm:$0x1]  ;;  %s2167_s16 = smov (!%p269_p5, %s1618_s16), 1  ;;  %s2169_s27 = smov (!%p267_p7, %s1312_s27), 0  ;;  %v1632_v2 = vmov 0  }
   0xf   : > { %v1698_v1 = vld [vmem:[%s2147_s3] sm:$0x1]  ;;  %s1319_s28 = sshll.u32 %s2167_s16, 6  ;;  %s1550_s29 = smul.u32 96, %s2167_s16 }
  0x10   : > { %s2171_s27 = smov (!%p1313_p8, %s2169_s27), 31  ;;  %p1715_p11 = pnand %p357_p10, %p356_p9 }
  0x11   : > { %s286_s30 = scalar_select %p285_p6, %s1688_s22, 31 }
  0x12   : > { %s1318_s5 = sshll.u32 %s2171_s27, 1 }
  0x13   : > { %s275_s6 = sadd.s32 %s1319_s28, %s1318_s5  ;;  %s1322_s7 = sshll.u32 %s286_s30, 1 }
  0x14   : > { %s1320_s8 = sshll.u32 %s275_s6, 2  ;;  %s289_s9 = sadd.s32 %s1322_s7, %s1319_s28 }
  0x15   : > { %s1707_s12 = scalar_lea.vmem %s2144_s0, %s1320_s8  ;;  %s1324_s13 = sshll.u32 %s289_s9, 2 }
  0x16   : > { %s1712_s23 = scalar_lea.vmem %s2145_s1, %s1324_s13  ;;  %s1549_s16 = smul.u32 3, %s286_s30 }
  0x18   : > { %s300_s24 = sadd.s32 %s1550_s29, %s1549_s16 }
  0x19   : > { %s1326_s25 = sshll.u32 %s300_s24, 2 }
  0x1a   : > { %s1722_s5 = scalar_lea.vmem %s2148_s4, %s1326_s25 }
  0x1b   : > { %308 = vst [vmem:[%s1722_s5] sm:$0xf] %v1632_v2  ;;  %309 = vst [vmem:[%s1722_s5 + $0x4] sm:$0xf] %v1632_v2 }
  0x1c   : > { %310 = vst [vmem:[%s1722_s5 + $0x8] sm:$0xf] %v1632_v2  ;;  %311 = vst [vmem:[%s1722_s5 + $0xc] sm:$0xf] %v1632_v2 }
  0x1d   : > { %312 = vst [vmem:[%s1722_s5 + $0x10] sm:$0xf] %v1632_v2  ;;  %313 = vst [vmem:[%s1722_s5 + $0x14] sm:$0xf] %v1632_v2 }
  0x1e   : > { %314 = vst [vmem:[%s1722_s5 + $0x18] sm:$0xf] %v1632_v2  ;;  %315 = vst [vmem:[%s1722_s5 + $0x1c] sm:$0xf] %v1632_v2 }
  0x1f   : > { %316 = vst [vmem:[%s1722_s5 + $0x20] sm:$0xf] %v1632_v2  ;;  %317 = vst [vmem:[%s1722_s5 + $0x24] sm:$0xf] %v1632_v2 }
  0x20   : > { %318 = vst [vmem:[%s1722_s5 + $0x28] sm:$0xf] %v1632_v2  ;;  %319 = vst [vmem:[%s1722_s5 + $0x2c] sm:$0xf] %v1632_v2 }
  0x21   : > { %320 = vst [vmem:[%s1722_s5 + $0x30] sm:$0xf] %v1632_v2  ;;  %321 = vst [vmem:[%s1722_s5 + $0x34] sm:$0xf] %v1632_v2 }
  0x22   : > { %322 = vst [vmem:[%s1722_s5 + $0x38] sm:$0xf] %v1632_v2  ;;  %323 = vst [vmem:[%s1722_s5 + $0x3c] sm:$0xf] %v1632_v2 }
  0x23   : > { %324 = vst [vmem:[%s1722_s5 + $0x40] sm:$0xf] %v1632_v2  ;;  %325 = vst [vmem:[%s1722_s5 + $0x44] sm:$0xf] %v1632_v2 }
  0x24   : > { %326 = vst [vmem:[%s1722_s5 + $0x48] sm:$0xf] %v1632_v2  ;;  %327 = vst [vmem:[%s1722_s5 + $0x4c] sm:$0xf] %v1632_v2 }
  0x25   : > { %328 = vst [vmem:[%s1722_s5 + $0x50] sm:$0xf] %v1632_v2  ;;  %329 = vst [vmem:[%s1722_s5 + $0x54] sm:$0xf] %v1632_v2 }
  0x26   : > { %330 = vst [vmem:[%s1722_s5 + $0x58] sm:$0xf] %v1632_v2  ;;  %331 = vst [vmem:[%s1722_s5 + $0x5c] sm:$0xf] %v1632_v2 }
  0x27   : > { %332 = vst [vmem:[%s1722_s5 + $0x60] sm:$0xf] %v1632_v2  ;;  %333 = vst [vmem:[%s1722_s5 + $0x64] sm:$0xf] %v1632_v2 }
  0x28   : > { %334 = vst [vmem:[%s1722_s5 + $0x68] sm:$0xf] %v1632_v2  ;;  %335 = vst [vmem:[%s1722_s5 + $0x6c] sm:$0xf] %v1632_v2 }
  0x29   : > { %336 = vst [vmem:[%s1722_s5 + $0x70] sm:$0xf] %v1632_v2  ;;  %337 = vst [vmem:[%s1722_s5 + $0x74] sm:$0xf] %v1632_v2 }
  0x2a   : > { %338 = vst [vmem:[%s1722_s5 + $0x78] sm:$0xf] %v1632_v2  ;;  %339 = vst [vmem:[%s1722_s5 + $0x7c] sm:$0xf] %v1632_v2 }
  0x2b   : > { %340 = vst [vmem:[%s1722_s5 + $0x80] sm:$0xf] %v1632_v2  ;;  %341 = vst [vmem:[%s1722_s5 + $0x84] sm:$0xf] %v1632_v2 }
  0x2c   : > { %342 = vst [vmem:[%s1722_s5 + $0x88] sm:$0xf] %v1632_v2  ;;  %343 = vst [vmem:[%s1722_s5 + $0x8c] sm:$0xf] %v1632_v2 }
  0x2d   : > { %344 = vst [vmem:[%s1722_s5 + $0x90] sm:$0xf] %v1632_v2  ;;  %345 = vst [vmem:[%s1722_s5 + $0x94] sm:$0xf] %v1632_v2 }
  0x2e   : > { %346 = vst [vmem:[%s1722_s5 + $0x98] sm:$0xf] %v1632_v2  ;;  %347 = vst [vmem:[%s1722_s5 + $0x9c] sm:$0xf] %v1632_v2  ;;  %361 = sbr.rel (%p1715_p11) target bundleno = 76 (0x4c), region = 40 }
  0x2f   : > { %348 = vst [vmem:[%s1722_s5 + $0xa0] sm:$0xf] %v1632_v2  ;;  %349 = vst [vmem:[%s1722_s5 + $0xa4] sm:$0xf] %v1632_v2 }
  0x30   : > { %350 = vst [vmem:[%s1722_s5 + $0xa8] sm:$0xf] %v1632_v2  ;;  %351 = vst [vmem:[%s1722_s5 + $0xac] sm:$0xf] %v1632_v2 }
  0x31   : > { %352 = vst [vmem:[%s1722_s5 + $0xb0] sm:$0xf] %v1632_v2  ;;  %353 = vst [vmem:[%s1722_s5 + $0xb4] sm:$0xf] %v1632_v2 }
  0x32   : > { %354 = vst [vmem:[%s1722_s5 + $0xb8] sm:$0xf] %v1632_v2  ;;  %355 = vst [vmem:[%s1722_s5 + $0xbc] sm:$0xf] %v1632_v2 }
  0x33   : > { %v367_v3 = vlaneseq  ;;  %v1472_v4 = vld [vmem:[%s1707_s12] sm:$0xff]   ;;  %vm413_vm0 = vcmask 1043456   ;;  %vm414_vm1 = vsmask.f32 7938  ;;  %vm390_vm2 = vsmask.f32 256 }
  0x34   : > { %v1473_v6 = vunpack.c.l.bf16 %v1472_v4  ;;  %v1474_v8 = vunpack.c.h.bf16 %v1472_v4  ;;  %vm391_vm3 = vsmask.f32 4368  ;;  %vm420_vm4 = vcmask 1040384   ;;  %vm415_vm5 = vmand %vm413_vm0, %vm414_vm1  ;;  %v416_v25 = vld [vmem:[%s1722_s5] sm:$0xf] }
  0x35   : > { %v368_v5 = vshrl.u32 %v367_v3, 7  ;;  %vm392_vm6 = vmor %vm390_vm2, %vm391_vm3  ;;  %v422_v26 = vld [vmem:[%s1722_s5 + $0x8] sm:$0x1] }
  0x36   : > { %vm421_vm7 = vmand %vm420_vm4, %vm390_vm2 }
  0x37   : > { %v369_v7 = vsub.s32 0, %v368_v5 }
  0x39   : > { %v370_v9 = vrot.slane %v1693_v0, %v369_v7  ;;  %v378_v10 = vrot.slane %v1698_v1, %v369_v7 }
  0x3b   : > { %v372_v11 = vmul.f32 %v1473_v6, %v370_v9  ;;  %v373_v12 = vmul.f32 %v1474_v8, %v370_v9 }
  0x3d   : > { %v380_v13 = vadd.f32 %v378_v10, %v372_v11  ;;  %v381_v14 = vadd.f32 %v378_v10, %v373_v12 }
  0x3f   : > { %v382_v15 = vmax.f32 %v380_v13, 0.0  ;;  %v383_v16 = vmax.f32 %v381_v14, 0.0 }
  0x41   : > { %v1439_v17 = vpack.c.bf16 %v382_v15, %v382_v15  ;;  %v1440_v18 = vpack.c.bf16 %v383_v16, %v383_v16 }
  0x43   : > { %v394_v19 = vshrl.u32 %v1439_v17, 16  ;;  %v397_v20 = vshll.u32 %v1439_v17, 16  ;;  %v402_v21 = vshrl.u32 %v1440_v18, 16  ;;  %v405_v22 = vshll.u32 %v1440_v18, 16 }
  0x45   : > { %v396_v23 = vrot.slane %v394_v19, 7  ;;  %v404_v24 = vrot.slane %v402_v21, 7 }
  0x47   : > { %v399_v27 = vor.u32 %v397_v20, %v396_v23  ;;  %v400_v28 = vrot.slane %v396_v23, 4  ;;  %v407_v29 = vor.u32 %v405_v22, %v404_v24  ;;  %v409_v30 = vrot.slane %v404_v24, 4 }
  0x49   : > { %v417_v31 = vsel %vm415_vm5, %v399_v27, %v416_v25  ;;  %v408_v32 = vsel %vm392_vm6, %v400_v28, %v407_v29  ;;  %v423_v33 = vsel %vm421_vm7, %v409_v30, %v422_v26 }
  0x4a   : > { %418 = vst [vmem:[%s1722_s5] sm:$0xf] %v417_v31  ;;  %419 = vst [vmem:[%s1722_s5 + $0x4] sm:$0xf] %v408_v32 }
  0x4b   : > { %424 = vst [vmem:[%s1722_s5 + $0x8] sm:$0x1] %v423_v33 }
  0x4c PF: > { %v1476_v34 = vld [vmem:[%s1712_s23] sm:$0xff]   ;;  %v486_v35 = vlaneseq  ;;  %v1784_v36 = vstv %s1688_s22  ;;  %v1535_v38 = vld [vmem:[%s1712_s23 + $0x8] sm:$0xff]   ;;  %v1536_v44 = vld [vmem:[%s1712_s23 + $0x10] sm:$0xff]   ;;  %vm1072_vm12 = vcmask 1043456   ;;  %vm1073_vm13 = vsmask.f32 7938 }
  0x4d   : > { %v588_v37 = vadd.s32 1, %v1784_v36  ;;  %v1477_v39 = vunpack.c.l.bf16 %v1476_v34  ;;  %v1478_v41 = vunpack.c.h.bf16 %v1476_v34  ;;  %v1481_v42 = vunpack.c.l.bf16 %v1535_v38  ;;  %v1537_v51 = vld [vmem:[%s1712_s23 + $0x18] sm:$0xff]   ;;  %v1794_v52 = vld [vmem:[%s1712_s23 + $0x20] sm:$0xff]   ;;  %vm1833_vm1 = vmand %vm1072_vm12, %vm1073_vm13 }
  0x4e   : > { %v487_v40 = vshrl.u32 %v486_v35, 7  ;;  %v589_v43 = vadd.s32 2, %v1784_v36  ;;  %v590_v45 = vadd.s32 3, %v1784_v36  ;;  %v1482_v47 = vunpack.c.h.bf16 %v1535_v38 }
  0x4f   : > { %vm603_vm8 = vcmp.le.s32.totalorder %v588_v37, 16  ;;  %v591_v48 = vadd.s32 4, %v1784_v36  ;;  %v1485_v49 = vunpack.c.l.bf16 %v1536_v44  ;;  %v1486_v50 = vunpack.c.h.bf16 %v1536_v44 }
  0x50   : > { %v488_v46 = vsub.s32 0, %v487_v40  ;;  %vm604_vm9 = vcmp.le.s32.totalorder %v589_v43, 16  ;;  %vm605_vm10 = vcmp.le.s32.totalorder %v590_v45, 16  ;;  %v1489_v55 = vunpack.c.l.bf16 %v1537_v51 }
  0x51   : > { %vm606_vm11 = vcmp.le.s32.totalorder %v591_v48, 16  ;;  %v1490_v56 = vunpack.c.h.bf16 %v1537_v51  ;;  %v1493_v57 = vunpack.c.l.bf16 %v1794_v52  ;;  %v1804_v58 = vadd.s32 5, %v1784_v36 }
  0x52   : > { %v1797_v53 = vrot.slane %v1693_v0, %v488_v46  ;;  %v1800_v54 = vrot.slane %v1698_v1, %v488_v46  ;;  %v1494_v59 = vunpack.c.h.bf16 %v1794_v52  ;;  %vm768_vm14 = vsmask.f32 256 }
  0x53   : > { %vm769_vm15 = vsmask.f32 4368  ;;  %vm1079_vm0 = vcmask 1040384   ;;  %vm607_vm4 = vcmp.le.s32.totalorder %v1804_v58, 16 }
  0x54   : > { %v491_v60 = vmul.f32 %v1477_v39, %v1797_v53  ;;  %v492_v61 = vmul.f32 %v1478_v41, %v1797_v53  ;;  %v493_v62 = vmul.f32 %v1481_v42, %v1797_v53  ;;  %v494_v63 = vmul.f32 %v1482_v47, %v1797_v53  ;;  %vm1839_vm2 = vmor %vm768_vm14, %vm769_vm15  ;;  %v1360_v47 = vld [vmem:[%s1722_s5 + $0xc] sm:$0xf] }
  0x55   : > { %v495_v0 = vmul.f32 %v1485_v49, %v1797_v53  ;;  %v496_v1 = vmul.f32 %v1486_v50, %v1797_v53  ;;  %v497_v2 = vmul.f32 %v1489_v55, %v1797_v53  ;;  %v498_v3 = vmul.f32 %v1490_v56, %v1797_v53  ;;  %vm1846_vm3 = vmand %vm1079_vm0, %vm768_vm14  ;;  %v1363_v49 = vld [vmem:[%s1722_s5 + $0x14] sm:$0x1] }
  0x56   : > { %v527_v4 = vadd.f32 %v1800_v54, %v491_v60  ;;  %v528_v5 = vadd.f32 %v1800_v54, %v492_v61  ;;  %v529_v6 = vadd.f32 %v1800_v54, %v493_v62  ;;  %v530_v7 = vadd.f32 %v1800_v54, %v494_v63 }
  0x57   : > { %v531_v8 = vadd.f32 %v1800_v54, %v495_v0  ;;  %v532_v9 = vadd.f32 %v1800_v54, %v496_v1  ;;  %v533_v10 = vadd.f32 %v1800_v54, %v497_v2  ;;  %v534_v11 = vadd.f32 %v1800_v54, %v498_v3  ;;  %v1365_v0 = vld [vmem:[%s1722_s5 + $0x18] sm:$0xf]  ;;  %v1368_v1 = vld [vmem:[%s1722_s5 + $0x20] sm:$0x1] }
  0x58   : > { %v557_v12 = vmax.f32 %v527_v4, 0.0  ;;  %v558_v13 = vmax.f32 %v528_v5, 0.0  ;;  %v559_v14 = vmax.f32 %v529_v6, 0.0  ;;  %v560_v15 = vmax.f32 %v530_v7, 0.0 }
  0x59   : > { %v561_v16 = vmax.f32 %v531_v8, 0.0  ;;  %v562_v17 = vmax.f32 %v532_v9, 0.0  ;;  %v563_v18 = vmax.f32 %v533_v10, 0.0  ;;  %v564_v19 = vmax.f32 %v534_v11, 0.0 }
  0x5a   : > { %v648_v20 = vsel %vm603_vm8, %v557_v12, 0.0  ;;  %v649_v21 = vsel %vm603_vm8, %v558_v13, 0.0  ;;  %v650_v22 = vsel %vm604_vm9, %v559_v14, 0.0  ;;  %v651_v23 = vsel %vm604_vm9, %v560_v15, 0.0 }
  0x5b   : > { %v1441_v24 = vpack.c.bf16 %v648_v20, %v648_v20  ;;  %v1442_v25 = vpack.c.bf16 %v649_v21, %v649_v21  ;;  %v1443_v26 = vpack.c.bf16 %v650_v22, %v650_v22  ;;  %v1444_v27 = vpack.c.bf16 %v651_v23, %v651_v23 }
  0x5c   : > { %v652_v28 = vsel %vm605_vm10, %v561_v16, 0.0  ;;  %v653_v29 = vsel %vm605_vm10, %v562_v17, 0.0  ;;  %v654_v30 = vsel %vm606_vm11, %v563_v18, 0.0  ;;  %v655_v31 = vsel %vm606_vm11, %v564_v19, 0.0  ;;  %v1370_v18 = vld [vmem:[%s1722_s5 + $0x24] sm:$0xf] }
  0x5d   : > { %v772_v32 = vshrl.u32 %v1441_v24, 16  ;;  %v775_v33 = vshll.u32 %v1441_v24, 16  ;;  %v780_v34 = vshrl.u32 %v1442_v25, 16  ;;  %v783_v35 = vshll.u32 %v1442_v25, 16 }
  0x5e   : > { %v789_v38 = vshrl.u32 %v1443_v26, 16  ;;  %v792_v39 = vshll.u32 %v1443_v26, 16  ;;  %v797_v40 = vshrl.u32 %v1444_v27, 16  ;;  %v800_v41 = vshll.u32 %v1444_v27, 16  ;;  %v1373_v27 = vld [vmem:[%s1722_s5 + $0x2c] sm:$0x1] }
  0x5f   : > { %v774_v42 = vrot.slane %v772_v32, 7  ;;  %v782_v44 = vrot.slane %v780_v34, 7  ;;  %v1445_v45 = vpack.c.bf16 %v652_v28, %v652_v28  ;;  %v1446_v46 = vpack.c.bf16 %v653_v29, %v653_v29  ;;  %v1375_v28 = vld [vmem:[%s1722_s5 + $0x30] sm:$0xf] }
  0x60   : > { %v791_v50 = vrot.slane %v789_v38, 7  ;;  %v799_v51 = vrot.slane %v797_v40, 7  ;;  %v1447_v55 = vpack.c.bf16 %v654_v30, %v654_v30  ;;  %v1448_v56 = vpack.c.bf16 %v655_v31, %v655_v31  ;;  %v1539_v38 = vld [vmem:[%s1712_s23 + $0x28] sm:$0xff]  }
  0x61   : > { %v777_v60 = vor.u32 %v775_v33, %v774_v42  ;;  %v778_v61 = vrot.slane %v774_v42, 4  ;;  %v785_v62 = vor.u32 %v783_v35, %v782_v44  ;;  %v787_v63 = vrot.slane %v782_v44, 4  ;;  %v1378_v35 = vld [vmem:[%s1722_s5 + $0x38] sm:$0x1] }
  0x62   : > { %v794_v2 = vor.u32 %v792_v39, %v791_v50  ;;  %v795_v3 = vrot.slane %v791_v50, 4  ;;  %v802_v4 = vor.u32 %v800_v41, %v799_v51  ;;  %v804_v5 = vrot.slane %v799_v51, 4 }
  0x63   : > { %v1076_v6 = vsel %vm1833_vm1, %v777_v60, %v1360_v47  ;;  %v786_v7 = vsel %vm1839_vm2, %v778_v61, %v785_v62  ;;  %v1082_v8 = vsel %vm1846_vm3, %v787_v63, %v1363_v49  ;;  %v806_v9 = vshrl.u32 %v1445_v45, 16 }
  0x64   : > { %1361 = vst [vmem:[%s1722_s5 + $0xc] sm:$0xf] %v1076_v6  ;;  %1362 = vst [vmem:[%s1722_s5 + $0x10] sm:$0xf] %v786_v7  ;;  %v1085_v10 = vsel %vm1833_vm1, %v794_v2, %v1365_v0  ;;  %v803_v11 = vsel %vm1839_vm2, %v795_v3, %v802_v4  ;;  %v1089_v12 = vsel %vm1846_vm3, %v804_v5, %v1368_v1  ;;  %v809_v13 = vshll.u32 %v1445_v45, 16  ;;  %v1910_v2 = vld [vmem:[%s1712_s23 + $0x38] sm:$0xff]  }
  0x65   : > { %1364 = vst [vmem:[%s1722_s5 + $0x14] sm:$0x1] %v1082_v8  ;;  %1366 = vst [vmem:[%s1722_s5 + $0x18] sm:$0xf] %v1085_v10  ;;  %v808_v14 = vrot.slane %v806_v9, 7  ;;  %v814_v15 = vshrl.u32 %v1446_v46, 16  ;;  %v499_v22 = vmul.f32 %v1493_v57, %v1797_v53  ;;  %v500_v31 = vmul.f32 %v1494_v59, %v1797_v53 }
  0x66   : > { %1367 = vst [vmem:[%s1722_s5 + $0x1c] sm:$0xf] %v803_v11  ;;  %1369 = vst [vmem:[%s1722_s5 + $0x20] sm:$0x1] %v1089_v12  ;;  %v817_v16 = vshll.u32 %v1446_v46, 16  ;;  %v823_v17 = vshrl.u32 %v1447_v55, 16  ;;  %v1497_v51 = vunpack.c.l.bf16 %v1539_v38  ;;  %v1498_v61 = vunpack.c.h.bf16 %v1539_v38 }
  0x67   : > { %v826_v19 = vshll.u32 %v1447_v55, 16  ;;  %v831_v20 = vshrl.u32 %v1448_v56, 16  ;;  %v834_v21 = vshll.u32 %v1448_v56, 16  ;;  %v811_v23 = vor.u32 %v809_v13, %v808_v14  ;;  %v1540_v46 = vld [vmem:[%s1712_s23 + $0x30] sm:$0xff]   ;;  %v1380_v13 = vld [vmem:[%s1722_s5 + $0x3c] sm:$0xf] }
  0x68   : > { %v812_v24 = vrot.slane %v808_v14, 4  ;;  %v816_v25 = vrot.slane %v814_v15, 7  ;;  %v825_v26 = vrot.slane %v823_v17, 7  ;;  %v535_v30 = vadd.f32 %v1800_v54, %v499_v22 }
  0x69   : > { %v833_v29 = vrot.slane %v831_v20, 7  ;;  %v1092_v57 = vsel %vm1833_vm1, %v811_v23, %v1370_v18  ;;  %v536_v45 = vadd.f32 %v1800_v54, %v500_v31  ;;  %v593_v60 = vadd.s32 6, %v1784_v36 }
  0x6a   : > { %v819_v32 = vor.u32 %v817_v16, %v816_v25  ;;  %v821_v33 = vrot.slane %v816_v25, 4  ;;  %v828_v34 = vor.u32 %v826_v19, %v825_v26  ;;  %1371 = vst [vmem:[%s1722_s5 + $0x24] sm:$0xf] %v1092_v57  ;;  %v829_v39 = vrot.slane %v825_v26, 4  ;;  %v1383_v26 = vld [vmem:[%s1722_s5 + $0x44] sm:$0x1] }
  0x6b   : > { %v836_v40 = vor.u32 %v834_v21, %v833_v29  ;;  %v838_v41 = vrot.slane %v833_v29, 4  ;;  %v565_v52 = vmax.f32 %v535_v30, 0.0  ;;  %v566_v56 = vmax.f32 %v536_v45, 0.0 }
  0x6c   : > { %v820_v59 = vsel %vm1839_vm2, %v812_v24, %v819_v32  ;;  %v1096_v42 = vsel %vm1846_vm3, %v821_v33, %v1373_v27  ;;  %v1099_v44 = vsel %vm1833_vm1, %v828_v34, %v1375_v28  ;;  %v501_v62 = vmul.f32 %v1497_v51, %v1797_v53 }
  0x6d   : > { %1372 = vst [vmem:[%s1722_s5 + $0x28] sm:$0xf] %v820_v59  ;;  %1374 = vst [vmem:[%s1722_s5 + $0x2c] sm:$0x1] %v1096_v42  ;;  %v837_v47 = vsel %vm1839_vm2, %v829_v39, %v836_v40  ;;  %v1103_v49 = vsel %vm1846_vm3, %v838_v41, %v1378_v35  ;;  %v656_v50 = vsel %vm607_vm4, %v565_v52, 0.0  ;;  %v1501_v63 = vunpack.c.l.bf16 %v1540_v46 }
  0x6e   : > { %1376 = vst [vmem:[%s1722_s5 + $0x30] sm:$0xf] %v1099_v44  ;;  %1377 = vst [vmem:[%s1722_s5 + $0x34] sm:$0xf] %v837_v47  ;;  %v1449_v55 = vpack.c.bf16 %v656_v50, %v656_v50  ;;  %v594_v0 = vadd.s32 7, %v1784_v36  ;;  %v1502_v1 = vunpack.c.h.bf16 %v1540_v46  ;;  %v657_v5 = vsel %vm607_vm4, %v566_v56, 0.0 }
  0x6f   : > { %1379 = vst [vmem:[%s1722_s5 + $0x38] sm:$0x1] %v1103_v49  ;;  %vm608_vm5 = vcmp.le.s32.totalorder %v593_v60, 16  ;;  %v1450_v6 = vpack.c.bf16 %v657_v5, %v657_v5  ;;  %v537_v7 = vadd.f32 %v1800_v54, %v501_v62  ;;  %v502_v8 = vmul.f32 %v1498_v61, %v1797_v53  ;;  %v1385_v46 = vld [vmem:[%s1722_s5 + $0x48] sm:$0xf] }
  0x70   : > { %v840_v3 = vshrl.u32 %v1449_v55, 16  ;;  %v843_v4 = vshll.u32 %v1449_v55, 16  ;;  %v503_v9 = vmul.f32 %v1501_v63, %v1797_v53  ;;  %vm609_vm6 = vcmp.le.s32.totalorder %v594_v0, 16  ;;  %v1388_v62 = vld [vmem:[%s1722_s5 + $0x50] sm:$0x1] }
  0x71   : > { %v504_v11 = vmul.f32 %v1502_v1, %v1797_v53  ;;  %v1505_v12 = vunpack.c.l.bf16 %v1910_v2  ;;  %v848_v14 = vshrl.u32 %v1450_v6, 16  ;;  %v851_v15 = vshll.u32 %v1450_v6, 16  ;;  %v1390_v6 = vld [vmem:[%s1722_s5 + $0x54] sm:$0xf] }
  0x72   : > { %v842_v10 = vrot.slane %v840_v3, 7  ;;  %v567_v58 = vmax.f32 %v537_v7, 0.0  ;;  %v538_v16 = vadd.f32 %v1800_v54, %v502_v8  ;;  %v539_v19 = vadd.f32 %v1800_v54, %v503_v9  ;;  %v1542_v8 = vld [vmem:[%s1712_s23 + $0x40] sm:$0xff]  }
  0x73   : > { %v540_v20 = vadd.f32 %v1800_v54, %v504_v11  ;;  %v850_v21 = vrot.slane %v848_v14, 7  ;;  %v505_v24 = vmul.f32 %v1505_v12, %v1797_v53  ;;  %v595_v51 = vadd.s32 8, %v1784_v36  ;;  %v1393_v11 = vld [vmem:[%s1722_s5 + $0x5c] sm:$0x1] }
  0x74   : > { %v845_v17 = vor.u32 %v843_v4, %v842_v10  ;;  %v846_v18 = vrot.slane %v842_v10, 4  ;;  %v658_v22 = vsel %vm608_vm5, %v567_v58, 0.0  ;;  %v568_v23 = vmax.f32 %v538_v16, 0.0 }
  0x75   : > { %v1451_v27 = vpack.c.bf16 %v658_v22, %v658_v22  ;;  %v569_v28 = vmax.f32 %v539_v19, 0.0  ;;  %v570_v29 = vmax.f32 %v540_v20, 0.0  ;;  %v853_v30 = vor.u32 %v851_v15, %v850_v21  ;;  %v1543_v20 = vld [vmem:[%s1712_s23 + $0x48] sm:$0xff]  }
  0x76   : > { %v1106_v25 = vsel %vm1833_vm1, %v845_v17, %v1380_v13  ;;  %v855_v31 = vrot.slane %v850_v21, 4  ;;  %v659_v57 = vsel %vm608_vm5, %v568_v23, 0.0  ;;  %v541_v32 = vadd.f32 %v1800_v54, %v505_v24 }
  0x77   : > { %1381 = vst [vmem:[%s1722_s5 + $0x3c] sm:$0xf] %v1106_v25  ;;  %v857_v33 = vshrl.u32 %v1451_v27, 16  ;;  %v860_v34 = vshll.u32 %v1451_v27, 16  ;;  %v1452_v35 = vpack.c.bf16 %v659_v57, %v659_v57  ;;  %v660_v38 = vsel %vm609_vm6, %v569_v28, 0.0 }
  0x78   : > { %v854_v39 = vsel %vm1839_vm2, %v846_v18, %v853_v30  ;;  %v1110_v40 = vsel %vm1846_vm3, %v855_v31, %v1383_v26  ;;  %v1453_v41 = vpack.c.bf16 %v660_v38, %v660_v38  ;;  %v661_v52 = vsel %vm609_vm6, %v570_v29, 0.0 }
  0x79   : > { %1382 = vst [vmem:[%s1722_s5 + $0x40] sm:$0xf] %v854_v39  ;;  %1384 = vst [vmem:[%s1722_s5 + $0x44] sm:$0x1] %v1110_v40  ;;  %v859_v59 = vrot.slane %v857_v33, 7  ;;  %v865_v42 = vshrl.u32 %v1452_v35, 16  ;;  %v1454_v45 = vpack.c.bf16 %v661_v52, %v661_v52  ;;  %v1506_v1 = vunpack.c.h.bf16 %v1910_v2 }
  0x7a   : > { %v868_v44 = vshll.u32 %v1452_v35, 16  ;;  %v874_v47 = vshrl.u32 %v1453_v41, 16  ;;  %v877_v49 = vshll.u32 %v1453_v41, 16  ;;  %v571_v50 = vmax.f32 %v541_v32, 0.0  ;;  %v1395_v35 = vld [vmem:[%s1722_s5 + $0x60] sm:$0xf] }
  0x7b   : > { %v862_v55 = vor.u32 %v860_v34, %v859_v59  ;;  %v863_v56 = vrot.slane %v859_v59, 4  ;;  %v867_v60 = vrot.slane %v865_v42, 7  ;;  %v882_v61 = vshrl.u32 %v1454_v45, 16  ;;  %v1978_v41 = vld [vmem:[%s1712_s23 + $0x50] sm:$0xff]  }
  0x7c   : > { %v876_v63 = vrot.slane %v874_v47, 7  ;;  %v885_v0 = vshll.u32 %v1454_v45, 16  ;;  %vm610_vm7 = vcmp.le.s32.totalorder %v595_v51, 16  ;;  %v506_v2 = vmul.f32 %v1506_v1, %v1797_v53 }
  0x7d   : > { %v1113_v3 = vsel %vm1833_vm1, %v862_v55, %v1385_v46  ;;  %v870_v4 = vor.u32 %v868_v44, %v867_v60  ;;  %v872_v5 = vrot.slane %v867_v60, 4  ;;  %v884_v7 = vrot.slane %v882_v61, 7 }
  0x7e   : > { %1386 = vst [vmem:[%s1722_s5 + $0x48] sm:$0xf] %v1113_v3  ;;  %v879_v9 = vor.u32 %v877_v49, %v876_v63  ;;  %v880_v10 = vrot.slane %v876_v63, 4  ;;  %v662_v12 = vsel %vm610_vm7, %v571_v50, 0.0  ;;  %v542_v18 = vadd.f32 %v1800_v54, %v506_v2 }
  0x7f   : > { %v871_v13 = vsel %vm1839_vm2, %v863_v56, %v870_v4  ;;  %v1117_v14 = vsel %vm1846_vm3, %v872_v5, %v1388_v62  ;;  %v887_v15 = vor.u32 %v885_v0, %v884_v7  ;;  %v889_v58 = vrot.slane %v884_v7, 4  ;;  %v1398_v0 = vld [vmem:[%s1722_s5 + $0x68] sm:$0x1] }
  0x80   : > { %1387 = vst [vmem:[%s1722_s5 + $0x4c] sm:$0xf] %v871_v13  ;;  %1389 = vst [vmem:[%s1722_s5 + $0x50] sm:$0x1] %v1117_v14  ;;  %v1120_v16 = vsel %vm1833_vm1, %v879_v9, %v1390_v6  ;;  %v1455_v17 = vpack.c.bf16 %v662_v12, %v662_v12  ;;  %v1509_v19 = vunpack.c.l.bf16 %v1542_v8  ;;  %v596_v23 = vadd.s32 9, %v1784_v36 }
  0x81   : > { %1391 = vst [vmem:[%s1722_s5 + $0x54] sm:$0xf] %v1120_v16  ;;  %v888_v21 = vsel %vm1839_vm2, %v880_v10, %v887_v15  ;;  %v1124_v22 = vsel %vm1846_vm3, %v889_v58, %v1393_v11  ;;  %v1510_v24 = vunpack.c.h.bf16 %v1542_v8  ;;  %v572_v27 = vmax.f32 %v542_v18, 0.0  ;;  %v1400_v16 = vld [vmem:[%s1722_s5 + $0x6c] sm:$0xf] }
  0x82   : > { %1392 = vst [vmem:[%s1722_s5 + $0x58] sm:$0xf] %v888_v21  ;;  %1394 = vst [vmem:[%s1722_s5 + $0x5c] sm:$0x1] %v1124_v22  ;;  %v891_v25 = vshrl.u32 %v1455_v17, 16  ;;  %v894_v26 = vshll.u32 %v1455_v17, 16  ;;  %v507_v28 = vmul.f32 %v1509_v19, %v1797_v53  ;;  %v1513_v30 = vunpack.c.l.bf16 %v1543_v20 }
  0x83   : > { %vm611_vm8 = vcmp.le.s32.totalorder %v596_v23, 16  ;;  %v508_v29 = vmul.f32 %v1510_v24, %v1797_v53  ;;  %v597_v31 = vadd.s32 10, %v1784_v36  ;;  %v663_v32 = vsel %vm610_vm7, %v572_v27, 0.0  ;;  %v1403_v22 = vld [vmem:[%s1722_s5 + $0x74] sm:$0x1] }
  0x84   : > { %v893_v57 = vrot.slane %v891_v25, 7  ;;  %v543_v33 = vadd.f32 %v1800_v54, %v507_v28  ;;  %v1514_v34 = vunpack.c.h.bf16 %v1543_v20  ;;  %v1456_v38 = vpack.c.bf16 %v663_v32, %v663_v32  ;;  %v1545_v25 = vld [vmem:[%s1712_s23 + $0x58] sm:$0xff]  }
  0x85   : > { %v544_v39 = vadd.f32 %v1800_v54, %v508_v29  ;;  %v509_v40 = vmul.f32 %v1513_v30, %v1797_v53  ;;  %vm612_vm9 = vcmp.le.s32.totalorder %v597_v31, 16  ;;  %v1517_v56 = vunpack.c.l.bf16 %v1978_v41 }
  0x86   : > { %v896_v52 = vor.u32 %v894_v26, %v893_v57  ;;  %v897_v59 = vrot.slane %v893_v57, 4  ;;  %v573_v42 = vmax.f32 %v543_v33, 0.0  ;;  %v510_v44 = vmul.f32 %v1514_v34, %v1797_v53 }
  0x87   : > { %v899_v45 = vshrl.u32 %v1456_v38, 16  ;;  %v902_v46 = vshll.u32 %v1456_v38, 16  ;;  %v574_v47 = vmax.f32 %v544_v39, 0.0  ;;  %v545_v49 = vadd.f32 %v1800_v54, %v509_v40 }
  0x88   : > { %v1127_v50 = vsel %vm1833_vm1, %v896_v52, %v1395_v35  ;;  %v664_v51 = vsel %vm611_vm8, %v573_v42, 0.0  ;;  %v546_v55 = vadd.f32 %v1800_v54, %v510_v44  ;;  %v511_v4 = vmul.f32 %v1517_v56, %v1797_v53  ;;  %v1405_v35 = vld [vmem:[%s1722_s5 + $0x78] sm:$0xf]  ;;  %v1546_v56 = vld [vmem:[%s1712_s23 + $0x60] sm:$0xff]  }
  0x89   : > { %1396 = vst [vmem:[%s1722_s5 + $0x60] sm:$0xf] %v1127_v50  ;;  %v901_v60 = vrot.slane %v899_v45, 7  ;;  %v1457_v61 = vpack.c.bf16 %v664_v51, %v664_v51  ;;  %v665_v62 = vsel %vm611_vm8, %v574_v47, 0.0  ;;  %v575_v63 = vmax.f32 %v545_v49, 0.0 }
  0x8a   : > { %v1458_v1 = vpack.c.bf16 %v665_v62, %v665_v62  ;;  %v576_v3 = vmax.f32 %v546_v55, 0.0  ;;  %v1992_v5 = vadd.s32 11, %v1784_v36  ;;  %v547_v19 = vadd.f32 %v1800_v54, %v511_v4 }
  0x8b   : > { %v904_v6 = vor.u32 %v902_v46, %v901_v60  ;;  %v906_v7 = vrot.slane %v901_v60, 4  ;;  %v908_v8 = vshrl.u32 %v1457_v61, 16  ;;  %v911_v9 = vshll.u32 %v1457_v61, 16 }
  0x8c   : > { %v916_v10 = vshrl.u32 %v1458_v1, 16  ;;  %v919_v11 = vshll.u32 %v1458_v1, 16  ;;  %v666_v12 = vsel %vm612_vm9, %v575_v63, 0.0  ;;  %v667_v2 = vsel %vm612_vm9, %v576_v3, 0.0 }
  0x8d   : > { %v905_v13 = vsel %vm1839_vm2, %v897_v59, %v904_v6  ;;  %v1131_v14 = vsel %vm1846_vm3, %v906_v7, %v1398_v0  ;;  %v910_v15 = vrot.slane %v908_v8, 7  ;;  %v1459_v58 = vpack.c.bf16 %v666_v12, %v666_v12  ;;  %v1408_v59 = vld [vmem:[%s1722_s5 + $0x80] sm:$0x1]  ;;  %v2034_v0 = vld [vmem:[%s1712_s23 + $0x68] sm:$0xff]  }
  0x8e   : > { %1397 = vst [vmem:[%s1722_s5 + $0x64] sm:$0xf] %v905_v13  ;;  %1399 = vst [vmem:[%s1722_s5 + $0x68] sm:$0x1] %v1131_v14  ;;  %v918_v17 = vrot.slane %v916_v10, 7  ;;  %v1460_v18 = vpack.c.bf16 %v667_v2, %v667_v2  ;;  %vm613_vm10 = vcmp.le.s32.totalorder %v1992_v5, 16  ;;  %v1518_v32 = vunpack.c.h.bf16 %v1978_v41 }
  0x8f   : > { %v913_v20 = vor.u32 %v911_v9, %v910_v15  ;;  %v914_v21 = vrot.slane %v910_v15, 4  ;;  %v925_v23 = vshrl.u32 %v1459_v58, 16  ;;  %v928_v24 = vshll.u32 %v1459_v58, 16  ;;  %v1410_v10 = vld [vmem:[%s1722_s5 + $0x84] sm:$0xf] }
  0x90   : > { %v921_v26 = vor.u32 %v919_v11, %v918_v17  ;;  %v923_v27 = vrot.slane %v918_v17, 4  ;;  %v933_v28 = vshrl.u32 %v1460_v18, 16  ;;  %v936_v29 = vshll.u32 %v1460_v18, 16 }
  0x91   : > { %v1134_v30 = vsel %vm1833_vm1, %v913_v20, %v1400_v16  ;;  %v927_v31 = vrot.slane %v925_v23, 7  ;;  %v577_v57 = vmax.f32 %v547_v19, 0.0  ;;  %v1521_v39 = vunpack.c.l.bf16 %v1545_v25 }
  0x92   : > { %1401 = vst [vmem:[%s1722_s5 + $0x6c] sm:$0xf] %v1134_v30  ;;  %v922_v33 = vsel %vm1839_vm2, %v914_v21, %v921_v26  ;;  %v1138_v34 = vsel %vm1846_vm3, %v923_v27, %v1403_v22  ;;  %v935_v38 = vrot.slane %v933_v28, 7  ;;  %v512_v42 = vmul.f32 %v1518_v32, %v1797_v53 }
  0x93   : > { %1402 = vst [vmem:[%s1722_s5 + $0x70] sm:$0xf] %v922_v33  ;;  %1404 = vst [vmem:[%s1722_s5 + $0x74] sm:$0x1] %v1138_v34  ;;  %v930_v40 = vor.u32 %v928_v24, %v927_v31  ;;  %v931_v52 = vrot.slane %v927_v31, 4  ;;  %v668_v41 = vsel %vm613_vm10, %v577_v57, 0.0  ;;  %v513_v47 = vmul.f32 %v1521_v39, %v1797_v53 }
  0x94   : > { %v938_v44 = vor.u32 %v936_v29, %v935_v38  ;;  %v940_v45 = vrot.slane %v935_v38, 4  ;;  %v1461_v46 = vpack.c.bf16 %v668_v41, %v668_v41  ;;  %v548_v50 = vadd.f32 %v1800_v54, %v512_v42  ;;  %v1413_v31 = vld [vmem:[%s1722_s5 + $0x8c] sm:$0x1] }
  0x95   : > { %v1141_v49 = vsel %vm1833_vm1, %v930_v40, %v1405_v35  ;;  %v599_v51 = vadd.s32 12, %v1784_v36  ;;  %v1522_v55 = vunpack.c.h.bf16 %v1545_v25  ;;  %v549_v3 = vadd.f32 %v1800_v54, %v513_v47  ;;  %v1415_v40 = vld [vmem:[%s1722_s5 + $0x90] sm:$0xf] }
  0x96   : > { %1406 = vst [vmem:[%s1722_s5 + $0x78] sm:$0xf] %v1141_v49  ;;  %v939_v60 = vsel %vm1839_vm2, %v931_v52, %v938_v44  ;;  %v1145_v61 = vsel %vm1846_vm3, %v940_v45, %v1408_v59  ;;  %v942_v62 = vshrl.u32 %v1461_v46, 16  ;;  %v945_v63 = vshll.u32 %v1461_v46, 16  ;;  %v1548_v45 = vld [vmem:[%s1712_s23 + $0x70] sm:$0xff]  }
  0x97   : > { %1407 = vst [vmem:[%s1722_s5 + $0x7c] sm:$0xf] %v939_v60  ;;  %1409 = vst [vmem:[%s1722_s5 + $0x80] sm:$0x1] %v1145_v61  ;;  %v578_v1 = vmax.f32 %v548_v50, 0.0  ;;  %vm614_vm11 = vcmp.le.s32.totalorder %v599_v51, 16  ;;  %v514_v4 = vmul.f32 %v1522_v55, %v1797_v53  ;;  %v1525_v7 = vunpack.c.l.bf16 %v1546_v56 }
  0x98   : > { %v944_v6 = vrot.slane %v942_v62, 7  ;;  %v600_v8 = vadd.s32 13, %v1784_v36  ;;  %v1526_v9 = vunpack.c.h.bf16 %v1546_v56  ;;  %v579_v12 = vmax.f32 %v549_v3, 0.0  ;;  %v1418_v61 = vld [vmem:[%s1722_s5 + $0x98] sm:$0x1] }
  0x99   : > { %v669_v11 = vsel %vm613_vm10, %v578_v1, 0.0  ;;  %v550_v2 = vadd.f32 %v1800_v54, %v514_v4  ;;  %v1529_v13 = vunpack.c.l.bf16 %v2034_v0  ;;  %v515_v16 = vmul.f32 %v1525_v7, %v1797_v53 }
  0x9a   : > { %v947_v14 = vor.u32 %v945_v63, %v944_v6  ;;  %v1462_v15 = vpack.c.bf16 %v669_v11, %v669_v11  ;;  %v948_v58 = vrot.slane %v944_v6, 4  ;;  %v670_v17 = vsel %vm614_vm11, %v579_v12, 0.0 }
  0x9b   : > { %v580_v18 = vmax.f32 %v550_v2, 0.0  ;;  %vm615_vm12 = vcmp.le.s32.totalorder %v600_v8, 16  ;;  %v516_v19 = vmul.f32 %v1526_v9, %v1797_v53  ;;  %v1463_v22 = vpack.c.bf16 %v670_v17, %v670_v17 }
  0x9c   : > { %v1148_v5 = vsel %vm1833_vm1, %v947_v14, %v1410_v10  ;;  %v950_v20 = vshrl.u32 %v1462_v15, 16  ;;  %v953_v21 = vshll.u32 %v1462_v15, 16  ;;  %v551_v24 = vadd.f32 %v1800_v54, %v515_v16  ;;  %v1420_v14 = vld [vmem:[%s1722_s5 + $0x9c] sm:$0xf] }
  0x9d   : > { %1411 = vst [vmem:[%s1722_s5 + $0x84] sm:$0xf] %v1148_v5  ;;  %v671_v23 = vsel %vm614_vm11, %v580_v18, 0.0  ;;  %v552_v25 = vadd.f32 %v1800_v54, %v516_v19  ;;  %v517_v26 = vmul.f32 %v1529_v13, %v1797_v53  ;;  %v959_v28 = vshrl.u32 %v1463_v22, 16  ;;  %v1423_v5 = vld [vmem:[%s1722_s5 + $0xa4] sm:$0x1] }
  0x9e   : > { %v952_v27 = vrot.slane %v950_v20, 7  ;;  %v962_v29 = vshll.u32 %v1463_v22, 16  ;;  %v1464_v30 = vpack.c.bf16 %v671_v23, %v671_v23  ;;  %v581_v57 = vmax.f32 %v551_v24, 0.0 }
  0x9f   : > { %v582_v32 = vmax.f32 %v552_v25, 0.0  ;;  %v553_v33 = vadd.f32 %v1800_v54, %v517_v26  ;;  %v2059_v34 = vadd.s32 14, %v1784_v36  ;;  %v961_v39 = vrot.slane %v959_v28, 7 }
  0xa0   : > { %v955_v35 = vor.u32 %v953_v21, %v952_v27  ;;  %v957_v38 = vrot.slane %v952_v27, 4  ;;  %v967_v52 = vshrl.u32 %v1464_v30, 16  ;;  %v970_v59 = vshll.u32 %v1464_v30, 16  ;;  %v1425_v27 = vld [vmem:[%s1722_s5 + $0xa8] sm:$0xf] }
  0xa1   : > { %v672_v41 = vsel %vm615_vm12, %v581_v57, 0.0  ;;  %v673_v42 = vsel %vm615_vm12, %v582_v32, 0.0  ;;  %v583_v44 = vmax.f32 %v553_v33, 0.0  ;;  %v964_v49 = vor.u32 %v962_v29, %v961_v39 }
  0xa2   : > { %v956_v46 = vsel %vm1839_vm2, %v948_v58, %v955_v35  ;;  %v1152_v47 = vsel %vm1846_vm3, %v957_v38, %v1413_v31  ;;  %v965_v50 = vrot.slane %v961_v39, 4  ;;  %v969_v51 = vrot.slane %v967_v52, 7 }
  0xa3   : > { %1412 = vst [vmem:[%s1722_s5 + $0x88] sm:$0xf] %v956_v46  ;;  %1414 = vst [vmem:[%s1722_s5 + $0x8c] sm:$0x1] %v1152_v47  ;;  %v1465_v55 = vpack.c.bf16 %v672_v41, %v672_v41  ;;  %v1466_v56 = vpack.c.bf16 %v673_v42, %v673_v42  ;;  %vm616_vm13 = vcmp.le.s32.totalorder %v2059_v34, 16  ;;  %v1155_v60 = vsel %vm1833_vm1, %v964_v49, %v1415_v40 }
  0xa4   : > { %v674_v62 = vsel %vm616_vm13, %v583_v44, 0.0  ;;  %v1530_v63 = vunpack.c.h.bf16 %v2034_v0  ;;  %v1533_v1 = vunpack.c.l.bf16 %v1548_v45  ;;  %1416 = vst [vmem:[%s1722_s5 + $0x90] sm:$0xf] %v1155_v60  ;;  %v972_v3 = vor.u32 %v970_v59, %v969_v51  ;;  %v1428_v46 = vld [vmem:[%s1722_s5 + $0xb0] sm:$0x1] }
  0xa5   : > { %v974_v4 = vrot.slane %v969_v51, 4  ;;  %v976_v6 = vshrl.u32 %v1465_v55, 16  ;;  %v979_v7 = vshll.u32 %v1465_v55, 16  ;;  %v984_v8 = vshrl.u32 %v1466_v56, 16 }
  0xa6   : > { %v987_v9 = vshll.u32 %v1466_v56, 16  ;;  %v1467_v10 = vpack.c.bf16 %v674_v62, %v674_v62  ;;  %v518_v11 = vmul.f32 %v1530_v63, %v1797_v53  ;;  %v973_v12 = vsel %vm1839_vm2, %v965_v50, %v972_v3  ;;  %v1430_v50 = vld [vmem:[%s1722_s5 + $0xb4] sm:$0xf] }
  0xa7   : > { %v1159_v0 = vsel %vm1846_vm3, %v974_v4, %v1418_v61  ;;  %v978_v2 = vrot.slane %v976_v6, 7  ;;  %v519_v13 = vmul.f32 %v1533_v1, %v1797_v53  ;;  %1417 = vst [vmem:[%s1722_s5 + $0x94] sm:$0xf] %v973_v12  ;;  %v986_v15 = vrot.slane %v984_v8, 7  ;;  %v1433_v4 = vld [vmem:[%s1722_s5 + $0xbc] sm:$0x1] }
  0xa8   : > { %1419 = vst [vmem:[%s1722_s5 + $0x98] sm:$0x1] %v1159_v0  ;;  %v993_v58 = vshrl.u32 %v1467_v10, 16  ;;  %v996_v16 = vshll.u32 %v1467_v10, 16  ;;  %v554_v17 = vadd.f32 %v1800_v54, %v518_v11  ;;  %v602_v21 = vadd.s32 15, %v1784_v36 }
  0xa9   : > { %v981_v18 = vor.u32 %v979_v7, %v978_v2  ;;  %v982_v19 = vrot.slane %v978_v2, 4  ;;  %v555_v20 = vadd.f32 %v1800_v54, %v519_v13  ;;  %v989_v22 = vor.u32 %v987_v9, %v986_v15 }
  0xaa   : > { %v991_v23 = vrot.slane %v986_v15, 4  ;;  %v995_v24 = vrot.slane %v993_v58, 7  ;;  %v584_v25 = vmax.f32 %v554_v17, 0.0  ;;  %vm617_vm14 = vcmp.le.s32.totalorder %v602_v21, 16 }
  0xab   : > { %v1162_v26 = vsel %vm1833_vm1, %v981_v18, %v1420_v14  ;;  %v585_v28 = vmax.f32 %v555_v20, 0.0  ;;  %v1534_v29 = vunpack.c.h.bf16 %v1548_v45  ;;  %v990_v30 = vsel %vm1839_vm2, %v982_v19, %v989_v22 }
  0xac   : > { %1421 = vst [vmem:[%s1722_s5 + $0x9c] sm:$0xf] %v1162_v26  ;;  %v1166_v36 = vsel %vm1846_vm3, %v991_v23, %v1423_v5  ;;  %v998_v31 = vor.u32 %v996_v16, %v995_v24  ;;  %v675_v57 = vsel %vm616_vm13, %v584_v25, 0.0  ;;  %1422 = vst [vmem:[%s1722_s5 + $0xa0] sm:$0xf] %v990_v30  ;;  %v999_v42 = vrot.slane %v995_v24, 4 }
  0xad   : > { %1424 = vst [vmem:[%s1722_s5 + $0xa4] sm:$0x1] %v1166_v36  ;;  %v1468_v32 = vpack.c.bf16 %v675_v57, %v675_v57  ;;  %v676_v33 = vsel %vm617_vm14, %v585_v28, 0.0  ;;  %v520_v35 = vmul.f32 %v1534_v29, %v1797_v53 }
  0xae   : > { %v1169_v38 = vsel %vm1833_vm1, %v998_v31, %v1425_v27  ;;  %v1469_v39 = vpack.c.bf16 %v676_v33, %v676_v33 }
  0xaf   : > { %1426 = vst [vmem:[%s1722_s5 + $0xa8] sm:$0xf] %v1169_v38  ;;  %v1001_v40 = vshrl.u32 %v1468_v32, 16  ;;  %v1004_v52 = vshll.u32 %v1468_v32, 16  ;;  %v556_v59 = vadd.f32 %v1800_v54, %v520_v35 }
  0xb0   : > { %v1010_v34 = vshrl.u32 %v1469_v39, 16  ;;  %v1013_v41 = vshll.u32 %v1469_v39, 16 }
  0xb1   : > { %v1003_v44 = vrot.slane %v1001_v40, 7  ;;  %v586_v45 = vmax.f32 %v556_v59, 0.0 }
  0xb2   : > { %v1012_v53 = vrot.slane %v1010_v34, 7 }
  0xb3   : > { %v1006_v47 = vor.u32 %v1004_v52, %v1003_v44  ;;  %v1008_v49 = vrot.slane %v1003_v44, 4  ;;  %v677_v51 = vsel %vm617_vm14, %v586_v45, 0.0 }
  0xb4   : > { %v1015_v55 = vor.u32 %v1013_v41, %v1012_v53  ;;  %v1470_v56 = vpack.c.bf16 %v677_v51, %v677_v51  ;;  %v1016_v1 = vrot.slane %v1012_v53, 4 }
  0xb5   : > { %v1007_v54 = vsel %vm1839_vm2, %v999_v42, %v1006_v47  ;;  %v1173_v60 = vsel %vm1846_vm3, %v1008_v49, %v1428_v46 }
  0xb6   : > { %1427 = vst [vmem:[%s1722_s5 + $0xac] sm:$0xf] %v1007_v54  ;;  %1429 = vst [vmem:[%s1722_s5 + $0xb0] sm:$0x1] %v1173_v60  ;;  %v1176_v61 = vsel %vm1833_vm1, %v1015_v55, %v1430_v50  ;;  %v1018_v62 = vshrl.u32 %v1470_v56, 16  ;;  %v1021_v63 = vshll.u32 %v1470_v56, 16 }
  0xb7   : > { %1431 = vst [vmem:[%s1722_s5 + $0xb4] sm:$0xf] %v1176_v61 }
  0xb8   : > { %v1020_v3 = vrot.slane %v1018_v62, 7 }
  0xba   : > { %v1023_v6 = vor.u32 %v1021_v63, %v1020_v3  ;;  %v1025_v7 = vrot.slane %v1020_v3, 4 }
  0xbc   : > { %v1024_v8 = vsel %vm1839_vm2, %v1016_v1, %v1023_v6  ;;  %v1180_v9 = vsel %vm1846_vm3, %v1025_v7, %v1433_v4 }
  0xbd   : > { %1432 = vst [vmem:[%s1722_s5 + $0xb8] sm:$0xf] %v1024_v8  ;;  %1434 = vst [vmem:[%s1722_s5 + $0xbc] sm:$0x1] %v1180_v9 }
  0xbe PF: > { %s14_s19 = sadd.s32 1, %s1630_s19   ;;  %s2156_s15 = smov %s1622_s17 }
  0xbf   : > { %p11_p12 = scmp.ge.s32.totalorder %s14_s19, 6   ;;  %s2157_s16 = smov %s1626_s18 }
  0xc0   : > { %s2158_s17 = smov %s2161_s20  ;;  %s2159_s18 = smov %s2165_s21 }
  0xc1   :  { %13 = sbr.rel (!%p11_p12) target bundleno = 3 (0x3), region = 74 }

// kernel: double_conv.4
= control target key start
LH: loop header
LB: loop body
LE: loop exit
PB: predicated region body
PF: predicated region fallthrough
CT: control target
= control target key end

     0   :  { %s4528_s12 = smov 0   ;;  %s4530_s13 = smov 0   ;;  %s5958_s0 = inlined_call_operand.vmem [shape: bf16[2,18,24,128], index: 0, kind: input, shape index: {}]   ;;  %s5959_s1 = inlined_call_operand.vmem [shape: bf16[3,384,128], index: 1, kind: input, shape index: {}]   ;;  %s5960_s2 = inlined_call_operand.vmem [shape: bf16[2,32,16,128], index: 2, kind: output, shape index: {0}]   ;;  %s5961_s3 = inlined_call_operand.vmem [shape: f32[2,2,128], index: 3, kind: output, shape index: {1}]  }
   0x1   :  { %s4532_s14 = smov 0  }
   0x2 LB: > { %s26_s15 = sadd.s32 1, %s4500_s13  ;;  %p3486_p0 = scmp.ge.s32.totalorder %s4504_s14, 1  ;;  %s4504_s14 = sphi %s4532_s14, %s14_s14   ;;  %s4500_s13 = sphi %s4530_s13, %s6125_s13   ;;  %s4496_s12 = sphi %s4528_s12, %s6124_s12  }
   0x3   : > { %p28_p1 = scmp.ge.s32.totalorder %s26_s15, 2  ;;  %p154_p2 = scmp.lt.s32.totalorder %s4504_s14, 3 }
   0x5   : > { %s6127_s15 = smov (%p28_p1, %s26_s15), 0  ;;  %p155_p3 = pnand %p3486_p0, %p154_p2 }
   0x7   : > { %158 = sbr.rel (%p155_p3) target bundleno = 713 (0x2c9), region = 28 }
   0xc   : > { %v4320_v0 = vld [vmem:[%s5959_s1 + $0x38] sm:$0xff]   ;;  %v4506_v1 = vmov 0   ;;  %p187_p4 = scmp.lt.s32.totalorder %s4496_s12, 1  ;;  %v4322_v3 = vld [vmem:[%s5959_s1 + $0x30] sm:$0xff]   ;;  %v4570_v5 = vld [vmem:[%s5959_s1 + $0xa8] sm:$0xff]   ;;  %vm2097_vm0 = vcmask 1046528  }
   0xd   : > { %988 = vmatprep.subr.bf16.mxu0 %v4506_v1  ;;  %v4553_v2 = vld [vmem:[%s5959_s1 + $0xb8] sm:$0xff]   ;;  %v4563_v4 = vld [vmem:[%s5959_s1 + $0xb0] sm:$0xff]   ;;  %v4324_v6 = vld [vmem:[%s5959_s1 + $0x28] sm:$0xff]   ;;  %vm2933_vm1 = vcmask 1045504   ;;  %vm3350_vm2 = vcmask 1040384  }
   0xe   : > { %989 = vmatpush1.bf16.msra.mxu0 %v4320_v0  ;;  %4277 = vmatprep.subr.bf16.mxu1 %v4553_v2  ;;  %s6129_s12 = smov (!%p187_p4, %s4496_s12), 1  ;;  %v4583_v7 = vld [vmem:[%s5959_s1 + $0xa0] sm:$0xff]   ;;  %v4595_v9 = vld [vmem:[%s5959_s1 + $0x98] sm:$0xff]   ;;  %v4612_v12 = vld [vmem:[%s5959_s1 + $0x90] sm:$0xff]  }
   0xf   : > { %990 = vmatprep.subr.bf16.mxu0 %v4506_v1  ;;  %4285 = vmatpush3.bf16.msra.mxu1 %v4553_v2  ;;  %s4293_s30 = smul.u32 216, %s6129_s12  ;;  %v4326_v8 = vld [vmem:[%s5959_s1 + $0x20] sm:$0xff]   ;;  %v4328_v10 = vld [vmem:[%s5959_s1 + $0x18] sm:$0xff]   ;;  %v4330_v13 = vld [vmem:[%s5959_s1 + $0x10] sm:$0xff]   ;;  %s3861_s7 = sshll.u32 %s6129_s12, 8 }
  0x10   : > { %4278 = vmatprep.subr.bf16.mxu1 %v4563_v4  ;;  %v4623_v14 = vld [vmem:[%s5959_s1 + $0x88] sm:$0xff]   ;;  %v4634_v16 = vld [vmem:[%s5959_s1 + $0x80] sm:$0xff]   ;;  %v4337_v18 = vld [vmem:[%s5959_s1 + $0x78] sm:$0xff]   ;;  %s5803_s9 = scalar_lea.vmem %s5960_s2, %s3861_s7 }
  0x11   : > { %s4600_s10 = scalar_lea.vmem %s5958_s0, %s4293_s30  ;;  %v4332_v15 = vld [vmem:[%s5959_s1 + $0x8] sm:$0xff]   ;;  %v4334_v17 = vld [vmem:[%s5959_s1] sm:$0xff]   ;;  %v4339_v20 = vld [vmem:[%s5959_s1 + $0xf8] sm:$0xff]  }
  0x12   : > { %991 = vmatpush1.bf16.msra.mxu0 %v4322_v3  ;;  %v4336_v11 = vld [vmem:[%s4600_s10 + $0x58] sm:$0xff]   ;;  %v4338_v19 = vld [vmem:[%s4600_s10 + $0x60] sm:$0xff]   ;;  %v4342_v21 = vld [vmem:[%s4600_s10 + $0x68] sm:$0xff]  }
  0x13   : > { %992 = vmatprep.subr.bf16.mxu0 %v4506_v1  ;;  %4286 = vmatpush3.bf16.msra.mxu1 %v4563_v4  ;;  %v4340_v22 = vld [vmem:[%s5959_s1 + $0x70] sm:$0xff]   ;;  %v4343_v24 = vld [vmem:[%s5959_s1 + $0x68] sm:$0xff]   ;;  %v4348_v27 = vld [vmem:[%s4600_s10 + $0x78] sm:$0xff]  }
  0x14   : > { %4279 = vmatprep.subr.bf16.mxu1 %v4570_v5  ;;  %4117 = vmatprep.mubr.bf16.mxu1 %v4336_v11  ;;  %v4341_v23 = vld [vmem:[%s5959_s1 + $0xf0] sm:$0xff]   ;;  %v4345_v26 = vld [vmem:[%s5959_s1 + $0xe8] sm:$0xff]   ;;  %v4346_v29 = vld [vmem:[%s5959_s1 + $0x60] sm:$0xff]  }
  0x15   : > { %v4344_v25 = vld [vmem:[%s4600_s10 + $0x70] sm:$0xff]   ;;  %v4347_v30 = vld [vmem:[%s5959_s1 + $0xe0] sm:$0xff]   ;;  %v4349_v31 = vld [vmem:[%s5959_s1 + $0x58] sm:$0xff]  }
  0x16   : > { %993 = vmatpush1.bf16.msra.mxu0 %v4324_v6  ;;  %v4671_v28 = vld [vmem:[%s4600_s10 + $0xc] sm:$0xff]   ;;  %v4350_v32 = vld [vmem:[%s4600_s10 + $0x80] sm:$0xff]   ;;  %v4351_v33 = vld [vmem:[%s5959_s1 + $0xd8] sm:$0xff]  }
  0x17   : > { %994 = vmatprep.subr.bf16.mxu0 %v4506_v1  ;;  %4287 = vmatpush3.bf16.msra.mxu1 %v4570_v5  ;;  %v4354_v34 = vld [vmem:[%s4600_s10 + $0x88] sm:$0xff]   ;;  %v4352_v35 = vld [vmem:[%s5959_s1 + $0x50] sm:$0xff]   ;;  %v4362_v40 = vld [vmem:[%s4600_s10 + $0x98] sm:$0xff]  }
  0x18   : > { %4280 = vmatprep.subr.bf16.mxu1 %v4583_v7  ;;  %1020 = vmatprep.mubr.bf16.mxu0 %v4671_v28  ;;  %v4353_v36 = vld [vmem:[%s5959_s1 + $0xd0] sm:$0xff]   ;;  %v4355_v37 = vld [vmem:[%s5959_s1 + $0x48] sm:$0xff]   ;;  %v4358_v41 = vld [vmem:[%s5959_s1 + $0x40] sm:$0xff]  }
  0x19   : > { %v4356_v38 = vld [vmem:[%s4600_s10 + $0x90] sm:$0xff]   ;;  %v4357_v39 = vld [vmem:[%s5959_s1 + $0xc8] sm:$0xff]   ;;  %v4359_v42 = vld [vmem:[%s5959_s1 + $0xc0] sm:$0xff]  }
  0x1a   : > { %995 = vmatpush1.bf16.msra.mxu0 %v4326_v8  ;;  %v4719_v43 = vld [vmem:[%s4600_s10] sm:$0xff]   ;;  %v4724_v45 = vld [vmem:[%s4600_s10 + $0x14] sm:$0xff]   ;;  %v4368_v47 = vld [vmem:[%s4600_s10 + $0xa8] sm:$0xff]  }
  0x1b   : > { %996 = vmatprep.subr.bf16.mxu0 %v4506_v1  ;;  %4288 = vmatpush3.bf16.msra.mxu1 %v4583_v7  ;;  %v4363_v44 = vld [vmem:[%s4600_s10 + $0xa0] sm:$0xff]   ;;  %v4364_v46 = vld [vmem:[%s5959_s1 + $0x138] sm:$0xff]   ;;  %v4365_v48 = vld [vmem:[%s5959_s1 + $0x130] sm:$0xff]  }
  0x1c   : > { %4281 = vmatprep.subr.bf16.mxu1 %v4595_v9  ;;  %v4740_v49 = vld [vmem:[%s4600_s10 + $0x8] sm:$0xff]   ;;  %v4369_v50 = vld [vmem:[%s4600_s10 + $0xb0] sm:$0xff]   ;;  %v4745_v51 = vld [vmem:[%s4600_s10 + $0x1c] sm:$0xff]  }
  0x1d   : > { %v4370_v52 = vld [vmem:[%s5959_s1 + $0x128] sm:$0xff]   ;;  %v4374_v53 = vld [vmem:[%s4600_s10 + $0xb8] sm:$0xff]   ;;  %v4371_v54 = vld [vmem:[%s5959_s1 + $0x120] sm:$0xff]  }
  0x1e   : > { %997 = vmatpush1.bf16.msra.mxu0 %v4328_v10  ;;  %v4762_v55 = vld [vmem:[%s4600_s10 + $0x10] sm:$0xff]   ;;  %v4375_v56 = vld [vmem:[%s4600_s10 + $0xc0] sm:$0xff]   ;;  %v4376_v58 = vld [vmem:[%s5959_s1 + $0x118] sm:$0xff]  }
  0x1f   : > { %998 = vmatprep.subr.bf16.mxu0 %v4506_v1  ;;  %4289 = vmatpush3.bf16.msra.mxu1 %v4595_v9  ;;  %v4767_v57 = vld [vmem:[%s4600_s10 + $0x24] sm:$0xff]   ;;  %v4377_v60 = vld [vmem:[%s5959_s1 + $0x110] sm:$0xff]   ;;  %v4785_v61 = vld [vmem:[%s4600_s10 + $0x18] sm:$0xff]  }
  0x20   : > { %4282 = vmatprep.subr.bf16.mxu1 %v4612_v12  ;;  %v4380_v59 = vld [vmem:[%s4600_s10 + $0xc8] sm:$0xff]   ;;  %v4381_v63 = vld [vmem:[%s4600_s10 + $0xd0] sm:$0xff]   ;;  %v4807_v3 = vld [vmem:[%s4600_s10 + $0x20] sm:$0xff]  }
  0x21   : > { %v4788_v62 = vld [vmem:[%s4600_s10 + $0x2c] sm:$0xff]   ;;  %v4829_v8 = vld [vmem:[%s4600_s10 + $0x3c] sm:$0xff]  }
  0x22   : > { %999 = vmatpush1.bf16.msra.mxu0 %v4330_v13  ;;  %v4382_v0 = vld [vmem:[%s5959_s1 + $0x108] sm:$0xff]   ;;  %v4391_v6 = vld [vmem:[%s5959_s1 + $0x1b0] sm:$0xff]   ;;  %v4399_v10 = vld [vmem:[%s5959_s1 + $0x1a0] sm:$0xff]  }
  0x23   : > { %1000 = vmatprep.subr.bf16.mxu0 %v4506_v1  ;;  %4290 = vmatpush3.bf16.msra.mxu1 %v4612_v12  ;;  %v4843_v11 = vld [vmem:[%s4600_s10 + $0x30] sm:$0xff]   ;;  %v4402_v13 = vld [vmem:[%s5959_s1 + $0x198] sm:$0xff]  }
  0x24   : > { %4283 = vmatprep.subr.bf16.mxu1 %v4623_v14 }
  0x26   : > { %1001 = vmatpush1.bf16.msra.mxu0 %v4332_v15  ;;  %v4860_v15 = vld [vmem:[%s4600_s10 + $0x38] sm:$0xff]  }
  0x27   : > { %1002 = vmatprep.subr.bf16.mxu0 %v4506_v1  ;;  %4291 = vmatpush3.bf16.msra.mxu1 %v4623_v14 }
  0x28   : > { %4284 = vmatprep.subr.bf16.mxu1 %v4634_v16 }
  0x2a   : > { %1003 = vmatpush1.bf16.msra.mxu0 %v4334_v17  ;;  %v4410_v17 = vld [vmem:[%s5959_s1 + $0x188] sm:$0xff]  }
  0x2b   : > { %1004 = vmatprep.subr.bf16.mxu0 %v4506_v1  ;;  %4292 = vmatpush3.bf16.msra.mxu1 %v4634_v16 }
  0x2c   : > { %1599 = vmatprep.subr.bf16.mxu1 %v4506_v1 }
  0x2e   : > { %1005 = vmatpush2.bf16.msra.mxu0 %v4337_v18  ;;  %4118 = vmatmul.mubr.bf16.vlgmr.msra.gmra.mxu1 %v4338_v19  ;;  %v4415_v18 = vld [vmem:[%s5959_s1 + $0x180] sm:$0xff]  }
  0x2f   : > { %1006 = vmatprep.subr.bf16.mxu0 %v4506_v1  ;;  %1600 = vmatpush1.bf16.msra.mxu1 %v4339_v20  ;;  %v4878_v19 = vld [vmem:[%s4600_s10 + $0x40] sm:$0xff]   ;;  %v4882_v20 = vld [vmem:[%s4600_s10 + $0x54] sm:$0xff]  }
  0x30   : > { %4121 = vmatprep.mubr.bf16.mxu1 %v4342_v21  ;;  %1601 = vmatprep.subr.bf16.mxu1 %v4506_v1  ;;  %v4418_v21 = vld [vmem:[%s5959_s1 + $0x1f8] sm:$0xff]  }
  0x32   : > { %1007 = vmatpush2.bf16.msra.mxu0 %v4340_v22  ;;  %v4891_v22 = vld [vmem:[%s5959_s1 + $0x178] sm:$0xff]  }
  0x33   : > { %1008 = vmatprep.subr.bf16.mxu0 %v4506_v1  ;;  %1602 = vmatpush1.bf16.msra.mxu1 %v4341_v23  ;;  %v4899_v23 = vld [vmem:[%s4600_s10 + $0x48] sm:$0xff]  }
  0x34   : > { %1603 = vmatprep.subr.bf16.mxu1 %v4506_v1 }
  0x36   : > { %1009 = vmatpush2.bf16.msra.mxu0 %v4343_v24  ;;  %4122 = vmatmul.mubr.bf16.gmra.mxu1 %v4344_v25  ;;  %v4903_v24 = vld [vmem:[%s4600_s10 + $0x5c] sm:$0xff]   ;;  %v4423_v25 = vld [vmem:[%s5959_s1 + $0x1f0] sm:$0xff]  }
  0x37   : > { %1010 = vmatprep.subr.bf16.mxu0 %v4506_v1  ;;  %1604 = vmatpush1.bf16.msra.mxu1 %v4345_v26  ;;  %v4426_v26 = vld [vmem:[%s5959_s1 + $0x1e8] sm:$0xff]  }
  0x38   : > { %4125 = vmatprep.mubr.bf16.mxu1 %v4348_v27  ;;  %1605 = vmatprep.subr.bf16.mxu1 %v4506_v1  ;;  %v4431_v27 = vld [vmem:[%s5959_s1 + $0x1e0] sm:$0xff]  }
  0x3a   : > { %1011 = vmatpush2.bf16.msra.mxu0 %v4346_v29  ;;  %v4925_v29 = vld [vmem:[%s4600_s10 + $0x64] sm:$0xff]  }
  0x3b   : > { %1012 = vmatprep.subr.bf16.mxu0 %v4506_v1  ;;  %1606 = vmatpush1.bf16.msra.mxu1 %v4347_v30  ;;  %v4434_v30 = vld [vmem:[%s5959_s1 + $0x1d8] sm:$0xff]  }
  0x3c   : > { %1607 = vmatprep.subr.bf16.mxu1 %v4506_v1 }
  0x3e   : > { %1013 = vmatpush2.bf16.msra.mxu0 %v4349_v31  ;;  %4126 = vmatmul.mubr.bf16.gmra.mxu1 %v4350_v32  ;;  %v4440_v31 = vld [vmem:[%s5959_s1 + $0x1d0] sm:$0xff]   ;;  %v4939_v32 = vld [vmem:[%s4600_s10 + $0x58] sm:$0xff]  }
  0x3f   : > { %1014 = vmatprep.subr.bf16.mxu0 %v4506_v1  ;;  %1608 = vmatpush1.bf16.msra.mxu1 %v4351_v33  ;;  %v4943_v33 = vld [vmem:[%s4600_s10 + $0x6c] sm:$0xff]  }
  0x40   : > { %4129 = vmatprep.mubr.bf16.mxu1 %v4354_v34  ;;  %1609 = vmatprep.subr.bf16.mxu1 %v4506_v1  ;;  %v4446_v34 = vld [vmem:[%s5959_s1 + $0x1c8] sm:$0xff]  }
  0x42   : > { %1015 = vmatpush2.bf16.msra.mxu0 %v4352_v35  ;;  %v4454_v35 = vld [vmem:[%s5959_s1 + $0x1c0] sm:$0xff]  }
  0x43   : > { %1016 = vmatprep.subr.bf16.mxu0 %v4506_v1  ;;  %1610 = vmatpush1.bf16.msra.mxu1 %v4353_v36  ;;  %v4957_v36 = vld [vmem:[%s4600_s10 + $0x60] sm:$0xff]  }
  0x44   : > { %1611 = vmatprep.subr.bf16.mxu1 %v4506_v1 }
  0x46   : > { %1017 = vmatpush2.bf16.msra.mxu0 %v4355_v37  ;;  %4130 = vmatmul.mubr.bf16.gmra.mxu1 %v4356_v38  ;;  %v4961_v37 = vld [vmem:[%s4600_s10 + $0x74] sm:$0xff]   ;;  %v4968_v38 = vld [vmem:[%s4600_s10 + $0x68] sm:$0xff]  }
  0x47   : > { %1018 = vmatprep.subr.bf16.mxu0 %v4506_v1  ;;  %1612 = vmatpush1.bf16.msra.mxu1 %v4357_v39  ;;  %v4971_v39 = vld [vmem:[%s4600_s10 + $0x7c] sm:$0xff]  }
  0x48   : > { %4133 = vmatprep.mubr.bf16.mxu1 %v4362_v40  ;;  %1613 = vmatprep.subr.bf16.mxu1 %v4506_v1  ;;  %v4981_v40 = vld [vmem:[%s4600_s10 + $0x84] sm:$0xff]  }
  0x4a   : > { %1019 = vmatpush2.bf16.msra.mxu0 %v4358_v41  ;;  %v4988_v41 = vld [vmem:[%s4600_s10 + $0x78] sm:$0xff]  }
  0x4b   : > { %4085 = vmatprep.subr.bf16.mxu0 %v4553_v2  ;;  %1614 = vmatpush1.bf16.msra.mxu1 %v4359_v42  ;;  %v4991_v42 = vld [vmem:[%s4600_s10 + $0x8c] sm:$0xff]  }
  0x4c   : > { %1615 = vmatprep.subr.bf16.mxu1 %v4506_v1 }
  0x4d   : > { %1021 = vmatmul.mubr.bf16.vlgmr.msra.gmra.mxu0 %v4719_v43 }
  0x4e   : > { %4086 = vmatpush3.bf16.msra.mxu0 %v4553_v2  ;;  %1028 = vmatprep.mubr.bf16.mxu0 %v4724_v45  ;;  %v4383_v2 = vld [vmem:[%s5959_s1 + $0x100] sm:$0xff]  }
  0x4f   : > { %4134 = vmatmul.mubr.bf16.gmra.mxu1 %v4363_v44  ;;  %4087 = vmatprep.subr.bf16.mxu0 %v4563_v4  ;;  %v5001_v44 = vld [vmem:[%s4600_s10 + $0x94] sm:$0xff]  }
  0x50   : > { %1616 = vmatpush2.bf16.msra.mxu1 %v4364_v46  ;;  %4137 = vmatprep.mubr.bf16.mxu1 %v4368_v47  ;;  %v5008_v46 = vld [vmem:[%s4600_s10 + $0x88] sm:$0xff]   ;;  %v5011_v47 = vld [vmem:[%s4600_s10 + $0x9c] sm:$0xff]  }
  0x51   : > { %1617 = vmatprep.subr.bf16.mxu1 %v4506_v1 }
  0x52   : > { %4088 = vmatpush3.bf16.msra.mxu0 %v4563_v4  ;;  %v4810_v4 = vld [vmem:[%s4600_s10 + $0x34] sm:$0xff]  }
  0x53   : > { %4089 = vmatprep.subr.bf16.mxu0 %v4570_v5 }
  0x54   : > { %1618 = vmatpush2.bf16.msra.mxu1 %v4365_v48  ;;  %v5018_v48 = vld [vmem:[%s4600_s10 + $0x90] sm:$0xff]  }
  0x55   : > { %1029 = vmatmul.mubr.bf16.gmra.mxu0 %v4740_v49  ;;  %1619 = vmatprep.subr.bf16.mxu1 %v4506_v1 }
  0x56   : > { %1035 = vmatprep.mubr.bf16.mxu0 %v4745_v51  ;;  %4090 = vmatpush3.bf16.msra.mxu0 %v4570_v5  ;;  %v4386_v5 = vld [vmem:[%s5959_s1 + $0x1b8] sm:$0xff]  }
  0x57   : > { %4138 = vmatmul.mubr.bf16.gmra.mxu1 %v4369_v50  ;;  %4091 = vmatprep.subr.bf16.mxu0 %v4583_v7  ;;  %v5021_v50 = vld [vmem:[%s4600_s10 + $0xa4] sm:$0xff]  }
  0x58   : > { %1620 = vmatpush2.bf16.msra.mxu1 %v4370_v52  ;;  %4141 = vmatprep.mubr.bf16.mxu1 %v4374_v53  ;;  %v5028_v52 = vld [vmem:[%s4600_s10 + $0x98] sm:$0xff]   ;;  %v5031_v53 = vld [vmem:[%s4600_s10 + $0xac] sm:$0xff]  }
  0x59   : > { %1621 = vmatprep.subr.bf16.mxu1 %v4506_v1 }
  0x5a   : > { %4092 = vmatpush3.bf16.msra.mxu0 %v4583_v7  ;;  %v4825_v7 = vld [vmem:[%s4600_s10 + $0x28] sm:$0xff]  }
  0x5b   : > { %4093 = vmatprep.subr.bf16.mxu0 %v4595_v9 }
  0x5c   : > { %1622 = vmatpush2.bf16.msra.mxu1 %v4371_v54  ;;  %v5038_v54 = vld [vmem:[%s4600_s10 + $0xa0] sm:$0xff]  }
  0x5d   : > { %1036 = vmatmul.mubr.bf16.gmra.mxu0 %v4762_v55  ;;  %1623 = vmatprep.subr.bf16.mxu1 %v4506_v1 }
  0x5e   : > { %1042 = vmatprep.mubr.bf16.mxu0 %v4767_v57  ;;  %4094 = vmatpush3.bf16.msra.mxu0 %v4595_v9  ;;  %v4394_v9 = vld [vmem:[%s5959_s1 + $0x1a8] sm:$0xff]  }
  0x5f   : > { %4142 = vmatmul.mubr.bf16.gmra.mxu1 %v4375_v56  ;;  %4095 = vmatprep.subr.bf16.mxu0 %v4612_v12  ;;  %v5041_v56 = vld [vmem:[%s4600_s10 + $0xb4] sm:$0xff]  }
  0x60   : > { %1624 = vmatpush2.bf16.msra.mxu1 %v4376_v58  ;;  %4145 = vmatprep.mubr.bf16.mxu1 %v4380_v59 }
  0x61   : > { %1625 = vmatprep.subr.bf16.mxu1 %v4506_v1 }
  0x62   : > { %4096 = vmatpush3.bf16.msra.mxu0 %v4612_v12  ;;  %v4847_v12 = vld [vmem:[%s4600_s10 + $0x44] sm:$0xff]  }
  0x63   : > { %4097 = vmatprep.subr.bf16.mxu0 %v4623_v14 }
  0x64   : > { %1626 = vmatpush2.bf16.msra.mxu1 %v4377_v60  ;;  %v5052_v60 = vld [vmem:[%s4600_s10 + $0xa8] sm:$0xff]  }
  0x65   : > { %1043 = vmatmul.mubr.bf16.gmra.mxu0 %v4785_v61  ;;  %1627 = vmatprep.subr.bf16.mxu1 %v4506_v1 }
  0x66   : > { %1050 = vmatprep.mubr.bf16.mxu0 %v4788_v62  ;;  %4098 = vmatpush3.bf16.msra.mxu0 %v4623_v14  ;;  %v4407_v14 = vld [vmem:[%s5959_s1 + $0x190] sm:$0xff]  }
  0x67   : > { %4146 = vmatmul.mubr.bf16.gmra.mxu1 %v4381_v63  ;;  %4099 = vmatprep.subr.bf16.mxu0 %v4634_v16  ;;  %v5055_v63 = vld [vmem:[%s4600_s10 + $0xbc] sm:$0xff]  }
  0x68   : > { %1628 = vmatpush2.bf16.msra.mxu1 %v4382_v0  ;;  %1631 = vmatprep.mubr.bf16.mxu1 %v4671_v28  ;;  %v4921_v28 = vld [vmem:[%s4600_s10 + $0x50] sm:$0xff]  }
  0x69   : > { %1629 = vmatprep.subr.bf16.mxu1 %v4506_v1 }
  0x6a   : > { %4100 = vmatpush3.bf16.msra.mxu0 %v4634_v16  ;;  %v4864_v16 = vld [vmem:[%s4600_s10 + $0x4c] sm:$0xff]  }
  0x6b   : > { %4149 = vmatprep.subr.bf16.mxu0 %v4891_v22 }
  0x6c   : > { %1630 = vmatpush2.bf16.msra.mxu1 %v4383_v2 }
  0x6d   : > { %1051 = vmatmul.mubr.bf16.gmra.mxu0 %v4807_v3  ;;  %2435 = vmatprep.subr.bf16.mxu1 %v4506_v1 }
  0x6e   : > { %1057 = vmatprep.mubr.bf16.mxu0 %v4810_v4 }
  0x6f   : > { %1632 = vmatmul.mubr.bf16.vlgmr.msra.gmra.mxu1 %v4719_v43  ;;  %v4998_v43 = vld [vmem:[%s4600_s10 + $0x80] sm:$0xff]  }
  0x70   : > { %2436 = vmatpush1.bf16.msra.mxu1 %v4386_v5  ;;  %1639 = vmatprep.mubr.bf16.mxu1 %v4724_v45 }
  0x71   : > { %2437 = vmatprep.subr.bf16.mxu1 %v4506_v1 }
  0x74   : > { %2438 = vmatpush1.bf16.msra.mxu1 %v4391_v6 }
  0x75   : > { %1058 = vmatmul.mubr.bf16.gmra.mxu0 %v4825_v7  ;;  %2439 = vmatprep.subr.bf16.mxu1 %v4506_v1 }
  0x76   : > { %1064 = vmatprep.mubr.bf16.mxu0 %v4829_v8 }
  0x77   : > { %1640 = vmatmul.mubr.bf16.gmra.mxu1 %v4740_v49 }
  0x78   : > { %1647 = vmatprep.mubr.bf16.mxu1 %v4745_v51  ;;  %2440 = vmatpush1.bf16.msra.mxu1 %v4394_v9  ;;  %v5066_v9 = vld [vmem:[%s4600_s10 + $0xb0] sm:$0xff]  }
  0x79   : > { %2441 = vmatprep.subr.bf16.mxu1 %v4506_v1 }
  0x7c   : > { %2442 = vmatpush1.bf16.msra.mxu1 %v4399_v10  ;;  %v5069_v10 = vld [vmem:[%s4600_s10 + $0xc4] sm:$0xff]  }
  0x7d   : > { %1065 = vmatmul.mubr.bf16.gmra.mxu0 %v4843_v11  ;;  %2443 = vmatprep.subr.bf16.mxu1 %v4506_v1 }
  0x7e   : > { %1072 = vmatprep.mubr.bf16.mxu0 %v4847_v12 }
  0x7f   : > { %1648 = vmatmul.mubr.bf16.gmra.mxu1 %v4762_v55 }
  0x80   : > { %1655 = vmatprep.mubr.bf16.mxu1 %v4767_v57  ;;  %2444 = vmatpush1.bf16.msra.mxu1 %v4402_v13 }
  0x81   : > { %2445 = vmatprep.subr.bf16.mxu1 %v4506_v1 }
  0x84   : > { %2446 = vmatpush1.bf16.msra.mxu1 %v4407_v14 }
  0x85   : > { %1073 = vmatmul.mubr.bf16.gmra.mxu0 %v4860_v15  ;;  %2447 = vmatprep.subr.bf16.mxu1 %v4506_v1 }
  0x86   : > { %1079 = vmatprep.mubr.bf16.mxu0 %v4864_v16 }
  0x87   : > { %1656 = vmatmul.mubr.bf16.gmra.mxu1 %v4785_v61 }
  0x88   : > { %1663 = vmatprep.mubr.bf16.mxu1 %v4788_v62  ;;  %2448 = vmatpush1.bf16.msra.mxu1 %v4410_v17 }
  0x89   : > { %2449 = vmatprep.subr.bf16.mxu1 %v4506_v1 }
  0x8c   : > { %2450 = vmatpush1.bf16.msra.mxu1 %v4415_v18 }
  0x8d   : > { %1080 = vmatmul.mubr.bf16.gmra.mxu0 %v4878_v19  ;;  %2451 = vmatprep.subr.bf16.mxu1 %v4506_v1 }
  0x8e   : > { %1086 = vmatprep.mubr.bf16.mxu0 %v4882_v20 }
  0x8f   : > { %1664 = vmatmul.mubr.bf16.gmra.mxu1 %v4807_v3 }
  0x90   : > { %1671 = vmatprep.mubr.bf16.mxu1 %v4810_v4  ;;  %2452 = vmatpush2.bf16.msra.mxu1 %v4418_v21  ;;  %v5080_v21 = vld [vmem:[%s4600_s10 + $0xb8] sm:$0xff]  }
  0x91   : > { %2453 = vmatprep.subr.bf16.mxu1 %v4506_v1 }
  0x94   : > { %2454 = vmatpush2.bf16.msra.mxu1 %v4423_v25  ;;  %v5083_v25 = vld [vmem:[%s4600_s10 + $0x18] sm:$0xff]  }
  0x95   : > { %1087 = vmatmul.mubr.bf16.gmra.mxu0 %v4899_v23  ;;  %2455 = vmatprep.subr.bf16.mxu1 %v4506_v1 }
  0x96   : > { %1094 = vmatprep.mubr.bf16.mxu0 %v4903_v24 }
  0x97   : > { %1672 = vmatmul.mubr.bf16.gmra.mxu1 %v4825_v7 }
  0x98   : > { %1679 = vmatprep.mubr.bf16.mxu1 %v4829_v8  ;;  %2456 = vmatpush2.bf16.msra.mxu1 %v4426_v26 }
  0x99   : > { %2457 = vmatprep.subr.bf16.mxu1 %v4506_v1 }
  0x9c   : > { %2458 = vmatpush2.bf16.msra.mxu1 %v4431_v27 }
  0x9d   : > { %1095 = vmatmul.mubr.bf16.gmra.mxu0 %v4921_v28  ;;  %2459 = vmatprep.subr.bf16.mxu1 %v4506_v1 }
  0x9e   : > { %1101 = vmatprep.mubr.bf16.mxu0 %v4925_v29 }
  0x9f   : > { %1680 = vmatmul.mubr.bf16.gmra.mxu1 %v4843_v11 }
  0xa0   : > { %1687 = vmatprep.mubr.bf16.mxu1 %v4847_v12  ;;  %2460 = vmatpush2.bf16.msra.mxu1 %v4434_v30 }
  0xa1   : > { %2461 = vmatprep.subr.bf16.mxu1 %v4506_v1 }
  0xa4   : > { %2462 = vmatpush2.bf16.msra.mxu1 %v4440_v31 }
  0xa5   : > { %1102 = vmatmul.mubr.bf16.gmra.mxu0 %v4939_v32  ;;  %2463 = vmatprep.subr.bf16.mxu1 %v4506_v1 }
  0xa6   : > { %1108 = vmatprep.mubr.bf16.mxu0 %v4943_v33 }
  0xa7   : > { %1688 = vmatmul.mubr.bf16.gmra.mxu1 %v4860_v15 }
  0xa8   : > { %1695 = vmatprep.mubr.bf16.mxu1 %v4864_v16  ;;  %2464 = vmatpush2.bf16.msra.mxu1 %v4446_v34  ;;  %v5098_v34 = vld [vmem:[%s4600_s10 + $0x20] sm:$0xff]  }
  0xa9   : > { %2465 = vmatprep.subr.bf16.mxu1 %v4506_v1  ;;  %v4978_v1 = vld [vmem:[%s4600_s10 + $0x70] sm:$0xff]  }
  0xac   : > { %2466 = vmatpush2.bf16.msra.mxu1 %v4454_v35  ;;  %v5101_v35 = vld [vmem:[%s4600_s10 + $0x28] sm:$0xff]  }
  0xad   : > { %1109 = vmatmul.mubr.bf16.gmra.mxu0 %v4957_v36 }
  0xae   : > { %1116 = vmatprep.mubr.bf16.mxu0 %v4961_v37 }
  0xaf   : > { %1696 = vmatmul.mubr.bf16.gmra.mxu1 %v4878_v19 }
  0xb0   : > { %1703 = vmatprep.mubr.bf16.mxu1 %v4882_v20 }
  0xb5   : > { %1117 = vmatmul.mubr.bf16.gmra.mxu0 %v4968_v38 }
  0xb6   : > { %1123 = vmatprep.mubr.bf16.mxu0 %v4971_v39 }
  0xb7   : > { %1704 = vmatmul.mubr.bf16.gmra.mxu1 %v4899_v23 }
  0xb8   : > { %1711 = vmatprep.mubr.bf16.mxu1 %v4903_v24 }
  0xbd   : > { %1124 = vmatmul.mubr.bf16.gmra.mxu0 %v4978_v1 }
  0xbe   : > { %1130 = vmatprep.mubr.bf16.mxu0 %v4981_v40 }
  0xbf   : > { %1712 = vmatmul.mubr.bf16.gmra.mxu1 %v4921_v28 }
  0xc0   : > { %1719 = vmatprep.mubr.bf16.mxu1 %v4925_v29 }
  0xc5   : > { %1131 = vmatmul.mubr.bf16.gmra.mxu0 %v4988_v41 }
  0xc6   : > { %1138 = vmatprep.mubr.bf16.mxu0 %v4991_v42 }
  0xc7   : > { %1720 = vmatmul.mubr.bf16.gmra.mxu1 %v4939_v32 }
  0xc8   : > { %1727 = vmatprep.mubr.bf16.mxu1 %v4943_v33 }
  0xcd   : > { %1139 = vmatmul.mubr.bf16.gmra.mxu0 %v4998_v43 }
  0xce   : > { %1145 = vmatprep.mubr.bf16.mxu0 %v5001_v44 }
  0xcf   : > { %1728 = vmatmul.mubr.bf16.gmra.mxu1 %v4957_v36 }
  0xd0   : > { %1735 = vmatprep.mubr.bf16.mxu1 %v4961_v37 }
  0xd5   : > { %1146 = vmatmul.mubr.bf16.gmra.mxu0 %v5008_v46 }
  0xd6   : > { %1152 = vmatprep.mubr.bf16.mxu0 %v5011_v47 }
  0xd7   : > { %1736 = vmatmul.mubr.bf16.gmra.mxu1 %v4968_v38 }
  0xd8   : > { %1743 = vmatprep.mubr.bf16.mxu1 %v4971_v39 }
  0xdd   : > { %1153 = vmatmul.mubr.bf16.gmra.mxu0 %v5018_v48 }
  0xde   : > { %1160 = vmatprep.mubr.bf16.mxu0 %v5021_v50 }
  0xdf   : > { %1744 = vmatmul.mubr.bf16.gmra.mxu1 %v4978_v1 }
  0xe0   : > { %1751 = vmatprep.mubr.bf16.mxu1 %v4981_v40 }
  0xe5   : > { %1161 = vmatmul.mubr.bf16.gmra.mxu0 %v5028_v52 }
  0xe6   : > { %1167 = vmatprep.mubr.bf16.mxu0 %v5031_v53 }
  0xe7   : > { %1752 = vmatmul.mubr.bf16.gmra.mxu1 %v4988_v41 }
  0xe8   : > { %1759 = vmatprep.mubr.bf16.mxu1 %v4991_v42 }
  0xed   : > { %1168 = vmatmul.mubr.bf16.gmra.mxu0 %v5038_v54 }
  0xee   : > { %1174 = vmatprep.mubr.bf16.mxu0 %v5041_v56  ;;  %v5045_v58 = vpop.f32.mrf.mxu1 }
  0xef   : > { %5962 = vst [vmem:[#allocation2_spill] sm:$0xff] %v5045_v58  ;;  %1760 = vmatmul.mubr.bf16.gmra.mxu1 %v4998_v43 }
  0xf0   : > { %1767 = vmatprep.mubr.bf16.mxu1 %v5001_v44  ;;  %v5049_v59 = vpop.f32.mrf.mxu1 }
  0xf1   : > { %5963 = vst [vmem:[#allocation3_spill] sm:$0xff] %v5049_v59 }
  0xf2   : > { %v5057_v0 = vpop.f32.mrf.mxu1 }
  0xf3   : > { %5964 = vst [vmem:[#allocation4_spill] sm:$0xff] %v5057_v0 }
  0xf4   : > { %v1293_v2 = vpop.f32.mrf.mxu1 }
  0xf5   : > { %1175 = vmatmul.mubr.bf16.gmra.mxu0 %v5052_v60 }
  0xf6   : > { %1182 = vmatprep.mubr.bf16.mxu0 %v5055_v63  ;;  %v5061_v5 = vpop.f32.mrf.mxu1 }
  0xf7   : > { %5965 = vst [vmem:[#allocation5_spill] sm:$0xff] %v5061_v5  ;;  %1768 = vmatmul.mubr.bf16.gmra.mxu1 %v5008_v46 }
  0xf8   : > { %1775 = vmatprep.mubr.bf16.mxu1 %v5011_v47  ;;  %v1305_v6 = vpop.f32.mrf.mxu1 }
  0xf9   : > { %v4441_v6 = vld [vmem:[%s5959_s1 + $0x170] sm:$0xff]  }
  0xfa   : > { %v4124_v13 = vpop.f32.mrf.mxu1 }
  0xfc   : > { %v5071_v14 = vpop.f32.mrf.mxu1 }
  0xfd   : > { %5966 = vst [vmem:[#allocation6_spill] sm:$0xff] %v5071_v14  ;;  %1183 = vmatmul.mubr.bf16.gmra.mxu0 %v5066_v9 }
  0xfe   : > { %1189 = vmatprep.mubr.bf16.mxu0 %v5069_v10  ;;  %v4127_v17 = vpop.f32.mrf.mxu1 }
  0xff   : > { %1776 = vmatmul.mubr.bf16.gmra.mxu1 %v5018_v48 }
 0x100   : > { %1783 = vmatprep.mubr.bf16.mxu1 %v5021_v50  ;;  %v5077_v18 = vpop.f32.mrf.mxu1 }
 0x101   : > { %5967 = vst [vmem:[#allocation7_spill] sm:$0xff] %v5077_v18 }
 0x102   : > { %v5085_v26 = vpop.f32.mrf.mxu1 }
 0x103   : > { %5968 = vst [vmem:[#allocation8_spill] sm:$0xff] %v5085_v26 }
 0x104   : > { %v5087_v27 = vpop.f32.mrf.mxu1 }
 0x105   : > { %5969 = vst [vmem:[#allocation9_spill] sm:$0xff] %v5087_v27  ;;  %1190 = vmatmul.mubr.bf16.gmra.mxu0 %v5080_v21  ;;  %v5123_v27 = vld [vmem:[%s4600_s10 + $0x30] sm:$0xff]  }
 0x106   : > { %4101 = vmatprep.mubr.bf16.mxu0 %v5083_v25  ;;  %v5091_v30 = vpop.f32.mrf.mxu1 }
 0x107   : > { %5970 = vst [vmem:[#allocation10_spill] sm:$0xff] %v5091_v30  ;;  %1784 = vmatmul.mubr.bf16.gmra.mxu1 %v5028_v52 }
 0x108   : > { %1791 = vmatprep.mubr.bf16.mxu1 %v5031_v53  ;;  %v5095_v31 = vpop.f32.mrf.mxu1 }
 0x109   : > { %5971 = vst [vmem:[#allocation11_spill] sm:$0xff] %v5095_v31 }
 0x10a   : > { %v5103_v2 = vpop.f32.mrf.mxu1 }
 0x10b   : > { %5972 = vst [vmem:[#allocation12_spill] sm:$0xff] %v5103_v2  ;;  %v4444_v2 = vld [vmem:[%s5959_s1 + $0x168] sm:$0xff]  }
 0x10c   : > { %v1337_v13 = vpop.f32.mrf.mxu1 }
 0x10d   : > { %v5108_v17 = vpop.f32.mrf.mxu0  ;;  %4102 = vmatmul.mubr.bf16.vlgmr.msra.gmra.mxu0 %v5098_v34 }
 0x10e   : > { %5973 = vst [vmem:[#allocation13_spill] sm:$0xff] %v5108_v17  ;;  %4150 = vmatpush3.bf16.msra.mxu0 %v4891_v22  ;;  %4105 = vmatprep.mubr.bf16.mxu0 %v5101_v35  ;;  %v5126_v22 = vld [vmem:[%s4600_s10 + $0x38] sm:$0xff]  }
 0x10f   : > { %v5113_v31 = vpop.f32.mrf.mxu1  ;;  %1792 = vmatmul.mubr.bf16.gmra.mxu1 %v5038_v54  ;;  %v1024_v30 = vpop.f32.mrf.mxu0  ;;  %4151 = vmatprep.subr.bf16.mxu0 %v4441_v6 }
 0x110   : > { %5974 = vst [vmem:[#allocation14_spill] sm:$0xff] %v5113_v31  ;;  %1799 = vmatprep.mubr.bf16.mxu1 %v5041_v56  ;;  %v4445_v30 = vld [vmem:[%s5959_s1 + $0x160] sm:$0xff]  }
 0x111   : > { %v1349_v13 = vpop.f32.mrf.mxu1  ;;  %v5120_v26 = vpop.f32.mrf.mxu0 }
 0x112   : > { %5975 = vst [vmem:[#allocation15_spill] sm:$0xff] %v5120_v26  ;;  %4152 = vmatpush3.bf16.msra.mxu0 %v4441_v6 }
 0x113   : > { %v4136_v18 = vpop.f32.mrf.mxu1  ;;  %v1027_v31 = vpop.f32.mrf.mxu0  ;;  %4153 = vmatprep.subr.bf16.mxu0 %v4444_v2 }
 0x114   : > { %v4449_v31 = vld [vmem:[%s5959_s1 + $0x158] sm:$0xff]  }
 0x115   : > { %v5131_v14 = vpop.f32.mrf.mxu1  ;;  %v1030_v5 = vpop.f32.mrf.mxu0  ;;  %4106 = vmatmul.mubr.bf16.gmra.mxu0 %v5123_v27 }
 0x116   : > { %5976 = vst [vmem:[#allocation16_spill] sm:$0xff] %v5131_v14  ;;  %4154 = vmatpush3.bf16.msra.mxu0 %v4444_v2  ;;  %4109 = vmatprep.mubr.bf16.mxu0 %v5126_v22  ;;  %v5145_v5 = vld [vmem:[%s4600_s10 + $0x40] sm:$0xff]   ;;  %v5148_v2 = vld [vmem:[%s4600_s10 + $0x48] sm:$0xff]  }
 0x117   : > { %v4139_v6 = vpop.f32.mrf.mxu1  ;;  %1800 = vmatmul.mubr.bf16.gmra.mxu1 %v5052_v60  ;;  %v1031_v18 = vpop.f32.mrf.mxu0  ;;  %4155 = vmatprep.subr.bf16.mxu0 %v4445_v30 }
 0x118   : > { %1807 = vmatprep.mubr.bf16.mxu1 %v5055_v63  ;;  %v4450_v18 = vld [vmem:[%s5959_s1 + $0x150] sm:$0xff]  }
 0x119   : > { %v5140_v13 = vpop.f32.mrf.mxu1  ;;  %v5142_v14 = vpop.f32.mrf.mxu0 }
 0x11a   : > { %5977 = vst [vmem:[#allocation17_spill] sm:$0xff] %v5140_v13  ;;  %5978 = vst [vmem:[#allocation18_spill] sm:$0xff] %v5142_v14  ;;  %4156 = vmatpush3.bf16.msra.mxu0 %v4445_v30 }
 0x11b   : > { %v5150_v6 = vpop.f32.mrf.mxu1  ;;  %v1034_v0 = vpop.f32.mrf.mxu0  ;;  %4157 = vmatprep.subr.bf16.mxu0 %v4449_v31 }
 0x11c   : > { %5979 = vst [vmem:[#allocation19_spill] sm:$0xff] %v5150_v6  ;;  %v4453_v6 = vld [vmem:[%s5959_s1 + $0x148] sm:$0xff]  }
 0x11d   : > { %v5155_v59 = vpop.f32.mrf.mxu1  ;;  %v5157_v58 = vpop.f32.mrf.mxu0  ;;  %4110 = vmatmul.mubr.bf16.gmra.mxu0 %v5145_v5 }
 0x11e   : > { %5980 = vst [vmem:[#allocation20_spill] sm:$0xff] %v5155_v59  ;;  %5981 = vst [vmem:[#allocation21_spill] sm:$0xff] %v5157_v58  ;;  %4158 = vmatpush3.bf16.msra.mxu0 %v4449_v31  ;;  %4113 = vmatprep.mubr.bf16.mxu0 %v5148_v2  ;;  %v5171_v58 = vld [vmem:[%s4600_s10 + $0x50] sm:$0xff]  }
 0x11f   : > { %v5161_v30 = vpop.f32.mrf.mxu1  ;;  %1808 = vmatmul.mubr.bf16.gmra.mxu1 %v5066_v9  ;;  %v1039_v0 = vpop.f32.mrf.mxu0  ;;  %4159 = vmatprep.subr.bf16.mxu0 %v4450_v18 }
 0x120   : > { %5982 = vst [vmem:[#allocation22_spill] sm:$0xff] %v5161_v30  ;;  %1815 = vmatprep.mubr.bf16.mxu1 %v5069_v10  ;;  %v4455_v0 = vld [vmem:[%s5959_s1 + $0x140] sm:$0xff]  }
 0x121   : > { %v5168_v59 = vpop.f32.mrf.mxu1  ;;  %v1040_v13 = vpop.f32.mrf.mxu0 }
 0x122   : > { %5983 = vst [vmem:[#allocation23_spill] sm:$0xff] %v5168_v59  ;;  %4160 = vmatpush3.bf16.msra.mxu0 %v4450_v18 }
 0x123   : > { %v5173_v31 = vpop.f32.mrf.mxu1  ;;  %v1041_v30 = vpop.f32.mrf.mxu0  ;;  %4161 = vmatprep.subr.bf16.mxu0 %v4453_v6 }
 0x124   : > { %5984 = vst [vmem:[#allocation24_spill] sm:$0xff] %v5173_v31  ;;  %v4456_v30 = vld [vmem:[%s5959_s1 + $0x238] sm:$0xff]   ;;  %v4464_v31 = vld [vmem:[%s4600_s10 + $0xc] sm:$0xff]  }
 0x125   : > { %v1381_v14 = vpop.f32.mrf.mxu1  ;;  %v5178_v26 = vpop.f32.mrf.mxu0  ;;  %4114 = vmatmul.mubr.bf16.gmra.mxu0 %v5171_v58 }
 0x126   : > { %5985 = vst [vmem:[#allocation25_spill] sm:$0xff] %v5178_v26  ;;  %4162 = vmatpush3.bf16.msra.mxu0 %v4453_v6  ;;  %4165 = vmatprep.mubr.bf16.mxu0 %v5083_v25 }
 0x127   : > { %v5182_v13 = vpop.f32.mrf.mxu1  ;;  %1816 = vmatmul.mubr.bf16.gmra.mxu1 %v5080_v21  ;;  %v1046_v18 = vpop.f32.mrf.mxu0  ;;  %4163 = vmatprep.subr.bf16.mxu0 %v4455_v0 }
 0x128   : > { %5986 = vst [vmem:[#allocation26_spill] sm:$0xff] %v5182_v13  ;;  %2467 = vmatprep.mubr.bf16.mxu1 %v4464_v31  ;;  %v4457_v13 = vld [vmem:[%s5959_s1 + $0x230] sm:$0xff]  }
 0x129   : > { %v1393_v14 = vpop.f32.mrf.mxu1  ;;  %v5189_v59 = vpop.f32.mrf.mxu0 }
 0x12a   : > { %5987 = vst [vmem:[#allocation27_spill] sm:$0xff] %v5189_v59  ;;  %4164 = vmatpush3.bf16.msra.mxu0 %v4455_v0  ;;  %v4465_v14 = vld [vmem:[%s4600_s10] sm:$0xff]  }
 0x12b   : > { %v4148_v6 = vpop.f32.mrf.mxu1  ;;  %v1049_v26 = vpop.f32.mrf.mxu0  ;;  %4213 = vmatprep.subr.bf16.mxu0 %v4456_v30 }
 0x12c   : > { %v4458_v26 = vld [vmem:[%s5959_s1 + $0x228] sm:$0xff]  }
 0x12d   : > { %v5194_v18 = vpop.f32.mrf.mxu1  ;;  %v1052_v17 = vpop.f32.mrf.mxu0  ;;  %4166 = vmatmul.mubr.bf16.vlgmr.msra.gmra.mxu0 %v5098_v34 }
 0x12e   : > { %5988 = vst [vmem:[#allocation28_spill] sm:$0xff] %v5194_v18  ;;  %4214 = vmatpush3.bf16.msra.mxu0 %v4456_v30  ;;  %4169 = vmatprep.mubr.bf16.mxu0 %v5101_v35 }
 0x12f   : > { %v5198_v31 = vpop.f32.mrf.mxu1  ;;  %2468 = vmatmul.mubr.bf16.vlgmr.msra.gmra.mxu1 %v4465_v14  ;;  %v1053_v0 = vpop.f32.mrf.mxu0  ;;  %4215 = vmatprep.subr.bf16.mxu0 %v4457_v13  ;;  %v4459_v14 = vld [vmem:[%s5959_s1 + $0x220] sm:$0xff]  }
 0x130   : > { %2475 = vmatprep.mubr.bf16.mxu1 %v4724_v45 }
 0x131   : > { %v1635_v6 = vpop.f32.mrf.mxu1  ;;  %v5205_v18 = vpop.f32.mrf.mxu0 }
 0x132   : > { %5989 = vst [vmem:[#allocation29_spill] sm:$0xff] %v5205_v18  ;;  %4216 = vmatpush3.bf16.msra.mxu0 %v4457_v13  ;;  %v4460_v6 = vld [vmem:[%s5959_s1 + $0x218] sm:$0xff]  }
 0x133   : > { %v5207_v17 = vpop.f32.mrf.mxu1  ;;  %v1056_v30 = vpop.f32.mrf.mxu0  ;;  %4217 = vmatprep.subr.bf16.mxu0 %v4458_v26 }
 0x135   : > { %v1638_v0 = vpop.f32.mrf.mxu1  ;;  %v5212_v59 = vpop.f32.mrf.mxu0  ;;  %4170 = vmatmul.mubr.bf16.gmra.mxu0 %v5123_v27 }
 0x136   : > { %5990 = vst [vmem:[#allocation30_spill] sm:$0xff] %v5212_v59  ;;  %4173 = vmatprep.mubr.bf16.mxu0 %v5126_v22  ;;  %4218 = vmatpush3.bf16.msra.mxu0 %v4458_v26  ;;  %v4461_v26 = vld [vmem:[%s5959_s1 + $0x210] sm:$0xff]  }
 0x137   : > { %v5216_v45 = vpop.f32.mrf.mxu1  ;;  %2476 = vmatmul.mubr.bf16.gmra.mxu1 %v4740_v49  ;;  %v1061_v13 = vpop.f32.mrf.mxu0  ;;  %4219 = vmatprep.subr.bf16.mxu0 %v4459_v14 }
 0x138   : > { %2483 = vmatprep.mubr.bf16.mxu1 %v4745_v51 }
 0x139   : > { %v1643_v30 = vpop.f32.mrf.mxu1  ;;  %v1062_v0 = vpop.f32.mrf.mxu0 }
 0x13a   : > { %4220 = vmatpush3.bf16.msra.mxu0 %v4459_v14 }
 0x13b   : > { %v5223_v18 = vpop.f32.mrf.mxu1  ;;  %v1063_v59 = vpop.f32.mrf.mxu0  ;;  %4221 = vmatprep.subr.bf16.mxu0 %v4460_v6 }
 0x13c   : > { %v4462_v59 = vld [vmem:[%s5959_s1 + $0x208] sm:$0xff]  }
 0x13d   : > { %v1646_v49 = vpop.f32.mrf.mxu1  ;;  %v5228_v13 = vpop.f32.mrf.mxu0  ;;  %4174 = vmatmul.mubr.bf16.gmra.mxu0 %v5145_v5 }
 0x13e   : > { %5991 = vst [vmem:[#allocation31_spill] sm:$0xff] %v5228_v13  ;;  %4177 = vmatprep.mubr.bf16.mxu0 %v5148_v2  ;;  %4222 = vmatpush3.bf16.msra.mxu0 %v4460_v6 }
 0x13f   : > { %v5232_v51 = vpop.f32.mrf.mxu1  ;;  %2484 = vmatmul.mubr.bf16.gmra.mxu1 %v4762_v55  ;;  %v1068_v14 = vpop.f32.mrf.mxu0  ;;  %4223 = vmatprep.subr.bf16.mxu0 %v4461_v26  ;;  %v4463_v55 = vld [vmem:[%s5959_s1 + $0x200] sm:$0xff]  }
 0x140   : > { %5992 = vst [vmem:[#allocation32_spill] sm:$0xff] %v5232_v51  ;;  %2491 = vmatprep.mubr.bf16.mxu1 %v4767_v57  ;;  %v5248_v51 = vld [vmem:[%s4600_s10 + $0x58] sm:$0xff]  }
 0x141   : > { %v1651_v30 = vpop.f32.mrf.mxu1  ;;  %v5239_v0 = vpop.f32.mrf.mxu0 }
 0x142   : > { %5993 = vst [vmem:[#allocation33_spill] sm:$0xff] %v5239_v0  ;;  %4224 = vmatpush3.bf16.msra.mxu0 %v4461_v26 }
 0x143   : > { %v5241_v49 = vpop.f32.mrf.mxu1  ;;  %v1071_v6 = vpop.f32.mrf.mxu0  ;;  %4225 = vmatprep.subr.bf16.mxu0 %v4462_v59 }
 0x144   : > { %5994 = vst [vmem:[#allocation34_spill] sm:$0xff] %v5241_v49 }
 0x145   : > { %v1654_v14 = vpop.f32.mrf.mxu1  ;;  %v1074_v13 = vpop.f32.mrf.mxu0  ;;  %4178 = vmatmul.mubr.bf16.gmra.mxu0 %v5171_v58 }
 0x146   : > { %4181 = vmatprep.mubr.bf16.mxu0 %v5248_v51  ;;  %4226 = vmatpush3.bf16.msra.mxu0 %v4462_v59  ;;  %v5262_v59 = vld [vmem:[%s4600_s10 + $0x60] sm:$0xff]  }
 0x147   : > { %v5251_v57 = vpop.f32.mrf.mxu1  ;;  %2492 = vmatmul.mubr.bf16.gmra.mxu1 %v4785_v61  ;;  %v1075_v26 = vpop.f32.mrf.mxu0  ;;  %4227 = vmatprep.subr.bf16.mxu0 %v4463_v55  ;;  %v5266_v61 = vld [vmem:[%s4600_s10 + $0x68] sm:$0xff]  }
 0x148   : > { %2499 = vmatprep.mubr.bf16.mxu1 %v4788_v62 }
 0x149   : > { %v1659_v30 = vpop.f32.mrf.mxu1  ;;  %v5255_v6 = vpop.f32.mrf.mxu0 }
 0x14a   : > { %5995 = vst [vmem:[#allocation35_spill] sm:$0xff] %v5255_v6  ;;  %4228 = vmatpush3.bf16.msra.mxu0 %v4463_v55 }
 0x14b   : > { %v5257_v13 = vpop.f32.mrf.mxu1  ;;  %v1078_v14 = vpop.f32.mrf.mxu0 }
 0x14c   : > { %5996 = vst [vmem:[#allocation36_spill] sm:$0xff] %v5257_v13  ;;  %v5278_v13 = vld [vmem:[%s4600_s10 + $0x70] sm:$0xff]  }
 0x14d   : > { %v1662_v0 = vpop.f32.mrf.mxu1  ;;  %v5259_v49 = vpop.f32.mrf.mxu0  ;;  %4182 = vmatmul.mubr.bf16.gmra.mxu0 %v5262_v59 }
 0x14e   : > { %5997 = vst [vmem:[#allocation37_spill] sm:$0xff] %v5259_v49  ;;  %4185 = vmatprep.mubr.bf16.mxu0 %v5266_v61 }
 0x14f   : > { %v5269_v62 = vpop.f32.mrf.mxu1  ;;  %2500 = vmatmul.mubr.bf16.gmra.mxu1 %v4807_v3  ;;  %v1083_v55 = vpop.f32.mrf.mxu0 }
 0x150   : > { %5998 = vst [vmem:[#allocation38_spill] sm:$0xff] %v5269_v62  ;;  %2507 = vmatprep.mubr.bf16.mxu1 %v4810_v4  ;;  %v5282_v62 = vld [vmem:[%s4600_s10 + $0x78] sm:$0xff]  }
 0x151   : > { %v1667_v0 = vpop.f32.mrf.mxu1  ;;  %v1084_v26 = vpop.f32.mrf.mxu0 }
 0x153   : > { %v5273_v30 = vpop.f32.mrf.mxu1  ;;  %v1085_v14 = vpop.f32.mrf.mxu0 }
 0x154   : > { %5999 = vst [vmem:[#allocation39_spill] sm:$0xff] %v5273_v30  ;;  %v5294_v30 = vld [vmem:[%s4600_s10 + $0x80] sm:$0xff]  }
 0x155   : > { %v1670_v49 = vpop.f32.mrf.mxu1  ;;  %v5275_v6 = vpop.f32.mrf.mxu0  ;;  %4186 = vmatmul.mubr.bf16.gmra.mxu0 %v5278_v13 }
 0x156   : > { %6000 = vst [vmem:[#allocation40_spill] sm:$0xff] %v5275_v6  ;;  %4189 = vmatprep.mubr.bf16.mxu0 %v5282_v62 }
 0x157   : > { %v5285_v3 = vpop.f32.mrf.mxu1  ;;  %2508 = vmatmul.mubr.bf16.gmra.mxu1 %v4825_v7  ;;  %v1090_v4 = vpop.f32.mrf.mxu0 }
 0x158   : > { %6001 = vst [vmem:[#allocation41_spill] sm:$0xff] %v5285_v3  ;;  %2515 = vmatprep.mubr.bf16.mxu1 %v4829_v8  ;;  %v5298_v3 = vld [vmem:[%s4600_s10 + $0x88] sm:$0xff]  }
 0x159   : > { %v1675_v49 = vpop.f32.mrf.mxu1  ;;  %v5289_v55 = vpop.f32.mrf.mxu0 }
 0x15a   : > { %6002 = vst [vmem:[#allocation42_spill] sm:$0xff] %v5289_v55 }
 0x15b   : > { %v5291_v0 = vpop.f32.mrf.mxu1  ;;  %v1093_v26 = vpop.f32.mrf.mxu0 }
 0x15c   : > { %6003 = vst [vmem:[#allocation43_spill] sm:$0xff] %v5291_v0  ;;  %v5312_v0 = vld [vmem:[%s4600_s10 + $0x90] sm:$0xff]  }
 0x15d   : > { %v1678_v14 = vpop.f32.mrf.mxu1  ;;  %v1096_v6 = vpop.f32.mrf.mxu0  ;;  %4190 = vmatmul.mubr.bf16.gmra.mxu0 %v5294_v30 }
 0x15e   : > { %4193 = vmatprep.mubr.bf16.mxu0 %v5298_v3 }
 0x15f   : > { %v5301_v7 = vpop.f32.mrf.mxu1  ;;  %2516 = vmatmul.mubr.bf16.gmra.mxu1 %v4843_v11  ;;  %v1097_v8 = vpop.f32.mrf.mxu0 }
 0x160   : > { %6004 = vst [vmem:[#allocation44_spill] sm:$0xff] %v5301_v7  ;;  %2523 = vmatprep.mubr.bf16.mxu1 %v4847_v12  ;;  %v5316_v7 = vld [vmem:[%s4600_s10 + $0x98] sm:$0xff]  }
 0x161   : > { %v1683_v4 = vpop.f32.mrf.mxu1  ;;  %v5305_v49 = vpop.f32.mrf.mxu0 }
 0x162   : > { %6005 = vst [vmem:[#allocation45_spill] sm:$0xff] %v5305_v49 }
 0x163   : > { %v5307_v6 = vpop.f32.mrf.mxu1  ;;  %v1100_v26 = vpop.f32.mrf.mxu0 }
 0x164   : > { %6006 = vst [vmem:[#allocation46_spill] sm:$0xff] %v5307_v6  ;;  %v5328_v6 = vld [vmem:[%s4600_s10 + $0xa0] sm:$0xff]  }
 0x165   : > { %v1686_v14 = vpop.f32.mrf.mxu1  ;;  %v5309_v55 = vpop.f32.mrf.mxu0  ;;  %4194 = vmatmul.mubr.bf16.gmra.mxu0 %v5312_v0 }
 0x166   : > { %6007 = vst [vmem:[#allocation47_spill] sm:$0xff] %v5309_v55  ;;  %4197 = vmatprep.mubr.bf16.mxu0 %v5316_v7 }
 0x167   : > { %v5319_v11 = vpop.f32.mrf.mxu1  ;;  %2524 = vmatmul.mubr.bf16.gmra.mxu1 %v4860_v15  ;;  %v1105_v12 = vpop.f32.mrf.mxu0 }
 0x168   : > { %6008 = vst [vmem:[#allocation48_spill] sm:$0xff] %v5319_v11  ;;  %2531 = vmatprep.mubr.bf16.mxu1 %v4864_v16  ;;  %v5332_v11 = vld [vmem:[%s4600_s10 + $0xa8] sm:$0xff]  }
 0x169   : > { %v1691_v8 = vpop.f32.mrf.mxu1  ;;  %v1106_v4 = vpop.f32.mrf.mxu0 }
 0x16b   : > { %v5323_v26 = vpop.f32.mrf.mxu1  ;;  %v1107_v14 = vpop.f32.mrf.mxu0 }
 0x16c   : > { %6009 = vst [vmem:[#allocation49_spill] sm:$0xff] %v5323_v26  ;;  %v5344_v26 = vld [vmem:[%s4600_s10 + $0xb0] sm:$0xff]  }
 0x16d   : > { %v1694_v49 = vpop.f32.mrf.mxu1  ;;  %v5325_v55 = vpop.f32.mrf.mxu0  ;;  %4198 = vmatmul.mubr.bf16.gmra.mxu0 %v5328_v6 }
 0x16e   : > { %6010 = vst [vmem:[#allocation50_spill] sm:$0xff] %v5325_v55  ;;  %4201 = vmatprep.mubr.bf16.mxu0 %v5332_v11 }
 0x16f   : > { %v5335_v15 = vpop.f32.mrf.mxu1  ;;  %2532 = vmatmul.mubr.bf16.gmra.mxu1 %v4878_v19  ;;  %v1112_v16 = vpop.f32.mrf.mxu0 }
 0x170   : > { %6011 = vst [vmem:[#allocation51_spill] sm:$0xff] %v5335_v15  ;;  %2539 = vmatprep.mubr.bf16.mxu1 %v4882_v20  ;;  %v5348_v15 = vld [vmem:[%s4600_s10 + $0xb8] sm:$0xff]  }
 0x171   : > { %v1699_v49 = vpop.f32.mrf.mxu1  ;;  %v5339_v12 = vpop.f32.mrf.mxu0 }
 0x172   : > { %6012 = vst [vmem:[#allocation52_spill] sm:$0xff] %v5339_v12 }
 0x173   : > { %v5341_v8 = vpop.f32.mrf.mxu1  ;;  %v1115_v4 = vpop.f32.mrf.mxu0 }
 0x174   : > { %6013 = vst [vmem:[#allocation53_spill] sm:$0xff] %v5341_v8  ;;  %v5362_v8 = vld [vmem:[%s4600_s10 + $0xc0] sm:$0xff]  }
 0x175   : > { %v1702_v14 = vpop.f32.mrf.mxu1  ;;  %v1118_v55 = vpop.f32.mrf.mxu0  ;;  %4202 = vmatmul.mubr.bf16.gmra.mxu0 %v5344_v26 }
 0x176   : > { %4205 = vmatprep.mubr.bf16.mxu0 %v5348_v15 }
 0x177   : > { %v5351_v19 = vpop.f32.mrf.mxu1  ;;  %2540 = vmatmul.mubr.bf16.gmra.mxu1 %v4899_v23  ;;  %v1119_v20 = vpop.f32.mrf.mxu0 }
 0x178   : > { %6014 = vst [vmem:[#allocation54_spill] sm:$0xff] %v5351_v19  ;;  %2547 = vmatprep.mubr.bf16.mxu1 %v4903_v24  ;;  %v5366_v19 = vld [vmem:[%s4600_s10 + $0xc8] sm:$0xff]  }
 0x179   : > { %v1707_v16 = vpop.f32.mrf.mxu1  ;;  %v5355_v49 = vpop.f32.mrf.mxu0 }
 0x17a   : > { %6015 = vst [vmem:[#allocation55_spill] sm:$0xff] %v5355_v49 }
 0x17b   : > { %v5357_v55 = vpop.f32.mrf.mxu1  ;;  %v1122_v4 = vpop.f32.mrf.mxu0 }
 0x17c   : > { %6016 = vst [vmem:[#allocation56_spill] sm:$0xff] %v5357_v55  ;;  %v5378_v55 = vld [vmem:[%s4600_s10 + $0xd0] sm:$0xff]   ;;  %s3490_s10 = sshll.u32 %s6129_s12, 1 }
 0x17d   : > { %v1710_v14 = vpop.f32.mrf.mxu1  ;;  %v5359_v12 = vpop.f32.mrf.mxu0  ;;  %4206 = vmatmul.mubr.bf16.gmra.mxu0 %v5362_v8  ;;  %s5723_s6 = scalar_lea.vmem %s5961_s3, %s3490_s10 }
 0x17e   : > { %6017 = vst [vmem:[#allocation57_spill] sm:$0xff] %v5359_v12  ;;  %4209 = vmatprep.mubr.bf16.mxu0 %v5366_v19 }
 0x17f   : > { %v5369_v23 = vpop.f32.mrf.mxu1  ;;  %2548 = vmatmul.mubr.bf16.gmra.mxu1 %v4921_v28  ;;  %v1127_v24 = vpop.f32.mrf.mxu0 }
 0x180   : > { %6018 = vst [vmem:[#allocation58_spill] sm:$0xff] %v5369_v23  ;;  %2555 = vmatprep.mubr.bf16.mxu1 %v4925_v29 }
 0x181   : > { %v1715_v20 = vpop.f32.mrf.mxu1  ;;  %v1128_v16 = vpop.f32.mrf.mxu0 }
 0x183   : > { %v5373_v4 = vpop.f32.mrf.mxu1  ;;  %v1129_v14 = vpop.f32.mrf.mxu0 }
 0x185   : > { %v1718_v12 = vpop.f32.mrf.mxu1  ;;  %v5375_v49 = vpop.f32.mrf.mxu0  ;;  %4210 = vmatmul.mubr.bf16.gmra.mxu0 %v5378_v55 }
 0x186   : > { %4229 = vmatprep.mubr.bf16.mxu0 %v5083_v25 }
 0x187   : > { %v5382_v23 = vpop.f32.mrf.mxu1  ;;  %2556 = vmatmul.mubr.bf16.gmra.mxu1 %v4939_v32  ;;  %v1134_v28 = vpop.f32.mrf.mxu0 }
 0x188   : > { %2563 = vmatprep.mubr.bf16.mxu1 %v4943_v33 }
 0x189   : > { %v1723_v29 = vpop.f32.mrf.mxu1  ;;  %v5386_v24 = vpop.f32.mrf.mxu0 }
 0x18a   : > { %6019 = vst [vmem:[#allocation59_spill] sm:$0xff] %v5386_v24 }
 0x18b   : > { %v5388_v20 = vpop.f32.mrf.mxu1  ;;  %v1137_v12 = vpop.f32.mrf.mxu0 }
 0x18d   : > { %v1726_v16 = vpop.f32.mrf.mxu1  ;;  %v1140_v14 = vpop.f32.mrf.mxu0  ;;  %4230 = vmatmul.mubr.bf16.vlgmr.msra.gmra.mxu0 %v5098_v34 }
 0x18e   : > { %4233 = vmatprep.mubr.bf16.mxu0 %v5101_v35 }
 0x18f   : > { %v5392_v25 = vpop.f32.mrf.mxu1  ;;  %2564 = vmatmul.mubr.bf16.gmra.mxu1 %v4957_v36  ;;  %v1141_v32 = vpop.f32.mrf.mxu0 }
 0x190   : > { %2571 = vmatprep.mubr.bf16.mxu1 %v4961_v37 }
 0x191   : > { %v1731_v33 = vpop.f32.mrf.mxu1  ;;  %v5396_v28 = vpop.f32.mrf.mxu0 }
 0x193   : > { %v5398_v29 = vpop.f32.mrf.mxu1  ;;  %v1144_v24 = vpop.f32.mrf.mxu0 }
 0x195   : > { %v1734_v12 = vpop.f32.mrf.mxu1  ;;  %v5400_v16 = vpop.f32.mrf.mxu0  ;;  %4234 = vmatmul.mubr.bf16.gmra.mxu0 %v5123_v27 }
 0x196   : > { %4237 = vmatprep.mubr.bf16.mxu0 %v5126_v22 }
 0x197   : > { %v5404_v34 = vpop.f32.mrf.mxu1  ;;  %2572 = vmatmul.mubr.bf16.gmra.mxu1 %v4968_v38  ;;  %v1149_v36 = vpop.f32.mrf.mxu0 }
 0x198   : > { %2579 = vmatprep.mubr.bf16.mxu1 %v4971_v39 }
 0x199   : > { %v1739_v37 = vpop.f32.mrf.mxu1  ;;  %v1150_v35 = vpop.f32.mrf.mxu0 }
 0x19b   : > { %v5408_v14 = vpop.f32.mrf.mxu1  ;;  %v1151_v32 = vpop.f32.mrf.mxu0 }
 0x19d   : > { %v1742_v24 = vpop.f32.mrf.mxu1  ;;  %v5410_v33 = vpop.f32.mrf.mxu0  ;;  %4238 = vmatmul.mubr.bf16.gmra.mxu0 %v5145_v5 }
 0x19e   : > { %4241 = vmatprep.mubr.bf16.mxu0 %v5148_v2 }
 0x19f   : > { %v5414_v27 = vpop.f32.mrf.mxu1  ;;  %2580 = vmatmul.mubr.bf16.gmra.mxu1 %v4978_v1  ;;  %v1156_v38 = vpop.f32.mrf.mxu0 }
 0x1a0   : > { %2587 = vmatprep.mubr.bf16.mxu1 %v4981_v40 }
 0x1a1   : > { %v1747_v39 = vpop.f32.mrf.mxu1  ;;  %v5418_v22 = vpop.f32.mrf.mxu0 }
 0x1a3   : > { %v5420_v12 = vpop.f32.mrf.mxu1  ;;  %v1159_v36 = vpop.f32.mrf.mxu0 }
 0x1a5   : > { %v1750_v37 = vpop.f32.mrf.mxu1  ;;  %v1162_v35 = vpop.f32.mrf.mxu0  ;;  %4242 = vmatmul.mubr.bf16.gmra.mxu0 %v5171_v58 }
 0x1a6   : > { %4245 = vmatprep.mubr.bf16.mxu0 %v5248_v51 }
 0x1a7   : > { %v5424_v5 = vpop.f32.mrf.mxu1  ;;  %2588 = vmatmul.mubr.bf16.gmra.mxu1 %v4988_v41  ;;  %v1163_v1 = vpop.f32.mrf.mxu0 }
 0x1a8   : > { %2595 = vmatprep.mubr.bf16.mxu1 %v4991_v42 }
 0x1a9   : > { %v1755_v40 = vpop.f32.mrf.mxu1  ;;  %v5428_v2 = vpop.f32.mrf.mxu0 }
 0x1ab   : > { %v5430_v32 = vpop.f32.mrf.mxu1  ;;  %v1166_v24 = vpop.f32.mrf.mxu0 }
 0x1ad   : > { %v1758_v38 = vpop.f32.mrf.mxu1  ;;  %v5432_v39 = vpop.f32.mrf.mxu0  ;;  %4246 = vmatmul.mubr.bf16.gmra.mxu0 %v5262_v59 }
 0x1ae   : > { %6020 = vst [vmem:[#allocation60_spill] sm:$0xff] %v5432_v39  ;;  %4249 = vmatprep.mubr.bf16.mxu0 %v5266_v61 }
 0x1af   : > { %v5436_v58 = vpop.f32.mrf.mxu1  ;;  %2596 = vmatmul.mubr.bf16.gmra.mxu1 %v4998_v43  ;;  %v1171_v41 = vpop.f32.mrf.mxu0 }
 0x1b0   : > { %2603 = vmatprep.mubr.bf16.mxu1 %v5001_v44 }
 0x1b1   : > { %v1763_v42 = vpop.f32.mrf.mxu1  ;;  %v1172_v51 = vpop.f32.mrf.mxu0 }
 0x1b3   : > { %v5440_v36 = vpop.f32.mrf.mxu1  ;;  %v1173_v37 = vpop.f32.mrf.mxu0 }
 0x1b5   : > { %v1766_v35 = vpop.f32.mrf.mxu1  ;;  %v5442_v1 = vpop.f32.mrf.mxu0  ;;  %4250 = vmatmul.mubr.bf16.gmra.mxu0 %v5278_v13 }
 0x1b6   : > { %4253 = vmatprep.mubr.bf16.mxu0 %v5282_v62 }
 0x1b7   : > { %v5446_v59 = vpop.f32.mrf.mxu1  ;;  %2604 = vmatmul.mubr.bf16.gmra.mxu1 %v5008_v46  ;;  %v1178_v43 = vpop.f32.mrf.mxu0 }
 0x1b8   : > { %2611 = vmatprep.mubr.bf16.mxu1 %v5011_v47 }
 0x1b9   : > { %v1771_v44 = vpop.f32.mrf.mxu1  ;;  %v5450_v61 = vpop.f32.mrf.mxu0 }
 0x1ba   : > { %6021 = vst [vmem:[#allocation61_spill] sm:$0xff] %v5450_v61 }
 0x1bb   : > { %v5452_v40 = vpop.f32.mrf.mxu1  ;;  %v1181_v24 = vpop.f32.mrf.mxu0 }
 0x1bd   : > { %v1774_v38 = vpop.f32.mrf.mxu1  ;;  %v1184_v41 = vpop.f32.mrf.mxu0  ;;  %4254 = vmatmul.mubr.bf16.gmra.mxu0 %v5294_v30 }
 0x1be   : > { %4257 = vmatprep.mubr.bf16.mxu0 %v5298_v3 }
 0x1bf   : > { %v5456_v13 = vpop.f32.mrf.mxu1  ;;  %2612 = vmatmul.mubr.bf16.gmra.mxu1 %v5018_v48  ;;  %v1185_v46 = vpop.f32.mrf.mxu0 }
 0x1c0   : > { %2619 = vmatprep.mubr.bf16.mxu1 %v5021_v50 }
 0x1c1   : > { %v1779_v47 = vpop.f32.mrf.mxu1  ;;  %v5460_v62 = vpop.f32.mrf.mxu0 }
 0x1c2   : > { %6022 = vst [vmem:[#allocation62_spill] sm:$0xff] %v5460_v62 }
 0x1c3   : > { %v5462_v42 = vpop.f32.mrf.mxu1  ;;  %v1188_v51 = vpop.f32.mrf.mxu0 }
 0x1c5   : > { %v1782_v37 = vpop.f32.mrf.mxu1  ;;  %v5464_v35 = vpop.f32.mrf.mxu0  ;;  %4258 = vmatmul.mubr.bf16.gmra.mxu0 %v5312_v0 }
 0x1c6   : > { %6023 = vst [vmem:[#allocation63_spill] sm:$0xff] %v5464_v35  ;;  %4261 = vmatprep.mubr.bf16.mxu0 %v5316_v7 }
 0x1c7   : > { %v5468_v30 = vpop.f32.mrf.mxu1  ;;  %2620 = vmatmul.mubr.bf16.gmra.mxu1 %v5028_v52  ;;  %v1193_v48 = vpop.f32.mrf.mxu0 }
 0x1c8   : > { %2627 = vmatprep.mubr.bf16.mxu1 %v5031_v53 }
 0x1c9   : > { %v1787_v50 = vpop.f32.mrf.mxu1  ;;  %v1194_v3 = vpop.f32.mrf.mxu0 }
 0x1cb   : > { %v5472_v43 = vpop.f32.mrf.mxu1  ;;  %v1195_v44 = vpop.f32.mrf.mxu0 }
 0x1cd   : > { %v1790_v24 = vpop.f32.mrf.mxu1  ;;  %v4103_v38 = vpop.f32.mrf.mxu0  ;;  %4262 = vmatmul.mubr.bf16.gmra.mxu0 %v5328_v6 }
 0x1ce   : > { %4265 = vmatprep.mubr.bf16.mxu0 %v5332_v11 }
 0x1cf   : > { %v5476_v0 = vpop.f32.mrf.mxu1  ;;  %2628 = vmatmul.mubr.bf16.gmra.mxu1 %v5038_v54  ;;  %v1231_v7 = vpop.f32.mrf.mxu0 }
 0x1d0   : > { %2635 = vmatprep.mubr.bf16.mxu1 %v5041_v56 }
 0x1d1   : > { %v1795_v52 = vpop.f32.mrf.mxu1  ;;  %v5480_v53 = vpop.f32.mrf.mxu0 }
 0x1d3   : > { %v5482_v41 = vpop.f32.mrf.mxu1  ;;  %v1234_v46 = vpop.f32.mrf.mxu0 }
 0x1d5   : > { %v1798_v47 = vpop.f32.mrf.mxu1  ;;  %v5484_v51 = vpop.f32.mrf.mxu0  ;;  %4266 = vmatmul.mubr.bf16.gmra.mxu0 %v5344_v26 }
 0x1d6   : > { %4269 = vmatprep.mubr.bf16.mxu0 %v5348_v15 }
 0x1d7   : > { %v5488_v6 = vpop.f32.mrf.mxu1  ;;  %2636 = vmatmul.mubr.bf16.gmra.mxu1 %v5052_v60  ;;  %v5491_v54 = vpop.f32.mrf.mxu0 }
 0x1d8   : > { %2643 = vmatprep.mubr.bf16.mxu1 %v5055_v63 }
 0x1d9   : > { %v1803_v56 = vpop.f32.mrf.mxu1  ;;  %v5494_v11 = vpop.f32.mrf.mxu0 }
 0x1db   : > { %v5496_v37 = vpop.f32.mrf.mxu1  ;;  %v1249_v48 = vpop.f32.mrf.mxu0 }
 0x1dd   : > { %v1806_v50 = vpop.f32.mrf.mxu1  ;;  %v5498_v3 = vpop.f32.mrf.mxu0  ;;  %4270 = vmatmul.mubr.bf16.gmra.mxu0 %v5362_v8 }
 0x1de   : > { %4273 = vmatprep.mubr.bf16.mxu0 %v5366_v19 }
 0x1df   : > { %v5502_v26 = vpop.f32.mrf.mxu1  ;;  %2644 = vmatmul.mubr.bf16.gmra.mxu1 %v5066_v9  ;;  %v1261_v60 = vpop.f32.mrf.mxu0 }
 0x1e0   : > { %6024 = vst [vmem:[#allocation64_spill] sm:$0xff] %v5502_v26  ;;  %2651 = vmatprep.mubr.bf16.mxu1 %v5069_v10  ;;  %v6030_v26 = vld [vmem:[#allocation13_spill] sm:$0xff] }
 0x1e1   : > { %v1811_v63 = vpop.f32.mrf.mxu1  ;;  %v4112_v15 = vpop.f32.mrf.mxu0 }
 0x1e3   : > { %v5506_v44 = vpop.f32.mrf.mxu1  ;;  %v5508_v24 = vpop.f32.mrf.mxu0 }
 0x1e4   : > { %6025 = vst [vmem:[#allocation65_spill] sm:$0xff] %v5506_v44 }
 0x1e5   : > { %v1814_v38 = vpop.f32.mrf.mxu1  ;;  %v4115_v52 = vpop.f32.mrf.mxu0  ;;  %4274 = vmatmul.mubr.bf16.gmra.mxu0 %v5378_v55 }
 0x1e7   : > { %v5511_v8 = vpop.f32.mrf.mxu1  ;;  %2652 = vmatmul.mubr.bf16.gmra.mxu1 %v5080_v21  ;;  %v5514_v19 = vpop.f32.mrf.mxu0 }
 0x1e8   : > { %6026 = vst [vmem:[#allocation66_spill] sm:$0xff] %v5511_v8  ;;  %v6031_v8 = vld [vmem:[#allocation15_spill] sm:$0xff] }
 0x1e9   : > { %v1819_v9 = vpop.f32.mrf.mxu1  ;;  %v5516_v47 = vpop.f32.mrf.mxu0  ;;  %v1235_v39 = vadd.f32 %v1234_v46, %v6031_v8  ;;  %v6033_v46 = vld [vmem:[#allocation36_spill] sm:$0xff] }
 0x1eb   : > { %v5518_v10 = vpop.f32.mrf.mxu1  ;;  %v5520_v56 = vpop.f32.mrf.mxu0 }
 0x1ec   : > { %6027 = vst [vmem:[#allocation67_spill] sm:$0xff] %v5518_v10 }
 0x1ed   : > { %v1822_v48 = vpop.f32.mrf.mxu1  ;;  %v4167_v50 = vpop.f32.mrf.mxu0 }
 0x1ee   : > { %v1867_v38 = vadd.f32 %v4167_v50, %v5216_v45 }
 0x1ef   : > { %v5522_v60 = vpop.f32.mrf.mxu1  ;;  %v1858_v63 = vpop.f32.mrf.mxu0 }
 0x1f0   : > { %6028 = vst [vmem:[#allocation68_spill] sm:$0xff] %v5522_v60  ;;  %v1859_v21 = vadd.f32 %v1858_v63, %v5198_v31  ;;  %v2101_v61 = vrot.slane %v1867_v38, 1 }
 0x1f1   : > { %v2471_v15 = vpop.f32.mrf.mxu1  ;;  %v4168_v55 = vpop.f32.mrf.mxu0 }
 0x1f2   : > { %v2098_v48 = vrot.slane %v1859_v21, 1  ;;  %v1870_v10 = vadd.f32 %v4168_v55, %v5223_v18  ;;  %v1232_v15 = vadd.f32 %v1231_v7, %v6030_v26  ;;  %v6034_v55 = vld [vmem:[#allocation18_spill] sm:$0xff] }
 0x1f3   : > { %v5526_v52 = vpop.f32.mrf.mxu1  ;;  %v1861_v9 = vpop.f32.mrf.mxu0 }
 0x1f4   : > { %6029 = vst [vmem:[#allocation69_spill] sm:$0xff] %v5526_v52  ;;  %v1862_v62 = vadd.f32 %v1861_v9, %v5207_v17  ;;  %v2103_v7 = vrot.slane %v1870_v10, 1  ;;  %v1242_v52 = vadd.f32 %v5480_v53, %v6034_v55  ;;  %v6038_v53 = vld [vmem:[#allocation21_spill] sm:$0xff] }
 0x1f5   : > { %v2474_v35 = vpop.f32.mrf.mxu1  ;;  %v4171_v44 = vpop.f32.mrf.mxu0  ;;  %v6040_v55 = vld [vmem:[#allocation41_spill] sm:$0xff] }
 0x1f6   : > { %v2099_v60 = vrot.slane %v1862_v62, 1  ;;  %v1883_v17 = vadd.f32 %v4171_v44, %v5251_v57  ;;  %v6032_v35 = vld [vmem:[#allocation32_spill] sm:$0xff] }
 0x1f7   : > { %v5532_v45 = vpop.f32.mrf.mxu1  ;;  %v1874_v31 = vpop.f32.mrf.mxu0 }
 0x1f8   : > { %v2100_v50 = vsel %vm2097_vm0, %v2098_v48, %v2099_v60  ;;  %v2102_v63 = vsel %vm2097_vm0, %v2099_v60, %v2101_v61  ;;  %v1875_v9 = vadd.f32 %v1874_v31, %v6032_v35  ;;  %v2108_v60 = vrot.slane %v1883_v17, 1 }
 0x1f9   : > { %v5538_v38 = vadd.f32 %v2100_v50, %v1232_v15  ;;  %v5540_v21 = vadd.f32 %v2102_v63, %v1235_v39  ;;  %v2479_v18 = vpop.f32.mrf.mxu1  ;;  %v4172_v62 = vpop.f32.mrf.mxu0  ;;  %v6035_v15 = vld [vmem:[#allocation34_spill] sm:$0xff]  ;;  %v6036_v39 = vld [vmem:[#allocation25_spill] sm:$0xff] }
 0x1fa   : > { %v2104_v26 = vrot.slane %v1875_v9, 1  ;;  %v1886_v8 = vadd.f32 %v4172_v62, %v6033_v46  ;;  %v1254_v50 = vadd.f32 %v5484_v51, %v6036_v39  ;;  %v1247_v62 = vadd.f32 %v5491_v54, %v6038_v53  ;;  %v6041_v51 = vld [vmem:[#allocation38_spill] sm:$0xff] }
 0x1fb   : > { %v5545_v48 = vpop.f32.mrf.mxu1  ;;  %v1877_v61 = vpop.f32.mrf.mxu0 }
 0x1fc   : > { %v2105_v57 = vsel %vm2097_vm0, %v2103_v7, %v2104_v26  ;;  %v2109_v44 = vrot.slane %v1886_v8, 1  ;;  %v1878_v31 = vadd.f32 %v1877_v61, %v6035_v15 }
 0x1fd   : > { %v5551_v63 = vadd.f32 %v2105_v57, %v1242_v52  ;;  %v2482_v10 = vpop.f32.mrf.mxu1  ;;  %v4175_v35 = vpop.f32.mrf.mxu0 }
 0x1fe   : > { %v2110_v9 = vsel %vm2097_vm0, %v2108_v60, %v2109_v44  ;;  %v2106_v18 = vrot.slane %v1878_v31, 1  ;;  %v1899_v61 = vadd.f32 %v4175_v35, %v6040_v55  ;;  %v6043_v31 = vld [vmem:[#allocation43_spill] sm:$0xff] }
 0x1ff   : > { %6037 = vst [vmem:[#allocation13_spill] sm:$0xff] %v5551_v63  ;;  %v5556_v46 = vadd.f32 %v2110_v9, %v1254_v50  ;;  %v5558_v17 = vpop.f32.mrf.mxu1  ;;  %v1890_v7 = vpop.f32.mrf.mxu0  ;;  %v6044_v63 = vld [vmem:[#allocation27_spill] sm:$0xff] }
 0x200   : > { %v2107_v8 = vsel %vm2097_vm0, %v2104_v26, %v2106_v18  ;;  %v1891_v52 = vadd.f32 %v1890_v7, %v6041_v51  ;;  %v1257_v54 = vadd.f32 %v5494_v11, %v6044_v63  ;;  %v2114_v53 = vrot.slane %v1899_v61, 1  ;;  %v6045_v35 = vld [vmem:[#allocation39_spill] sm:$0xff]  ;;  %v6046_v7 = vld [vmem:[#allocation30_spill] sm:$0xff]  ;;  %v6048_v11 = vld [vmem:[#allocation29_spill] sm:$0xff] }
 0x201   : > { %6039 = vst [vmem:[#allocation15_spill] sm:$0xff] %v5556_v46  ;;  %v5563_v57 = vadd.f32 %v2107_v8, %v1247_v62  ;;  %v2487_v15 = vpop.f32.mrf.mxu1  ;;  %v4176_v39 = vpop.f32.mrf.mxu0  ;;  %v1269_v62 = vadd.f32 %v5498_v3, %v6046_v7  ;;  %v1264_v63 = vadd.f32 %v5508_v24, %v6048_v11 }
 0x202   : > { %v2111_v60 = vrot.slane %v1891_v52, 1  ;;  %v1902_v10 = vadd.f32 %v4176_v39, %v6043_v31 }
 0x203   : > { %6042 = vst [vmem:[#allocation32_spill] sm:$0xff] %v5563_v57  ;;  %v5568_v50 = vpop.f32.mrf.mxu1  ;;  %v1893_v9 = vpop.f32.mrf.mxu0 }
 0x204   : > { %v2112_v26 = vsel %vm2097_vm0, %v2109_v44, %v2111_v60  ;;  %v2116_v18 = vrot.slane %v1902_v10, 1  ;;  %v1894_v55 = vadd.f32 %v1893_v9, %v6045_v35  ;;  %v6051_v9 = vld [vmem:[#allocation48_spill] sm:$0xff] }
 0x205   : > { %v5574_v8 = vadd.f32 %v2112_v26, %v1257_v54  ;;  %v2490_v51 = vpop.f32.mrf.mxu1  ;;  %v4179_v52 = vpop.f32.mrf.mxu0  ;;  %v6052_v35 = vld [vmem:[#allocation44_spill] sm:$0xff] }
 0x206   : > { %v2117_v15 = vsel %vm2097_vm0, %v2114_v53, %v2116_v18  ;;  %v2113_v39 = vrot.slane %v1894_v55, 1  ;;  %v1915_v26 = vadd.f32 %v4179_v52, %v6051_v9  ;;  %v6053_v51 = vld [vmem:[#allocation46_spill] sm:$0xff] }
 0x207   : > { %6047 = vst [vmem:[#allocation36_spill] sm:$0xff] %v5574_v8  ;;  %v5579_v31 = vadd.f32 %v2117_v15, %v1269_v62  ;;  %v5581_v61 = vpop.f32.mrf.mxu1  ;;  %v1906_v44 = vpop.f32.mrf.mxu0  ;;  %v6054_v8 = vld [vmem:[#allocation49_spill] sm:$0xff] }
 0x208   : > { %v2115_v60 = vsel %vm2097_vm0, %v2113_v39, %v2114_v53  ;;  %v1907_v7 = vadd.f32 %v1906_v44, %v6052_v35  ;;  %v2121_v11 = vrot.slane %v1915_v26, 1  ;;  %v6055_v39 = vld [vmem:[#allocation31_spill] sm:$0xff] }
 0x209   : > { %6049 = vst [vmem:[#allocation18_spill] sm:$0xff] %v5579_v31  ;;  %v5584_v10 = vadd.f32 %v2115_v60, %v1264_v63  ;;  %v2495_v3 = vpop.f32.mrf.mxu1  ;;  %v4180_v54 = vpop.f32.mrf.mxu0  ;;  %v1276_v63 = vadd.f32 %v5514_v19, %v6055_v39  ;;  %v6056_v60 = vld [vmem:[#allocation33_spill] sm:$0xff]  ;;  %v6058_v26 = vld [vmem:[#allocation51_spill] sm:$0xff] }
 0x20a   : > { %v2118_v31 = vrot.slane %v1907_v7, 1  ;;  %v1918_v57 = vadd.f32 %v4180_v54, %v6054_v8  ;;  %v1279_v52 = vadd.f32 %v5520_v56, %v6056_v60  ;;  %v6060_v56 = vld [vmem:[#allocation56_spill] sm:$0xff] }
 0x20b   : > { %6050 = vst [vmem:[#allocation34_spill] sm:$0xff] %v5584_v10  ;;  %v5588_v18 = vpop.f32.mrf.mxu1  ;;  %v1909_v55 = vpop.f32.mrf.mxu0  ;;  %v6061_v10 = vld [vmem:[#allocation35_spill] sm:$0xff] }
 0x20c   : > { %v1910_v24 = vadd.f32 %v1909_v55, %v6053_v51  ;;  %v6057_v55 = vld [vmem:[#allocation54_spill] sm:$0xff]  ;;  %v1286_v46 = vadd.f32 %v5516_v47, %v6061_v10  ;;  %v6065_v47 = vld [vmem:[#allocation37_spill] sm:$0xff]  ;;  %v6066_v10 = vld [vmem:[#allocation3_spill] sm:$0xff] }
 0x20d   : > { %v2498_v62 = vpop.f32.mrf.mxu1  ;;  %v4183_v15 = vpop.f32.mrf.mxu0 }
 0x20e   : > { %v2119_v53 = vrot.slane %v1910_v24, 1  ;;  %v1931_v51 = vadd.f32 %v4183_v15, %v6057_v55  ;;  %v2123_v24 = vrot.slane %v1918_v57, 1 }
 0x20f   : > { %v5596_v3 = vpop.f32.mrf.mxu1  ;;  %v1922_v44 = vpop.f32.mrf.mxu0 }
 0x210   : > { %v2120_v9 = vsel %vm2097_vm0, %v2118_v31, %v2119_v53  ;;  %v2122_v35 = vsel %vm2097_vm0, %v2119_v53, %v2121_v11  ;;  %v1923_v7 = vadd.f32 %v1922_v44, %v6058_v26  ;;  %v2128_v53 = vrot.slane %v1931_v51, 1 }
 0x211   : > { %v5602_v62 = vadd.f32 %v2120_v9, %v1276_v63  ;;  %v5604_v8 = vadd.f32 %v2122_v35, %v1279_v52  ;;  %v2503_v54 = vpop.f32.mrf.mxu1  ;;  %v4184_v19 = vpop.f32.mrf.mxu0  ;;  %v6062_v63 = vld [vmem:[#allocation53_spill] sm:$0xff]  ;;  %v6063_v52 = vld [vmem:[#allocation40_spill] sm:$0xff]  ;;  %v6064_v35 = vld [vmem:[#allocation2_spill] sm:$0xff] }
 0x212   : > { %v2124_v39 = vrot.slane %v1923_v7, 1  ;;  %v1934_v60 = vadd.f32 %v4184_v19, %v6060_v56  ;;  %v1298_v55 = vadd.f32 %v6064_v35, %v6063_v52  ;;  %v1291_v56 = vadd.f32 %v6066_v10, %v6065_v47  ;;  %v6071_v47 = vld [vmem:[#allocation4_spill] sm:$0xff] }
 0x213   : > { %6059 = vst [vmem:[#allocation25_spill] sm:$0xff] %v5604_v8  ;;  %v5609_v31 = vpop.f32.mrf.mxu1  ;;  %v1925_v11 = vpop.f32.mrf.mxu0 }
 0x214   : > { %v2125_v15 = vsel %vm2097_vm0, %v2123_v24, %v2124_v39  ;;  %v2129_v44 = vrot.slane %v1934_v60, 1  ;;  %v1926_v9 = vadd.f32 %v1925_v11, %v6062_v63  ;;  %v6068_v63 = vld [vmem:[#allocation58_spill] sm:$0xff] }
 0x215   : > { %v5615_v26 = vadd.f32 %v2125_v15, %v1286_v46  ;;  %v2506_v57 = vpop.f32.mrf.mxu1  ;;  %v4187_v7 = vpop.f32.mrf.mxu0 }
 0x216   : > { %v2130_v54 = vsel %vm2097_vm0, %v2128_v53, %v2129_v44  ;;  %v2126_v19 = vrot.slane %v1926_v9, 1  ;;  %v1947_v11 = vadd.f32 %v4187_v7, %v5382_v23  ;;  %v6070_v57 = vld [vmem:[#allocation42_spill] sm:$0xff]  ;;  %v6072_v7 = vld [vmem:[#allocation47_spill] sm:$0xff] }
 0x217   : > { %v5620_v8 = vadd.f32 %v2130_v54, %v1298_v55  ;;  %v5622_v51 = vpop.f32.mrf.mxu1  ;;  %v1938_v24 = vpop.f32.mrf.mxu0  ;;  %v1301_v55 = vadd.f32 %v6071_v47, %v6070_v57  ;;  %v6075_v57 = vld [vmem:[#allocation6_spill] sm:$0xff] }
 0x218   : > { %v2127_v60 = vsel %vm2097_vm0, %v2124_v39, %v2126_v19  ;;  %v1939_v46 = vadd.f32 %v1938_v24, %v6068_v63 }
 0x219   : > { %6067 = vst [vmem:[#allocation21_spill] sm:$0xff] %v5620_v8  ;;  %v5627_v15 = vadd.f32 %v2127_v60, %v1291_v56  ;;  %v2511_v52 = vpop.f32.mrf.mxu1  ;;  %v4188_v35 = vpop.f32.mrf.mxu0  ;;  %v2134_v8 = vrot.slane %v1947_v11, 1  ;;  %v6073_v56 = vld [vmem:[#allocation5_spill] sm:$0xff] }
 0x21a   : > { %v2131_v53 = vrot.slane %v1939_v46, 1  ;;  %v1950_v9 = vadd.f32 %v4188_v35, %v5388_v20  ;;  %v1313_v24 = vadd.f32 %v6073_v56, %v6072_v7  ;;  %v6074_v35 = vld [vmem:[#allocation45_spill] sm:$0xff] }
 0x21b   : > { %6069 = vst [vmem:[#allocation41_spill] sm:$0xff] %v5627_v15  ;;  %v5632_v54 = vpop.f32.mrf.mxu1  ;;  %v1941_v10 = vpop.f32.mrf.mxu0  ;;  %v1308_v47 = vadd.f32 %v6075_v57, %v6074_v35  ;;  %v6078_v57 = vld [vmem:[#allocation7_spill] sm:$0xff] }
 0x21c   : > { %v2132_v39 = vsel %vm2097_vm0, %v2129_v44, %v2131_v53  ;;  %v2136_v19 = vrot.slane %v1950_v9, 1  ;;  %v1942_v23 = vadd.f32 %v1941_v10, %v5373_v4 }
 0x21d   : > { %v5638_v60 = vadd.f32 %v2132_v39, %v1301_v55  ;;  %v2514_v63 = vpop.f32.mrf.mxu1  ;;  %v4191_v46 = vpop.f32.mrf.mxu0 }
 0x21e   : > { %v2137_v20 = vsel %vm2097_vm0, %v2134_v8, %v2136_v19  ;;  %v2133_v52 = vrot.slane %v1942_v23, 1  ;;  %v1963_v10 = vadd.f32 %v4191_v46, %v5404_v34 }
 0x21f   : > { %v5643_v15 = vadd.f32 %v2137_v20, %v1313_v24  ;;  %v5645_v11 = vpop.f32.mrf.mxu1  ;;  %v1954_v44 = vpop.f32.mrf.mxu0 }
 0x220   : > { %v2135_v4 = vsel %vm2097_vm0, %v2133_v52, %v2134_v8  ;;  %v1955_v39 = vadd.f32 %v1954_v44, %v5392_v25  ;;  %v2141_v63 = vrot.slane %v1963_v10, 1  ;;  %v6077_v52 = vld [vmem:[#allocation50_spill] sm:$0xff] }
 0x221   : > { %v5648_v53 = vadd.f32 %v2135_v4, %v1308_v47  ;;  %v2519_v9 = vpop.f32.mrf.mxu1  ;;  %v4192_v55 = vpop.f32.mrf.mxu0  ;;  %v1320_v47 = vadd.f32 %v6078_v57, %v6077_v52  ;;  %v6079_v4 = vld [vmem:[#allocation52_spill] sm:$0xff] }
 0x222   : > { %v2138_v20 = vrot.slane %v1955_v39, 1  ;;  %v1966_v35 = vadd.f32 %v4192_v55, %v5408_v14  ;;  %v6080_v9 = vld [vmem:[#allocation9_spill] sm:$0xff] }
 0x223   : > { %6076 = vst [vmem:[#allocation38_spill] sm:$0xff] %v5648_v53  ;;  %v5652_v19 = vpop.f32.mrf.mxu1  ;;  %v1957_v23 = vpop.f32.mrf.mxu0  ;;  %v1323_v34 = vadd.f32 %v6080_v9, %v6079_v4  ;;  %v6081_v4 = vld [vmem:[#allocation55_spill] sm:$0xff]  ;;  %v6082_v9 = vld [vmem:[#allocation8_spill] sm:$0xff] }
 0x224   : > { %v1958_v7 = vadd.f32 %v1957_v23, %v5398_v29  ;;  %v1330_v53 = vadd.f32 %v6082_v9, %v6081_v4 }
 0x225   : > { %v2522_v56 = vpop.f32.mrf.mxu1  ;;  %v4195_v24 = vpop.f32.mrf.mxu0 }
 0x226   : > { %v2139_v8 = vrot.slane %v1958_v7, 1  ;;  %v1979_v23 = vadd.f32 %v4195_v24, %v5424_v5  ;;  %v2143_v56 = vrot.slane %v1966_v35, 1 }
 0x227   : > { %v5660_v46 = vpop.f32.mrf.mxu1  ;;  %v1970_v25 = vpop.f32.mrf.mxu0 }
 0x228   : > { %v2140_v44 = vsel %vm2097_vm0, %v2138_v20, %v2139_v8  ;;  %v2142_v29 = vsel %vm2097_vm0, %v2139_v8, %v2141_v63  ;;  %v1971_v10 = vadd.f32 %v1970_v25, %v5414_v27  ;;  %v2148_v8 = vrot.slane %v1979_v23, 1 }
 0x229   : > { %v5666_v39 = vadd.f32 %v2140_v44, %v1320_v47  ;;  %v5668_v14 = vadd.f32 %v2142_v29, %v1323_v34  ;;  %v2527_v55 = vpop.f32.mrf.mxu1  ;;  %v4196_v7 = vpop.f32.mrf.mxu0  ;;  %v6083_v47 = vld [vmem:[#allocation10_spill] sm:$0xff] }
 0x22a   : > { %v2144_v52 = vrot.slane %v1971_v10, 1  ;;  %v1982_v57 = vadd.f32 %v4196_v7, %v5430_v32  ;;  %v1342_v34 = vadd.f32 %v6083_v47, %v5375_v49  ;;  %v6084_v10 = vld [vmem:[#allocation57_spill] sm:$0xff]  ;;  %v6085_v55 = vld [vmem:[#allocation11_spill] sm:$0xff]  ;;  %v6087_v47 = vld [vmem:[#allocation12_spill] sm:$0xff] }
 0x22b   : > { %v5673_v20 = vpop.f32.mrf.mxu1  ;;  %v1973_v63 = vpop.f32.mrf.mxu0  ;;  %v1335_v7 = vadd.f32 %v6085_v55, %v6084_v10 }
 0x22c   : > { %v2145_v5 = vsel %vm2097_vm0, %v2143_v56, %v2144_v52  ;;  %v2149_v27 = vrot.slane %v1982_v57, 1  ;;  %v1974_v24 = vadd.f32 %v1973_v63, %v5420_v12 }
 0x22d   : > { %v5679_v25 = vadd.f32 %v2145_v5, %v1330_v53  ;;  %v2530_v35 = vpop.f32.mrf.mxu1  ;;  %v4199_v44 = vpop.f32.mrf.mxu0 }
 0x22e   : > { %v2150_v32 = vsel %vm2097_vm0, %v2148_v8, %v2149_v27  ;;  %v2146_v29 = vrot.slane %v1974_v24, 1  ;;  %v1995_v57 = vadd.f32 %v4199_v44, %v5446_v59  ;;  %v6086_v24 = vld [vmem:[#allocation59_spill] sm:$0xff] }
 0x22f   : > { %v5684_v4 = vadd.f32 %v2150_v32, %v1342_v34  ;;  %v5686_v23 = vpop.f32.mrf.mxu1  ;;  %v1986_v56 = vpop.f32.mrf.mxu0  ;;  %v1345_v34 = vadd.f32 %v6087_v47, %v6086_v24 }
 0x230   : > { %v2147_v12 = vsel %vm2097_vm0, %v2144_v52, %v2146_v29  ;;  %v1987_v49 = vadd.f32 %v1986_v56, %v5436_v58  ;;  %v2154_v10 = vrot.slane %v1995_v57, 1  ;;  %v6088_v58 = vld [vmem:[#allocation14_spill] sm:$0xff] }
 0x231   : > { %v5691_v53 = vadd.f32 %v2147_v12, %v1335_v7  ;;  %v2535_v9 = vpop.f32.mrf.mxu1  ;;  %v4200_v63 = vpop.f32.mrf.mxu0  ;;  %v1357_v44 = vadd.f32 %v6088_v58, %v5400_v16 }
 0x232   : > { %v2151_v8 = vrot.slane %v1987_v49, 1  ;;  %v1998_v5 = vadd.f32 %v4200_v63, %v5452_v40  ;;  %v6089_v49 = vld [vmem:[#allocation16_spill] sm:$0xff] }
 0x233   : > { %v5696_v35 = vpop.f32.mrf.mxu1  ;;  %v1989_v32 = vpop.f32.mrf.mxu0  ;;  %v1352_v9 = vadd.f32 %v6089_v49, %v5396_v28 }
 0x234   : > { %v2152_v52 = vsel %vm2097_vm0, %v2149_v27, %v2151_v8  ;;  %v2156_v29 = vrot.slane %v1998_v5, 1  ;;  %v1990_v59 = vadd.f32 %v1989_v32, %v5440_v36 }
 0x235   : > { %v5702_v55 = vadd.f32 %v2152_v52, %v1345_v34  ;;  %v2538_v7 = vpop.f32.mrf.mxu1  ;;  %v4203_v40 = vpop.f32.mrf.mxu0 }
 0x236   : > { %v2157_v56 = vsel %vm2097_vm0, %v2154_v10, %v2156_v29  ;;  %v2153_v12 = vrot.slane %v1990_v59, 1  ;;  %v2011_v16 = vadd.f32 %v4203_v40, %v5468_v30  ;;  %v6091_v7 = vld [vmem:[#allocation20_spill] sm:$0xff] }
 0x237   : > { %v5707_v57 = vadd.f32 %v2157_v56, %v1357_v44  ;;  %v5709_v27 = vpop.f32.mrf.mxu1  ;;  %v2002_v63 = vpop.f32.mrf.mxu0  ;;  %v1367_v40 = vadd.f32 %v6091_v7, %v5418_v22 }
 0x238   : > { %v2155_v36 = vsel %vm2097_vm0, %v2153_v12, %v2154_v10  ;;  %v2003_v47 = vadd.f32 %v2002_v63, %v5456_v13  ;;  %v2161_v10 = vrot.slane %v2011_v16, 1  ;;  %v6090_v13 = vld [vmem:[#allocation17_spill] sm:$0xff]  ;;  %v4507_v12 = vmov 0.0  }
 0x239   : > { %v5712_v8 = vadd.f32 %v2155_v36, %v1352_v9  ;;  %v2543_v5 = vpop.f32.mrf.mxu1  ;;  %v4204_v24 = vpop.f32.mrf.mxu0  ;;  %v1364_v44 = vadd.f32 %v6090_v13, %v5410_v33  ;;  %3348 = vst [vmem:[%s5723_s6] sm:$0x3] %v4507_v12 }
 0x23a   : > { %v2158_v30 = vrot.slane %v2003_v47, 1  ;;  %v2014_v59 = vadd.f32 %v4204_v24, %v5472_v43 }
 0x23b   : > { %v5717_v34 = vpop.f32.mrf.mxu1  ;;  %v2005_v32 = vpop.f32.mrf.mxu0 }
 0x23c   : > { %v2006_v28 = vadd.f32 %v2005_v32, %v5462_v42  ;;  %v2163_v22 = vrot.slane %v2014_v59, 1  ;;  %v6092_v32 = vld [vmem:[#allocation19_spill] sm:$0xff] }
 0x23d   : > { %v2546_v52 = vpop.f32.mrf.mxu1  ;;  %v4207_v29 = vpop.f32.mrf.mxu0 }
 0x23e   : > { %v2159_v58 = vrot.slane %v2006_v28, 1  ;;  %v2027_v63 = vadd.f32 %v4207_v29, %v5488_v6  ;;  %v1374_v28 = vadd.f32 %v6092_v32, %v5428_v2  ;;  %v6094_v2 = vld [vmem:[#allocation60_spill] sm:$0xff] }
 0x23f   : > { %v5730_v42 = vpop.f32.mrf.mxu1  ;;  %v2018_v56 = vpop.f32.mrf.mxu0 }
 0x240   : > { %v2160_v49 = vsel %vm2097_vm0, %v2158_v30, %v2159_v58  ;;  %v2162_v9 = vsel %vm2097_vm0, %v2159_v58, %v2161_v10  ;;  %v2019_v43 = vadd.f32 %v2018_v56, %v5476_v0  ;;  %v2168_v30 = vrot.slane %v2027_v63, 1  ;;  %v6093_v58 = vld [vmem:[#allocation22_spill] sm:$0xff]  ;;  %v6095_v56 = vld [vmem:[#allocation23_spill] sm:$0xff] }
 0x241   : > { %v5737_v36 = vadd.f32 %v2160_v49, %v1364_v44  ;;  %v5739_v16 = vadd.f32 %v2162_v9, %v1367_v40  ;;  %v2551_v33 = vpop.f32.mrf.mxu1  ;;  %v4208_v5 = vpop.f32.mrf.mxu0  ;;  %v1386_v13 = vadd.f32 %v6093_v58, %v5442_v1  ;;  %v1379_v12 = vadd.f32 %v6095_v56, %v6094_v2  ;;  %v6097_v1 = vld [vmem:[#allocation64_spill] sm:$0xff]  ;;  %v6102_v56 = vld [vmem:[#allocation63_spill] sm:$0xff] }
 0x242   : > { %v2164_v24 = vrot.slane %v2019_v43, 1  ;;  %v2030_v47 = vadd.f32 %v4208_v5, %v5496_v37  ;;  %v6096_v43 = vld [vmem:[#allocation66_spill] sm:$0xff] }
 0x243   : > { %v5744_v52 = vpop.f32.mrf.mxu1  ;;  %v2021_v10 = vpop.f32.mrf.mxu0 }
 0x244   : > { %v2165_v6 = vsel %vm2097_vm0, %v2163_v22, %v2164_v24  ;;  %v2169_v0 = vrot.slane %v2030_v47, 1  ;;  %v2022_v29 = vadd.f32 %v2021_v10, %v5482_v41  ;;  %v6098_v10 = vld [vmem:[#allocation67_spill] sm:$0xff] }
 0x245   : > { %v5750_v44 = vadd.f32 %v2165_v6, %v1374_v28  ;;  %v2554_v59 = vpop.f32.mrf.mxu1  ;;  %v4211_v7 = vpop.f32.mrf.mxu0  ;;  %v6099_v6 = vld [vmem:[#allocation61_spill] sm:$0xff] }
 0x246   : > { %v2170_v37 = vsel %vm2097_vm0, %v2168_v30, %v2169_v0  ;;  %v2166_v40 = vrot.slane %v2022_v29, 1  ;;  %v2043_v33 = vadd.f32 %v4211_v7, %v6096_v43  ;;  %v6100_v29 = vld [vmem:[#allocation24_spill] sm:$0xff]  ;;  %v6101_v7 = vld [vmem:[#allocation65_spill] sm:$0xff] }
 0x247   : > { %v5755_v49 = vadd.f32 %v2170_v37, %v1386_v13  ;;  %v5757_v9 = vpop.f32.mrf.mxu1  ;;  %v2034_v63 = vpop.f32.mrf.mxu0  ;;  %v1389_v58 = vadd.f32 %v6100_v29, %v6099_v6 }
 0x248   : > { %v2167_v41 = vsel %vm2097_vm0, %v2164_v24, %v2166_v40  ;;  %v2035_v5 = vadd.f32 %v2034_v63, %v6097_v1  ;;  %v2174_v37 = vrot.slane %v2043_v33, 1 }
 0x249   : > { %v5762_v22 = vadd.f32 %v2167_v41, %v1379_v12  ;;  %v2559_v47 = vpop.f32.mrf.mxu1  ;;  %v4212_v32 = vpop.f32.mrf.mxu0  ;;  %v6103_v12 = vld [vmem:[#allocation26_spill] sm:$0xff] }
 0x24a   : > { %v2171_v28 = vrot.slane %v2035_v5, 1  ;;  %v2046_v30 = vadd.f32 %v4212_v32, %v6098_v10  ;;  %v1401_v63 = vadd.f32 %v6103_v12, %v6102_v56  ;;  %v6105_v32 = vld [vmem:[#allocation62_spill] sm:$0xff]  ;;  %v6106_v10 = vld [vmem:[#allocation28_spill] sm:$0xff]  ;;  %v6110_v12 = vld [vmem:[#allocation69_spill] sm:$0xff] }
 0x24b   : > { %v5767_v13 = vpop.f32.mrf.mxu1  ;;  %v2037_v59 = vpop.f32.mrf.mxu0  ;;  %v1396_v6 = vadd.f32 %v6106_v10, %v6105_v32 }
 0x24c   : > { %v2172_v24 = vsel %vm2097_vm0, %v2169_v0, %v2171_v28  ;;  %v2176_v40 = vrot.slane %v2046_v30, 1  ;;  %v2038_v2 = vadd.f32 %v2037_v59, %v6101_v7  ;;  %v6109_v7 = vld [vmem:[#allocation68_spill] sm:$0xff] }
 0x24d   : > { %v5773_v41 = vadd.f32 %v2172_v24, %v1389_v58  ;;  %v2562_v43 = vpop.f32.mrf.mxu1  ;;  %v4231_v1 = vpop.f32.mrf.mxu0 }
 0x24e   : > { %v2177_v5 = vsel %vm2097_vm0, %v2174_v37, %v2176_v40  ;;  %v2173_v47 = vrot.slane %v2038_v2, 1  ;;  %v2703_v24 = vadd.f32 %v4231_v1, %v5532_v45 }
 0x24f   : > { %6104 = vst [vmem:[#allocation43_spill] sm:$0xff] %v5773_v41  ;;  %v5778_v29 = vadd.f32 %v2177_v5, %v1401_v63  ;;  %v5780_v33 = vpop.f32.mrf.mxu1  ;;  %v2694_v0 = vpop.f32.mrf.mxu0 }
 0x250   : > { %v2175_v28 = vsel %vm2097_vm0, %v2173_v47, %v2174_v37  ;;  %v2695_v40 = vadd.f32 %v2694_v0, %v6109_v7  ;;  %v2937_v32 = vrot.slane %v2703_v24, 2 }
 0x251   : > { %6107 = vst [vmem:[#allocation27_spill] sm:$0xff] %v5778_v29  ;;  %v5783_v30 = vadd.f32 %v2175_v28, %v1396_v6  ;;  %v2567_v58 = vpop.f32.mrf.mxu1  ;;  %v4232_v59 = vpop.f32.mrf.mxu0 }
 0x252   : > { %v2934_v10 = vrot.slane %v2695_v40, 2  ;;  %v2706_v37 = vadd.f32 %v4232_v59, %v5545_v48 }
 0x253   : > { %6108 = vst [vmem:[#allocation39_spill] sm:$0xff] %v5783_v30  ;;  %v5787_v2 = vpop.f32.mrf.mxu1  ;;  %v2697_v56 = vpop.f32.mrf.mxu0 }
 0x254   : > { %v2698_v63 = vadd.f32 %v2697_v56, %v6110_v12  ;;  %v2939_v48 = vrot.slane %v2706_v37, 2 }
 0x255   : > { %v2570_v43 = vpop.f32.mrf.mxu1  ;;  %v4235_v5 = vpop.f32.mrf.mxu0 }
 0x256   : > { %v2935_v47 = vrot.slane %v2698_v63, 2  ;;  %v2719_v0 = vadd.f32 %v4235_v5, %v5581_v61 }
 0x257   : > { %v5792_v6 = vpop.f32.mrf.mxu1  ;;  %v2710_v28 = vpop.f32.mrf.mxu0 }
 0x258   : > { %v2936_v45 = vsel %vm2933_vm1, %v2934_v10, %v2935_v47  ;;  %v2938_v1 = vsel %vm2933_vm1, %v2935_v47, %v2937_v32  ;;  %v2711_v58 = vadd.f32 %v2710_v28, %v5558_v17  ;;  %v6111_v28 = vld [vmem:[#allocation13_spill] sm:$0xff] }
 0x259   : > { %v3046_v7 = vadd.f32 %v2936_v45, %v5538_v38  ;;  %v3047_v24 = vadd.f32 %v2938_v1, %v5540_v21  ;;  %v2575_v40 = vpop.f32.mrf.mxu1  ;;  %v4236_v56 = vpop.f32.mrf.mxu0  ;;  %v2944_v21 = vrot.slane %v2719_v0, 2 }
 0x25a   : > { %v2940_v59 = vrot.slane %v2711_v58, 2  ;;  %v2722_v12 = vadd.f32 %v4236_v56, %v5588_v18 }
 0x25b   : > { %v3897_v63 = vpack.c.bf16 %v3047_v24, %v3046_v7  ;;  %v3238_v61 = vadd.f32 %v3047_v24, %v3046_v7  ;;  %v3275_v43 = vmul.f32 %v3046_v7, %v3046_v7  ;;  %v3276_v17 = vmul.f32 %v3047_v24, %v3047_v24  ;;  %v5806_v5 = vpop.f32.mrf.mxu1  ;;  %v2713_v38 = vpop.f32.mrf.mxu0 }
 0x25c   : > { %v2941_v32 = vsel %vm2933_vm1, %v2939_v48, %v2940_v59  ;;  %v2945_v10 = vrot.slane %v2722_v12, 2  ;;  %v2714_v37 = vadd.f32 %v2713_v38, %v5568_v50 }
 0x25d   : > { %3898 = vst [vmem:[%s5803_s9] sm:$0xff] %v3897_v63   ;;  %v3307_v47 = vadd.f32 %v3276_v17, %v3275_v43  ;;  %v3048_v45 = vadd.f32 %v2941_v32, %v6111_v28  ;;  %v2578_v1 = vpop.f32.mrf.mxu1  ;;  %v4239_v58 = vpop.f32.mrf.mxu0  ;;  %v6112_v63 = vld [vmem:[#allocation15_spill] sm:$0xff]  ;;  %v6113_v17 = vld [vmem:[#allocation32_spill] sm:$0xff] }
 0x25e   : > { %v2946_v18 = vsel %vm2933_vm1, %v2944_v21, %v2945_v10  ;;  %v2942_v40 = vrot.slane %v2714_v37, 2  ;;  %v2735_v48 = vadd.f32 %v4239_v58, %v5622_v51 }
 0x25f   : > { %v3239_v7 = vadd.f32 %v3238_v61, %v3048_v45  ;;  %v3277_v24 = vmul.f32 %v3048_v45, %v3048_v45  ;;  %v5813_v56 = vpop.f32.mrf.mxu1  ;;  %v2726_v30 = vpop.f32.mrf.mxu0  ;;  %v3050_v43 = vadd.f32 %v2946_v18, %v6112_v63 }
 0x260   : > { %v2943_v0 = vsel %vm2933_vm1, %v2940_v59, %v2942_v40  ;;  %v2727_v50 = vadd.f32 %v2726_v30, %v5596_v3  ;;  %v2950_v51 = vrot.slane %v2735_v48, 2  ;;  %v6114_v40 = vld [vmem:[#allocation36_spill] sm:$0xff] }
 0x261   : > { %v3308_v12 = vadd.f32 %v3307_v47, %v3277_v24  ;;  %v3049_v38 = vadd.f32 %v2943_v0, %v6113_v17  ;;  %v2583_v32 = vpop.f32.mrf.mxu1  ;;  %v4240_v21 = vpop.f32.mrf.mxu0  ;;  %v3279_v58 = vmul.f32 %v3050_v43, %v3050_v43 }
 0x262   : > { %v2947_v37 = vrot.slane %v2727_v50, 2  ;;  %v2738_v61 = vadd.f32 %v4240_v21, %v5632_v54 }
 0x263   : > { %v3902_v28 = vpack.c.bf16 %v3049_v38, %v3048_v45  ;;  %v3240_v1 = vadd.f32 %v3239_v7, %v3049_v38  ;;  %v3278_v29 = vmul.f32 %v3049_v38, %v3049_v38  ;;  %v5821_v41 = vpop.f32.mrf.mxu1  ;;  %v2729_v59 = vpop.f32.mrf.mxu0 }
 0x264   : > { %v2948_v3 = vsel %vm2933_vm1, %v2945_v10, %v2947_v37  ;;  %v2952_v30 = vrot.slane %v2738_v61, 2  ;;  %v2730_v47 = vadd.f32 %v2729_v59, %v5609_v31  ;;  %v6116_v37 = vld [vmem:[#allocation34_spill] sm:$0xff] }
 0x265   : > { %3974 = vst [vmem:[%s5803_s9 + $0x8] sm:$0xff] %v3902_v28   ;;  %v3309_v18 = vadd.f32 %v3308_v12, %v3278_v29  ;;  %v3051_v24 = vadd.f32 %v2948_v3, %v6114_v40  ;;  %v3241_v0 = vadd.f32 %v3240_v1, %v3050_v43  ;;  %v2586_v54 = vpop.f32.mrf.mxu1  ;;  %v4243_v45 = vpop.f32.mrf.mxu0  ;;  %v6115_v12 = vld [vmem:[#allocation18_spill] sm:$0xff] }
 0x266   : > { %v2953_v7 = vsel %vm2933_vm1, %v2950_v51, %v2952_v30  ;;  %v2949_v50 = vrot.slane %v2730_v47, 2  ;;  %v2751_v59 = vadd.f32 %v4243_v45, %v5660_v46 }
 0x267   : > { %v3907_v63 = vpack.c.bf16 %v3051_v24, %v3050_v43  ;;  %v3242_v17 = vadd.f32 %v3241_v0, %v3051_v24  ;;  %v3280_v48 = vmul.f32 %v3051_v24, %v3051_v24  ;;  %v3310_v38 = vadd.f32 %v3309_v18, %v3279_v58  ;;  %v5828_v10 = vpop.f32.mrf.mxu1  ;;  %v2742_v32 = vpop.f32.mrf.mxu0 }
 0x268   : > { %v2951_v31 = vsel %vm2933_vm1, %v2949_v50, %v2950_v51  ;;  %v3053_v21 = vadd.f32 %v2953_v7, %v6115_v12  ;;  %v2743_v43 = vadd.f32 %v2742_v32, %v5645_v11  ;;  %v2957_v50 = vrot.slane %v2751_v59, 2  ;;  %v6117_v12 = vld [vmem:[#allocation25_spill] sm:$0xff] }
 0x269   : > { %3975 = vst [vmem:[%s5803_s9 + $0x10] sm:$0xff] %v3907_v63   ;;  %v3311_v29 = vadd.f32 %v3310_v38, %v3280_v48  ;;  %v3052_v61 = vadd.f32 %v2951_v31, %v6116_v37  ;;  %v2591_v28 = vpop.f32.mrf.mxu1  ;;  %v4244_v1 = vpop.f32.mrf.mxu0 }
 0x26a   : > { %v3282_v40 = vmul.f32 %v3053_v21, %v3053_v21  ;;  %v2954_v63 = vrot.slane %v2743_v43, 2  ;;  %v2754_v46 = vadd.f32 %v4244_v1, %v5673_v20 }
 0x26b   : > { %v3912_v3 = vpack.c.bf16 %v3053_v21, %v3052_v61  ;;  %v3243_v30 = vadd.f32 %v3242_v17, %v3052_v61  ;;  %v3281_v47 = vmul.f32 %v3052_v61, %v3052_v61  ;;  %v5836_v58 = vpop.f32.mrf.mxu1  ;;  %v2745_v18 = vpop.f32.mrf.mxu0 }
 0x26c   : > { %v2746_v51 = vadd.f32 %v2745_v18, %v5652_v19  ;;  %v2959_v61 = vrot.slane %v2754_v46, 2 }
 0x26d   : > { %3976 = vst [vmem:[%s5803_s9 + $0x18] sm:$0xff] %v3912_v3   ;;  %v3312_v24 = vadd.f32 %v3311_v29, %v3281_v47  ;;  %v3244_v0 = vadd.f32 %v3243_v30, %v3053_v21  ;;  %v2594_v54 = vpop.f32.mrf.mxu1  ;;  %v4247_v7 = vpop.f32.mrf.mxu0 }
 0x26e   : > { %v2955_v45 = vrot.slane %v2746_v51, 2  ;;  %v2767_v19 = vadd.f32 %v4247_v7, %v5709_v27 }
 0x26f   : > { %v3313_v11 = vadd.f32 %v3312_v24, %v3282_v40  ;;  %v5841_v48 = vpop.f32.mrf.mxu1  ;;  %v2758_v17 = vpop.f32.mrf.mxu0 }
 0x270   : > { %v2956_v38 = vsel %vm2933_vm1, %v2954_v63, %v2955_v45  ;;  %v2958_v32 = vsel %vm2933_vm1, %v2955_v45, %v2957_v50  ;;  %v2759_v31 = vadd.f32 %v2758_v17, %v5686_v23  ;;  %v2964_v27 = vrot.slane %v2767_v19, 2  ;;  %v6118_v17 = vld [vmem:[#allocation21_spill] sm:$0xff] }
 0x271   : > { %v3054_v29 = vadd.f32 %v2956_v38, %v5602_v62  ;;  %v3055_v21 = vadd.f32 %v2958_v32, %v6117_v12  ;;  %v2599_v37 = vpop.f32.mrf.mxu1  ;;  %v4248_v20 = vpop.f32.mrf.mxu0 }
 0x272   : > { %v2960_v28 = vrot.slane %v2759_v31, 2  ;;  %v2770_v1 = vadd.f32 %v4248_v20, %v5717_v34 }
 0x273   : > { %v3917_v59 = vpack.c.bf16 %v3055_v21, %v3054_v29  ;;  %v3245_v43 = vadd.f32 %v3244_v0, %v3054_v29  ;;  %v3283_v3 = vmul.f32 %v3054_v29, %v3054_v29  ;;  %v5850_v30 = vpop.f32.mrf.mxu1  ;;  %v2761_v47 = vpop.f32.mrf.mxu0  ;;  %v3284_v40 = vmul.f32 %v3055_v21, %v3055_v21  ;;  %v6119_v29 = vld [vmem:[#allocation41_spill] sm:$0xff] }
 0x274   : > { %v2961_v23 = vsel %vm2933_vm1, %v2959_v61, %v2960_v28  ;;  %v2965_v18 = vrot.slane %v2770_v1, 2  ;;  %v2762_v62 = vadd.f32 %v2761_v47, %v5696_v35 }
 0x275   : > { %3977 = vst [vmem:[%s5803_s9 + $0x20] sm:$0xff] %v3917_v59   ;;  %v3246_v51 = vadd.f32 %v3245_v43, %v3055_v21  ;;  %v3314_v24 = vadd.f32 %v3313_v11, %v3283_v3  ;;  %v3056_v54 = vadd.f32 %v2961_v23, %v5615_v26  ;;  %v2602_v7 = vpop.f32.mrf.mxu1  ;;  %v4251_v34 = vpop.f32.mrf.mxu0 }
 0x276   : > { %v2966_v0 = vsel %vm2933_vm1, %v2964_v27, %v2965_v18  ;;  %v2962_v50 = vrot.slane %v2762_v62, 2  ;;  %v2783_v31 = vadd.f32 %v4251_v34, %v5757_v9 }
 0x277   : > { %v3315_v63 = vadd.f32 %v3314_v24, %v3284_v40  ;;  %v3247_v46 = vadd.f32 %v3246_v51, %v3056_v54  ;;  %v3285_v45 = vmul.f32 %v3056_v54, %v3056_v54  ;;  %v3058_v38 = vadd.f32 %v2966_v0, %v6118_v17  ;;  %v5858_v32 = vpop.f32.mrf.mxu1  ;;  %v2774_v19 = vpop.f32.mrf.mxu0  ;;  %v6120_v17 = vld [vmem:[#allocation38_spill] sm:$0xff] }
 0x278   : > { %v2963_v35 = vsel %vm2933_vm1, %v2960_v28, %v2962_v50  ;;  %v2775_v11 = vadd.f32 %v2774_v19, %v5730_v42  ;;  %v2970_v28 = vrot.slane %v2783_v31, 2 }
 0x279   : > { %v3316_v26 = vadd.f32 %v3315_v63, %v3285_v45  ;;  %v3057_v12 = vadd.f32 %v2963_v35, %v6119_v29  ;;  %v2607_v21 = vpop.f32.mrf.mxu1  ;;  %v4252_v37 = vpop.f32.mrf.mxu0  ;;  %v3287_v23 = vmul.f32 %v3058_v38, %v3058_v38 }
 0x27a   : > { %v2967_v20 = vrot.slane %v2775_v11, 2  ;;  %v2786_v61 = vadd.f32 %v4252_v37, %v5767_v13 }
 0x27b   : > { %v3922_v1 = vpack.c.bf16 %v3057_v12, %v3056_v54  ;;  %v3248_v59 = vadd.f32 %v3247_v46, %v3057_v12  ;;  %v3286_v43 = vmul.f32 %v3057_v12, %v3057_v12  ;;  %v5865_v3 = vpop.f32.mrf.mxu1  ;;  %v2777_v47 = vpop.f32.mrf.mxu0 }
 0x27c   : > { %v2968_v9 = vsel %vm2933_vm1, %v2965_v18, %v2967_v20  ;;  %v2972_v27 = vrot.slane %v2786_v61, 2  ;;  %v2778_v42 = vadd.f32 %v2777_v47, %v5744_v52 }
 0x27d   : > { %3978 = vst [vmem:[%s5803_s9 + $0x28] sm:$0xff] %v3922_v1   ;;  %v3317_v62 = vadd.f32 %v3316_v26, %v3286_v43  ;;  %v3059_v51 = vadd.f32 %v2968_v9, %v5638_v60  ;;  %v3249_v40 = vadd.f32 %v3248_v59, %v3058_v38  ;;  %v2610_v13 = vpop.f32.mrf.mxu1  ;;  %v4255_v24 = vpop.f32.mrf.mxu0 }
 0x27e   : > { %v2973_v54 = vsel %vm2933_vm1, %v2970_v28, %v2972_v27  ;;  %v2969_v7 = vrot.slane %v2778_v42, 2  ;;  %v2799_v11 = vadd.f32 %v4255_v24, %v5792_v6 }
 0x27f   : > { %v3927_v34 = vpack.c.bf16 %v3059_v51, %v3058_v38  ;;  %v3250_v0 = vadd.f32 %v3249_v40, %v3059_v51  ;;  %v3288_v50 = vmul.f32 %v3059_v51, %v3059_v51  ;;  %v3318_v63 = vadd.f32 %v3317_v62, %v3287_v23  ;;  %v5872_v18 = vpop.f32.mrf.mxu1  ;;  %v2790_v46 = vpop.f32.mrf.mxu0 }
 0x280   : > { %v2971_v52 = vsel %vm2933_vm1, %v2969_v7, %v2970_v28  ;;  %v3061_v60 = vadd.f32 %v2973_v54, %v5643_v15  ;;  %v2791_v38 = vadd.f32 %v2790_v46, %v5780_v33  ;;  %v2977_v47 = vrot.slane %v2799_v11, 2 }
 0x281   : > { %3979 = vst [vmem:[%s5803_s9 + $0x30] sm:$0xff] %v3927_v34   ;;  %v3319_v45 = vadd.f32 %v3318_v63, %v3288_v50  ;;  %v3060_v19 = vadd.f32 %v2971_v52, %v6120_v17  ;;  %v2615_v35 = vpop.f32.mrf.mxu1  ;;  %v4256_v31 = vpop.f32.mrf.mxu0 }
 0x282   : > { %v3290_v61 = vmul.f32 %v3061_v60, %v3061_v60  ;;  %v2974_v28 = vrot.slane %v2791_v38, 2  ;;  %v2802_v6 = vadd.f32 %v4256_v31, %v5806_v5 }
 0x283   : > { %v3932_v26 = vpack.c.bf16 %v3061_v60, %v3060_v19  ;;  %v3251_v29 = vadd.f32 %v3250_v0, %v3060_v19  ;;  %v3289_v12 = vmul.f32 %v3060_v19, %v3060_v19  ;;  %v5880_v21 = vpop.f32.mrf.mxu1  ;;  %v2793_v37 = vpop.f32.mrf.mxu0 }
 0x284   : > { %v2794_v20 = vadd.f32 %v2793_v37, %v5787_v2  ;;  %v2979_v54 = vrot.slane %v2802_v6, 2 }
 0x285   : > { %3980 = vst [vmem:[%s5803_s9 + $0x38] sm:$0xff] %v3932_v26   ;;  %v3320_v1 = vadd.f32 %v3319_v45, %v3289_v12  ;;  %v3252_v15 = vadd.f32 %v3251_v29, %v3061_v60  ;;  %v2618_v59 = vpop.f32.mrf.mxu1  ;;  %v4259_v43 = vpop.f32.mrf.mxu0 }
 0x286   : > { %v2975_v9 = vrot.slane %v2794_v20, 2  ;;  %v2815_v2 = vadd.f32 %v4259_v43, %v5828_v10 }
 0x287   : > { %v3321_v33 = vadd.f32 %v3320_v1, %v3290_v61  ;;  %v5885_v27 = vpop.f32.mrf.mxu1  ;;  %v2806_v42 = vpop.f32.mrf.mxu0 }
 0x288   : > { %v2976_v23 = vsel %vm2933_vm1, %v2974_v28, %v2975_v9  ;;  %v2978_v62 = vsel %vm2933_vm1, %v2975_v9, %v2977_v47  ;;  %v2807_v51 = vadd.f32 %v2806_v42, %v5813_v56  ;;  %v2984_v10 = vrot.slane %v2815_v2, 2 }
 0x289   : > { %v3062_v40 = vadd.f32 %v2976_v23, %v5666_v39  ;;  %v3063_v13 = vadd.f32 %v2978_v62, %v5668_v14  ;;  %v2623_v24 = vpop.f32.mrf.mxu1  ;;  %v4260_v5 = vpop.f32.mrf.mxu0 }
 0x28a   : > { %v2980_v7 = vrot.slane %v2807_v51, 2  ;;  %v2818_v34 = vadd.f32 %v4260_v5, %v5836_v58 }
 0x28b   : > { %v3937_v0 = vpack.c.bf16 %v3063_v13, %v3062_v40  ;;  %v3253_v50 = vadd.f32 %v3252_v15, %v3062_v40  ;;  %v3291_v63 = vmul.f32 %v3062_v40, %v3062_v40  ;;  %v5894_v46 = vpop.f32.mrf.mxu1  ;;  %v2809_v52 = vpop.f32.mrf.mxu0  ;;  %v3292_v60 = vmul.f32 %v3063_v13, %v3063_v13 }
 0x28c   : > { %v2981_v56 = vsel %vm2933_vm1, %v2979_v54, %v2980_v7  ;;  %v2985_v45 = vrot.slane %v2818_v34, 2  ;;  %v2810_v39 = vadd.f32 %v2809_v52, %v5821_v41 }
 0x28d   : > { %3981 = vst [vmem:[%s5803_s9 + $0x40] sm:$0xff] %v3937_v0   ;;  %v3254_v14 = vadd.f32 %v3253_v50, %v3063_v13  ;;  %v3322_v17 = vadd.f32 %v3321_v33, %v3291_v63  ;;  %v3064_v19 = vadd.f32 %v2981_v56, %v5679_v25  ;;  %v2626_v35 = vpop.f32.mrf.mxu1  ;;  %v4263_v58 = vpop.f32.mrf.mxu0 }
 0x28e   : > { %v2986_v31 = vsel %vm2933_vm1, %v2984_v10, %v2985_v45  ;;  %v2982_v11 = vrot.slane %v2810_v39, 2  ;;  %v2831_v41 = vadd.f32 %v4263_v58, %v5858_v32 }
 0x28f   : > { %v3323_v38 = vadd.f32 %v3322_v17, %v3292_v60  ;;  %v3255_v26 = vadd.f32 %v3254_v14, %v3064_v19  ;;  %v3293_v29 = vmul.f32 %v3064_v19, %v3064_v19  ;;  %v5901_v12 = vpop.f32.mrf.mxu1  ;;  %v2822_v37 = vpop.f32.mrf.mxu0  ;;  %v3066_v25 = vadd.f32 %v2986_v31, %v5684_v4 }
 0x290   : > { %v2983_v20 = vsel %vm2933_vm1, %v2980_v7, %v2982_v11  ;;  %v2823_v61 = vadd.f32 %v2822_v37, %v5841_v48  ;;  %v2990_v32 = vrot.slane %v2831_v41, 2 }
 0x291   : > { %v3324_v1 = vadd.f32 %v3323_v38, %v3293_v29  ;;  %v3065_v15 = vadd.f32 %v2983_v20, %v5691_v53  ;;  %v2631_v59 = vpop.f32.mrf.mxu1  ;;  %v4264_v43 = vpop.f32.mrf.mxu0  ;;  %v3295_v2 = vmul.f32 %v3066_v25, %v3066_v25 }
 0x292   : > { %v2987_v47 = vrot.slane %v2823_v61, 2  ;;  %v2834_v28 = vadd.f32 %v4264_v43, %v5865_v3 }
 0x293   : > { %v3942_v6 = vpack.c.bf16 %v3065_v15, %v3064_v19  ;;  %v3256_v9 = vadd.f32 %v3255_v26, %v3065_v15  ;;  %v3294_v33 = vmul.f32 %v3065_v15, %v3065_v15  ;;  %v5909_v42 = vpop.f32.mrf.mxu1  ;;  %v2825_v23 = vpop.f32.mrf.mxu0 }
 0x294   : > { %v2988_v48 = vsel %vm2933_vm1, %v2985_v45, %v2987_v47  ;;  %v2992_v62 = vrot.slane %v2834_v28, 2  ;;  %v2826_v4 = vadd.f32 %v2825_v23, %v5850_v30 }
 0x295   : > { %3982 = vst [vmem:[%s5803_s9 + $0x48] sm:$0xff] %v3942_v6   ;;  %v3325_v53 = vadd.f32 %v3324_v1, %v3294_v33  ;;  %v3067_v51 = vadd.f32 %v2988_v48, %v5702_v55  ;;  %v3257_v40 = vadd.f32 %v3256_v9, %v3066_v25  ;;  %v2634_v3 = vpop.f32.mrf.mxu1  ;;  %v4267_v13 = vpop.f32.mrf.mxu0 }
 0x296   : > { %v2993_v24 = vsel %vm2933_vm1, %v2990_v32, %v2992_v62  ;;  %v2989_v5 = vrot.slane %v2826_v4, 2  ;;  %v2847_v39 = vadd.f32 %v4267_v13, %v5885_v27 }
 0x297   : > { %v3947_v54 = vpack.c.bf16 %v3067_v51, %v3066_v25  ;;  %v3258_v7 = vadd.f32 %v3257_v40, %v3067_v51  ;;  %v3296_v34 = vmul.f32 %v3067_v51, %v3067_v51  ;;  %v3326_v0 = vadd.f32 %v3325_v53, %v3295_v2  ;;  %v2637_v50 = vpop.f32.mrf.mxu1  ;;  %v2838_v63 = vpop.f32.mrf.mxu0 }
 0x298   : > { %v2991_v30 = vsel %vm2933_vm1, %v2989_v5, %v2990_v32  ;;  %v3069_v10 = vadd.f32 %v2993_v24, %v5707_v57  ;;  %v2839_v14 = vadd.f32 %v2838_v63, %v5872_v18 }
 0x299   : > { %3983 = vst [vmem:[%s5803_s9 + $0x50] sm:$0xff] %v3947_v54   ;;  %v3327_v52 = vadd.f32 %v3326_v0, %v3296_v34  ;;  %v3068_v55 = vadd.f32 %v2991_v30, %v5712_v8  ;;  %v2639_v56 = vpop.f32.mrf.mxu1  ;;  %v4268_v45 = vpop.f32.mrf.mxu0  ;;  %v2997_v8 = vrot.slane %v2847_v39, 2 }
 0x29a   : > { %v3298_v11 = vmul.f32 %v3069_v10, %v3069_v10  ;;  %v2994_v37 = vrot.slane %v2839_v14, 2  ;;  %v2850_v20 = vadd.f32 %v4268_v45, %v5894_v46 }
 0x29b   : > { %v3952_v60 = vpack.c.bf16 %v3069_v10, %v3068_v55  ;;  %v3259_v17 = vadd.f32 %v3258_v7, %v3068_v55  ;;  %v3297_v19 = vmul.f32 %v3068_v55, %v3068_v55  ;;  %v2640_v35 = vpop.f32.mrf.mxu1  ;;  %v2841_v58 = vpop.f32.mrf.mxu0 }
 0x29c   : > { %v2842_v31 = vadd.f32 %v2841_v58, %v5880_v21  ;;  %v2999_v6 = vrot.slane %v2850_v20, 2 }
 0x29d   : > { %3984 = vst [vmem:[%s5803_s9 + $0x58] sm:$0xff] %v3952_v60   ;;  %v3328_v38 = vadd.f32 %v3327_v52, %v3297_v19  ;;  %v3260_v26 = vadd.f32 %v3259_v17, %v3069_v10  ;;  %v2642_v57 = vpop.f32.mrf.mxu1  ;;  %v4271_v29 = vpop.f32.mrf.mxu0 }
 0x29e   : > { %v2995_v27 = vrot.slane %v2842_v31, 2  ;;  %v2863_v15 = vadd.f32 %v4271_v29, %v2637_v50 }
 0x29f   : > { %v3329_v41 = vadd.f32 %v3328_v38, %v3298_v11  ;;  %v2645_v18 = vpop.f32.mrf.mxu1  ;;  %v2854_v61 = vpop.f32.mrf.mxu0 }
 0x2a0   : > { %v2996_v1 = vsel %vm2933_vm1, %v2994_v37, %v2995_v27  ;;  %v2998_v25 = vsel %vm2933_vm1, %v2995_v27, %v2997_v8  ;;  %v2855_v21 = vadd.f32 %v2854_v61, %v5901_v12  ;;  %v3004_v4 = vrot.slane %v2863_v15, 2  ;;  %v6122_v15 = vld [vmem:[#allocation27_spill] sm:$0xff] }
 0x2a1   : > { %v3070_v59 = vadd.f32 %v2996_v1, %v5737_v36  ;;  %v3071_v43 = vadd.f32 %v2998_v25, %v5739_v16  ;;  %v2647_v47 = vpop.f32.mrf.mxu1  ;;  %v4272_v28 = vpop.f32.mrf.mxu0 }
 0x2a2   : > { %v3000_v46 = vrot.slane %v2855_v21, 2  ;;  %v2866_v9 = vadd.f32 %v4272_v28, %v2640_v35 }
 0x2a3   : > { %v3957_v33 = vpack.c.bf16 %v3071_v43, %v3070_v59  ;;  %v3261_v23 = vadd.f32 %v3260_v26, %v3070_v59  ;;  %v3299_v32 = vmul.f32 %v3070_v59, %v3070_v59  ;;  %v2648_v48 = vpop.f32.mrf.mxu1  ;;  %v2857_v62 = vpop.f32.mrf.mxu0  ;;  %v3300_v51 = vmul.f32 %v3071_v43, %v3071_v43  ;;  %v6123_v59 = vld [vmem:[#allocation39_spill] sm:$0xff] }
 0x2a4   : > { %v3001_v2 = vsel %vm2933_vm1, %v2999_v6, %v3000_v46  ;;  %v3005_v53 = vrot.slane %v2866_v9, 2  ;;  %v2858_v12 = vadd.f32 %v2857_v62, %v5909_v42 }
 0x2a5   : > { %3985 = vst [vmem:[%s5803_s9 + $0x60] sm:$0xff] %v3957_v33   ;;  %v3262_v36 = vadd.f32 %v3261_v23, %v3071_v43  ;;  %v3330_v16 = vadd.f32 %v3329_v41, %v3299_v32  ;;  %v3072_v40 = vadd.f32 %v3001_v2, %v5750_v44  ;;  %v2650_v3 = vpop.f32.mrf.mxu1  ;;  %v4275_v13 = vpop.f32.mrf.mxu0 }
 0x2a6   : > { %v3006_v24 = vsel %vm2933_vm1, %v3004_v4, %v3005_v53  ;;  %v3002_v5 = vrot.slane %v2858_v12, 2 }
 0x2a7   : > { %v3331_v54 = vadd.f32 %v3330_v16, %v3300_v51  ;;  %v3263_v7 = vadd.f32 %v3262_v36, %v3072_v40  ;;  %v3301_v34 = vmul.f32 %v3072_v40, %v3072_v40  ;;  %v2653_v0 = vpop.f32.mrf.mxu1  ;;  %v2870_v50 = vpop.f32.mrf.mxu0  ;;  %v3074_v52 = vadd.f32 %v3006_v24, %v5755_v49  ;;  %v6121_v49 = vld [vmem:[#allocation43_spill] sm:$0xff] }
 0x2a8   : > { %v3003_v63 = vsel %vm2933_vm1, %v3000_v46, %v3002_v5  ;;  %v2871_v30 = vadd.f32 %v2870_v50, %v2645_v18  ;;  %v2879_v56 = vadd.f32 %v4275_v13, %v2653_v0  ;;  %v3349_v13 = vld [vmem:[%s5723_s6] sm:$0x3] }
 0x2a9   : > { %v3332_v42 = vadd.f32 %v3331_v54, %v3301_v34  ;;  %v3073_v10 = vadd.f32 %v3003_v63, %v5762_v22  ;;  %v2655_v44 = vpop.f32.mrf.mxu1  ;;  %v4276_v55 = vpop.f32.mrf.mxu0  ;;  %v3303_v11 = vmul.f32 %v3074_v52, %v3074_v52 }
 0x2aa   : > { %v3007_v45 = vrot.slane %v2871_v30, 2  ;;  %v3010_v29 = vrot.slane %v2879_v56, 2 }
 0x2ab   : > { %v3962_v39 = vpack.c.bf16 %v3073_v10, %v3072_v40  ;;  %v3264_v14 = vadd.f32 %v3263_v7, %v3073_v10  ;;  %v3302_v60 = vmul.f32 %v3073_v10, %v3073_v10  ;;  %v2656_v17 = vpop.f32.mrf.mxu1  ;;  %v2873_v19 = vpop.f32.mrf.mxu0 }
 0x2ac   : > { %v3008_v35 = vsel %vm2933_vm1, %v3005_v53, %v3007_v45  ;;  %v2882_v58 = vadd.f32 %v4276_v55, %v2656_v17  ;;  %v2874_v31 = vadd.f32 %v2873_v19, %v2648_v48 }
 0x2ad   : > { %3986 = vst [vmem:[%s5803_s9 + $0x68] sm:$0xff] %v3962_v39   ;;  %v3333_v38 = vadd.f32 %v3332_v42, %v3302_v60  ;;  %v3075_v26 = vadd.f32 %v3008_v35, %v6121_v49  ;;  %v3265_v22 = vadd.f32 %v3264_v14, %v3074_v52  ;;  %v2658_v57 = vpop.f32.mrf.mxu1 }
 0x2ae   : > { %v3012_v8 = vrot.slane %v2882_v58, 2  ;;  %v3009_v37 = vrot.slane %v2874_v31, 2 }
 0x2af   : > { %v3967_v20 = vpack.c.bf16 %v3075_v26, %v3074_v52  ;;  %v3266_v27 = vadd.f32 %v3265_v22, %v3075_v26  ;;  %v3304_v41 = vmul.f32 %v3075_v26, %v3075_v26  ;;  %v3334_v18 = vadd.f32 %v3333_v38, %v3303_v11 }
 0x2b0   : > { %v3013_v61 = vsel %vm2933_vm1, %v3010_v29, %v3012_v8  ;;  %v3011_v1 = vsel %vm2933_vm1, %v3009_v37, %v3010_v29 }
 0x2b1   : > { %3987 = vst [vmem:[%s5803_s9 + $0x70] sm:$0xff] %v3967_v20   ;;  %v3335_v25 = vadd.f32 %v3334_v18, %v3304_v41  ;;  %v3077_v21 = vadd.f32 %v3013_v61, %v6122_v15  ;;  %v3076_v43 = vadd.f32 %v3011_v1, %v6123_v59 }
 0x2b3   : > { %v3972_v47 = vpack.c.bf16 %v3077_v21, %v3076_v43  ;;  %v3267_v28 = vadd.f32 %v3266_v27, %v3076_v43  ;;  %v3305_v6 = vmul.f32 %v3076_v43, %v3076_v43  ;;  %v3306_v46 = vmul.f32 %v3077_v21, %v3077_v21 }
 0x2b5   : > { %3988 = vst [vmem:[%s5803_s9 + $0x78] sm:$0xff] %v3972_v47   ;;  %v3268_v9 = vadd.f32 %v3267_v28, %v3077_v21  ;;  %v3336_v33 = vadd.f32 %v3335_v25, %v3305_v6 }
 0x2b7   : > { %v3269_v23 = vrot.slane %v3268_v9, 4  ;;  %v3337_v32 = vadd.f32 %v3336_v33, %v3306_v46 }
 0x2b9   : > { %v3270_v48 = vadd.f32 %v3269_v23, %v3268_v9  ;;  %v3338_v62 = vrot.slane %v3337_v32, 4 }
 0x2bb   : > { %v3271_v4 = vrot.slane %v3270_v48, 2  ;;  %v3339_v2 = vadd.f32 %v3338_v62, %v3337_v32 }
 0x2bd   : > { %v3272_v53 = vadd.f32 %v3271_v4, %v3270_v48  ;;  %v3340_v12 = vrot.slane %v3339_v2, 2 }
 0x2bf   : > { %v3273_v36 = vrot.slane %v3272_v53, 1  ;;  %v3341_v51 = vadd.f32 %v3340_v12, %v3339_v2 }
 0x2c1   : > { %v3342_v16 = vrot.slane %v3341_v51, 1  ;;  %v3274_v40 = vadd.f32 %v3273_v36, %v3272_v53 }
 0x2c3   : > { %v3343_v3 = vadd.f32 %v3342_v16, %v3341_v51 }
 0x2c5   : > { %v3351_v24 = vsel %vm3350_vm2, %v3274_v40, %v3343_v3 }
 0x2c6   : > { %v3352_v5 = vadd.f32 %v3351_v24, %v3349_v13 }
 0x2c8   : > { %3353 = vst [vmem:[%s5723_s6] sm:$0x3] %v3352_v5 }
 0x2c9 PF: > { %s14_s14 = sadd.s32 1, %s4504_s14   ;;  %s6124_s12 = smov %s4500_s13 }
 0x2ca   : > { %p11_p5 = scmp.ge.s32.totalorder %s14_s14, 4   ;;  %s6125_s13 = smov %s6127_s15 }
 0x2cc   :  { %13 = sbr.rel (!%p11_p5) target bundleno = 2 (0x2), region = 79 }

// kernel: double_conv.6
= control target key start
LH: loop header
LB: loop body
LE: loop exit
PB: predicated region body
PF: predicated region fallthrough
CT: control target
= control target key end

     0   :  { %s4528_s12 = smov 0   ;;  %s4530_s13 = smov 0   ;;  %s5958_s0 = inlined_call_operand.vmem [shape: bf16[2,32,24,128], index: 0, kind: input, shape index: {}]   ;;  %s5959_s1 = inlined_call_operand.vmem [shape: bf16[3,384,128], index: 1, kind: input, shape index: {}]   ;;  %s5960_s2 = inlined_call_operand.vmem [shape: bf16[2,16,16,128], index: 2, kind: output, shape index: {0}]   ;;  %s5961_s3 = inlined_call_operand.vmem [shape: f32[2,2,128], index: 3, kind: output, shape index: {1}]  }
   0x1   :  { %s4532_s14 = smov 0  }
   0x2 LB: > { %s26_s15 = sadd.s32 1, %s4500_s13  ;;  %p3486_p0 = scmp.ge.s32.totalorder %s4504_s14, 1  ;;  %s4504_s14 = sphi %s4532_s14, %s14_s14   ;;  %s4500_s13 = sphi %s4530_s13, %s6125_s13   ;;  %s4496_s12 = sphi %s4528_s12, %s6124_s12  }
   0x3   : > { %p28_p1 = scmp.ge.s32.totalorder %s26_s15, 2  ;;  %p154_p2 = scmp.lt.s32.totalorder %s4504_s14, 3 }
   0x5   : > { %s6127_s15 = smov (%p28_p1, %s26_s15), 0  ;;  %p155_p3 = pnand %p3486_p0, %p154_p2 }
   0x7   : > { %158 = sbr.rel (%p155_p3) target bundleno = 713 (0x2c9), region = 28 }
   0xc   : > { %v4320_v0 = vld [vmem:[%s5959_s1 + $0x38] sm:$0xff]   ;;  %v4506_v1 = vmov 0   ;;  %p187_p4 = scmp.lt.s32.totalorder %s4496_s12, 1  ;;  %v4322_v3 = vld [vmem:[%s5959_s1 + $0x30] sm:$0xff]   ;;  %v4570_v5 = vld [vmem:[%s5959_s1 + $0xa8] sm:$0xff]   ;;  %vm2097_vm0 = vcmask 1046528  }
   0xd   : > { %988 = vmatprep.subr.bf16.mxu0 %v4506_v1  ;;  %v4553_v2 = vld [vmem:[%s5959_s1 + $0xb8] sm:$0xff]   ;;  %v4563_v4 = vld [vmem:[%s5959_s1 + $0xb0] sm:$0xff]   ;;  %v4324_v6 = vld [vmem:[%s5959_s1 + $0x28] sm:$0xff]   ;;  %vm2933_vm1 = vcmask 1045504   ;;  %vm3350_vm2 = vcmask 1040384  }
   0xe   : > { %989 = vmatpush1.bf16.msra.mxu0 %v4320_v0  ;;  %4277 = vmatprep.subr.bf16.mxu1 %v4553_v2  ;;  %s6129_s12 = smov (!%p187_p4, %s4496_s12), 1  ;;  %v4583_v7 = vld [vmem:[%s5959_s1 + $0xa0] sm:$0xff]   ;;  %v4595_v9 = vld [vmem:[%s5959_s1 + $0x98] sm:$0xff]   ;;  %v4612_v12 = vld [vmem:[%s5959_s1 + $0x90] sm:$0xff]  }
   0xf   : > { %990 = vmatprep.subr.bf16.mxu0 %v4506_v1  ;;  %4285 = vmatpush3.bf16.msra.mxu1 %v4553_v2  ;;  %s4293_s30 = smul.u32 384, %s6129_s12  ;;  %v4326_v8 = vld [vmem:[%s5959_s1 + $0x20] sm:$0xff]   ;;  %v4328_v10 = vld [vmem:[%s5959_s1 + $0x18] sm:$0xff]   ;;  %v4330_v13 = vld [vmem:[%s5959_s1 + $0x10] sm:$0xff]   ;;  %s3861_s7 = sshll.u32 %s6129_s12, 7 }
  0x10   : > { %4278 = vmatprep.subr.bf16.mxu1 %v4563_v4  ;;  %v4623_v14 = vld [vmem:[%s5959_s1 + $0x88] sm:$0xff]   ;;  %v4634_v16 = vld [vmem:[%s5959_s1 + $0x80] sm:$0xff]   ;;  %v4337_v18 = vld [vmem:[%s5959_s1 + $0x78] sm:$0xff]   ;;  %s5803_s9 = scalar_lea.vmem %s5960_s2, %s3861_s7 }
  0x11   : > { %s4600_s10 = scalar_lea.vmem %s5958_s0, %s4293_s30  ;;  %v4332_v15 = vld [vmem:[%s5959_s1 + $0x8] sm:$0xff]   ;;  %v4334_v17 = vld [vmem:[%s5959_s1] sm:$0xff]   ;;  %v4339_v20 = vld [vmem:[%s5959_s1 + $0xf8] sm:$0xff]  }
  0x12   : > { %991 = vmatpush1.bf16.msra.mxu0 %v4322_v3  ;;  %v4336_v11 = vld [vmem:[%s4600_s10 + $0x58] sm:$0xff]   ;;  %v4338_v19 = vld [vmem:[%s4600_s10 + $0x60] sm:$0xff]   ;;  %v4342_v21 = vld [vmem:[%s4600_s10 + $0x68] sm:$0xff]  }
  0x13   : > { %992 = vmatprep.subr.bf16.mxu0 %v4506_v1  ;;  %4286 = vmatpush3.bf16.msra.mxu1 %v4563_v4  ;;  %v4340_v22 = vld [vmem:[%s5959_s1 + $0x70] sm:$0xff]   ;;  %v4343_v24 = vld [vmem:[%s5959_s1 + $0x68] sm:$0xff]   ;;  %v4348_v27 = vld [vmem:[%s4600_s10 + $0x78] sm:$0xff]  }
  0x14   : > { %4279 = vmatprep.subr.bf16.mxu1 %v4570_v5  ;;  %4117 = vmatprep.mubr.bf16.mxu1 %v4336_v11  ;;  %v4341_v23 = vld [vmem:[%s5959_s1 + $0xf0] sm:$0xff]   ;;  %v4345_v26 = vld [vmem:[%s5959_s1 + $0xe8] sm:$0xff]   ;;  %v4346_v29 = vld [vmem:[%s5959_s1 + $0x60] sm:$0xff]  }
  0x15   : > { %v4344_v25 = vld [vmem:[%s4600_s10 + $0x70] sm:$0xff]   ;;  %v4347_v30 = vld [vmem:[%s5959_s1 + $0xe0] sm:$0xff]   ;;  %v4349_v31 = vld [vmem:[%s5959_s1 + $0x58] sm:$0xff]  }
  0x16   : > { %993 = vmatpush1.bf16.msra.mxu0 %v4324_v6  ;;  %v4671_v28 = vld [vmem:[%s4600_s10 + $0xc] sm:$0xff]   ;;  %v4350_v32 = vld [vmem:[%s4600_s10 + $0x80] sm:$0xff]   ;;  %v4351_v33 = vld [vmem:[%s5959_s1 + $0xd8] sm:$0xff]  }
  0x17   : > { %994 = vmatprep.subr.bf16.mxu0 %v4506_v1  ;;  %4287 = vmatpush3.bf16.msra.mxu1 %v4570_v5  ;;  %v4354_v34 = vld [vmem:[%s4600_s10 + $0x88] sm:$0xff]   ;;  %v4352_v35 = vld [vmem:[%s5959_s1 + $0x50] sm:$0xff]   ;;  %v4362_v40 = vld [vmem:[%s4600_s10 + $0x98] sm:$0xff]  }
  0x18   : > { %4280 = vmatprep.subr.bf16.mxu1 %v4583_v7  ;;  %1020 = vmatprep.mubr.bf16.mxu0 %v4671_v28  ;;  %v4353_v36 = vld [vmem:[%s5959_s1 + $0xd0] sm:$0xff]   ;;  %v4355_v37 = vld [vmem:[%s5959_s1 + $0x48] sm:$0xff]   ;;  %v4358_v41 = vld [vmem:[%s5959_s1 + $0x40] sm:$0xff]  }
  0x19   : > { %v4356_v38 = vld [vmem:[%s4600_s10 + $0x90] sm:$0xff]   ;;  %v4357_v39 = vld [vmem:[%s5959_s1 + $0xc8] sm:$0xff]   ;;  %v4359_v42 = vld [vmem:[%s5959_s1 + $0xc0] sm:$0xff]  }
  0x1a   : > { %995 = vmatpush1.bf16.msra.mxu0 %v4326_v8  ;;  %v4719_v43 = vld [vmem:[%s4600_s10] sm:$0xff]   ;;  %v4724_v45 = vld [vmem:[%s4600_s10 + $0x14] sm:$0xff]   ;;  %v4368_v47 = vld [vmem:[%s4600_s10 + $0xa8] sm:$0xff]  }
  0x1b   : > { %996 = vmatprep.subr.bf16.mxu0 %v4506_v1  ;;  %4288 = vmatpush3.bf16.msra.mxu1 %v4583_v7  ;;  %v4363_v44 = vld [vmem:[%s4600_s10 + $0xa0] sm:$0xff]   ;;  %v4364_v46 = vld [vmem:[%s5959_s1 + $0x138] sm:$0xff]   ;;  %v4365_v48 = vld [vmem:[%s5959_s1 + $0x130] sm:$0xff]  }
  0x1c   : > { %4281 = vmatprep.subr.bf16.mxu1 %v4595_v9  ;;  %v4740_v49 = vld [vmem:[%s4600_s10 + $0x8] sm:$0xff]   ;;  %v4369_v50 = vld [vmem:[%s4600_s10 + $0xb0] sm:$0xff]   ;;  %v4745_v51 = vld [vmem:[%s4600_s10 + $0x1c] sm:$0xff]  }
  0x1d   : > { %v4370_v52 = vld [vmem:[%s5959_s1 + $0x128] sm:$0xff]   ;;  %v4374_v53 = vld [vmem:[%s4600_s10 + $0xb8] sm:$0xff]   ;;  %v4371_v54 = vld [vmem:[%s5959_s1 + $0x120] sm:$0xff]  }
  0x1e   : > { %997 = vmatpush1.bf16.msra.mxu0 %v4328_v10  ;;  %v4762_v55 = vld [vmem:[%s4600_s10 + $0x10] sm:$0xff]   ;;  %v4375_v56 = vld [vmem:[%s4600_s10 + $0xc0] sm:$0xff]   ;;  %v4376_v58 = vld [vmem:[%s5959_s1 + $0x118] sm:$0xff]  }
  0x1f   : > { %998 = vmatprep.subr.bf16.mxu0 %v4506_v1  ;;  %4289 = vmatpush3.bf16.msra.mxu1 %v4595_v9  ;;  %v4767_v57 = vld [vmem:[%s4600_s10 + $0x24] sm:$0xff]   ;;  %v4377_v60 = vld [vmem:[%s5959_s1 + $0x110] sm:$0xff]   ;;  %v4785_v61 = vld [vmem:[%s4600_s10 + $0x18] sm:$0xff]  }
  0x20   : > { %4282 = vmatprep.subr.bf16.mxu1 %v4612_v12  ;;  %v4380_v59 = vld [vmem:[%s4600_s10 + $0xc8] sm:$0xff]   ;;  %v4381_v63 = vld [vmem:[%s4600_s10 + $0xd0] sm:$0xff]   ;;  %v4807_v3 = vld [vmem:[%s4600_s10 + $0x20] sm:$0xff]  }
  0x21   : > { %v4788_v62 = vld [vmem:[%s4600_s10 + $0x2c] sm:$0xff]   ;;  %v4829_v8 = vld [vmem:[%s4600_s10 + $0x3c] sm:$0xff]  }
  0x22   : > { %999 = vmatpush1.bf16.msra.mxu0 %v4330_v13  ;;  %v4382_v0 = vld [vmem:[%s5959_s1 + $0x108] sm:$0xff]   ;;  %v4391_v6 = vld [vmem:[%s5959_s1 + $0x1b0] sm:$0xff]   ;;  %v4399_v10 = vld [vmem:[%s5959_s1 + $0x1a0] sm:$0xff]  }
  0x23   : > { %1000 = vmatprep.subr.bf16.mxu0 %v4506_v1  ;;  %4290 = vmatpush3.bf16.msra.mxu1 %v4612_v12  ;;  %v4843_v11 = vld [vmem:[%s4600_s10 + $0x30] sm:$0xff]   ;;  %v4402_v13 = vld [vmem:[%s5959_s1 + $0x198] sm:$0xff]  }
  0x24   : > { %4283 = vmatprep.subr.bf16.mxu1 %v4623_v14 }
  0x26   : > { %1001 = vmatpush1.bf16.msra.mxu0 %v4332_v15  ;;  %v4860_v15 = vld [vmem:[%s4600_s10 + $0x38] sm:$0xff]  }
  0x27   : > { %1002 = vmatprep.subr.bf16.mxu0 %v4506_v1  ;;  %4291 = vmatpush3.bf16.msra.mxu1 %v4623_v14 }
  0x28   : > { %4284 = vmatprep.subr.bf16.mxu1 %v4634_v16 }
  0x2a   : > { %1003 = vmatpush1.bf16.msra.mxu0 %v4334_v17  ;;  %v4410_v17 = vld [vmem:[%s5959_s1 + $0x188] sm:$0xff]  }
  0x2b   : > { %1004 = vmatprep.subr.bf16.mxu0 %v4506_v1  ;;  %4292 = vmatpush3.bf16.msra.mxu1 %v4634_v16 }
  0x2c   : > { %1599 = vmatprep.subr.bf16.mxu1 %v4506_v1 }
  0x2e   : > { %1005 = vmatpush2.bf16.msra.mxu0 %v4337_v18  ;;  %4118 = vmatmul.mubr.bf16.vlgmr.msra.gmra.mxu1 %v4338_v19  ;;  %v4415_v18 = vld [vmem:[%s5959_s1 + $0x180] sm:$0xff]  }
  0x2f   : > { %1006 = vmatprep.subr.bf16.mxu0 %v4506_v1  ;;  %1600 = vmatpush1.bf16.msra.mxu1 %v4339_v20  ;;  %v4878_v19 = vld [vmem:[%s4600_s10 + $0x40] sm:$0xff]   ;;  %v4882_v20 = vld [vmem:[%s4600_s10 + $0x54] sm:$0xff]  }
  0x30   : > { %4121 = vmatprep.mubr.bf16.mxu1 %v4342_v21  ;;  %1601 = vmatprep.subr.bf16.mxu1 %v4506_v1  ;;  %v4418_v21 = vld [vmem:[%s5959_s1 + $0x1f8] sm:$0xff]  }
  0x32   : > { %1007 = vmatpush2.bf16.msra.mxu0 %v4340_v22  ;;  %v4891_v22 = vld [vmem:[%s5959_s1 + $0x178] sm:$0xff]  }
  0x33   : > { %1008 = vmatprep.subr.bf16.mxu0 %v4506_v1  ;;  %1602 = vmatpush1.bf16.msra.mxu1 %v4341_v23  ;;  %v4899_v23 = vld [vmem:[%s4600_s10 + $0x48] sm:$0xff]  }
  0x34   : > { %1603 = vmatprep.subr.bf16.mxu1 %v4506_v1 }
  0x36   : > { %1009 = vmatpush2.bf16.msra.mxu0 %v4343_v24  ;;  %4122 = vmatmul.mubr.bf16.gmra.mxu1 %v4344_v25  ;;  %v4903_v24 = vld [vmem:[%s4600_s10 + $0x5c] sm:$0xff]   ;;  %v4423_v25 = vld [vmem:[%s5959_s1 + $0x1f0] sm:$0xff]  }
  0x37   : > { %1010 = vmatprep.subr.bf16.mxu0 %v4506_v1  ;;  %1604 = vmatpush1.bf16.msra.mxu1 %v4345_v26  ;;  %v4426_v26 = vld [vmem:[%s5959_s1 + $0x1e8] sm:$0xff]  }
  0x38   : > { %4125 = vmatprep.mubr.bf16.mxu1 %v4348_v27  ;;  %1605 = vmatprep.subr.bf16.mxu1 %v4506_v1  ;;  %v4431_v27 = vld [vmem:[%s5959_s1 + $0x1e0] sm:$0xff]  }
  0x3a   : > { %1011 = vmatpush2.bf16.msra.mxu0 %v4346_v29  ;;  %v4925_v29 = vld [vmem:[%s4600_s10 + $0x64] sm:$0xff]  }
  0x3b   : > { %1012 = vmatprep.subr.bf16.mxu0 %v4506_v1  ;;  %1606 = vmatpush1.bf16.msra.mxu1 %v4347_v30  ;;  %v4434_v30 = vld [vmem:[%s5959_s1 + $0x1d8] sm:$0xff]  }
  0x3c   : > { %1607 = vmatprep.subr.bf16.mxu1 %v4506_v1 }
  0x3e   : > { %1013 = vmatpush2.bf16.msra.mxu0 %v4349_v31  ;;  %4126 = vmatmul.mubr.bf16.gmra.mxu1 %v4350_v32  ;;  %v4440_v31 = vld [vmem:[%s5959_s1 + $0x1d0] sm:$0xff]   ;;  %v4939_v32 = vld [vmem:[%s4600_s10 + $0x58] sm:$0xff]  }
  0x3f   : > { %1014 = vmatprep.subr.bf16.mxu0 %v4506_v1  ;;  %1608 = vmatpush1.bf16.msra.mxu1 %v4351_v33  ;;  %v4943_v33 = vld [vmem:[%s4600_s10 + $0x6c] sm:$0xff]  }
  0x40   : > { %4129 = vmatprep.mubr.bf16.mxu1 %v4354_v34  ;;  %1609 = vmatprep.subr.bf16.mxu1 %v4506_v1  ;;  %v4446_v34 = vld [vmem:[%s5959_s1 + $0x1c8] sm:$0xff]  }
  0x42   : > { %1015 = vmatpush2.bf16.msra.mxu0 %v4352_v35  ;;  %v4454_v35 = vld [vmem:[%s5959_s1 + $0x1c0] sm:$0xff]  }
  0x43   : > { %1016 = vmatprep.subr.bf16.mxu0 %v4506_v1  ;;  %1610 = vmatpush1.bf16.msra.mxu1 %v4353_v36  ;;  %v4957_v36 = vld [vmem:[%s4600_s10 + $0x60] sm:$0xff]  }
  0x44   : > { %1611 = vmatprep.subr.bf16.mxu1 %v4506_v1 }
  0x46   : > { %1017 = vmatpush2.bf16.msra.mxu0 %v4355_v37  ;;  %4130 = vmatmul.mubr.bf16.gmra.mxu1 %v4356_v38  ;;  %v4961_v37 = vld [vmem:[%s4600_s10 + $0x74] sm:$0xff]   ;;  %v4968_v38 = vld [vmem:[%s4600_s10 + $0x68] sm:$0xff]  }
  0x47   : > { %1018 = vmatprep.subr.bf16.mxu0 %v4506_v1  ;;  %1612 = vmatpush1.bf16.msra.mxu1 %v4357_v39  ;;  %v4971_v39 = vld [vmem:[%s4600_s10 + $0x7c] sm:$0xff]  }
  0x48   : > { %4133 = vmatprep.mubr.bf16.mxu1 %v4362_v40  ;;  %1613 = vmatprep.subr.bf16.mxu1 %v4506_v1  ;;  %v4981_v40 = vld [vmem:[%s4600_s10 + $0x84] sm:$0xff]  }
  0x4a   : > { %1019 = vmatpush2.bf16.msra.mxu0 %v4358_v41  ;;  %v4988_v41 = vld [vmem:[%s4600_s10 + $0x78] sm:$0xff]  }
  0x4b   : > { %4085 = vmatprep.subr.bf16.mxu0 %v4553_v2  ;;  %1614 = vmatpush1.bf16.msra.mxu1 %v4359_v42  ;;  %v4991_v42 = vld [vmem:[%s4600_s10 + $0x8c] sm:$0xff]  }
  0x4c   : > { %1615 = vmatprep.subr.bf16.mxu1 %v4506_v1 }
  0x4d   : > { %1021 = vmatmul.mubr.bf16.vlgmr.msra.gmra.mxu0 %v4719_v43 }
  0x4e   : > { %4086 = vmatpush3.bf16.msra.mxu0 %v4553_v2  ;;  %1028 = vmatprep.mubr.bf16.mxu0 %v4724_v45  ;;  %v4383_v2 = vld [vmem:[%s5959_s1 + $0x100] sm:$0xff]  }
  0x4f   : > { %4134 = vmatmul.mubr.bf16.gmra.mxu1 %v4363_v44  ;;  %4087 = vmatprep.subr.bf16.mxu0 %v4563_v4  ;;  %v5001_v44 = vld [vmem:[%s4600_s10 + $0x94] sm:$0xff]  }
  0x50   : > { %1616 = vmatpush2.bf16.msra.mxu1 %v4364_v46  ;;  %4137 = vmatprep.mubr.bf16.mxu1 %v4368_v47  ;;  %v5008_v46 = vld [vmem:[%s4600_s10 + $0x88] sm:$0xff]   ;;  %v5011_v47 = vld [vmem:[%s4600_s10 + $0x9c] sm:$0xff]  }
  0x51   : > { %1617 = vmatprep.subr.bf16.mxu1 %v4506_v1 }
  0x52   : > { %4088 = vmatpush3.bf16.msra.mxu0 %v4563_v4  ;;  %v4810_v4 = vld [vmem:[%s4600_s10 + $0x34] sm:$0xff]  }
  0x53   : > { %4089 = vmatprep.subr.bf16.mxu0 %v4570_v5 }
  0x54   : > { %1618 = vmatpush2.bf16.msra.mxu1 %v4365_v48  ;;  %v5018_v48 = vld [vmem:[%s4600_s10 + $0x90] sm:$0xff]  }
  0x55   : > { %1029 = vmatmul.mubr.bf16.gmra.mxu0 %v4740_v49  ;;  %1619 = vmatprep.subr.bf16.mxu1 %v4506_v1 }
  0x56   : > { %1035 = vmatprep.mubr.bf16.mxu0 %v4745_v51  ;;  %4090 = vmatpush3.bf16.msra.mxu0 %v4570_v5  ;;  %v4386_v5 = vld [vmem:[%s5959_s1 + $0x1b8] sm:$0xff]  }
  0x57   : > { %4138 = vmatmul.mubr.bf16.gmra.mxu1 %v4369_v50  ;;  %4091 = vmatprep.subr.bf16.mxu0 %v4583_v7  ;;  %v5021_v50 = vld [vmem:[%s4600_s10 + $0xa4] sm:$0xff]  }
  0x58   : > { %1620 = vmatpush2.bf16.msra.mxu1 %v4370_v52  ;;  %4141 = vmatprep.mubr.bf16.mxu1 %v4374_v53  ;;  %v5028_v52 = vld [vmem:[%s4600_s10 + $0x98] sm:$0xff]   ;;  %v5031_v53 = vld [vmem:[%s4600_s10 + $0xac] sm:$0xff]  }
  0x59   : > { %1621 = vmatprep.subr.bf16.mxu1 %v4506_v1 }
  0x5a   : > { %4092 = vmatpush3.bf16.msra.mxu0 %v4583_v7  ;;  %v4825_v7 = vld [vmem:[%s4600_s10 + $0x28] sm:$0xff]  }
  0x5b   : > { %4093 = vmatprep.subr.bf16.mxu0 %v4595_v9 }
  0x5c   : > { %1622 = vmatpush2.bf16.msra.mxu1 %v4371_v54  ;;  %v5038_v54 = vld [vmem:[%s4600_s10 + $0xa0] sm:$0xff]  }
  0x5d   : > { %1036 = vmatmul.mubr.bf16.gmra.mxu0 %v4762_v55  ;;  %1623 = vmatprep.subr.bf16.mxu1 %v4506_v1 }
  0x5e   : > { %1042 = vmatprep.mubr.bf16.mxu0 %v4767_v57  ;;  %4094 = vmatpush3.bf16.msra.mxu0 %v4595_v9  ;;  %v4394_v9 = vld [vmem:[%s5959_s1 + $0x1a8] sm:$0xff]  }
  0x5f   : > { %4142 = vmatmul.mubr.bf16.gmra.mxu1 %v4375_v56  ;;  %4095 = vmatprep.subr.bf16.mxu0 %v4612_v12  ;;  %v5041_v56 = vld [vmem:[%s4600_s10 + $0xb4] sm:$0xff]  }
  0x60   : > { %1624 = vmatpush2.bf16.msra.mxu1 %v4376_v58  ;;  %4145 = vmatprep.mubr.bf16.mxu1 %v4380_v59 }
  0x61   : > { %1625 = vmatprep.subr.bf16.mxu1 %v4506_v1 }
  0x62   : > { %4096 = vmatpush3.bf16.msra.mxu0 %v4612_v12  ;;  %v4847_v12 = vld [vmem:[%s4600_s10 + $0x44] sm:$0xff]  }
  0x63   : > { %4097 = vmatprep.subr.bf16.mxu0 %v4623_v14 }
  0x64   : > { %1626 = vmatpush2.bf16.msra.mxu1 %v4377_v60  ;;  %v5052_v60 = vld [vmem:[%s4600_s10 + $0xa8] sm:$0xff]  }
  0x65   : > { %1043 = vmatmul.mubr.bf16.gmra.mxu0 %v4785_v61  ;;  %1627 = vmatprep.subr.bf16.mxu1 %v4506_v1 }
  0x66   : > { %1050 = vmatprep.mubr.bf16.mxu0 %v4788_v62  ;;  %4098 = vmatpush3.bf16.msra.mxu0 %v4623_v14  ;;  %v4407_v14 = vld [vmem:[%s5959_s1 + $0x190] sm:$0xff]  }
  0x67   : > { %4146 = vmatmul.mubr.bf16.gmra.mxu1 %v4381_v63  ;;  %4099 = vmatprep.subr.bf16.mxu0 %v4634_v16  ;;  %v5055_v63 = vld [vmem:[%s4600_s10 + $0xbc] sm:$0xff]  }
  0x68   : > { %1628 = vmatpush2.bf16.msra.mxu1 %v4382_v0  ;;  %1631 = vmatprep.mubr.bf16.mxu1 %v4671_v28  ;;  %v4921_v28 = vld [vmem:[%s4600_s10 + $0x50] sm:$0xff]  }
  0x69   : > { %1629 = vmatprep.subr.bf16.mxu1 %v4506_v1 }
  0x6a   : > { %4100 = vmatpush3.bf16.msra.mxu0 %v4634_v16  ;;  %v4864_v16 = vld [vmem:[%s4600_s10 + $0x4c] sm:$0xff]  }
  0x6b   : > { %4149 = vmatprep.subr.bf16.mxu0 %v4891_v22 }
  0x6c   : > { %1630 = vmatpush2.bf16.msra.mxu1 %v4383_v2 }
  0x6d   : > { %1051 = vmatmul.mubr.bf16.gmra.mxu0 %v4807_v3  ;;  %2435 = vmatprep.subr.bf16.mxu1 %v4506_v1 }
  0x6e   : > { %1057 = vmatprep.mubr.bf16.mxu0 %v4810_v4 }
  0x6f   : > { %1632 = vmatmul.mubr.bf16.vlgmr.msra.gmra.mxu1 %v4719_v43  ;;  %v4998_v43 = vld [vmem:[%s4600_s10 + $0x80] sm:$0xff]  }
  0x70   : > { %2436 = vmatpush1.bf16.msra.mxu1 %v4386_v5  ;;  %1639 = vmatprep.mubr.bf16.mxu1 %v4724_v45 }
  0x71   : > { %2437 = vmatprep.subr.bf16.mxu1 %v4506_v1 }
  0x74   : > { %2438 = vmatpush1.bf16.msra.mxu1 %v4391_v6 }
  0x75   : > { %1058 = vmatmul.mubr.bf16.gmra.mxu0 %v4825_v7  ;;  %2439 = vmatprep.subr.bf16.mxu1 %v4506_v1 }
  0x76   : > { %1064 = vmatprep.mubr.bf16.mxu0 %v4829_v8 }
  0x77   : > { %1640 = vmatmul.mubr.bf16.gmra.mxu1 %v4740_v49 }
  0x78   : > { %1647 = vmatprep.mubr.bf16.mxu1 %v4745_v51  ;;  %2440 = vmatpush1.bf16.msra.mxu1 %v4394_v9  ;;  %v5066_v9 = vld [vmem:[%s4600_s10 + $0xb0] sm:$0xff]  }
  0x79   : > { %2441 = vmatprep.subr.bf16.mxu1 %v4506_v1 }
  0x7c   : > { %2442 = vmatpush1.bf16.msra.mxu1 %v4399_v10  ;;  %v5069_v10 = vld [vmem:[%s4600_s10 + $0xc4] sm:$0xff]  }
  0x7d   : > { %1065 = vmatmul.mubr.bf16.gmra.mxu0 %v4843_v11  ;;  %2443 = vmatprep.subr.bf16.mxu1 %v4506_v1 }
  0x7e   : > { %1072 = vmatprep.mubr.bf16.mxu0 %v4847_v12 }
  0x7f   : > { %1648 = vmatmul.mubr.bf16.gmra.mxu1 %v4762_v55 }
  0x80   : > { %1655 = vmatprep.mubr.bf16.mxu1 %v4767_v57  ;;  %2444 = vmatpush1.bf16.msra.mxu1 %v4402_v13 }
  0x81   : > { %2445 = vmatprep.subr.bf16.mxu1 %v4506_v1 }
  0x84   : > { %2446 = vmatpush1.bf16.msra.mxu1 %v4407_v14 }
  0x85   : > { %1073 = vmatmul.mubr.bf16.gmra.mxu0 %v4860_v15  ;;  %2447 = vmatprep.subr.bf16.mxu1 %v4506_v1 }
  0x86   : > { %1079 = vmatprep.mubr.bf16.mxu0 %v4864_v16 }
  0x87   : > { %1656 = vmatmul.mubr.bf16.gmra.mxu1 %v4785_v61 }
  0x88   : > { %1663 = vmatprep.mubr.bf16.mxu1 %v4788_v62  ;;  %2448 = vmatpush1.bf16.msra.mxu1 %v4410_v17 }
  0x89   : > { %2449 = vmatprep.subr.bf16.mxu1 %v4506_v1 }
  0x8c   : > { %2450 = vmatpush1.bf16.msra.mxu1 %v4415_v18 }
  0x8d   : > { %1080 = vmatmul.mubr.bf16.gmra.mxu0 %v4878_v19  ;;  %2451 = vmatprep.subr.bf16.mxu1 %v4506_v1 }
  0x8e   : > { %1086 = vmatprep.mubr.bf16.mxu0 %v4882_v20 }
  0x8f   : > { %1664 = vmatmul.mubr.bf16.gmra.mxu1 %v4807_v3 }
  0x90   : > { %1671 = vmatprep.mubr.bf16.mxu1 %v4810_v4  ;;  %2452 = vmatpush2.bf16.msra.mxu1 %v4418_v21  ;;  %v5080_v21 = vld [vmem:[%s4600_s10 + $0xb8] sm:$0xff]  }
  0x91   : > { %2453 = vmatprep.subr.bf16.mxu1 %v4506_v1 }
  0x94   : > { %2454 = vmatpush2.bf16.msra.mxu1 %v4423_v25  ;;  %v5083_v25 = vld [vmem:[%s4600_s10 + $0x18] sm:$0xff]  }
  0x95   : > { %1087 = vmatmul.mubr.bf16.gmra.mxu0 %v4899_v23  ;;  %2455 = vmatprep.subr.bf16.mxu1 %v4506_v1 }
  0x96   : > { %1094 = vmatprep.mubr.bf16.mxu0 %v4903_v24 }
  0x97   : > { %1672 = vmatmul.mubr.bf16.gmra.mxu1 %v4825_v7 }
  0x98   : > { %1679 = vmatprep.mubr.bf16.mxu1 %v4829_v8  ;;  %2456 = vmatpush2.bf16.msra.mxu1 %v4426_v26 }
  0x99   : > { %2457 = vmatprep.subr.bf16.mxu1 %v4506_v1 }
  0x9c   : > { %2458 = vmatpush2.bf16.msra.mxu1 %v4431_v27 }
  0x9d   : > { %1095 = vmatmul.mubr.bf16.gmra.mxu0 %v4921_v28  ;;  %2459 = vmatprep.subr.bf16.mxu1 %v4506_v1 }
  0x9e   : > { %1101 = vmatprep.mubr.bf16.mxu0 %v4925_v29 }
  0x9f   : > { %1680 = vmatmul.mubr.bf16.gmra.mxu1 %v4843_v11 }
  0xa0   : > { %1687 = vmatprep.mubr.bf16.mxu1 %v4847_v12  ;;  %2460 = vmatpush2.bf16.msra.mxu1 %v4434_v30 }
  0xa1   : > { %2461 = vmatprep.subr.bf16.mxu1 %v4506_v1 }
  0xa4   : > { %2462 = vmatpush2.bf16.msra.mxu1 %v4440_v31 }
  0xa5   : > { %1102 = vmatmul.mubr.bf16.gmra.mxu0 %v4939_v32  ;;  %2463 = vmatprep.subr.bf16.mxu1 %v4506_v1 }
  0xa6   : > { %1108 = vmatprep.mubr.bf16.mxu0 %v4943_v33 }
  0xa7   : > { %1688 = vmatmul.mubr.bf16.gmra.mxu1 %v4860_v15 }
  0xa8   : > { %1695 = vmatprep.mubr.bf16.mxu1 %v4864_v16  ;;  %2464 = vmatpush2.bf16.msra.mxu1 %v4446_v34  ;;  %v5098_v34 = vld [vmem:[%s4600_s10 + $0x20] sm:$0xff]  }
  0xa9   : > { %2465 = vmatprep.subr.bf16.mxu1 %v4506_v1  ;;  %v4978_v1 = vld [vmem:[%s4600_s10 + $0x70] sm:$0xff]  }
  0xac   : > { %2466 = vmatpush2.bf16.msra.mxu1 %v4454_v35  ;;  %v5101_v35 = vld [vmem:[%s4600_s10 + $0x28] sm:$0xff]  }
  0xad   : > { %1109 = vmatmul.mubr.bf16.gmra.mxu0 %v4957_v36 }
  0xae   : > { %1116 = vmatprep.mubr.bf16.mxu0 %v4961_v37 }
  0xaf   : > { %1696 = vmatmul.mubr.bf16.gmra.mxu1 %v4878_v19 }
  0xb0   : > { %1703 = vmatprep.mubr.bf16.mxu1 %v4882_v20 }
  0xb5   : > { %1117 = vmatmul.mubr.bf16.gmra.mxu0 %v4968_v38 }
  0xb6   : > { %1123 = vmatprep.mubr.bf16.mxu0 %v4971_v39 }
  0xb7   : > { %1704 = vmatmul.mubr.bf16.gmra.mxu1 %v4899_v23 }
  0xb8   : > { %1711 = vmatprep.mubr.bf16.mxu1 %v4903_v24 }
  0xbd   : > { %1124 = vmatmul.mubr.bf16.gmra.mxu0 %v4978_v1 }
  0xbe   : > { %1130 = vmatprep.mubr.bf16.mxu0 %v4981_v40 }
  0xbf   : > { %1712 = vmatmul.mubr.bf16.gmra.mxu1 %v4921_v28 }
  0xc0   : > { %1719 = vmatprep.mubr.bf16.mxu1 %v4925_v29 }
  0xc5   : > { %1131 = vmatmul.mubr.bf16.gmra.mxu0 %v4988_v41 }
  0xc6   : > { %1138 = vmatprep.mubr.bf16.mxu0 %v4991_v42 }
  0xc7   : > { %1720 = vmatmul.mubr.bf16.gmra.mxu1 %v4939_v32 }
  0xc8   : > { %1727 = vmatprep.mubr.bf16.mxu1 %v4943_v33 }
  0xcd   : > { %1139 = vmatmul.mubr.bf16.gmra.mxu0 %v4998_v43 }
  0xce   : > { %1145 = vmatprep.mubr.bf16.mxu0 %v5001_v44 }
  0xcf   : > { %1728 = vmatmul.mubr.bf16.gmra.mxu1 %v4957_v36 }
  0xd0   : > { %1735 = vmatprep.mubr.bf16.mxu1 %v4961_v37 }
  0xd5   : > { %1146 = vmatmul.mubr.bf16.gmra.mxu0 %v5008_v46 }
  0xd6   : > { %1152 = vmatprep.mubr.bf16.mxu0 %v5011_v47 }
  0xd7   : > { %1736 = vmatmul.mubr.bf16.gmra.mxu1 %v4968_v38 }
  0xd8   : > { %1743 = vmatprep.mubr.bf16.mxu1 %v4971_v39 }
  0xdd   : > { %1153 = vmatmul.mubr.bf16.gmra.mxu0 %v5018_v48 }
  0xde   : > { %1160 = vmatprep.mubr.bf16.mxu0 %v5021_v50 }
  0xdf   : > { %1744 = vmatmul.mubr.bf16.gmra.mxu1 %v4978_v1 }
  0xe0   : > { %1751 = vmatprep.mubr.bf16.mxu1 %v4981_v40 }
  0xe5   : > { %1161 = vmatmul.mubr.bf16.gmra.mxu0 %v5028_v52 }
  0xe6   : > { %1167 = vmatprep.mubr.bf16.mxu0 %v5031_v53 }
  0xe7   : > { %1752 = vmatmul.mubr.bf16.gmra.mxu1 %v4988_v41 }
  0xe8   : > { %1759 = vmatprep.mubr.bf16.mxu1 %v4991_v42 }
  0xed   : > { %1168 = vmatmul.mubr.bf16.gmra.mxu0 %v5038_v54 }
  0xee   : > { %1174 = vmatprep.mubr.bf16.mxu0 %v5041_v56  ;;  %v5045_v58 = vpop.f32.mrf.mxu1 }
  0xef   : > { %5962 = vst [vmem:[#allocation2_spill] sm:$0xff] %v5045_v58  ;;  %1760 = vmatmul.mubr.bf16.gmra.mxu1 %v4998_v43 }
  0xf0   : > { %1767 = vmatprep.mubr.bf16.mxu1 %v5001_v44  ;;  %v5049_v59 = vpop.f32.mrf.mxu1 }
  0xf1   : > { %5963 = vst [vmem:[#allocation3_spill] sm:$0xff] %v5049_v59 }
  0xf2   : > { %v5057_v0 = vpop.f32.mrf.mxu1 }
  0xf3   : > { %5964 = vst [vmem:[#allocation4_spill] sm:$0xff] %v5057_v0 }
  0xf4   : > { %v1293_v2 = vpop.f32.mrf.mxu1 }
  0xf5   : > { %1175 = vmatmul.mubr.bf16.gmra.mxu0 %v5052_v60 }
  0xf6   : > { %1182 = vmatprep.mubr.bf16.mxu0 %v5055_v63  ;;  %v5061_v5 = vpop.f32.mrf.mxu1 }
  0xf7   : > { %5965 = vst [vmem:[#allocation5_spill] sm:$0xff] %v5061_v5  ;;  %1768 = vmatmul.mubr.bf16.gmra.mxu1 %v5008_v46 }
  0xf8   : > { %1775 = vmatprep.mubr.bf16.mxu1 %v5011_v47  ;;  %v1305_v6 = vpop.f32.mrf.mxu1 }
  0xf9   : > { %v4441_v6 = vld [vmem:[%s5959_s1 + $0x170] sm:$0xff]  }
  0xfa   : > { %v4124_v13 = vpop.f32.mrf.mxu1 }
  0xfc   : > { %v5071_v14 = vpop.f32.mrf.mxu1 }
  0xfd   : > { %5966 = vst [vmem:[#allocation6_spill] sm:$0xff] %v5071_v14  ;;  %1183 = vmatmul.mubr.bf16.gmra.mxu0 %v5066_v9 }
  0xfe   : > { %1189 = vmatprep.mubr.bf16.mxu0 %v5069_v10  ;;  %v4127_v17 = vpop.f32.mrf.mxu1 }
  0xff   : > { %1776 = vmatmul.mubr.bf16.gmra.mxu1 %v5018_v48 }
 0x100   : > { %1783 = vmatprep.mubr.bf16.mxu1 %v5021_v50  ;;  %v5077_v18 = vpop.f32.mrf.mxu1 }
 0x101   : > { %5967 = vst [vmem:[#allocation7_spill] sm:$0xff] %v5077_v18 }
 0x102   : > { %v5085_v26 = vpop.f32.mrf.mxu1 }
 0x103   : > { %5968 = vst [vmem:[#allocation8_spill] sm:$0xff] %v5085_v26 }
 0x104   : > { %v5087_v27 = vpop.f32.mrf.mxu1 }
 0x105   : > { %5969 = vst [vmem:[#allocation9_spill] sm:$0xff] %v5087_v27  ;;  %1190 = vmatmul.mubr.bf16.gmra.mxu0 %v5080_v21  ;;  %v5123_v27 = vld [vmem:[%s4600_s10 + $0x30] sm:$0xff]  }
 0x106   : > { %4101 = vmatprep.mubr.bf16.mxu0 %v5083_v25  ;;  %v5091_v30 = vpop.f32.mrf.mxu1 }
 0x107   : > { %5970 = vst [vmem:[#allocation10_spill] sm:$0xff] %v5091_v30  ;;  %1784 = vmatmul.mubr.bf16.gmra.mxu1 %v5028_v52 }
 0x108   : > { %1791 = vmatprep.mubr.bf16.mxu1 %v5031_v53  ;;  %v5095_v31 = vpop.f32.mrf.mxu1 }
 0x109   : > { %5971 = vst [vmem:[#allocation11_spill] sm:$0xff] %v5095_v31 }
 0x10a   : > { %v5103_v2 = vpop.f32.mrf.mxu1 }
 0x10b   : > { %5972 = vst [vmem:[#allocation12_spill] sm:$0xff] %v5103_v2  ;;  %v4444_v2 = vld [vmem:[%s5959_s1 + $0x168] sm:$0xff]  }
 0x10c   : > { %v1337_v13 = vpop.f32.mrf.mxu1 }
 0x10d   : > { %v5108_v17 = vpop.f32.mrf.mxu0  ;;  %4102 = vmatmul.mubr.bf16.vlgmr.msra.gmra.mxu0 %v5098_v34 }
 0x10e   : > { %5973 = vst [vmem:[#allocation13_spill] sm:$0xff] %v5108_v17  ;;  %4150 = vmatpush3.bf16.msra.mxu0 %v4891_v22  ;;  %4105 = vmatprep.mubr.bf16.mxu0 %v5101_v35  ;;  %v5126_v22 = vld [vmem:[%s4600_s10 + $0x38] sm:$0xff]  }
 0x10f   : > { %v5113_v31 = vpop.f32.mrf.mxu1  ;;  %1792 = vmatmul.mubr.bf16.gmra.mxu1 %v5038_v54  ;;  %v1024_v30 = vpop.f32.mrf.mxu0  ;;  %4151 = vmatprep.subr.bf16.mxu0 %v4441_v6 }
 0x110   : > { %5974 = vst [vmem:[#allocation14_spill] sm:$0xff] %v5113_v31  ;;  %1799 = vmatprep.mubr.bf16.mxu1 %v5041_v56  ;;  %v4445_v30 = vld [vmem:[%s5959_s1 + $0x160] sm:$0xff]  }
 0x111   : > { %v1349_v13 = vpop.f32.mrf.mxu1  ;;  %v5120_v26 = vpop.f32.mrf.mxu0 }
 0x112   : > { %5975 = vst [vmem:[#allocation15_spill] sm:$0xff] %v5120_v26  ;;  %4152 = vmatpush3.bf16.msra.mxu0 %v4441_v6 }
 0x113   : > { %v4136_v18 = vpop.f32.mrf.mxu1  ;;  %v1027_v31 = vpop.f32.mrf.mxu0  ;;  %4153 = vmatprep.subr.bf16.mxu0 %v4444_v2 }
 0x114   : > { %v4449_v31 = vld [vmem:[%s5959_s1 + $0x158] sm:$0xff]  }
 0x115   : > { %v5131_v14 = vpop.f32.mrf.mxu1  ;;  %v1030_v5 = vpop.f32.mrf.mxu0  ;;  %4106 = vmatmul.mubr.bf16.gmra.mxu0 %v5123_v27 }
 0x116   : > { %5976 = vst [vmem:[#allocation16_spill] sm:$0xff] %v5131_v14  ;;  %4154 = vmatpush3.bf16.msra.mxu0 %v4444_v2  ;;  %4109 = vmatprep.mubr.bf16.mxu0 %v5126_v22  ;;  %v5145_v5 = vld [vmem:[%s4600_s10 + $0x40] sm:$0xff]   ;;  %v5148_v2 = vld [vmem:[%s4600_s10 + $0x48] sm:$0xff]  }
 0x117   : > { %v4139_v6 = vpop.f32.mrf.mxu1  ;;  %1800 = vmatmul.mubr.bf16.gmra.mxu1 %v5052_v60  ;;  %v1031_v18 = vpop.f32.mrf.mxu0  ;;  %4155 = vmatprep.subr.bf16.mxu0 %v4445_v30 }
 0x118   : > { %1807 = vmatprep.mubr.bf16.mxu1 %v5055_v63  ;;  %v4450_v18 = vld [vmem:[%s5959_s1 + $0x150] sm:$0xff]  }
 0x119   : > { %v5140_v13 = vpop.f32.mrf.mxu1  ;;  %v5142_v14 = vpop.f32.mrf.mxu0 }
 0x11a   : > { %5977 = vst [vmem:[#allocation17_spill] sm:$0xff] %v5140_v13  ;;  %5978 = vst [vmem:[#allocation18_spill] sm:$0xff] %v5142_v14  ;;  %4156 = vmatpush3.bf16.msra.mxu0 %v4445_v30 }
 0x11b   : > { %v5150_v6 = vpop.f32.mrf.mxu1  ;;  %v1034_v0 = vpop.f32.mrf.mxu0  ;;  %4157 = vmatprep.subr.bf16.mxu0 %v4449_v31 }
 0x11c   : > { %5979 = vst [vmem:[#allocation19_spill] sm:$0xff] %v5150_v6  ;;  %v4453_v6 = vld [vmem:[%s5959_s1 + $0x148] sm:$0xff]  }
 0x11d   : > { %v5155_v59 = vpop.f32.mrf.mxu1  ;;  %v5157_v58 = vpop.f32.mrf.mxu0  ;;  %4110 = vmatmul.mubr.bf16.gmra.mxu0 %v5145_v5 }
 0x11e   : > { %5980 = vst [vmem:[#allocation20_spill] sm:$0xff] %v5155_v59  ;;  %5981 = vst [vmem:[#allocation21_spill] sm:$0xff] %v5157_v58  ;;  %4158 = vmatpush3.bf16.msra.mxu0 %v4449_v31  ;;  %4113 = vmatprep.mubr.bf16.mxu0 %v5148_v2  ;;  %v5171_v58 = vld [vmem:[%s4600_s10 + $0x50] sm:$0xff]  }
 0x11f   : > { %v5161_v30 = vpop.f32.mrf.mxu1  ;;  %1808 = vmatmul.mubr.bf16.gmra.mxu1 %v5066_v9  ;;  %v1039_v0 = vpop.f32.mrf.mxu0  ;;  %4159 = vmatprep.subr.bf16.mxu0 %v4450_v18 }
 0x120   : > { %5982 = vst [vmem:[#allocation22_spill] sm:$0xff] %v5161_v30  ;;  %1815 = vmatprep.mubr.bf16.mxu1 %v5069_v10  ;;  %v4455_v0 = vld [vmem:[%s5959_s1 + $0x140] sm:$0xff]  }
 0x121   : > { %v5168_v59 = vpop.f32.mrf.mxu1  ;;  %v1040_v13 = vpop.f32.mrf.mxu0 }
 0x122   : > { %5983 = vst [vmem:[#allocation23_spill] sm:$0xff] %v5168_v59  ;;  %4160 = vmatpush3.bf16.msra.mxu0 %v4450_v18 }
 0x123   : > { %v5173_v31 = vpop.f32.mrf.mxu1  ;;  %v1041_v30 = vpop.f32.mrf.mxu0  ;;  %4161 = vmatprep.subr.bf16.mxu0 %v4453_v6 }
 0x124   : > { %5984 = vst [vmem:[#allocation24_spill] sm:$0xff] %v5173_v31  ;;  %v4456_v30 = vld [vmem:[%s5959_s1 + $0x238] sm:$0xff]   ;;  %v4464_v31 = vld [vmem:[%s4600_s10 + $0xc] sm:$0xff]  }
 0x125   : > { %v1381_v14 = vpop.f32.mrf.mxu1  ;;  %v5178_v26 = vpop.f32.mrf.mxu0  ;;  %4114 = vmatmul.mubr.bf16.gmra.mxu0 %v5171_v58 }
 0x126   : > { %5985 = vst [vmem:[#allocation25_spill] sm:$0xff] %v5178_v26  ;;  %4162 = vmatpush3.bf16.msra.mxu0 %v4453_v6  ;;  %4165 = vmatprep.mubr.bf16.mxu0 %v5083_v25 }
 0x127   : > { %v5182_v13 = vpop.f32.mrf.mxu1  ;;  %1816 = vmatmul.mubr.bf16.gmra.mxu1 %v5080_v21  ;;  %v1046_v18 = vpop.f32.mrf.mxu0  ;;  %4163 = vmatprep.subr.bf16.mxu0 %v4455_v0 }
 0x128   : > { %5986 = vst [vmem:[#allocation26_spill] sm:$0xff] %v5182_v13  ;;  %2467 = vmatprep.mubr.bf16.mxu1 %v4464_v31  ;;  %v4457_v13 = vld [vmem:[%s5959_s1 + $0x230] sm:$0xff]  }
 0x129   : > { %v1393_v14 = vpop.f32.mrf.mxu1  ;;  %v5189_v59 = vpop.f32.mrf.mxu0 }
 0x12a   : > { %5987 = vst [vmem:[#allocation27_spill] sm:$0xff] %v5189_v59  ;;  %4164 = vmatpush3.bf16.msra.mxu0 %v4455_v0  ;;  %v4465_v14 = vld [vmem:[%s4600_s10] sm:$0xff]  }
 0x12b   : > { %v4148_v6 = vpop.f32.mrf.mxu1  ;;  %v1049_v26 = vpop.f32.mrf.mxu0  ;;  %4213 = vmatprep.subr.bf16.mxu0 %v4456_v30 }
 0x12c   : > { %v4458_v26 = vld [vmem:[%s5959_s1 + $0x228] sm:$0xff]  }
 0x12d   : > { %v5194_v18 = vpop.f32.mrf.mxu1  ;;  %v1052_v17 = vpop.f32.mrf.mxu0  ;;  %4166 = vmatmul.mubr.bf16.vlgmr.msra.gmra.mxu0 %v5098_v34 }
 0x12e   : > { %5988 = vst [vmem:[#allocation28_spill] sm:$0xff] %v5194_v18  ;;  %4214 = vmatpush3.bf16.msra.mxu0 %v4456_v30  ;;  %4169 = vmatprep.mubr.bf16.mxu0 %v5101_v35 }
 0x12f   : > { %v5198_v31 = vpop.f32.mrf.mxu1  ;;  %2468 = vmatmul.mubr.bf16.vlgmr.msra.gmra.mxu1 %v4465_v14  ;;  %v1053_v0 = vpop.f32.mrf.mxu0  ;;  %4215 = vmatprep.subr.bf16.mxu0 %v4457_v13  ;;  %v4459_v14 = vld [vmem:[%s5959_s1 + $0x220] sm:$0xff]  }
 0x130   : > { %2475 = vmatprep.mubr.bf16.mxu1 %v4724_v45 }
 0x131   : > { %v1635_v6 = vpop.f32.mrf.mxu1  ;;  %v5205_v18 = vpop.f32.mrf.mxu0 }
 0x132   : > { %5989 = vst [vmem:[#allocation29_spill] sm:$0xff] %v5205_v18  ;;  %4216 = vmatpush3.bf16.msra.mxu0 %v4457_v13  ;;  %v4460_v6 = vld [vmem:[%s5959_s1 + $0x218] sm:$0xff]  }
 0x133   : > { %v5207_v17 = vpop.f32.mrf.mxu1  ;;  %v1056_v30 = vpop.f32.mrf.mxu0  ;;  %4217 = vmatprep.subr.bf16.mxu0 %v4458_v26 }
 0x135   : > { %v1638_v0 = vpop.f32.mrf.mxu1  ;;  %v5212_v59 = vpop.f32.mrf.mxu0  ;;  %4170 = vmatmul.mubr.bf16.gmra.mxu0 %v5123_v27 }
 0x136   : > { %5990 = vst [vmem:[#allocation30_spill] sm:$0xff] %v5212_v59  ;;  %4173 = vmatprep.mubr.bf16.mxu0 %v5126_v22  ;;  %4218 = vmatpush3.bf16.msra.mxu0 %v4458_v26  ;;  %v4461_v26 = vld [vmem:[%s5959_s1 + $0x210] sm:$0xff]  }
 0x137   : > { %v5216_v45 = vpop.f32.mrf.mxu1  ;;  %2476 = vmatmul.mubr.bf16.gmra.mxu1 %v4740_v49  ;;  %v1061_v13 = vpop.f32.mrf.mxu0  ;;  %4219 = vmatprep.subr.bf16.mxu0 %v4459_v14 }
 0x138   : > { %2483 = vmatprep.mubr.bf16.mxu1 %v4745_v51 }
 0x139   : > { %v1643_v30 = vpop.f32.mrf.mxu1  ;;  %v1062_v0 = vpop.f32.mrf.mxu0 }
 0x13a   : > { %4220 = vmatpush3.bf16.msra.mxu0 %v4459_v14 }
 0x13b   : > { %v5223_v18 = vpop.f32.mrf.mxu1  ;;  %v1063_v59 = vpop.f32.mrf.mxu0  ;;  %4221 = vmatprep.subr.bf16.mxu0 %v4460_v6 }
 0x13c   : > { %v4462_v59 = vld [vmem:[%s5959_s1 + $0x208] sm:$0xff]  }
 0x13d   : > { %v1646_v49 = vpop.f32.mrf.mxu1  ;;  %v5228_v13 = vpop.f32.mrf.mxu0  ;;  %4174 = vmatmul.mubr.bf16.gmra.mxu0 %v5145_v5 }
 0x13e   : > { %5991 = vst [vmem:[#allocation31_spill] sm:$0xff] %v5228_v13  ;;  %4177 = vmatprep.mubr.bf16.mxu0 %v5148_v2  ;;  %4222 = vmatpush3.bf16.msra.mxu0 %v4460_v6 }
 0x13f   : > { %v5232_v51 = vpop.f32.mrf.mxu1  ;;  %2484 = vmatmul.mubr.bf16.gmra.mxu1 %v4762_v55  ;;  %v1068_v14 = vpop.f32.mrf.mxu0  ;;  %4223 = vmatprep.subr.bf16.mxu0 %v4461_v26  ;;  %v4463_v55 = vld [vmem:[%s5959_s1 + $0x200] sm:$0xff]  }
 0x140   : > { %5992 = vst [vmem:[#allocation32_spill] sm:$0xff] %v5232_v51  ;;  %2491 = vmatprep.mubr.bf16.mxu1 %v4767_v57  ;;  %v5248_v51 = vld [vmem:[%s4600_s10 + $0x58] sm:$0xff]  }
 0x141   : > { %v1651_v30 = vpop.f32.mrf.mxu1  ;;  %v5239_v0 = vpop.f32.mrf.mxu0 }
 0x142   : > { %5993 = vst [vmem:[#allocation33_spill] sm:$0xff] %v5239_v0  ;;  %4224 = vmatpush3.bf16.msra.mxu0 %v4461_v26 }
 0x143   : > { %v5241_v49 = vpop.f32.mrf.mxu1  ;;  %v1071_v6 = vpop.f32.mrf.mxu0  ;;  %4225 = vmatprep.subr.bf16.mxu0 %v4462_v59 }
 0x144   : > { %5994 = vst [vmem:[#allocation34_spill] sm:$0xff] %v5241_v49 }
 0x145   : > { %v1654_v14 = vpop.f32.mrf.mxu1  ;;  %v1074_v13 = vpop.f32.mrf.mxu0  ;;  %4178 = vmatmul.mubr.bf16.gmra.mxu0 %v5171_v58 }
 0x146   : > { %4181 = vmatprep.mubr.bf16.mxu0 %v5248_v51  ;;  %4226 = vmatpush3.bf16.msra.mxu0 %v4462_v59  ;;  %v5262_v59 = vld [vmem:[%s4600_s10 + $0x60] sm:$0xff]  }
 0x147   : > { %v5251_v57 = vpop.f32.mrf.mxu1  ;;  %2492 = vmatmul.mubr.bf16.gmra.mxu1 %v4785_v61  ;;  %v1075_v26 = vpop.f32.mrf.mxu0  ;;  %4227 = vmatprep.subr.bf16.mxu0 %v4463_v55  ;;  %v5266_v61 = vld [vmem:[%s4600_s10 + $0x68] sm:$0xff]  }
 0x148   : > { %2499 = vmatprep.mubr.bf16.mxu1 %v4788_v62 }
 0x149   : > { %v1659_v30 = vpop.f32.mrf.mxu1  ;;  %v5255_v6 = vpop.f32.mrf.mxu0 }
 0x14a   : > { %5995 = vst [vmem:[#allocation35_spill] sm:$0xff] %v5255_v6  ;;  %4228 = vmatpush3.bf16.msra.mxu0 %v4463_v55 }
 0x14b   : > { %v5257_v13 = vpop.f32.mrf.mxu1  ;;  %v1078_v14 = vpop.f32.mrf.mxu0 }
 0x14c   : > { %5996 = vst [vmem:[#allocation36_spill] sm:$0xff] %v5257_v13  ;;  %v5278_v13 = vld [vmem:[%s4600_s10 + $0x70] sm:$0xff]  }
 0x14d   : > { %v1662_v0 = vpop.f32.mrf.mxu1  ;;  %v5259_v49 = vpop.f32.mrf.mxu0  ;;  %4182 = vmatmul.mubr.bf16.gmra.mxu0 %v5262_v59 }
 0x14e   : > { %5997 = vst [vmem:[#allocation37_spill] sm:$0xff] %v5259_v49  ;;  %4185 = vmatprep.mubr.bf16.mxu0 %v5266_v61 }
 0x14f   : > { %v5269_v62 = vpop.f32.mrf.mxu1  ;;  %2500 = vmatmul.mubr.bf16.gmra.mxu1 %v4807_v3  ;;  %v1083_v55 = vpop.f32.mrf.mxu0 }
 0x150   : > { %5998 = vst [vmem:[#allocation38_spill] sm:$0xff] %v5269_v62  ;;  %2507 = vmatprep.mubr.bf16.mxu1 %v4810_v4  ;;  %v5282_v62 = vld [vmem:[%s4600_s10 + $0x78] sm:$0xff]  }
 0x151   : > { %v1667_v0 = vpop.f32.mrf.mxu1  ;;  %v1084_v26 = vpop.f32.mrf.mxu0 }
 0x153   : > { %v5273_v30 = vpop.f32.mrf.mxu1  ;;  %v1085_v14 = vpop.f32.mrf.mxu0 }
 0x154   : > { %5999 = vst [vmem:[#allocation39_spill] sm:$0xff] %v5273_v30  ;;  %v5294_v30 = vld [vmem:[%s4600_s10 + $0x80] sm:$0xff]  }
 0x155   : > { %v1670_v49 = vpop.f32.mrf.mxu1  ;;  %v5275_v6 = vpop.f32.mrf.mxu0  ;;  %4186 = vmatmul.mubr.bf16.gmra.mxu0 %v5278_v13 }
 0x156   : > { %6000 = vst [vmem:[#allocation40_spill] sm:$0xff] %v5275_v6  ;;  %4189 = vmatprep.mubr.bf16.mxu0 %v5282_v62 }
 0x157   : > { %v5285_v3 = vpop.f32.mrf.mxu1  ;;  %2508 = vmatmul.mubr.bf16.gmra.mxu1 %v4825_v7  ;;  %v1090_v4 = vpop.f32.mrf.mxu0 }
 0x158   : > { %6001 = vst [vmem:[#allocation41_spill] sm:$0xff] %v5285_v3  ;;  %2515 = vmatprep.mubr.bf16.mxu1 %v4829_v8  ;;  %v5298_v3 = vld [vmem:[%s4600_s10 + $0x88] sm:$0xff]  }
 0x159   : > { %v1675_v49 = vpop.f32.mrf.mxu1  ;;  %v5289_v55 = vpop.f32.mrf.mxu0 }
 0x15a   : > { %6002 = vst [vmem:[#allocation42_spill] sm:$0xff] %v5289_v55 }
 0x15b   : > { %v5291_v0 = vpop.f32.mrf.mxu1  ;;  %v1093_v26 = vpop.f32.mrf.mxu0 }
 0x15c   : > { %6003 = vst [vmem:[#allocation43_spill] sm:$0xff] %v5291_v0  ;;  %v5312_v0 = vld [vmem:[%s4600_s10 + $0x90] sm:$0xff]  }
 0x15d   : > { %v1678_v14 = vpop.f32.mrf.mxu1  ;;  %v1096_v6 = vpop.f32.mrf.mxu0  ;;  %4190 = vmatmul.mubr.bf16.gmra.mxu0 %v5294_v30 }
 0x15e   : > { %4193 = vmatprep.mubr.bf16.mxu0 %v5298_v3 }
 0x15f   : > { %v5301_v7 = vpop.f32.mrf.mxu1  ;;  %2516 = vmatmul.mubr.bf16.gmra.mxu1 %v4843_v11  ;;  %v1097_v8 = vpop.f32.mrf.mxu0 }
 0x160   : > { %6004 = vst [vmem:[#allocation44_spill] sm:$0xff] %v5301_v7  ;;  %2523 = vmatprep.mubr.bf16.mxu1 %v4847_v12  ;;  %v5316_v7 = vld [vmem:[%s4600_s10 + $0x98] sm:$0xff]  }
 0x161   : > { %v1683_v4 = vpop.f32.mrf.mxu1  ;;  %v5305_v49 = vpop.f32.mrf.mxu0 }
 0x162   : > { %6005 = vst [vmem:[#allocation45_spill] sm:$0xff] %v5305_v49 }
 0x163   : > { %v5307_v6 = vpop.f32.mrf.mxu1  ;;  %v1100_v26 = vpop.f32.mrf.mxu0 }
 0x164   : > { %6006 = vst [vmem:[#allocation46_spill] sm:$0xff] %v5307_v6  ;;  %v5328_v6 = vld [vmem:[%s4600_s10 + $0xa0] sm:$0xff]  }
 0x165   : > { %v1686_v14 = vpop.f32.mrf.mxu1  ;;  %v5309_v55 = vpop.f32.mrf.mxu0  ;;  %4194 = vmatmul.mubr.bf16.gmra.mxu0 %v5312_v0 }
 0x166   : > { %6007 = vst [vmem:[#allocation47_spill] sm:$0xff] %v5309_v55  ;;  %4197 = vmatprep.mubr.bf16.mxu0 %v5316_v7 }
 0x167   : > { %v5319_v11 = vpop.f32.mrf.mxu1  ;;  %2524 = vmatmul.mubr.bf16.gmra.mxu1 %v4860_v15  ;;  %v1105_v12 = vpop.f32.mrf.mxu0 }
 0x168   : > { %6008 = vst [vmem:[#allocation48_spill] sm:$0xff] %v5319_v11  ;;  %2531 = vmatprep.mubr.bf16.mxu1 %v4864_v16  ;;  %v5332_v11 = vld [vmem:[%s4600_s10 + $0xa8] sm:$0xff]  }
 0x169   : > { %v1691_v8 = vpop.f32.mrf.mxu1  ;;  %v1106_v4 = vpop.f32.mrf.mxu0 }
 0x16b   : > { %v5323_v26 = vpop.f32.mrf.mxu1  ;;  %v1107_v14 = vpop.f32.mrf.mxu0 }
 0x16c   : > { %6009 = vst [vmem:[#allocation49_spill] sm:$0xff] %v5323_v26  ;;  %v5344_v26 = vld [vmem:[%s4600_s10 + $0xb0] sm:$0xff]  }
 0x16d   : > { %v1694_v49 = vpop.f32.mrf.mxu1  ;;  %v5325_v55 = vpop.f32.mrf.mxu0  ;;  %4198 = vmatmul.mubr.bf16.gmra.mxu0 %v5328_v6 }
 0x16e   : > { %6010 = vst [vmem:[#allocation50_spill] sm:$0xff] %v5325_v55  ;;  %4201 = vmatprep.mubr.bf16.mxu0 %v5332_v11 }
 0x16f   : > { %v5335_v15 = vpop.f32.mrf.mxu1  ;;  %2532 = vmatmul.mubr.bf16.gmra.mxu1 %v4878_v19  ;;  %v1112_v16 = vpop.f32.mrf.mxu0 }
 0x170   : > { %6011 = vst [vmem:[#allocation51_spill] sm:$0xff] %v5335_v15  ;;  %2539 = vmatprep.mubr.bf16.mxu1 %v4882_v20  ;;  %v5348_v15 = vld [vmem:[%s4600_s10 + $0xb8] sm:$0xff]  }
 0x171   : > { %v1699_v49 = vpop.f32.mrf.mxu1  ;;  %v5339_v12 = vpop.f32.mrf.mxu0 }
 0x172   : > { %6012 = vst [vmem:[#allocation52_spill] sm:$0xff] %v5339_v12 }
 0x173   : > { %v5341_v8 = vpop.f32.mrf.mxu1  ;;  %v1115_v4 = vpop.f32.mrf.mxu0 }
 0x174   : > { %6013 = vst [vmem:[#allocation53_spill] sm:$0xff] %v5341_v8  ;;  %v5362_v8 = vld [vmem:[%s4600_s10 + $0xc0] sm:$0xff]  }
 0x175   : > { %v1702_v14 = vpop.f32.mrf.mxu1  ;;  %v1118_v55 = vpop.f32.mrf.mxu0  ;;  %4202 = vmatmul.mubr.bf16.gmra.mxu0 %v5344_v26 }
 0x176   : > { %4205 = vmatprep.mubr.bf16.mxu0 %v5348_v15 }
 0x177   : > { %v5351_v19 = vpop.f32.mrf.mxu1  ;;  %2540 = vmatmul.mubr.bf16.gmra.mxu1 %v4899_v23  ;;  %v1119_v20 = vpop.f32.mrf.mxu0 }
 0x178   : > { %6014 = vst [vmem:[#allocation54_spill] sm:$0xff] %v5351_v19  ;;  %2547 = vmatprep.mubr.bf16.mxu1 %v4903_v24  ;;  %v5366_v19 = vld [vmem:[%s4600_s10 + $0xc8] sm:$0xff]  }
 0x179   : > { %v1707_v16 = vpop.f32.mrf.mxu1  ;;  %v5355_v49 = vpop.f32.mrf.mxu0 }
 0x17a   : > { %6015 = vst [vmem:[#allocation55_spill] sm:$0xff] %v5355_v49 }
 0x17b   : > { %v5357_v55 = vpop.f32.mrf.mxu1  ;;  %v1122_v4 = vpop.f32.mrf.mxu0 }
 0x17c   : > { %6016 = vst [vmem:[#allocation56_spill] sm:$0xff] %v5357_v55  ;;  %v5378_v55 = vld [vmem:[%s4600_s10 + $0xd0] sm:$0xff]   ;;  %s3490_s10 = sshll.u32 %s6129_s12, 1 }
 0x17d   : > { %v1710_v14 = vpop.f32.mrf.mxu1  ;;  %v5359_v12 = vpop.f32.mrf.mxu0  ;;  %4206 = vmatmul.mubr.bf16.gmra.mxu0 %v5362_v8  ;;  %s5723_s6 = scalar_lea.vmem %s5961_s3, %s3490_s10 }
 0x17e   : > { %6017 = vst [vmem:[#allocation57_spill] sm:$0xff] %v5359_v12  ;;  %4209 = vmatprep.mubr.bf16.mxu0 %v5366_v19 }
 0x17f   : > { %v5369_v23 = vpop.f32.mrf.mxu1  ;;  %2548 = vmatmul.mubr.bf16.gmra.mxu1 %v4921_v28  ;;  %v1127_v24 = vpop.f32.mrf.mxu0 }
 0x180   : > { %6018 = vst [vmem:[#allocation58_spill] sm:$0xff] %v5369_v23  ;;  %2555 = vmatprep.mubr.bf16.mxu1 %v4925_v29 }
 0x181   : > { %v1715_v20 = vpop.f32.mrf.mxu1  ;;  %v1128_v16 = vpop.f32.mrf.mxu0 }
 0x183   : > { %v5373_v4 = vpop.f32.mrf.mxu1  ;;  %v1129_v14 = vpop.f32.mrf.mxu0 }
 0x185   : > { %v1718_v12 = vpop.f32.mrf.mxu1  ;;  %v5375_v49 = vpop.f32.mrf.mxu0  ;;  %4210 = vmatmul.mubr.bf16.gmra.mxu0 %v5378_v55 }
 0x186   : > { %4229 = vmatprep.mubr.bf16.mxu0 %v5083_v25 }
 0x187   : > { %v5382_v23 = vpop.f32.mrf.mxu1  ;;  %2556 = vmatmul.mubr.bf16.gmra.mxu1 %v4939_v32  ;;  %v1134_v28 = vpop.f32.mrf.mxu0 }
 0x188   : > { %2563 = vmatprep.mubr.bf16.mxu1 %v4943_v33 }
 0x189   : > { %v1723_v29 = vpop.f32.mrf.mxu1  ;;  %v5386_v24 = vpop.f32.mrf.mxu0 }
 0x18a   : > { %6019 = vst [vmem:[#allocation59_spill] sm:$0xff] %v5386_v24 }
 0x18b   : > { %v5388_v20 = vpop.f32.mrf.mxu1  ;;  %v1137_v12 = vpop.f32.mrf.mxu0 }
 0x18d   : > { %v1726_v16 = vpop.f32.mrf.mxu1  ;;  %v1140_v14 = vpop.f32.mrf.mxu0  ;;  %4230 = vmatmul.mubr.bf16.vlgmr.msra.gmra.mxu0 %v5098_v34 }
 0x18e   : > { %4233 = vmatprep.mubr.bf16.mxu0 %v5101_v35 }
 0x18f   : > { %v5392_v25 = vpop.f32.mrf.mxu1  ;;  %2564 = vmatmul.mubr.bf16.gmra.mxu1 %v4957_v36  ;;  %v1141_v32 = vpop.f32.mrf.mxu0 }
 0x190   : > { %2571 = vmatprep.mubr.bf16.mxu1 %v4961_v37 }
 0x191   : > { %v1731_v33 = vpop.f32.mrf.mxu1  ;;  %v5396_v28 = vpop.f32.mrf.mxu0 }
 0x193   : > { %v5398_v29 = vpop.f32.mrf.mxu1  ;;  %v1144_v24 = vpop.f32.mrf.mxu0 }
 0x195   : > { %v1734_v12 = vpop.f32.mrf.mxu1  ;;  %v5400_v16 = vpop.f32.mrf.mxu0  ;;  %4234 = vmatmul.mubr.bf16.gmra.mxu0 %v5123_v27 }
 0x196   : > { %4237 = vmatprep.mubr.bf16.mxu0 %v5126_v22 }
 0x197   : > { %v5404_v34 = vpop.f32.mrf.mxu1  ;;  %2572 = vmatmul.mubr.bf16.gmra.mxu1 %v4968_v38  ;;  %v1149_v36 = vpop.f32.mrf.mxu0 }
 0x198   : > { %2579 = vmatprep.mubr.bf16.mxu1 %v4971_v39 }
 0x199   : > { %v1739_v37 = vpop.f32.mrf.mxu1  ;;  %v1150_v35 = vpop.f32.mrf.mxu0 }
 0x19b   : > { %v5408_v14 = vpop.f32.mrf.mxu1  ;;  %v1151_v32 = vpop.f32.mrf.mxu0 }
 0x19d   : > { %v1742_v24 = vpop.f32.mrf.mxu1  ;;  %v5410_v33 = vpop.f32.mrf.mxu0  ;;  %4238 = vmatmul.mubr.bf16.gmra.mxu0 %v5145_v5 }
 0x19e   : > { %4241 = vmatprep.mubr.bf16.mxu0 %v5148_v2 }
 0x19f   : > { %v5414_v27 = vpop.f32.mrf.mxu1  ;;  %2580 = vmatmul.mubr.bf16.gmra.mxu1 %v4978_v1  ;;  %v1156_v38 = vpop.f32.mrf.mxu0 }
 0x1a0   : > { %2587 = vmatprep.mubr.bf16.mxu1 %v4981_v40 }
 0x1a1   : > { %v1747_v39 = vpop.f32.mrf.mxu1  ;;  %v5418_v22 = vpop.f32.mrf.mxu0 }
 0x1a3   : > { %v5420_v12 = vpop.f32.mrf.mxu1  ;;  %v1159_v36 = vpop.f32.mrf.mxu0 }
 0x1a5   : > { %v1750_v37 = vpop.f32.mrf.mxu1  ;;  %v1162_v35 = vpop.f32.mrf.mxu0  ;;  %4242 = vmatmul.mubr.bf16.gmra.mxu0 %v5171_v58 }
 0x1a6   : > { %4245 = vmatprep.mubr.bf16.mxu0 %v5248_v51 }
 0x1a7   : > { %v5424_v5 = vpop.f32.mrf.mxu1  ;;  %2588 = vmatmul.mubr.bf16.gmra.mxu1 %v4988_v41  ;;  %v1163_v1 = vpop.f32.mrf.mxu0 }
 0x1a8   : > { %2595 = vmatprep.mubr.bf16.mxu1 %v4991_v42 }
 0x1a9   : > { %v1755_v40 = vpop.f32.mrf.mxu1  ;;  %v5428_v2 = vpop.f32.mrf.mxu0 }
 0x1ab   : > { %v5430_v32 = vpop.f32.mrf.mxu1  ;;  %v1166_v24 = vpop.f32.mrf.mxu0 }
 0x1ad   : > { %v1758_v38 = vpop.f32.mrf.mxu1  ;;  %v5432_v39 = vpop.f32.mrf.mxu0  ;;  %4246 = vmatmul.mubr.bf16.gmra.mxu0 %v5262_v59 }
 0x1ae   : > { %6020 = vst [vmem:[#allocation60_spill] sm:$0xff] %v5432_v39  ;;  %4249 = vmatprep.mubr.bf16.mxu0 %v5266_v61 }
 0x1af   : > { %v5436_v58 = vpop.f32.mrf.mxu1  ;;  %2596 = vmatmul.mubr.bf16.gmra.mxu1 %v4998_v43  ;;  %v1171_v41 = vpop.f32.mrf.mxu0 }
 0x1b0   : > { %2603 = vmatprep.mubr.bf16.mxu1 %v5001_v44 }
 0x1b1   : > { %v1763_v42 = vpop.f32.mrf.mxu1  ;;  %v1172_v51 = vpop.f32.mrf.mxu0 }
 0x1b3   : > { %v5440_v36 = vpop.f32.mrf.mxu1  ;;  %v1173_v37 = vpop.f32.mrf.mxu0 }
 0x1b5   : > { %v1766_v35 = vpop.f32.mrf.mxu1  ;;  %v5442_v1 = vpop.f32.mrf.mxu0  ;;  %4250 = vmatmul.mubr.bf16.gmra.mxu0 %v5278_v13 }
 0x1b6   : > { %4253 = vmatprep.mubr.bf16.mxu0 %v5282_v62 }
 0x1b7   : > { %v5446_v59 = vpop.f32.mrf.mxu1  ;;  %2604 = vmatmul.mubr.bf16.gmra.mxu1 %v5008_v46  ;;  %v1178_v43 = vpop.f32.mrf.mxu0 }
 0x1b8   : > { %2611 = vmatprep.mubr.bf16.mxu1 %v5011_v47 }
 0x1b9   : > { %v1771_v44 = vpop.f32.mrf.mxu1  ;;  %v5450_v61 = vpop.f32.mrf.mxu0 }
 0x1ba   : > { %6021 = vst [vmem:[#allocation61_spill] sm:$0xff] %v5450_v61 }
 0x1bb   : > { %v5452_v40 = vpop.f32.mrf.mxu1  ;;  %v1181_v24 = vpop.f32.mrf.mxu0 }
 0x1bd   : > { %v1774_v38 = vpop.f32.mrf.mxu1  ;;  %v1184_v41 = vpop.f32.mrf.mxu0  ;;  %4254 = vmatmul.mubr.bf16.gmra.mxu0 %v5294_v30 }
 0x1be   : > { %4257 = vmatprep.mubr.bf16.mxu0 %v5298_v3 }
 0x1bf   : > { %v5456_v13 = vpop.f32.mrf.mxu1  ;;  %2612 = vmatmul.mubr.bf16.gmra.mxu1 %v5018_v48  ;;  %v1185_v46 = vpop.f32.mrf.mxu0 }
 0x1c0   : > { %2619 = vmatprep.mubr.bf16.mxu1 %v5021_v50 }
 0x1c1   : > { %v1779_v47 = vpop.f32.mrf.mxu1  ;;  %v5460_v62 = vpop.f32.mrf.mxu0 }
 0x1c2   : > { %6022 = vst [vmem:[#allocation62_spill] sm:$0xff] %v5460_v62 }
 0x1c3   : > { %v5462_v42 = vpop.f32.mrf.mxu1  ;;  %v1188_v51 = vpop.f32.mrf.mxu0 }
 0x1c5   : > { %v1782_v37 = vpop.f32.mrf.mxu1  ;;  %v5464_v35 = vpop.f32.mrf.mxu0  ;;  %4258 = vmatmul.mubr.bf16.gmra.mxu0 %v5312_v0 }
 0x1c6   : > { %6023 = vst [vmem:[#allocation63_spill] sm:$0xff] %v5464_v35  ;;  %4261 = vmatprep.mubr.bf16.mxu0 %v5316_v7 }
 0x1c7   : > { %v5468_v30 = vpop.f32.mrf.mxu1  ;;  %2620 = vmatmul.mubr.bf16.gmra.mxu1 %v5028_v52  ;;  %v1193_v48 = vpop.f32.mrf.mxu0 }
 0x1c8   : > { %2627 = vmatprep.mubr.bf16.mxu1 %v5031_v53 }
 0x1c9   : > { %v1787_v50 = vpop.f32.mrf.mxu1  ;;  %v1194_v3 = vpop.f32.mrf.mxu0 }
 0x1cb   : > { %v5472_v43 = vpop.f32.mrf.mxu1  ;;  %v1195_v44 = vpop.f32.mrf.mxu0 }
 0x1cd   : > { %v1790_v24 = vpop.f32.mrf.mxu1  ;;  %v4103_v38 = vpop.f32.mrf.mxu0  ;;  %4262 = vmatmul.mubr.bf16.gmra.mxu0 %v5328_v6 }
 0x1ce   : > { %4265 = vmatprep.mubr.bf16.mxu0 %v5332_v11 }
 0x1cf   : > { %v5476_v0 = vpop.f32.mrf.mxu1  ;;  %2628 = vmatmul.mubr.bf16.gmra.mxu1 %v5038_v54  ;;  %v1231_v7 = vpop.f32.mrf.mxu0 }
 0x1d0   : > { %2635 = vmatprep.mubr.bf16.mxu1 %v5041_v56 }
 0x1d1   : > { %v1795_v52 = vpop.f32.mrf.mxu1  ;;  %v5480_v53 = vpop.f32.mrf.mxu0 }
 0x1d3   : > { %v5482_v41 = vpop.f32.mrf.mxu1  ;;  %v1234_v46 = vpop.f32.mrf.mxu0 }
 0x1d5   : > { %v1798_v47 = vpop.f32.mrf.mxu1  ;;  %v5484_v51 = vpop.f32.mrf.mxu0  ;;  %4266 = vmatmul.mubr.bf16.gmra.mxu0 %v5344_v26 }
 0x1d6   : > { %4269 = vmatprep.mubr.bf16.mxu0 %v5348_v15 }
 0x1d7   : > { %v5488_v6 = vpop.f32.mrf.mxu1  ;;  %2636 = vmatmul.mubr.bf16.gmra.mxu1 %v5052_v60  ;;  %v5491_v54 = vpop.f32.mrf.mxu0 }
 0x1d8   : > { %2643 = vmatprep.mubr.bf16.mxu1 %v5055_v63 }
 0x1d9   : > { %v1803_v56 = vpop.f32.mrf.mxu1  ;;  %v5494_v11 = vpop.f32.mrf.mxu0 }
 0x1db   : > { %v5496_v37 = vpop.f32.mrf.mxu1  ;;  %v1249_v48 = vpop.f32.mrf.mxu0 }
 0x1dd   : > { %v1806_v50 = vpop.f32.mrf.mxu1  ;;  %v5498_v3 = vpop.f32.mrf.mxu0  ;;  %4270 = vmatmul.mubr.bf16.gmra.mxu0 %v5362_v8 }
 0x1de   : > { %4273 = vmatprep.mubr.bf16.mxu0 %v5366_v19 }
 0x1df   : > { %v5502_v26 = vpop.f32.mrf.mxu1  ;;  %2644 = vmatmul.mubr.bf16.gmra.mxu1 %v5066_v9  ;;  %v1261_v60 = vpop.f32.mrf.mxu0 }
 0x1e0   : > { %6024 = vst [vmem:[#allocation64_spill] sm:$0xff] %v5502_v26  ;;  %2651 = vmatprep.mubr.bf16.mxu1 %v5069_v10  ;;  %v6030_v26 = vld [vmem:[#allocation13_spill] sm:$0xff] }
 0x1e1   : > { %v1811_v63 = vpop.f32.mrf.mxu1  ;;  %v4112_v15 = vpop.f32.mrf.mxu0 }
 0x1e3   : > { %v5506_v44 = vpop.f32.mrf.mxu1  ;;  %v5508_v24 = vpop.f32.mrf.mxu0 }
 0x1e4   : > { %6025 = vst [vmem:[#allocation65_spill] sm:$0xff] %v5506_v44 }
 0x1e5   : > { %v1814_v38 = vpop.f32.mrf.mxu1  ;;  %v4115_v52 = vpop.f32.mrf.mxu0  ;;  %4274 = vmatmul.mubr.bf16.gmra.mxu0 %v5378_v55 }
 0x1e7   : > { %v5511_v8 = vpop.f32.mrf.mxu1  ;;  %2652 = vmatmul.mubr.bf16.gmra.mxu1 %v5080_v21  ;;  %v5514_v19 = vpop.f32.mrf.mxu0 }
 0x1e8   : > { %6026 = vst [vmem:[#allocation66_spill] sm:$0xff] %v5511_v8  ;;  %v6031_v8 = vld [vmem:[#allocation15_spill] sm:$0xff] }
 0x1e9   : > { %v1819_v9 = vpop.f32.mrf.mxu1  ;;  %v5516_v47 = vpop.f32.mrf.mxu0  ;;  %v1235_v39 = vadd.f32 %v1234_v46, %v6031_v8  ;;  %v6033_v46 = vld [vmem:[#allocation36_spill] sm:$0xff] }
 0x1eb   : > { %v5518_v10 = vpop.f32.mrf.mxu1  ;;  %v5520_v56 = vpop.f32.mrf.mxu0 }
 0x1ec   : > { %6027 = vst [vmem:[#allocation67_spill] sm:$0xff] %v5518_v10 }
 0x1ed   : > { %v1822_v48 = vpop.f32.mrf.mxu1  ;;  %v4167_v50 = vpop.f32.mrf.mxu0 }
 0x1ee   : > { %v1867_v38 = vadd.f32 %v4167_v50, %v5216_v45 }
 0x1ef   : > { %v5522_v60 = vpop.f32.mrf.mxu1  ;;  %v1858_v63 = vpop.f32.mrf.mxu0 }
 0x1f0   : > { %6028 = vst [vmem:[#allocation68_spill] sm:$0xff] %v5522_v60  ;;  %v1859_v21 = vadd.f32 %v1858_v63, %v5198_v31  ;;  %v2101_v61 = vrot.slane %v1867_v38, 1 }
 0x1f1   : > { %v2471_v15 = vpop.f32.mrf.mxu1  ;;  %v4168_v55 = vpop.f32.mrf.mxu0 }
 0x1f2   : > { %v2098_v48 = vrot.slane %v1859_v21, 1  ;;  %v1870_v10 = vadd.f32 %v4168_v55, %v5223_v18  ;;  %v1232_v15 = vadd.f32 %v1231_v7, %v6030_v26  ;;  %v6034_v55 = vld [vmem:[#allocation18_spill] sm:$0xff] }
 0x1f3   : > { %v5526_v52 = vpop.f32.mrf.mxu1  ;;  %v1861_v9 = vpop.f32.mrf.mxu0 }
 0x1f4   : > { %6029 = vst [vmem:[#allocation69_spill] sm:$0xff] %v5526_v52  ;;  %v1862_v62 = vadd.f32 %v1861_v9, %v5207_v17  ;;  %v2103_v7 = vrot.slane %v1870_v10, 1  ;;  %v1242_v52 = vadd.f32 %v5480_v53, %v6034_v55  ;;  %v6038_v53 = vld [vmem:[#allocation21_spill] sm:$0xff] }
 0x1f5   : > { %v2474_v35 = vpop.f32.mrf.mxu1  ;;  %v4171_v44 = vpop.f32.mrf.mxu0  ;;  %v6040_v55 = vld [vmem:[#allocation41_spill] sm:$0xff] }
 0x1f6   : > { %v2099_v60 = vrot.slane %v1862_v62, 1  ;;  %v1883_v17 = vadd.f32 %v4171_v44, %v5251_v57  ;;  %v6032_v35 = vld [vmem:[#allocation32_spill] sm:$0xff] }
 0x1f7   : > { %v5532_v45 = vpop.f32.mrf.mxu1  ;;  %v1874_v31 = vpop.f32.mrf.mxu0 }
 0x1f8   : > { %v2100_v50 = vsel %vm2097_vm0, %v2098_v48, %v2099_v60  ;;  %v2102_v63 = vsel %vm2097_vm0, %v2099_v60, %v2101_v61  ;;  %v1875_v9 = vadd.f32 %v1874_v31, %v6032_v35  ;;  %v2108_v60 = vrot.slane %v1883_v17, 1 }
 0x1f9   : > { %v5538_v38 = vadd.f32 %v2100_v50, %v1232_v15  ;;  %v5540_v21 = vadd.f32 %v2102_v63, %v1235_v39  ;;  %v2479_v18 = vpop.f32.mrf.mxu1  ;;  %v4172_v62 = vpop.f32.mrf.mxu0  ;;  %v6035_v15 = vld [vmem:[#allocation34_spill] sm:$0xff]  ;;  %v6036_v39 = vld [vmem:[#allocation25_spill] sm:$0xff] }
 0x1fa   : > { %v2104_v26 = vrot.slane %v1875_v9, 1  ;;  %v1886_v8 = vadd.f32 %v4172_v62, %v6033_v46  ;;  %v1254_v50 = vadd.f32 %v5484_v51, %v6036_v39  ;;  %v1247_v62 = vadd.f32 %v5491_v54, %v6038_v53  ;;  %v6041_v51 = vld [vmem:[#allocation38_spill] sm:$0xff] }
 0x1fb   : > { %v5545_v48 = vpop.f32.mrf.mxu1  ;;  %v1877_v61 = vpop.f32.mrf.mxu0 }
 0x1fc   : > { %v2105_v57 = vsel %vm2097_vm0, %v2103_v7, %v2104_v26  ;;  %v2109_v44 = vrot.slane %v1886_v8, 1  ;;  %v1878_v31 = vadd.f32 %v1877_v61, %v6035_v15 }
 0x1fd   : > { %v5551_v63 = vadd.f32 %v2105_v57, %v1242_v52  ;;  %v2482_v10 = vpop.f32.mrf.mxu1  ;;  %v4175_v35 = vpop.f32.mrf.mxu0 }
 0x1fe   : > { %v2110_v9 = vsel %vm2097_vm0, %v2108_v60, %v2109_v44  ;;  %v2106_v18 = vrot.slane %v1878_v31, 1  ;;  %v1899_v61 = vadd.f32 %v4175_v35, %v6040_v55  ;;  %v6043_v31 = vld [vmem:[#allocation43_spill] sm:$0xff] }
 0x1ff   : > { %6037 = vst [vmem:[#allocation13_spill] sm:$0xff] %v5551_v63  ;;  %v5556_v46 = vadd.f32 %v2110_v9, %v1254_v50  ;;  %v5558_v17 = vpop.f32.mrf.mxu1  ;;  %v1890_v7 = vpop.f32.mrf.mxu0  ;;  %v6044_v63 = vld [vmem:[#allocation27_spill] sm:$0xff] }
 0x200   : > { %v2107_v8 = vsel %vm2097_vm0, %v2104_v26, %v2106_v18  ;;  %v1891_v52 = vadd.f32 %v1890_v7, %v6041_v51  ;;  %v1257_v54 = vadd.f32 %v5494_v11, %v6044_v63  ;;  %v2114_v53 = vrot.slane %v1899_v61, 1  ;;  %v6045_v35 = vld [vmem:[#allocation39_spill] sm:$0xff]  ;;  %v6046_v7 = vld [vmem:[#allocation30_spill] sm:$0xff]  ;;  %v6048_v11 = vld [vmem:[#allocation29_spill] sm:$0xff] }
 0x201   : > { %6039 = vst [vmem:[#allocation15_spill] sm:$0xff] %v5556_v46  ;;  %v5563_v57 = vadd.f32 %v2107_v8, %v1247_v62  ;;  %v2487_v15 = vpop.f32.mrf.mxu1  ;;  %v4176_v39 = vpop.f32.mrf.mxu0  ;;  %v1269_v62 = vadd.f32 %v5498_v3, %v6046_v7  ;;  %v1264_v63 = vadd.f32 %v5508_v24, %v6048_v11 }
 0x202   : > { %v2111_v60 = vrot.slane %v1891_v52, 1  ;;  %v1902_v10 = vadd.f32 %v4176_v39, %v6043_v31 }
 0x203   : > { %6042 = vst [vmem:[#allocation32_spill] sm:$0xff] %v5563_v57  ;;  %v5568_v50 = vpop.f32.mrf.mxu1  ;;  %v1893_v9 = vpop.f32.mrf.mxu0 }
 0x204   : > { %v2112_v26 = vsel %vm2097_vm0, %v2109_v44, %v2111_v60  ;;  %v2116_v18 = vrot.slane %v1902_v10, 1  ;;  %v1894_v55 = vadd.f32 %v1893_v9, %v6045_v35  ;;  %v6051_v9 = vld [vmem:[#allocation48_spill] sm:$0xff] }
 0x205   : > { %v5574_v8 = vadd.f32 %v2112_v26, %v1257_v54  ;;  %v2490_v51 = vpop.f32.mrf.mxu1  ;;  %v4179_v52 = vpop.f32.mrf.mxu0  ;;  %v6052_v35 = vld [vmem:[#allocation44_spill] sm:$0xff] }
 0x206   : > { %v2117_v15 = vsel %vm2097_vm0, %v2114_v53, %v2116_v18  ;;  %v2113_v39 = vrot.slane %v1894_v55, 1  ;;  %v1915_v26 = vadd.f32 %v4179_v52, %v6051_v9  ;;  %v6053_v51 = vld [vmem:[#allocation46_spill] sm:$0xff] }
 0x207   : > { %6047 = vst [vmem:[#allocation36_spill] sm:$0xff] %v5574_v8  ;;  %v5579_v31 = vadd.f32 %v2117_v15, %v1269_v62  ;;  %v5581_v61 = vpop.f32.mrf.mxu1  ;;  %v1906_v44 = vpop.f32.mrf.mxu0  ;;  %v6054_v8 = vld [vmem:[#allocation49_spill] sm:$0xff] }
 0x208   : > { %v2115_v60 = vsel %vm2097_vm0, %v2113_v39, %v2114_v53  ;;  %v1907_v7 = vadd.f32 %v1906_v44, %v6052_v35  ;;  %v2121_v11 = vrot.slane %v1915_v26, 1  ;;  %v6055_v39 = vld [vmem:[#allocation31_spill] sm:$0xff] }
 0x209   : > { %6049 = vst [vmem:[#allocation18_spill] sm:$0xff] %v5579_v31  ;;  %v5584_v10 = vadd.f32 %v2115_v60, %v1264_v63  ;;  %v2495_v3 = vpop.f32.mrf.mxu1  ;;  %v4180_v54 = vpop.f32.mrf.mxu0  ;;  %v1276_v63 = vadd.f32 %v5514_v19, %v6055_v39  ;;  %v6056_v60 = vld [vmem:[#allocation33_spill] sm:$0xff]  ;;  %v6058_v26 = vld [vmem:[#allocation51_spill] sm:$0xff] }
 0x20a   : > { %v2118_v31 = vrot.slane %v1907_v7, 1  ;;  %v1918_v57 = vadd.f32 %v4180_v54, %v6054_v8  ;;  %v1279_v52 = vadd.f32 %v5520_v56, %v6056_v60  ;;  %v6060_v56 = vld [vmem:[#allocation56_spill] sm:$0xff] }
 0x20b   : > { %6050 = vst [vmem:[#allocation34_spill] sm:$0xff] %v5584_v10  ;;  %v5588_v18 = vpop.f32.mrf.mxu1  ;;  %v1909_v55 = vpop.f32.mrf.mxu0  ;;  %v6061_v10 = vld [vmem:[#allocation35_spill] sm:$0xff] }
 0x20c   : > { %v1910_v24 = vadd.f32 %v1909_v55, %v6053_v51  ;;  %v6057_v55 = vld [vmem:[#allocation54_spill] sm:$0xff]  ;;  %v1286_v46 = vadd.f32 %v5516_v47, %v6061_v10  ;;  %v6065_v47 = vld [vmem:[#allocation37_spill] sm:$0xff]  ;;  %v6066_v10 = vld [vmem:[#allocation3_spill] sm:$0xff] }
 0x20d   : > { %v2498_v62 = vpop.f32.mrf.mxu1  ;;  %v4183_v15 = vpop.f32.mrf.mxu0 }
 0x20e   : > { %v2119_v53 = vrot.slane %v1910_v24, 1  ;;  %v1931_v51 = vadd.f32 %v4183_v15, %v6057_v55  ;;  %v2123_v24 = vrot.slane %v1918_v57, 1 }
 0x20f   : > { %v5596_v3 = vpop.f32.mrf.mxu1  ;;  %v1922_v44 = vpop.f32.mrf.mxu0 }
 0x210   : > { %v2120_v9 = vsel %vm2097_vm0, %v2118_v31, %v2119_v53  ;;  %v2122_v35 = vsel %vm2097_vm0, %v2119_v53, %v2121_v11  ;;  %v1923_v7 = vadd.f32 %v1922_v44, %v6058_v26  ;;  %v2128_v53 = vrot.slane %v1931_v51, 1 }
 0x211   : > { %v5602_v62 = vadd.f32 %v2120_v9, %v1276_v63  ;;  %v5604_v8 = vadd.f32 %v2122_v35, %v1279_v52  ;;  %v2503_v54 = vpop.f32.mrf.mxu1  ;;  %v4184_v19 = vpop.f32.mrf.mxu0  ;;  %v6062_v63 = vld [vmem:[#allocation53_spill] sm:$0xff]  ;;  %v6063_v52 = vld [vmem:[#allocation40_spill] sm:$0xff]  ;;  %v6064_v35 = vld [vmem:[#allocation2_spill] sm:$0xff] }
 0x212   : > { %v2124_v39 = vrot.slane %v1923_v7, 1  ;;  %v1934_v60 = vadd.f32 %v4184_v19, %v6060_v56  ;;  %v1298_v55 = vadd.f32 %v6064_v35, %v6063_v52  ;;  %v1291_v56 = vadd.f32 %v6066_v10, %v6065_v47  ;;  %v6071_v47 = vld [vmem:[#allocation4_spill] sm:$0xff] }
 0x213   : > { %6059 = vst [vmem:[#allocation25_spill] sm:$0xff] %v5604_v8  ;;  %v5609_v31 = vpop.f32.mrf.mxu1  ;;  %v1925_v11 = vpop.f32.mrf.mxu0 }
 0x214   : > { %v2125_v15 = vsel %vm2097_vm0, %v2123_v24, %v2124_v39  ;;  %v2129_v44 = vrot.slane %v1934_v60, 1  ;;  %v1926_v9 = vadd.f32 %v1925_v11, %v6062_v63  ;;  %v6068_v63 = vld [vmem:[#allocation58_spill] sm:$0xff] }
 0x215   : > { %v5615_v26 = vadd.f32 %v2125_v15, %v1286_v46  ;;  %v2506_v57 = vpop.f32.mrf.mxu1  ;;  %v4187_v7 = vpop.f32.mrf.mxu0 }
 0x216   : > { %v2130_v54 = vsel %vm2097_vm0, %v2128_v53, %v2129_v44  ;;  %v2126_v19 = vrot.slane %v1926_v9, 1  ;;  %v1947_v11 = vadd.f32 %v4187_v7, %v5382_v23  ;;  %v6070_v57 = vld [vmem:[#allocation42_spill] sm:$0xff]  ;;  %v6072_v7 = vld [vmem:[#allocation47_spill] sm:$0xff] }
 0x217   : > { %v5620_v8 = vadd.f32 %v2130_v54, %v1298_v55  ;;  %v5622_v51 = vpop.f32.mrf.mxu1  ;;  %v1938_v24 = vpop.f32.mrf.mxu0  ;;  %v1301_v55 = vadd.f32 %v6071_v47, %v6070_v57  ;;  %v6075_v57 = vld [vmem:[#allocation6_spill] sm:$0xff] }
 0x218   : > { %v2127_v60 = vsel %vm2097_vm0, %v2124_v39, %v2126_v19  ;;  %v1939_v46 = vadd.f32 %v1938_v24, %v6068_v63 }
 0x219   : > { %6067 = vst [vmem:[#allocation21_spill] sm:$0xff] %v5620_v8  ;;  %v5627_v15 = vadd.f32 %v2127_v60, %v1291_v56  ;;  %v2511_v52 = vpop.f32.mrf.mxu1  ;;  %v4188_v35 = vpop.f32.mrf.mxu0  ;;  %v2134_v8 = vrot.slane %v1947_v11, 1  ;;  %v6073_v56 = vld [vmem:[#allocation5_spill] sm:$0xff] }
 0x21a   : > { %v2131_v53 = vrot.slane %v1939_v46, 1  ;;  %v1950_v9 = vadd.f32 %v4188_v35, %v5388_v20  ;;  %v1313_v24 = vadd.f32 %v6073_v56, %v6072_v7  ;;  %v6074_v35 = vld [vmem:[#allocation45_spill] sm:$0xff] }
 0x21b   : > { %6069 = vst [vmem:[#allocation41_spill] sm:$0xff] %v5627_v15  ;;  %v5632_v54 = vpop.f32.mrf.mxu1  ;;  %v1941_v10 = vpop.f32.mrf.mxu0  ;;  %v1308_v47 = vadd.f32 %v6075_v57, %v6074_v35  ;;  %v6078_v57 = vld [vmem:[#allocation7_spill] sm:$0xff] }
 0x21c   : > { %v2132_v39 = vsel %vm2097_vm0, %v2129_v44, %v2131_v53  ;;  %v2136_v19 = vrot.slane %v1950_v9, 1  ;;  %v1942_v23 = vadd.f32 %v1941_v10, %v5373_v4 }
 0x21d   : > { %v5638_v60 = vadd.f32 %v2132_v39, %v1301_v55  ;;  %v2514_v63 = vpop.f32.mrf.mxu1  ;;  %v4191_v46 = vpop.f32.mrf.mxu0 }
 0x21e   : > { %v2137_v20 = vsel %vm2097_vm0, %v2134_v8, %v2136_v19  ;;  %v2133_v52 = vrot.slane %v1942_v23, 1  ;;  %v1963_v10 = vadd.f32 %v4191_v46, %v5404_v34 }
 0x21f   : > { %v5643_v15 = vadd.f32 %v2137_v20, %v1313_v24  ;;  %v5645_v11 = vpop.f32.mrf.mxu1  ;;  %v1954_v44 = vpop.f32.mrf.mxu0 }
 0x220   : > { %v2135_v4 = vsel %vm2097_vm0, %v2133_v52, %v2134_v8  ;;  %v1955_v39 = vadd.f32 %v1954_v44, %v5392_v25  ;;  %v2141_v63 = vrot.slane %v1963_v10, 1  ;;  %v6077_v52 = vld [vmem:[#allocation50_spill] sm:$0xff] }
 0x221   : > { %v5648_v53 = vadd.f32 %v2135_v4, %v1308_v47  ;;  %v2519_v9 = vpop.f32.mrf.mxu1  ;;  %v4192_v55 = vpop.f32.mrf.mxu0  ;;  %v1320_v47 = vadd.f32 %v6078_v57, %v6077_v52  ;;  %v6079_v4 = vld [vmem:[#allocation52_spill] sm:$0xff] }
 0x222   : > { %v2138_v20 = vrot.slane %v1955_v39, 1  ;;  %v1966_v35 = vadd.f32 %v4192_v55, %v5408_v14  ;;  %v6080_v9 = vld [vmem:[#allocation9_spill] sm:$0xff] }
 0x223   : > { %6076 = vst [vmem:[#allocation38_spill] sm:$0xff] %v5648_v53  ;;  %v5652_v19 = vpop.f32.mrf.mxu1  ;;  %v1957_v23 = vpop.f32.mrf.mxu0  ;;  %v1323_v34 = vadd.f32 %v6080_v9, %v6079_v4  ;;  %v6081_v4 = vld [vmem:[#allocation55_spill] sm:$0xff]  ;;  %v6082_v9 = vld [vmem:[#allocation8_spill] sm:$0xff] }
 0x224   : > { %v1958_v7 = vadd.f32 %v1957_v23, %v5398_v29  ;;  %v1330_v53 = vadd.f32 %v6082_v9, %v6081_v4 }
 0x225   : > { %v2522_v56 = vpop.f32.mrf.mxu1  ;;  %v4195_v24 = vpop.f32.mrf.mxu0 }
 0x226   : > { %v2139_v8 = vrot.slane %v1958_v7, 1  ;;  %v1979_v23 = vadd.f32 %v4195_v24, %v5424_v5  ;;  %v2143_v56 = vrot.slane %v1966_v35, 1 }
 0x227   : > { %v5660_v46 = vpop.f32.mrf.mxu1  ;;  %v1970_v25 = vpop.f32.mrf.mxu0 }
 0x228   : > { %v2140_v44 = vsel %vm2097_vm0, %v2138_v20, %v2139_v8  ;;  %v2142_v29 = vsel %vm2097_vm0, %v2139_v8, %v2141_v63  ;;  %v1971_v10 = vadd.f32 %v1970_v25, %v5414_v27  ;;  %v2148_v8 = vrot.slane %v1979_v23, 1 }
 0x229   : > { %v5666_v39 = vadd.f32 %v2140_v44, %v1320_v47  ;;  %v5668_v14 = vadd.f32 %v2142_v29, %v1323_v34  ;;  %v2527_v55 = vpop.f32.mrf.mxu1  ;;  %v4196_v7 = vpop.f32.mrf.mxu0  ;;  %v6083_v47 = vld [vmem:[#allocation10_spill] sm:$0xff] }
 0x22a   : > { %v2144_v52 = vrot.slane %v1971_v10, 1  ;;  %v1982_v57 = vadd.f32 %v4196_v7, %v5430_v32  ;;  %v1342_v34 = vadd.f32 %v6083_v47, %v5375_v49  ;;  %v6084_v10 = vld [vmem:[#allocation57_spill] sm:$0xff]  ;;  %v6085_v55 = vld [vmem:[#allocation11_spill] sm:$0xff]  ;;  %v6087_v47 = vld [vmem:[#allocation12_spill] sm:$0xff] }
 0x22b   : > { %v5673_v20 = vpop.f32.mrf.mxu1  ;;  %v1973_v63 = vpop.f32.mrf.mxu0  ;;  %v1335_v7 = vadd.f32 %v6085_v55, %v6084_v10 }
 0x22c   : > { %v2145_v5 = vsel %vm2097_vm0, %v2143_v56, %v2144_v52  ;;  %v2149_v27 = vrot.slane %v1982_v57, 1  ;;  %v1974_v24 = vadd.f32 %v1973_v63, %v5420_v12 }
 0x22d   : > { %v5679_v25 = vadd.f32 %v2145_v5, %v1330_v53  ;;  %v2530_v35 = vpop.f32.mrf.mxu1  ;;  %v4199_v44 = vpop.f32.mrf.mxu0 }
 0x22e   : > { %v2150_v32 = vsel %vm2097_vm0, %v2148_v8, %v2149_v27  ;;  %v2146_v29 = vrot.slane %v1974_v24, 1  ;;  %v1995_v57 = vadd.f32 %v4199_v44, %v5446_v59  ;;  %v6086_v24 = vld [vmem:[#allocation59_spill] sm:$0xff] }
 0x22f   : > { %v5684_v4 = vadd.f32 %v2150_v32, %v1342_v34  ;;  %v5686_v23 = vpop.f32.mrf.mxu1  ;;  %v1986_v56 = vpop.f32.mrf.mxu0  ;;  %v1345_v34 = vadd.f32 %v6087_v47, %v6086_v24 }
 0x230   : > { %v2147_v12 = vsel %vm2097_vm0, %v2144_v52, %v2146_v29  ;;  %v1987_v49 = vadd.f32 %v1986_v56, %v5436_v58  ;;  %v2154_v10 = vrot.slane %v1995_v57, 1  ;;  %v6088_v58 = vld [vmem:[#allocation14_spill] sm:$0xff] }
 0x231   : > { %v5691_v53 = vadd.f32 %v2147_v12, %v1335_v7  ;;  %v2535_v9 = vpop.f32.mrf.mxu1  ;;  %v4200_v63 = vpop.f32.mrf.mxu0  ;;  %v1357_v44 = vadd.f32 %v6088_v58, %v5400_v16 }
 0x232   : > { %v2151_v8 = vrot.slane %v1987_v49, 1  ;;  %v1998_v5 = vadd.f32 %v4200_v63, %v5452_v40  ;;  %v6089_v49 = vld [vmem:[#allocation16_spill] sm:$0xff] }
 0x233   : > { %v5696_v35 = vpop.f32.mrf.mxu1  ;;  %v1989_v32 = vpop.f32.mrf.mxu0  ;;  %v1352_v9 = vadd.f32 %v6089_v49, %v5396_v28 }
 0x234   : > { %v2152_v52 = vsel %vm2097_vm0, %v2149_v27, %v2151_v8  ;;  %v2156_v29 = vrot.slane %v1998_v5, 1  ;;  %v1990_v59 = vadd.f32 %v1989_v32, %v5440_v36 }
 0x235   : > { %v5702_v55 = vadd.f32 %v2152_v52, %v1345_v34  ;;  %v2538_v7 = vpop.f32.mrf.mxu1  ;;  %v4203_v40 = vpop.f32.mrf.mxu0 }
 0x236   : > { %v2157_v56 = vsel %vm2097_vm0, %v2154_v10, %v2156_v29  ;;  %v2153_v12 = vrot.slane %v1990_v59, 1  ;;  %v2011_v16 = vadd.f32 %v4203_v40, %v5468_v30  ;;  %v6091_v7 = vld [vmem:[#allocation20_spill] sm:$0xff] }
 0x237   : > { %v5707_v57 = vadd.f32 %v2157_v56, %v1357_v44  ;;  %v5709_v27 = vpop.f32.mrf.mxu1  ;;  %v2002_v63 = vpop.f32.mrf.mxu0  ;;  %v1367_v40 = vadd.f32 %v6091_v7, %v5418_v22 }
 0x238   : > { %v2155_v36 = vsel %vm2097_vm0, %v2153_v12, %v2154_v10  ;;  %v2003_v47 = vadd.f32 %v2002_v63, %v5456_v13  ;;  %v2161_v10 = vrot.slane %v2011_v16, 1  ;;  %v6090_v13 = vld [vmem:[#allocation17_spill] sm:$0xff]  ;;  %v4507_v12 = vmov 0.0  }
 0x239   : > { %v5712_v8 = vadd.f32 %v2155_v36, %v1352_v9  ;;  %v2543_v5 = vpop.f32.mrf.mxu1  ;;  %v4204_v24 = vpop.f32.mrf.mxu0  ;;  %v1364_v44 = vadd.f32 %v6090_v13, %v5410_v33  ;;  %3348 = vst [vmem:[%s5723_s6] sm:$0x3] %v4507_v12 }
 0x23a   : > { %v2158_v30 = vrot.slane %v2003_v47, 1  ;;  %v2014_v59 = vadd.f32 %v4204_v24, %v5472_v43 }
 0x23b   : > { %v5717_v34 = vpop.f32.mrf.mxu1  ;;  %v2005_v32 = vpop.f32.mrf.mxu0 }
 0x23c   : > { %v2006_v28 = vadd.f32 %v2005_v32, %v5462_v42  ;;  %v2163_v22 = vrot.slane %v2014_v59, 1  ;;  %v6092_v32 = vld [vmem:[#allocation19_spill] sm:$0xff] }
 0x23d   : > { %v2546_v52 = vpop.f32.mrf.mxu1  ;;  %v4207_v29 = vpop.f32.mrf.mxu0 }
 0x23e   : > { %v2159_v58 = vrot.slane %v2006_v28, 1  ;;  %v2027_v63 = vadd.f32 %v4207_v29, %v5488_v6  ;;  %v1374_v28 = vadd.f32 %v6092_v32, %v5428_v2  ;;  %v6094_v2 = vld [vmem:[#allocation60_spill] sm:$0xff] }
 0x23f   : > { %v5730_v42 = vpop.f32.mrf.mxu1  ;;  %v2018_v56 = vpop.f32.mrf.mxu0 }
 0x240   : > { %v2160_v49 = vsel %vm2097_vm0, %v2158_v30, %v2159_v58  ;;  %v2162_v9 = vsel %vm2097_vm0, %v2159_v58, %v2161_v10  ;;  %v2019_v43 = vadd.f32 %v2018_v56, %v5476_v0  ;;  %v2168_v30 = vrot.slane %v2027_v63, 1  ;;  %v6093_v58 = vld [vmem:[#allocation22_spill] sm:$0xff]  ;;  %v6095_v56 = vld [vmem:[#allocation23_spill] sm:$0xff] }
 0x241   : > { %v5737_v36 = vadd.f32 %v2160_v49, %v1364_v44  ;;  %v5739_v16 = vadd.f32 %v2162_v9, %v1367_v40  ;;  %v2551_v33 = vpop.f32.mrf.mxu1  ;;  %v4208_v5 = vpop.f32.mrf.mxu0  ;;  %v1386_v13 = vadd.f32 %v6093_v58, %v5442_v1  ;;  %v1379_v12 = vadd.f32 %v6095_v56, %v6094_v2  ;;  %v6097_v1 = vld [vmem:[#allocation64_spill] sm:$0xff]  ;;  %v6102_v56 = vld [vmem:[#allocation63_spill] sm:$0xff] }
 0x242   : > { %v2164_v24 = vrot.slane %v2019_v43, 1  ;;  %v2030_v47 = vadd.f32 %v4208_v5, %v5496_v37  ;;  %v6096_v43 = vld [vmem:[#allocation66_spill] sm:$0xff] }
 0x243   : > { %v5744_v52 = vpop.f32.mrf.mxu1  ;;  %v2021_v10 = vpop.f32.mrf.mxu0 }
 0x244   : > { %v2165_v6 = vsel %vm2097_vm0, %v2163_v22, %v2164_v24  ;;  %v2169_v0 = vrot.slane %v2030_v47, 1  ;;  %v2022_v29 = vadd.f32 %v2021_v10, %v5482_v41  ;;  %v6098_v10 = vld [vmem:[#allocation67_spill] sm:$0xff] }
 0x245   : > { %v5750_v44 = vadd.f32 %v2165_v6, %v1374_v28  ;;  %v2554_v59 = vpop.f32.mrf.mxu1  ;;  %v4211_v7 = vpop.f32.mrf.mxu0  ;;  %v6099_v6 = vld [vmem:[#allocation61_spill] sm:$0xff] }
 0x246   : > { %v2170_v37 = vsel %vm2097_vm0, %v2168_v30, %v2169_v0  ;;  %v2166_v40 = vrot.slane %v2022_v29, 1  ;;  %v2043_v33 = vadd.f32 %v4211_v7, %v6096_v43  ;;  %v6100_v29 = vld [vmem:[#allocation24_spill] sm:$0xff]  ;;  %v6101_v7 = vld [vmem:[#allocation65_spill] sm:$0xff] }
 0x247   : > { %v5755_v49 = vadd.f32 %v2170_v37, %v1386_v13  ;;  %v5757_v9 = vpop.f32.mrf.mxu1  ;;  %v2034_v63 = vpop.f32.mrf.mxu0  ;;  %v1389_v58 = vadd.f32 %v6100_v29, %v6099_v6 }
 0x248   : > { %v2167_v41 = vsel %vm2097_vm0, %v2164_v24, %v2166_v40  ;;  %v2035_v5 = vadd.f32 %v2034_v63, %v6097_v1  ;;  %v2174_v37 = vrot.slane %v2043_v33, 1 }
 0x249   : > { %v5762_v22 = vadd.f32 %v2167_v41, %v1379_v12  ;;  %v2559_v47 = vpop.f32.mrf.mxu1  ;;  %v4212_v32 = vpop.f32.mrf.mxu0  ;;  %v6103_v12 = vld [vmem:[#allocation26_spill] sm:$0xff] }
 0x24a   : > { %v2171_v28 = vrot.slane %v2035_v5, 1  ;;  %v2046_v30 = vadd.f32 %v4212_v32, %v6098_v10  ;;  %v1401_v63 = vadd.f32 %v6103_v12, %v6102_v56  ;;  %v6105_v32 = vld [vmem:[#allocation62_spill] sm:$0xff]  ;;  %v6106_v10 = vld [vmem:[#allocation28_spill] sm:$0xff]  ;;  %v6110_v12 = vld [vmem:[#allocation69_spill] sm:$0xff] }
 0x24b   : > { %v5767_v13 = vpop.f32.mrf.mxu1  ;;  %v2037_v59 = vpop.f32.mrf.mxu0  ;;  %v1396_v6 = vadd.f32 %v6106_v10, %v6105_v32 }
 0x24c   : > { %v2172_v24 = vsel %vm2097_vm0, %v2169_v0, %v2171_v28  ;;  %v2176_v40 = vrot.slane %v2046_v30, 1  ;;  %v2038_v2 = vadd.f32 %v2037_v59, %v6101_v7  ;;  %v6109_v7 = vld [vmem:[#allocation68_spill] sm:$0xff] }
 0x24d   : > { %v5773_v41 = vadd.f32 %v2172_v24, %v1389_v58  ;;  %v2562_v43 = vpop.f32.mrf.mxu1  ;;  %v4231_v1 = vpop.f32.mrf.mxu0 }
 0x24e   : > { %v2177_v5 = vsel %vm2097_vm0, %v2174_v37, %v2176_v40  ;;  %v2173_v47 = vrot.slane %v2038_v2, 1  ;;  %v2703_v24 = vadd.f32 %v4231_v1, %v5532_v45 }
 0x24f   : > { %6104 = vst [vmem:[#allocation43_spill] sm:$0xff] %v5773_v41  ;;  %v5778_v29 = vadd.f32 %v2177_v5, %v1401_v63  ;;  %v5780_v33 = vpop.f32.mrf.mxu1  ;;  %v2694_v0 = vpop.f32.mrf.mxu0 }
 0x250   : > { %v2175_v28 = vsel %vm2097_vm0, %v2173_v47, %v2174_v37  ;;  %v2695_v40 = vadd.f32 %v2694_v0, %v6109_v7  ;;  %v2937_v32 = vrot.slane %v2703_v24, 2 }
 0x251   : > { %6107 = vst [vmem:[#allocation27_spill] sm:$0xff] %v5778_v29  ;;  %v5783_v30 = vadd.f32 %v2175_v28, %v1396_v6  ;;  %v2567_v58 = vpop.f32.mrf.mxu1  ;;  %v4232_v59 = vpop.f32.mrf.mxu0 }
 0x252   : > { %v2934_v10 = vrot.slane %v2695_v40, 2  ;;  %v2706_v37 = vadd.f32 %v4232_v59, %v5545_v48 }
 0x253   : > { %6108 = vst [vmem:[#allocation39_spill] sm:$0xff] %v5783_v30  ;;  %v5787_v2 = vpop.f32.mrf.mxu1  ;;  %v2697_v56 = vpop.f32.mrf.mxu0 }
 0x254   : > { %v2698_v63 = vadd.f32 %v2697_v56, %v6110_v12  ;;  %v2939_v48 = vrot.slane %v2706_v37, 2 }
 0x255   : > { %v2570_v43 = vpop.f32.mrf.mxu1  ;;  %v4235_v5 = vpop.f32.mrf.mxu0 }
 0x256   : > { %v2935_v47 = vrot.slane %v2698_v63, 2  ;;  %v2719_v0 = vadd.f32 %v4235_v5, %v5581_v61 }
 0x257   : > { %v5792_v6 = vpop.f32.mrf.mxu1  ;;  %v2710_v28 = vpop.f32.mrf.mxu0 }
 0x258   : > { %v2936_v45 = vsel %vm2933_vm1, %v2934_v10, %v2935_v47  ;;  %v2938_v1 = vsel %vm2933_vm1, %v2935_v47, %v2937_v32  ;;  %v2711_v58 = vadd.f32 %v2710_v28, %v5558_v17  ;;  %v6111_v28 = vld [vmem:[#allocation13_spill] sm:$0xff] }
 0x259   : > { %v3046_v7 = vadd.f32 %v2936_v45, %v5538_v38  ;;  %v3047_v24 = vadd.f32 %v2938_v1, %v5540_v21  ;;  %v2575_v40 = vpop.f32.mrf.mxu1  ;;  %v4236_v56 = vpop.f32.mrf.mxu0  ;;  %v2944_v21 = vrot.slane %v2719_v0, 2 }
 0x25a   : > { %v2940_v59 = vrot.slane %v2711_v58, 2  ;;  %v2722_v12 = vadd.f32 %v4236_v56, %v5588_v18 }
 0x25b   : > { %v3897_v63 = vpack.c.bf16 %v3047_v24, %v3046_v7  ;;  %v3238_v61 = vadd.f32 %v3047_v24, %v3046_v7  ;;  %v3275_v43 = vmul.f32 %v3046_v7, %v3046_v7  ;;  %v3276_v17 = vmul.f32 %v3047_v24, %v3047_v24  ;;  %v5806_v5 = vpop.f32.mrf.mxu1  ;;  %v2713_v38 = vpop.f32.mrf.mxu0 }
 0x25c   : > { %v2941_v32 = vsel %vm2933_vm1, %v2939_v48, %v2940_v59  ;;  %v2945_v10 = vrot.slane %v2722_v12, 2  ;;  %v2714_v37 = vadd.f32 %v2713_v38, %v5568_v50 }
 0x25d   : > { %3898 = vst [vmem:[%s5803_s9] sm:$0xff] %v3897_v63   ;;  %v3307_v47 = vadd.f32 %v3276_v17, %v3275_v43  ;;  %v3048_v45 = vadd.f32 %v2941_v32, %v6111_v28  ;;  %v2578_v1 = vpop.f32.mrf.mxu1  ;;  %v4239_v58 = vpop.f32.mrf.mxu0  ;;  %v6112_v63 = vld [vmem:[#allocation15_spill] sm:$0xff]  ;;  %v6113_v17 = vld [vmem:[#allocation32_spill] sm:$0xff] }
 0x25e   : > { %v2946_v18 = vsel %vm2933_vm1, %v2944_v21, %v2945_v10  ;;  %v2942_v40 = vrot.slane %v2714_v37, 2  ;;  %v2735_v48 = vadd.f32 %v4239_v58, %v5622_v51 }
 0x25f   : > { %v3239_v7 = vadd.f32 %v3238_v61, %v3048_v45  ;;  %v3277_v24 = vmul.f32 %v3048_v45, %v3048_v45  ;;  %v5813_v56 = vpop.f32.mrf.mxu1  ;;  %v2726_v30 = vpop.f32.mrf.mxu0  ;;  %v3050_v43 = vadd.f32 %v2946_v18, %v6112_v63 }
 0x260   : > { %v2943_v0 = vsel %vm2933_vm1, %v2940_v59, %v2942_v40  ;;  %v2727_v50 = vadd.f32 %v2726_v30, %v5596_v3  ;;  %v2950_v51 = vrot.slane %v2735_v48, 2  ;;  %v6114_v40 = vld [vmem:[#allocation36_spill] sm:$0xff] }
 0x261   : > { %v3308_v12 = vadd.f32 %v3307_v47, %v3277_v24  ;;  %v3049_v38 = vadd.f32 %v2943_v0, %v6113_v17  ;;  %v2583_v32 = vpop.f32.mrf.mxu1  ;;  %v4240_v21 = vpop.f32.mrf.mxu0  ;;  %v3279_v58 = vmul.f32 %v3050_v43, %v3050_v43 }
 0x262   : > { %v2947_v37 = vrot.slane %v2727_v50, 2  ;;  %v2738_v61 = vadd.f32 %v4240_v21, %v5632_v54 }
 0x263   : > { %v3902_v28 = vpack.c.bf16 %v3049_v38, %v3048_v45  ;;  %v3240_v1 = vadd.f32 %v3239_v7, %v3049_v38  ;;  %v3278_v29 = vmul.f32 %v3049_v38, %v3049_v38  ;;  %v5821_v41 = vpop.f32.mrf.mxu1  ;;  %v2729_v59 = vpop.f32.mrf.mxu0 }
 0x264   : > { %v2948_v3 = vsel %vm2933_vm1, %v2945_v10, %v2947_v37  ;;  %v2952_v30 = vrot.slane %v2738_v61, 2  ;;  %v2730_v47 = vadd.f32 %v2729_v59, %v5609_v31  ;;  %v6116_v37 = vld [vmem:[#allocation34_spill] sm:$0xff] }
 0x265   : > { %3974 = vst [vmem:[%s5803_s9 + $0x8] sm:$0xff] %v3902_v28   ;;  %v3309_v18 = vadd.f32 %v3308_v12, %v3278_v29  ;;  %v3051_v24 = vadd.f32 %v2948_v3, %v6114_v40  ;;  %v3241_v0 = vadd.f32 %v3240_v1, %v3050_v43  ;;  %v2586_v54 = vpop.f32.mrf.mxu1  ;;  %v4243_v45 = vpop.f32.mrf.mxu0  ;;  %v6115_v12 = vld [vmem:[#allocation18_spill] sm:$0xff] }
 0x266   : > { %v2953_v7 = vsel %vm2933_vm1, %v2950_v51, %v2952_v30  ;;  %v2949_v50 = vrot.slane %v2730_v47, 2  ;;  %v2751_v59 = vadd.f32 %v4243_v45, %v5660_v46 }
 0x267   : > { %v3907_v63 = vpack.c.bf16 %v3051_v24, %v3050_v43  ;;  %v3242_v17 = vadd.f32 %v3241_v0, %v3051_v24  ;;  %v3280_v48 = vmul.f32 %v3051_v24, %v3051_v24  ;;  %v3310_v38 = vadd.f32 %v3309_v18, %v3279_v58  ;;  %v5828_v10 = vpop.f32.mrf.mxu1  ;;  %v2742_v32 = vpop.f32.mrf.mxu0 }
 0x268   : > { %v2951_v31 = vsel %vm2933_vm1, %v2949_v50, %v2950_v51  ;;  %v3053_v21 = vadd.f32 %v2953_v7, %v6115_v12  ;;  %v2743_v43 = vadd.f32 %v2742_v32, %v5645_v11  ;;  %v2957_v50 = vrot.slane %v2751_v59, 2  ;;  %v6117_v12 = vld [vmem:[#allocation25_spill] sm:$0xff] }
 0x269   : > { %3975 = vst [vmem:[%s5803_s9 + $0x10] sm:$0xff] %v3907_v63   ;;  %v3311_v29 = vadd.f32 %v3310_v38, %v3280_v48  ;;  %v3052_v61 = vadd.f32 %v2951_v31, %v6116_v37  ;;  %v2591_v28 = vpop.f32.mrf.mxu1  ;;  %v4244_v1 = vpop.f32.mrf.mxu0 }
 0x26a   : > { %v3282_v40 = vmul.f32 %v3053_v21, %v3053_v21  ;;  %v2954_v63 = vrot.slane %v2743_v43, 2  ;;  %v2754_v46 = vadd.f32 %v4244_v1, %v5673_v20 }
 0x26b   : > { %v3912_v3 = vpack.c.bf16 %v3053_v21, %v3052_v61  ;;  %v3243_v30 = vadd.f32 %v3242_v17, %v3052_v61  ;;  %v3281_v47 = vmul.f32 %v3052_v61, %v3052_v61  ;;  %v5836_v58 = vpop.f32.mrf.mxu1  ;;  %v2745_v18 = vpop.f32.mrf.mxu0 }
 0x26c   : > { %v2746_v51 = vadd.f32 %v2745_v18, %v5652_v19  ;;  %v2959_v61 = vrot.slane %v2754_v46, 2 }
 0x26d   : > { %3976 = vst [vmem:[%s5803_s9 + $0x18] sm:$0xff] %v3912_v3   ;;  %v3312_v24 = vadd.f32 %v3311_v29, %v3281_v47  ;;  %v3244_v0 = vadd.f32 %v3243_v30, %v3053_v21  ;;  %v2594_v54 = vpop.f32.mrf.mxu1  ;;  %v4247_v7 = vpop.f32.mrf.mxu0 }
 0x26e   : > { %v2955_v45 = vrot.slane %v2746_v51, 2  ;;  %v2767_v19 = vadd.f32 %v4247_v7, %v5709_v27 }
 0x26f   : > { %v3313_v11 = vadd.f32 %v3312_v24, %v3282_v40  ;;  %v5841_v48 = vpop.f32.mrf.mxu1  ;;  %v2758_v17 = vpop.f32.mrf.mxu0 }
 0x270   : > { %v2956_v38 = vsel %vm2933_vm1, %v2954_v63, %v2955_v45  ;;  %v2958_v32 = vsel %vm2933_vm1, %v2955_v45, %v2957_v50  ;;  %v2759_v31 = vadd.f32 %v2758_v17, %v5686_v23  ;;  %v2964_v27 = vrot.slane %v2767_v19, 2  ;;  %v6118_v17 = vld [vmem:[#allocation21_spill] sm:$0xff] }
 0x271   : > { %v3054_v29 = vadd.f32 %v2956_v38, %v5602_v62  ;;  %v3055_v21 = vadd.f32 %v2958_v32, %v6117_v12  ;;  %v2599_v37 = vpop.f32.mrf.mxu1  ;;  %v4248_v20 = vpop.f32.mrf.mxu0 }
 0x272   : > { %v2960_v28 = vrot.slane %v2759_v31, 2  ;;  %v2770_v1 = vadd.f32 %v4248_v20, %v5717_v34 }
 0x273   : > { %v3917_v59 = vpack.c.bf16 %v3055_v21, %v3054_v29  ;;  %v3245_v43 = vadd.f32 %v3244_v0, %v3054_v29  ;;  %v3283_v3 = vmul.f32 %v3054_v29, %v3054_v29  ;;  %v5850_v30 = vpop.f32.mrf.mxu1  ;;  %v2761_v47 = vpop.f32.mrf.mxu0  ;;  %v3284_v40 = vmul.f32 %v3055_v21, %v3055_v21  ;;  %v6119_v29 = vld [vmem:[#allocation41_spill] sm:$0xff] }
 0x274   : > { %v2961_v23 = vsel %vm2933_vm1, %v2959_v61, %v2960_v28  ;;  %v2965_v18 = vrot.slane %v2770_v1, 2  ;;  %v2762_v62 = vadd.f32 %v2761_v47, %v5696_v35 }
 0x275   : > { %3977 = vst [vmem:[%s5803_s9 + $0x20] sm:$0xff] %v3917_v59   ;;  %v3246_v51 = vadd.f32 %v3245_v43, %v3055_v21  ;;  %v3314_v24 = vadd.f32 %v3313_v11, %v3283_v3  ;;  %v3056_v54 = vadd.f32 %v2961_v23, %v5615_v26  ;;  %v2602_v7 = vpop.f32.mrf.mxu1  ;;  %v4251_v34 = vpop.f32.mrf.mxu0 }
 0x276   : > { %v2966_v0 = vsel %vm2933_vm1, %v2964_v27, %v2965_v18  ;;  %v2962_v50 = vrot.slane %v2762_v62, 2  ;;  %v2783_v31 = vadd.f32 %v4251_v34, %v5757_v9 }
 0x277   : > { %v3315_v63 = vadd.f32 %v3314_v24, %v3284_v40  ;;  %v3247_v46 = vadd.f32 %v3246_v51, %v3056_v54  ;;  %v3285_v45 = vmul.f32 %v3056_v54, %v3056_v54  ;;  %v3058_v38 = vadd.f32 %v2966_v0, %v6118_v17  ;;  %v5858_v32 = vpop.f32.mrf.mxu1  ;;  %v2774_v19 = vpop.f32.mrf.mxu0  ;;  %v6120_v17 = vld [vmem:[#allocation38_spill] sm:$0xff] }
 0x278   : > { %v2963_v35 = vsel %vm2933_vm1, %v2960_v28, %v2962_v50  ;;  %v2775_v11 = vadd.f32 %v2774_v19, %v5730_v42  ;;  %v2970_v28 = vrot.slane %v2783_v31, 2 }
 0x279   : > { %v3316_v26 = vadd.f32 %v3315_v63, %v3285_v45  ;;  %v3057_v12 = vadd.f32 %v2963_v35, %v6119_v29  ;;  %v2607_v21 = vpop.f32.mrf.mxu1  ;;  %v4252_v37 = vpop.f32.mrf.mxu0  ;;  %v3287_v23 = vmul.f32 %v3058_v38, %v3058_v38 }
 0x27a   : > { %v2967_v20 = vrot.slane %v2775_v11, 2  ;;  %v2786_v61 = vadd.f32 %v4252_v37, %v5767_v13 }
 0x27b   : > { %v3922_v1 = vpack.c.bf16 %v3057_v12, %v3056_v54  ;;  %v3248_v59 = vadd.f32 %v3247_v46, %v3057_v12  ;;  %v3286_v43 = vmul.f32 %v3057_v12, %v3057_v12  ;;  %v5865_v3 = vpop.f32.mrf.mxu1  ;;  %v2777_v47 = vpop.f32.mrf.mxu0 }
 0x27c   : > { %v2968_v9 = vsel %vm2933_vm1, %v2965_v18, %v2967_v20  ;;  %v2972_v27 = vrot.slane %v2786_v61, 2  ;;  %v2778_v42 = vadd.f32 %v2777_v47, %v5744_v52 }
 0x27d   : > { %3978 = vst [vmem:[%s5803_s9 + $0x28] sm:$0xff] %v3922_v1   ;;  %v3317_v62 = vadd.f32 %v3316_v26, %v3286_v43  ;;  %v3059_v51 = vadd.f32 %v2968_v9, %v5638_v60  ;;  %v3249_v40 = vadd.f32 %v3248_v59, %v3058_v38  ;;  %v2610_v13 = vpop.f32.mrf.mxu1  ;;  %v4255_v24 = vpop.f32.mrf.mxu0 }
 0x27e   : > { %v2973_v54 = vsel %vm2933_vm1, %v2970_v28, %v2972_v27  ;;  %v2969_v7 = vrot.slane %v2778_v42, 2  ;;  %v2799_v11 = vadd.f32 %v4255_v24, %v5792_v6 }
 0x27f   : > { %v3927_v34 = vpack.c.bf16 %v3059_v51, %v3058_v38  ;;  %v3250_v0 = vadd.f32 %v3249_v40, %v3059_v51  ;;  %v3288_v50 = vmul.f32 %v3059_v51, %v3059_v51  ;;  %v3318_v63 = vadd.f32 %v3317_v62, %v3287_v23  ;;  %v5872_v18 = vpop.f32.mrf.mxu1  ;;  %v2790_v46 = vpop.f32.mrf.mxu0 }
 0x280   : > { %v2971_v52 = vsel %vm2933_vm1, %v2969_v7, %v2970_v28  ;;  %v3061_v60 = vadd.f32 %v2973_v54, %v5643_v15  ;;  %v2791_v38 = vadd.f32 %v2790_v46, %v5780_v33  ;;  %v2977_v47 = vrot.slane %v2799_v11, 2 }
 0x281   : > { %3979 = vst [vmem:[%s5803_s9 + $0x30] sm:$0xff] %v3927_v34   ;;  %v3319_v45 = vadd.f32 %v3318_v63, %v3288_v50  ;;  %v3060_v19 = vadd.f32 %v2971_v52, %v6120_v17  ;;  %v2615_v35 = vpop.f32.mrf.mxu1  ;;  %v4256_v31 = vpop.f32.mrf.mxu0 }
 0x282   : > { %v3290_v61 = vmul.f32 %v3061_v60, %v3061_v60  ;;  %v2974_v28 = vrot.slane %v2791_v38, 2  ;;  %v2802_v6 = vadd.f32 %v4256_v31, %v5806_v5 }
 0x283   : > { %v3932_v26 = vpack.c.bf16 %v3061_v60, %v3060_v19  ;;  %v3251_v29 = vadd.f32 %v3250_v0, %v3060_v19  ;;  %v3289_v12 = vmul.f32 %v3060_v19, %v3060_v19  ;;  %v5880_v21 = vpop.f32.mrf.mxu1  ;;  %v2793_v37 = vpop.f32.mrf.mxu0 }
 0x284   : > { %v2794_v20 = vadd.f32 %v2793_v37, %v5787_v2  ;;  %v2979_v54 = vrot.slane %v2802_v6, 2 }
 0x285   : > { %3980 = vst [vmem:[%s5803_s9 + $0x38] sm:$0xff] %v3932_v26   ;;  %v3320_v1 = vadd.f32 %v3319_v45, %v3289_v12  ;;  %v3252_v15 = vadd.f32 %v3251_v29, %v3061_v60  ;;  %v2618_v59 = vpop.f32.mrf.mxu1  ;;  %v4259_v43 = vpop.f32.mrf.mxu0 }
 0x286   : > { %v2975_v9 = vrot.slane %v2794_v20, 2  ;;  %v2815_v2 = vadd.f32 %v4259_v43, %v5828_v10 }
 0x287   : > { %v3321_v33 = vadd.f32 %v3320_v1, %v3290_v61  ;;  %v5885_v27 = vpop.f32.mrf.mxu1  ;;  %v2806_v42 = vpop.f32.mrf.mxu0 }
 0x288   : > { %v2976_v23 = vsel %vm2933_vm1, %v2974_v28, %v2975_v9  ;;  %v2978_v62 = vsel %vm2933_vm1, %v2975_v9, %v2977_v47  ;;  %v2807_v51 = vadd.f32 %v2806_v42, %v5813_v56  ;;  %v2984_v10 = vrot.slane %v2815_v2, 2 }
 0x289   : > { %v3062_v40 = vadd.f32 %v2976_v23, %v5666_v39  ;;  %v3063_v13 = vadd.f32 %v2978_v62, %v5668_v14  ;;  %v2623_v24 = vpop.f32.mrf.mxu1  ;;  %v4260_v5 = vpop.f32.mrf.mxu0 }
 0x28a   : > { %v2980_v7 = vrot.slane %v2807_v51, 2  ;;  %v2818_v34 = vadd.f32 %v4260_v5, %v5836_v58 }
 0x28b   : > { %v3937_v0 = vpack.c.bf16 %v3063_v13, %v3062_v40  ;;  %v3253_v50 = vadd.f32 %v3252_v15, %v3062_v40  ;;  %v3291_v63 = vmul.f32 %v3062_v40, %v3062_v40  ;;  %v5894_v46 = vpop.f32.mrf.mxu1  ;;  %v2809_v52 = vpop.f32.mrf.mxu0  ;;  %v3292_v60 = vmul.f32 %v3063_v13, %v3063_v13 }
 0x28c   : > { %v2981_v56 = vsel %vm2933_vm1, %v2979_v54, %v2980_v7  ;;  %v2985_v45 = vrot.slane %v2818_v34, 2  ;;  %v2810_v39 = vadd.f32 %v2809_v52, %v5821_v41 }
 0x28d   : > { %3981 = vst [vmem:[%s5803_s9 + $0x40] sm:$0xff] %v3937_v0   ;;  %v3254_v14 = vadd.f32 %v3253_v50, %v3063_v13  ;;  %v3322_v17 = vadd.f32 %v3321_v33, %v3291_v63  ;;  %v3064_v19 = vadd.f32 %v2981_v56, %v5679_v25  ;;  %v2626_v35 = vpop.f32.mrf.mxu1  ;;  %v4263_v58 = vpop.f32.mrf.mxu0 }
 0x28e   : > { %v2986_v31 = vsel %vm2933_vm1, %v2984_v10, %v2985_v45  ;;  %v2982_v11 = vrot.slane %v2810_v39, 2  ;;  %v2831_v41 = vadd.f32 %v4263_v58, %v5858_v32 }
 0x28f   : > { %v3323_v38 = vadd.f32 %v3322_v17, %v3292_v60  ;;  %v3255_v26 = vadd.f32 %v3254_v14, %v3064_v19  ;;  %v3293_v29 = vmul.f32 %v3064_v19, %v3064_v19  ;;  %v5901_v12 = vpop.f32.mrf.mxu1  ;;  %v2822_v37 = vpop.f32.mrf.mxu0  ;;  %v3066_v25 = vadd.f32 %v2986_v31, %v5684_v4 }
 0x290   : > { %v2983_v20 = vsel %vm2933_vm1, %v2980_v7, %v2982_v11  ;;  %v2823_v61 = vadd.f32 %v2822_v37, %v5841_v48  ;;  %v2990_v32 = vrot.slane %v2831_v41, 2 }
 0x291   : > { %v3324_v1 = vadd.f32 %v3323_v38, %v3293_v29  ;;  %v3065_v15 = vadd.f32 %v2983_v20, %v5691_v53  ;;  %v2631_v59 = vpop.f32.mrf.mxu1  ;;  %v4264_v43 = vpop.f32.mrf.mxu0  ;;  %v3295_v2 = vmul.f32 %v3066_v25, %v3066_v25 }
 0x292   : > { %v2987_v47 = vrot.slane %v2823_v61, 2  ;;  %v2834_v28 = vadd.f32 %v4264_v43, %v5865_v3 }
 0x293   : > { %v3942_v6 = vpack.c.bf16 %v3065_v15, %v3064_v19  ;;  %v3256_v9 = vadd.f32 %v3255_v26, %v3065_v15  ;;  %v3294_v33 = vmul.f32 %v3065_v15, %v3065_v15  ;;  %v5909_v42 = vpop.f32.mrf.mxu1  ;;  %v2825_v23 = vpop.f32.mrf.mxu0 }
 0x294   : > { %v2988_v48 = vsel %vm2933_vm1, %v2985_v45, %v2987_v47  ;;  %v2992_v62 = vrot.slane %v2834_v28, 2  ;;  %v2826_v4 = vadd.f32 %v2825_v23, %v5850_v30 }
 0x295   : > { %3982 = vst [vmem:[%s5803_s9 + $0x48] sm:$0xff] %v3942_v6   ;;  %v3325_v53 = vadd.f32 %v3324_v1, %v3294_v33  ;;  %v3067_v51 = vadd.f32 %v2988_v48, %v5702_v55  ;;  %v3257_v40 = vadd.f32 %v3256_v9, %v3066_v25  ;;  %v2634_v3 = vpop.f32.mrf.mxu1  ;;  %v4267_v13 = vpop.f32.mrf.mxu0 }
 0x296   : > { %v2993_v24 = vsel %vm2933_vm1, %v2990_v32, %v2992_v62  ;;  %v2989_v5 = vrot.slane %v2826_v4, 2  ;;  %v2847_v39 = vadd.f32 %v4267_v13, %v5885_v27 }
 0x297   : > { %v3947_v54 = vpack.c.bf16 %v3067_v51, %v3066_v25  ;;  %v3258_v7 = vadd.f32 %v3257_v40, %v3067_v51  ;;  %v3296_v34 = vmul.f32 %v3067_v51, %v3067_v51  ;;  %v3326_v0 = vadd.f32 %v3325_v53, %v3295_v2  ;;  %v2637_v50 = vpop.f32.mrf.mxu1  ;;  %v2838_v63 = vpop.f32.mrf.mxu0 }
 0x298   : > { %v2991_v30 = vsel %vm2933_vm1, %v2989_v5, %v2990_v32  ;;  %v3069_v10 = vadd.f32 %v2993_v24, %v5707_v57  ;;  %v2839_v14 = vadd.f32 %v2838_v63, %v5872_v18 }
 0x299   : > { %3983 = vst [vmem:[%s5803_s9 + $0x50] sm:$0xff] %v3947_v54   ;;  %v3327_v52 = vadd.f32 %v3326_v0, %v3296_v34  ;;  %v3068_v55 = vadd.f32 %v2991_v30, %v5712_v8  ;;  %v2639_v56 = vpop.f32.mrf.mxu1  ;;  %v4268_v45 = vpop.f32.mrf.mxu0  ;;  %v2997_v8 = vrot.slane %v2847_v39, 2 }
 0x29a   : > { %v3298_v11 = vmul.f32 %v3069_v10, %v3069_v10  ;;  %v2994_v37 = vrot.slane %v2839_v14, 2  ;;  %v2850_v20 = vadd.f32 %v4268_v45, %v5894_v46 }
 0x29b   : > { %v3952_v60 = vpack.c.bf16 %v3069_v10, %v3068_v55  ;;  %v3259_v17 = vadd.f32 %v3258_v7, %v3068_v55  ;;  %v3297_v19 = vmul.f32 %v3068_v55, %v3068_v55  ;;  %v2640_v35 = vpop.f32.mrf.mxu1  ;;  %v2841_v58 = vpop.f32.mrf.mxu0 }
 0x29c   : > { %v2842_v31 = vadd.f32 %v2841_v58, %v5880_v21  ;;  %v2999_v6 = vrot.slane %v2850_v20, 2 }
 0x29d   : > { %3984 = vst [vmem:[%s5803_s9 + $0x58] sm:$0xff] %v3952_v60   ;;  %v3328_v38 = vadd.f32 %v3327_v52, %v3297_v19  ;;  %v3260_v26 = vadd.f32 %v3259_v17, %v3069_v10  ;;  %v2642_v57 = vpop.f32.mrf.mxu1  ;;  %v4271_v29 = vpop.f32.mrf.mxu0 }
 0x29e   : > { %v2995_v27 = vrot.slane %v2842_v31, 2  ;;  %v2863_v15 = vadd.f32 %v4271_v29, %v2637_v50 }
 0x29f   : > { %v3329_v41 = vadd.f32 %v3328_v38, %v3298_v11  ;;  %v2645_v18 = vpop.f32.mrf.mxu1  ;;  %v2854_v61 = vpop.f32.mrf.mxu0 }
 0x2a0   : > { %v2996_v1 = vsel %vm2933_vm1, %v2994_v37, %v2995_v27  ;;  %v2998_v25 = vsel %vm2933_vm1, %v2995_v27, %v2997_v8  ;;  %v2855_v21 = vadd.f32 %v2854_v61, %v5901_v12  ;;  %v3004_v4 = vrot.slane %v2863_v15, 2  ;;  %v6122_v15 = vld [vmem:[#allocation27_spill] sm:$0xff] }
 0x2a1   : > { %v3070_v59 = vadd.f32 %v2996_v1, %v5737_v36  ;;  %v3071_v43 = vadd.f32 %v2998_v25, %v5739_v16  ;;  %v2647_v47 = vpop.f32.mrf.mxu1  ;;  %v4272_v28 = vpop.f32.mrf.mxu0 }
 0x2a2   : > { %v3000_v46 = vrot.slane %v2855_v21, 2  ;;  %v2866_v9 = vadd.f32 %v4272_v28, %v2640_v35 }
 0x2a3   : > { %v3957_v33 = vpack.c.bf16 %v3071_v43, %v3070_v59  ;;  %v3261_v23 = vadd.f32 %v3260_v26, %v3070_v59  ;;  %v3299_v32 = vmul.f32 %v3070_v59, %v3070_v59  ;;  %v2648_v48 = vpop.f32.mrf.mxu1  ;;  %v2857_v62 = vpop.f32.mrf.mxu0  ;;  %v3300_v51 = vmul.f32 %v3071_v43, %v3071_v43  ;;  %v6123_v59 = vld [vmem:[#allocation39_spill] sm:$0xff] }
 0x2a4   : > { %v3001_v2 = vsel %vm2933_vm1, %v2999_v6, %v3000_v46  ;;  %v3005_v53 = vrot.slane %v2866_v9, 2  ;;  %v2858_v12 = vadd.f32 %v2857_v62, %v5909_v42 }
 0x2a5   : > { %3985 = vst [vmem:[%s5803_s9 + $0x60] sm:$0xff] %v3957_v33   ;;  %v3262_v36 = vadd.f32 %v3261_v23, %v3071_v43  ;;  %v3330_v16 = vadd.f32 %v3329_v41, %v3299_v32  ;;  %v3072_v40 = vadd.f32 %v3001_v2, %v5750_v44  ;;  %v2650_v3 = vpop.f32.mrf.mxu1  ;;  %v4275_v13 = vpop.f32.mrf.mxu0 }
 0x2a6   : > { %v3006_v24 = vsel %vm2933_vm1, %v3004_v4, %v3005_v53  ;;  %v3002_v5 = vrot.slane %v2858_v12, 2 }
 0x2a7   : > { %v3331_v54 = vadd.f32 %v3330_v16, %v3300_v51  ;;  %v3263_v7 = vadd.f32 %v3262_v36, %v3072_v40  ;;  %v3301_v34 = vmul.f32 %v3072_v40, %v3072_v40  ;;  %v2653_v0 = vpop.f32.mrf.mxu1  ;;  %v2870_v50 = vpop.f32.mrf.mxu0  ;;  %v3074_v52 = vadd.f32 %v3006_v24, %v5755_v49  ;;  %v6121_v49 = vld [vmem:[#allocation43_spill] sm:$0xff] }
 0x2a8   : > { %v3003_v63 = vsel %vm2933_vm1, %v3000_v46, %v3002_v5  ;;  %v2871_v30 = vadd.f32 %v2870_v50, %v2645_v18  ;;  %v2879_v56 = vadd.f32 %v4275_v13, %v2653_v0  ;;  %v3349_v13 = vld [vmem:[%s5723_s6] sm:$0x3] }
 0x2a9   : > { %v3332_v42 = vadd.f32 %v3331_v54, %v3301_v34  ;;  %v3073_v10 = vadd.f32 %v3003_v63, %v5762_v22  ;;  %v2655_v44 = vpop.f32.mrf.mxu1  ;;  %v4276_v55 = vpop.f32.mrf.mxu0  ;;  %v3303_v11 = vmul.f32 %v3074_v52, %v3074_v52 }
 0x2aa   : > { %v3007_v45 = vrot.slane %v2871_v30, 2  ;;  %v3010_v29 = vrot.slane %v2879_v56, 2 }
 0x2ab   : > { %v3962_v39 = vpack.c.bf16 %v3073_v10, %v3072_v40  ;;  %v3264_v14 = vadd.f32 %v3263_v7, %v3073_v10  ;;  %v3302_v60 = vmul.f32 %v3073_v10, %v3073_v10  ;;  %v2656_v17 = vpop.f32.mrf.mxu1  ;;  %v2873_v19 = vpop.f32.mrf.mxu0 }
 0x2ac   : > { %v3008_v35 = vsel %vm2933_vm1, %v3005_v53, %v3007_v45  ;;  %v2882_v58 = vadd.f32 %v4276_v55, %v2656_v17  ;;  %v2874_v31 = vadd.f32 %v2873_v19, %v2648_v48 }
 0x2ad   : > { %3986 = vst [vmem:[%s5803_s9 + $0x68] sm:$0xff] %v3962_v39   ;;  %v3333_v38 = vadd.f32 %v3332_v42, %v3302_v60  ;;  %v3075_v26 = vadd.f32 %v3008_v35, %v6121_v49  ;;  %v3265_v22 = vadd.f32 %v3264_v14, %v3074_v52  ;;  %v2658_v57 = vpop.f32.mrf.mxu1 }
 0x2ae   : > { %v3012_v8 = vrot.slane %v2882_v58, 2  ;;  %v3009_v37 = vrot.slane %v2874_v31, 2 }
 0x2af   : > { %v3967_v20 = vpack.c.bf16 %v3075_v26, %v3074_v52  ;;  %v3266_v27 = vadd.f32 %v3265_v22, %v3075_v26  ;;  %v3304_v41 = vmul.f32 %v3075_v26, %v3075_v26  ;;  %v3334_v18 = vadd.f32 %v3333_v38, %v3303_v11 }
 0x2b0   : > { %v3013_v61 = vsel %vm2933_vm1, %v3010_v29, %v3012_v8  ;;  %v3011_v1 = vsel %vm2933_vm1, %v3009_v37, %v3010_v29 }
 0x2b1   : > { %3987 = vst [vmem:[%s5803_s9 + $0x70] sm:$0xff] %v3967_v20   ;;  %v3335_v25 = vadd.f32 %v3334_v18, %v3304_v41  ;;  %v3077_v21 = vadd.f32 %v3013_v61, %v6122_v15  ;;  %v3076_v43 = vadd.f32 %v3011_v1, %v6123_v59 }
 0x2b3   : > { %v3972_v47 = vpack.c.bf16 %v3077_v21, %v3076_v43  ;;  %v3267_v28 = vadd.f32 %v3266_v27, %v3076_v43  ;;  %v3305_v6 = vmul.f32 %v3076_v43, %v3076_v43  ;;  %v3306_v46 = vmul.f32 %v3077_v21, %v3077_v21 }
 0x2b5   : > { %3988 = vst [vmem:[%s5803_s9 + $0x78] sm:$0xff] %v3972_v47   ;;  %v3268_v9 = vadd.f32 %v3267_v28, %v3077_v21  ;;  %v3336_v33 = vadd.f32 %v3335_v25, %v3305_v6 }
 0x2b7   : > { %v3269_v23 = vrot.slane %v3268_v9, 4  ;;  %v3337_v32 = vadd.f32 %v3336_v33, %v3306_v46 }
 0x2b9   : > { %v3270_v48 = vadd.f32 %v3269_v23, %v3268_v9  ;;  %v3338_v62 = vrot.slane %v3337_v32, 4 }
 0x2bb   : > { %v3271_v4 = vrot.slane %v3270_v48, 2  ;;  %v3339_v2 = vadd.f32 %v3338_v62, %v3337_v32 }
 0x2bd   : > { %v3272_v53 = vadd.f32 %v3271_v4, %v3270_v48  ;;  %v3340_v12 = vrot.slane %v3339_v2, 2 }
 0x2bf   : > { %v3273_v36 = vrot.slane %v3272_v53, 1  ;;  %v3341_v51 = vadd.f32 %v3340_v12, %v3339_v2 }
 0x2c1   : > { %v3342_v16 = vrot.slane %v3341_v51, 1  ;;  %v3274_v40 = vadd.f32 %v3273_v36, %v3272_v53 }
 0x2c3   : > { %v3343_v3 = vadd.f32 %v3342_v16, %v3341_v51 }
 0x2c5   : > { %v3351_v24 = vsel %vm3350_vm2, %v3274_v40, %v3343_v3 }
 0x2c6   : > { %v3352_v5 = vadd.f32 %v3351_v24, %v3349_v13 }
 0x2c8   : > { %3353 = vst [vmem:[%s5723_s6] sm:$0x3] %v3352_v5 }
 0x2c9 PF: > { %s14_s14 = sadd.s32 1, %s4504_s14   ;;  %s6124_s12 = smov %s4500_s13 }
 0x2ca   : > { %p11_p5 = scmp.ge.s32.totalorder %s14_s14, 4   ;;  %s6125_s13 = smov %s6127_s15 }
 0x2cc   :  { %13 = sbr.rel (!%p11_p5) target bundleno = 2 (0x2), region = 79 }

</bundles_post_ra>
